<compile_context>
chip_gen: v7x
topology: tpu7x:2x2x1
jax: 0.10.0
libtpu: 0.0.40
codegen_flags: <defaults>
</compile_context>

<pallas_src>
import functools
import math

import jax
import jax.numpy as jnp
from jax import lax
from jax.experimental import pallas as pl
from jax.experimental.pallas import tpu as pltpu


_MASK_VALUE = -1e30  # finite "-inf": keeps alpha / exp well-defined even for masked rows
_NT_DIMS = (((1,), (1,)), ((), ()))  # contract last dims of both operands (q @ k^T, no transpose op)


def _flash_fwd_kernel(q_ref, k_ref, v_ref, o_ref, m_sc, l_sc, acc_sc,
                      *, scale, causal, tq, tk, heads_per_block, head_dim):
    """One (batch, head_block, q_tile, kv_tile) grid step of online-softmax attention.

    q_ref/o_ref: (1, tq, heads_per_block * head_dim)
    k_ref/v_ref: (1, tk, heads_per_block * head_dim)
    """
    qi = pl.program_id(2)
    kv = pl.program_id(3)

    @pl.when(kv == 0)
    def _init():
        m_sc[...] = jnp.full_like(m_sc, _MASK_VALUE)
        l_sc[...] = jnp.zeros_like(l_sc)
        acc_sc[...] = jnp.zeros_like(acc_sc)

    def _body():
        q = q_ref[0]   # (tq, HP*D), input dtype -> native MXU rate for bf16
        k = k_ref[0]   # (tk, HP*D)
        v = v_ref[0]   # (tk, HP*D)

        if causal:
            # Mask built once per grid step, shared by all packed heads (VPU/XLU
            # work is free filler under the MXU bound).
            row = lax.broadcasted_iota(jnp.int32, (tq, tk), 0) + qi * tq
            col = lax.broadcasted_iota(jnp.int32, (tq, tk), 1) + kv * tk
            causal_mask = row >= col

        for h in range(heads_per_block):
            lo = h * head_dim
            hi = lo + head_dim
            q_h = q[:, lo:hi]   # (tq, D)
            k_h = k[:, lo:hi]   # (tk, D)
            v_h = v[:, lo:hi]   # (tk, D)

            # QK^T in the input dtype; scale applied to the f32 scores afterwards.
            s = lax.dot_general(q_h, k_h, _NT_DIMS,
                                preferred_element_type=jnp.float32)  # (tq, tk) f32
            s = s * scale
            if causal:
                s = jnp.where(causal_mask, s, _MASK_VALUE)

            m_prev = m_sc[h]                                          # (tq, 1)
            m_new = jnp.maximum(m_prev, s.max(axis=-1, keepdims=True))
            alpha = jnp.exp(m_prev - m_new)
            p = jnp.exp(s - m_new)

            l_sc[h] = alpha * l_sc[h] + p.sum(axis=-1, keepdims=True)
            acc_sc[h] = alpha * acc_sc[h] + jnp.dot(
                p.astype(v_h.dtype), v_h, preferred_element_type=jnp.float32)
            m_sc[h] = m_new

    if causal:
        # Skip kv tiles that lie entirely above the diagonal for this q tile.
        @pl.when(kv * tk < (qi + 1) * tq)
        def _():
            _body()
    else:
        _body()

    @pl.when(kv == pl.num_programs(3) - 1)
    def _finalize():
        outs = []
        for h in range(heads_per_block):
            inv_l = pl.reciprocal(l_sc[h], approx=True)               # (tq, 1)
            outs.append(acc_sc[h] * inv_l)                            # (tq, D) f32
        block = outs[0] if len(outs) == 1 else jnp.concatenate(outs, axis=-1)
        o_ref[0] = block.astype(o_ref.dtype)                          # lane-dense store


def _pick_tile(dim, target):
    """Largest divisor of `dim` that is <= target and sublane friendly."""
    target = max(1, min(target, dim))
    for t in range(target, 0, -1):
        if dim % t == 0 and (t % 8 == 0 or t == dim):
            return t
    return dim


def long_context_attention(query, key, value, dropout_p=0.0, softmax_scale=None,
                           causal=False, window_size=(-1, -1), softcap=0.0,
                           alibi_slopes=None, deterministic=False,
                           return_attn_probs=False, *, tq=None, tk=None):
    """Forward of LongContextAttention for ulysses world size == 1, ring degree == 1."""
    # TODO(synk): dropout / sliding window / softcap / alibi / attn-probs not supported here.
    assert dropout_p == 0.0
    assert tuple(window_size) == (-1, -1)
    assert softcap == 0.0
    assert alibi_slopes is None
    assert not return_attn_probs

    B, S, H, D = query.shape
    assert key.shape == (B, S, H, D) and value.shape == (B, S, H, D)
    scale = (1.0 / math.sqrt(D)) if softmax_scale is None else softmax_scale

    # Pack heads so the last block dim is a multiple of 128 lanes (lane-dense
    # loads / accumulator / output store). Fallback: take all heads at once
    # (then the block last dim equals the full array dim, which is also legal).
    heads_per_block = None
    for h in range(1, H + 1):
        if H % h == 0 and (h * D) % 128 == 0:
            heads_per_block = h
            break
    if heads_per_block is None:
        heads_per_block = H
    hpd = heads_per_block * D

    if tq is None:
        tq = _pick_tile(S, 256)
    if tk is None:
        tk = _pick_tile(S, 512)
    assert S % tq == 0 and S % tk == 0

    # Free, contiguous views -- no transposes / extra HBM passes around the kernel.
    qf = query.reshape(B, S, H * D)
    kf = key.reshape(B, S, H * D)
    vf = value.reshape(B, S, H * D)

    grid = (B, H // heads_per_block, S // tq, S // tk)

    def qo_map(b, hb, qi, kv):
        return (b, qi, hb)

    if causal:
        def kv_map(b, hb, qi, kv):
            # Clamp skipped (fully masked) kv tiles to the last needed block so no
            # new DMA is issued for them.
            last_needed = ((qi + 1) * tq - 1) // tk
            return (b, jnp.minimum(kv, last_needed), hb)
    else:
        def kv_map(b, hb, qi, kv):
            return (b, kv, hb)

    kernel = functools.partial(
        _flash_fwd_kernel, scale=scale, causal=causal, tq=tq, tk=tk,
        heads_per_block=heads_per_block, head_dim=D)

    # Advisory cost hint for XLA's scheduler (causal does ~half the work).
    work_frac = 0.5 if causal else 1.0
    itemsize = query.dtype.itemsize
    cost = pl.CostEstimate(
        flops=int(4 * B * H * S * S * D * work_frac),
        transcendentals=int(B * H * S * S * work_frac),
        bytes_accessed=int(4 * B * S * H * D * itemsize),
    )

    out = pl.pallas_call(
        kernel,
        out_shape=jax.ShapeDtypeStruct((B, S, H * D), query.dtype),
        grid_spec=pltpu.PrefetchScalarGridSpec(
            num_scalar_prefetch=0,
            grid=grid,
            in_specs=[
                pl.BlockSpec((1, tq, hpd), qo_map),
                pl.BlockSpec((1, tk, hpd), kv_map),
                pl.BlockSpec((1, tk, hpd), kv_map),
            ],
            out_specs=pl.BlockSpec((1, tq, hpd), qo_map),
            scratch_shapes=[
                pltpu.VMEM((heads_per_block, tq, 1), jnp.float32),   # running max m_i
                pltpu.VMEM((heads_per_block, tq, 1), jnp.float32),   # running sum l_i
                pltpu.VMEM((heads_per_block, tq, D), jnp.float32),   # output accumulator
            ],
        ),
        compiler_params=pltpu.CompilerParams(
            # kv axis carries the online-softmax state -> "arbitrary"; the rest are
            # independent and can be sharded across TensorCores (megacore / v7x).
            dimension_semantics=("parallel", "parallel", "parallel", "arbitrary"),
            vmem_limit_bytes=64 * 1024 * 1024,
        ),
        cost_estimate=cost,
    )(qf, kf, vf)

    return out.reshape(B, S, H, D)


def _reference_attention(q, k, v, softmax_scale=None, causal=False):
    B, S, H, D = q.shape
    scale = (1.0 / math.sqrt(D)) if softmax_scale is None else softmax_scale
    qf, kf, vf = (x.astype(jnp.float32) for x in (q, k, v))
    s = jnp.einsum("bqhd,bkhd->bhqk", qf, kf) * scale
    if causal:
        mask = jnp.tril(jnp.ones((S, S), dtype=bool))
        s = jnp.where(mask[None, None], s, -jnp.inf)
    p = jax.nn.softmax(s, axis=-1)
    o = jnp.einsum("bhqk,bkhd->bqhd", p, vf)
    return o.astype(q.dtype)


if __name__ == "__main__":
    # Small shapes consistent with the module's flash-attn layout [B, S, H, D].
    B, S, H, D = 2, 512, 2, 64
    rng = jax.random.PRNGKey(0)
    kq, kk, kv_ = jax.random.split(rng, 3)
    base_q = jax.random.normal(kq, (B, S, H, D), dtype=jnp.float32)
    base_k = jax.random.normal(kk, (B, S, H, D), dtype=jnp.float32)
    base_v = jax.random.normal(kv_, (B, S, H, D), dtype=jnp.float32)

    def run_case(dtype, causal, tol, tq=None, tk=None):
        q = base_q.astype(dtype)
        k = base_k.astype(dtype)
        v = base_v.astype(dtype)
        out = jax.block_until_ready(
            long_context_attention(q, k, v, dropout_p=0.0, softmax_scale=None,
                                   causal=causal, tq=tq, tk=tk))
        assert out.shape == (B, S, H, D) and out.dtype == q.dtype
        ref = _reference_attention(q, k, v, causal=causal)
        err = float(jnp.max(jnp.abs(out.astype(jnp.float32) - ref.astype(jnp.float32))))
        assert err < tol, f"dtype={dtype}, causal={causal}, tq={tq}, tk={tk}: max abs err {err}"

    # bf16 fast path (default large tiles) and a multi-kv-tile causal case that
    # exercises the online-softmax accumulation, tile skipping and index clamping.
    run_case(jnp.bfloat16, causal=False, tol=6e-2)
    run_case(jnp.bfloat16, causal=True, tol=6e-2, tq=128, tk=128)
    run_case(jnp.float32, causal=True, tol=2.5e-2)
    run_case(jnp.float32, causal=False, tol=2.5e-2, tq=128, tk=256)

    print("KERNEL_OK")
</pallas_src>

<mosaic_0001>
module attributes {stable_mosaic.version = 11 : i64} {
  func.func @_flash_fwd_kernel(%arg0: i32, %arg1: i32, %arg2: i32, %arg3: i32, %arg4: memref<1x256x128xbf16, #tpu.memory_space<vmem>>, %arg5: memref<1x512x128xbf16, #tpu.memory_space<vmem>>, %arg6: memref<1x512x128xbf16, #tpu.memory_space<vmem>>, %arg7: memref<1x256x128xbf16, #tpu.memory_space<vmem>>, %arg8: memref<2x256x1xf32, #tpu.memory_space<vmem>>, %arg9: memref<2x256x1xf32, #tpu.memory_space<vmem>>, %arg10: memref<2x256x64xf32, #tpu.memory_space<vmem>>) attributes {dimension_semantics = [#tpu.dimension_semantics<parallel>, #tpu.dimension_semantics<parallel>, #tpu.dimension_semantics<parallel>, #tpu.dimension_semantics<arbitrary>], iteration_bounds = array<i64: 2, 1, 2, 1>, scalar_prefetch = 0 : i64, scratch_operands = 3 : i64, tpu.core_type = #tpu.core_type<tc>, window_params = [{transform_indices = @transform_0, window_bounds = array<i64: 1, 256, 128>}, {transform_indices = @transform_1, window_bounds = array<i64: 1, 512, 128>}, {transform_indices = @transform_2, window_bounds = array<i64: 1, 512, 128>}, {transform_indices = @transform_3, window_bounds = array<i64: 1, 256, 128>}]} {
    %c0_i32 = arith.constant 0 : i32
    %0 = arith.cmpi eq, %arg3, %c0_i32 : i32
    %1 = arith.extui %0 : i1 to i32
    %c0_i32_0 = arith.constant 0 : i32
    %2 = arith.cmpi ne, %1, %c0_i32_0 : i32
    scf.if %2 {
      %cst_55 = arith.constant -1.000000e+30 : f32
      %88 = vector.broadcast %cst_55 : f32 to vector<2x256x1xf32>
      %c0_56 = arith.constant 0 : index
      %c0_57 = arith.constant 0 : index
      %c0_58 = arith.constant 0 : index
      %89 = vector.load %arg8[%c0_56, %c0_57, %c0_58] : memref<2x256x1xf32, #tpu.memory_space<vmem>>, vector<2x256x1xf32>
      tpu.vector_store %arg8[%c0_56, %c0_57, %c0_58], %88 {strides = array<i32>} : memref<2x256x1xf32, #tpu.memory_space<vmem>>, vector<2x256x1xf32>,
      %cst_59 = arith.constant 0.000000e+00 : f32
      %90 = vector.broadcast %cst_59 : f32 to vector<2x256x1xf32>
      %c0_60 = arith.constant 0 : index
      %c0_61 = arith.constant 0 : index
      %c0_62 = arith.constant 0 : index
      %91 = vector.load %arg9[%c0_60, %c0_61, %c0_62] : memref<2x256x1xf32, #tpu.memory_space<vmem>>, vector<2x256x1xf32>
      tpu.vector_store %arg9[%c0_60, %c0_61, %c0_62], %90 {strides = array<i32>} : memref<2x256x1xf32, #tpu.memory_space<vmem>>, vector<2x256x1xf32>,
      %cst_63 = arith.constant 0.000000e+00 : f32
      %92 = vector.broadcast %cst_63 : f32 to vector<2x256x64xf32>
      %c0_64 = arith.constant 0 : index
      %c0_65 = arith.constant 0 : index
      %c0_66 = arith.constant 0 : index
      %93 = vector.load %arg10[%c0_64, %c0_65, %c0_66] : memref<2x256x64xf32, #tpu.memory_space<vmem>>, vector<2x256x64xf32>
      tpu.vector_store %arg10[%c0_64, %c0_65, %c0_66], %92 {strides = array<i32>} : memref<2x256x64xf32, #tpu.memory_space<vmem>>, vector<2x256x64xf32>,
    } else {
    }
    %c0 = arith.constant 0 : index
    %c0_1 = arith.constant 0 : index
    %c0_2 = arith.constant 0 : index
    %3 = vector.load %arg4[%c0, %c0_1, %c0_2] : memref<1x256x128xbf16, #tpu.memory_space<vmem>>, vector<1x256x128xbf16>
    %4 = vector.shape_cast %3 : vector<1x256x128xbf16> to vector<256x128xbf16>
    %c0_3 = arith.constant 0 : index
    %c0_4 = arith.constant 0 : index
    %c0_5 = arith.constant 0 : index
    %5 = vector.load %arg5[%c0_3, %c0_4, %c0_5] : memref<1x512x128xbf16, #tpu.memory_space<vmem>>, vector<1x512x128xbf16>
    %6 = vector.shape_cast %5 : vector<1x512x128xbf16> to vector<512x128xbf16>
    %c0_6 = arith.constant 0 : index
    %c0_7 = arith.constant 0 : index
    %c0_8 = arith.constant 0 : index
    %7 = vector.load %arg6[%c0_6, %c0_7, %c0_8] : memref<1x512x128xbf16, #tpu.memory_space<vmem>>, vector<1x512x128xbf16>
    %8 = vector.shape_cast %7 : vector<1x512x128xbf16> to vector<512x128xbf16>
    %9 = vector.extract_strided_slice %4 {offsets = [0, 0], sizes = [256, 64], strides = [1, 1]} : vector<256x128xbf16> to vector<256x64xbf16>
    %10 = vector.extract_strided_slice %6 {offsets = [0, 0], sizes = [512, 64], strides = [1, 1]} : vector<512x128xbf16> to vector<512x64xbf16>
    %11 = vector.extract_strided_slice %8 {offsets = [0, 0], sizes = [512, 64], strides = [1, 1]} : vector<512x128xbf16> to vector<512x64xbf16>
    %cst = arith.constant dense<0.000000e+00> : vector<256x512xf32>
    %12 = tpu.matmul %9, %10, %cst {dimension_numbers = #tpu.dot_dimension_numbers<[1], [1], [0], [0], [0, 0, 1, 0], [], []>} : vector<256x64xbf16>, vector<512x64xbf16>, vector<256x512xf32> -> vector<256x512xf32>
    %cst_9 = arith.constant 1.250000e-01 : f32
    %13 = vector.broadcast %cst_9 : f32 to vector<256x512xf32>
    %14 = arith.mulf %12, %13 : vector<256x512xf32>
    %c0_10 = arith.constant 0 : index
    %c0_11 = arith.constant 0 : index
    %c0_12 = arith.constant 0 : index
    %15 = vector.load %arg8[%c0_10, %c0_11, %c0_12] : memref<2x256x1xf32, #tpu.memory_space<vmem>>, vector<1x256x1xf32>
    %16 = vector.shape_cast %15 : vector<1x256x1xf32> to vector<256x1xf32>
    %cst_13 = arith.constant dense<0xFF800000> : vector<256xf32>
    %17 = vector.multi_reduction <maximumf>, %14, %cst_13 [1] : vector<256x512xf32> to vector<256xf32>
    %18 = vector.shape_cast %17 : vector<256xf32> to vector<256x1xf32>
    %19 = arith.maximumf %16, %18 : vector<256x1xf32>
    %20 = arith.subf %16, %19 : vector<256x1xf32>
    %21 = math.exp %20 : vector<256x1xf32>
    %22 = vector.broadcast %19 : vector<256x1xf32> to vector<256x512xf32>
    %23 = arith.subf %14, %22 : vector<256x512xf32>
    %24 = math.exp %23 : vector<256x512xf32>
    %c0_14 = arith.constant 0 : index
    %c0_15 = arith.constant 0 : index
    %c0_16 = arith.constant 0 : index
    %25 = vector.load %arg9[%c0_14, %c0_15, %c0_16] : memref<2x256x1xf32, #tpu.memory_space<vmem>>, vector<1x256x1xf32>
    %26 = vector.shape_cast %25 : vector<1x256x1xf32> to vector<256x1xf32>
    %27 = arith.mulf %21, %26 : vector<256x1xf32>
    %cst_17 = arith.constant dense<0.000000e+00> : vector<256xf32>
    %28 = vector.multi_reduction <add>, %24, %cst_17 [1] : vector<256x512xf32> to vector<256xf32>
    %29 = vector.shape_cast %28 : vector<256xf32> to vector<256x1xf32>
    %30 = arith.addf %27, %29 : vector<256x1xf32>
    %c0_18 = arith.constant 0 : index
    %c0_19 = arith.constant 0 : index
    %c0_20 = arith.constant 0 : index
    %31 = vector.load %arg9[%c0_18, %c0_19, %c0_20] : memref<2x256x1xf32, #tpu.memory_space<vmem>>, vector<1x256x1xf32>
    %32 = vector.shape_cast %31 : vector<1x256x1xf32> to vector<256x1xf32>
    %33 = vector.shape_cast %30 : vector<256x1xf32> to vector<1x256x1xf32>
    tpu.vector_store %arg9[%c0_18, %c0_19, %c0_20], %33 {strides = array<i32>} : memref<2x256x1xf32, #tpu.memory_space<vmem>>, vector<1x256x1xf32>,
    %c0_21 = arith.constant 0 : index
    %c0_22 = arith.constant 0 : index
    %c0_23 = arith.constant 0 : index
    %34 = vector.load %arg10[%c0_21, %c0_22, %c0_23] : memref<2x256x64xf32, #tpu.memory_space<vmem>>, vector<1x256x64xf32>
    %35 = vector.shape_cast %34 : vector<1x256x64xf32> to vector<256x64xf32>
    %36 = vector.broadcast %21 : vector<256x1xf32> to vector<256x64xf32>
    %37 = arith.mulf %36, %35 : vector<256x64xf32>
    %38 = arith.truncf %24 : vector<256x512xf32> to vector<256x512xbf16>
    %cst_24 = arith.constant dense<0.000000e+00> : vector<256x64xf32>
    %39 = tpu.matmul %38, %11, %cst_24 {dimension_numbers = #tpu.dot_dimension_numbers<[1], [0], [0], [1], [0, 0, 1, 1], [], []>} : vector<256x512xbf16>, vector<512x64xbf16>, vector<256x64xf32> -> vector<256x64xf32>
    %40 = arith.addf %37, %39 : vector<256x64xf32>
    %c0_25 = arith.constant 0 : index
    %c0_26 = arith.constant 0 : index
    %c0_27 = arith.constant 0 : index
    %41 = vector.load %arg10[%c0_25, %c0_26, %c0_27] : memref<2x256x64xf32, #tpu.memory_space<vmem>>, vector<1x256x64xf32>
    %42 = vector.shape_cast %41 : vector<1x256x64xf32> to vector<256x64xf32>
    %43 = vector.shape_cast %40 : vector<256x64xf32> to vector<1x256x64xf32>
    tpu.vector_store %arg10[%c0_25, %c0_26, %c0_27], %43 {strides = array<i32>} : memref<2x256x64xf32, #tpu.memory_space<vmem>>, vector<1x256x64xf32>,
    %c0_28 = arith.constant 0 : index
    %c0_29 = arith.constant 0 : index
    %c0_30 = arith.constant 0 : index
    %44 = vector.load %arg8[%c0_28, %c0_29, %c0_30] : memref<2x256x1xf32, #tpu.memory_space<vmem>>, vector<1x256x1xf32>
    %45 = vector.shape_cast %44 : vector<1x256x1xf32> to vector<256x1xf32>
    %46 = vector.shape_cast %19 : vector<256x1xf32> to vector<1x256x1xf32>
    tpu.vector_store %arg8[%c0_28, %c0_29, %c0_30], %46 {strides = array<i32>} : memref<2x256x1xf32, #tpu.memory_space<vmem>>, vector<1x256x1xf32>,
    %47 = vector.extract_strided_slice %4 {offsets = [0, 64], sizes = [256, 64], strides = [1, 1]} : vector<256x128xbf16> to vector<256x64xbf16>
    %48 = vector.extract_strided_slice %6 {offsets = [0, 64], sizes = [512, 64], strides = [1, 1]} : vector<512x128xbf16> to vector<512x64xbf16>
    %49 = vector.extract_strided_slice %8 {offsets = [0, 64], sizes = [512, 64], strides = [1, 1]} : vector<512x128xbf16> to vector<512x64xbf16>
    %cst_31 = arith.constant dense<0.000000e+00> : vector<256x512xf32>
    %50 = tpu.matmul %47, %48, %cst_31 {dimension_numbers = #tpu.dot_dimension_numbers<[1], [1], [0], [0], [0, 0, 1, 0], [], []>} : vector<256x64xbf16>, vector<512x64xbf16>, vector<256x512xf32> -> vector<256x512xf32>
    %cst_32 = arith.constant 1.250000e-01 : f32
    %51 = vector.broadcast %cst_32 : f32 to vector<256x512xf32>
    %52 = arith.mulf %50, %51 : vector<256x512xf32>
    %c1 = arith.constant 1 : index
    %c0_33 = arith.constant 0 : index
    %c0_34 = arith.constant 0 : index
    %53 = vector.load %arg8[%c1, %c0_33, %c0_34] : memref<2x256x1xf32, #tpu.memory_space<vmem>>, vector<1x256x1xf32>
    %54 = vector.shape_cast %53 : vector<1x256x1xf32> to vector<256x1xf32>
    %cst_35 = arith.constant dense<0xFF800000> : vector<256xf32>
    %55 = vector.multi_reduction <maximumf>, %52, %cst_35 [1] : vector<256x512xf32> to vector<256xf32>
    %56 = vector.shape_cast %55 : vector<256xf32> to vector<256x1xf32>
    %57 = arith.maximumf %54, %56 : vector<256x1xf32>
    %58 = arith.subf %54, %57 : vector<256x1xf32>
    %59 = math.exp %58 : vector<256x1xf32>
    %60 = vector.broadcast %57 : vector<256x1xf32> to vector<256x512xf32>
    %61 = arith.subf %52, %60 : vector<256x512xf32>
    %62 = math.exp %61 : vector<256x512xf32>
    %c1_36 = arith.constant 1 : index
    %c0_37 = arith.constant 0 : index
    %c0_38 = arith.constant 0 : index
    %63 = vector.load %arg9[%c1_36, %c0_37, %c0_38] : memref<2x256x1xf32, #tpu.memory_space<vmem>>, vector<1x256x1xf32>
    %64 = vector.shape_cast %63 : vector<1x256x1xf32> to vector<256x1xf32>
    %65 = arith.mulf %59, %64 : vector<256x1xf32>
    %cst_39 = arith.constant dense<0.000000e+00> : vector<256xf32>
    %66 = vector.multi_reduction <add>, %62, %cst_39 [1] : vector<256x512xf32> to vector<256xf32>
    %67 = vector.shape_cast %66 : vector<256xf32> to vector<256x1xf32>
    %68 = arith.addf %65, %67 : vector<256x1xf32>
    %c1_40 = arith.constant 1 : index
    %c0_41 = arith.constant 0 : index
    %c0_42 = arith.constant 0 : index
    %69 = vector.load %arg9[%c1_40, %c0_41, %c0_42] : memref<2x256x1xf32, #tpu.memory_space<vmem>>, vector<1x256x1xf32>
    %70 = vector.shape_cast %69 : vector<1x256x1xf32> to vector<256x1xf32>
    %71 = vector.shape_cast %68 : vector<256x1xf32> to vector<1x256x1xf32>
    tpu.vector_store %arg9[%c1_40, %c0_41, %c0_42], %71 {strides = array<i32>} : memref<2x256x1xf32, #tpu.memory_space<vmem>>, vector<1x256x1xf32>,
    %c1_43 = arith.constant 1 : index
    %c0_44 = arith.constant 0 : index
    %c0_45 = arith.constant 0 : index
    %72 = vector.load %arg10[%c1_43, %c0_44, %c0_45] : memref<2x256x64xf32, #tpu.memory_space<vmem>>, vector<1x256x64xf32>
    %73 = vector.shape_cast %72 : vector<1x256x64xf32> to vector<256x64xf32>
    %74 = vector.broadcast %59 : vector<256x1xf32> to vector<256x64xf32>
    %75 = arith.mulf %74, %73 : vector<256x64xf32>
    %76 = arith.truncf %62 : vector<256x512xf32> to vector<256x512xbf16>
    %cst_46 = arith.constant dense<0.000000e+00> : vector<256x64xf32>
    %77 = tpu.matmul %76, %49, %cst_46 {dimension_numbers = #tpu.dot_dimension_numbers<[1], [0], [0], [1], [0, 0, 1, 1], [], []>} : vector<256x512xbf16>, vector<512x64xbf16>, vector<256x64xf32> -> vector<256x64xf32>
    %78 = arith.addf %75, %77 : vector<256x64xf32>
    %c1_47 = arith.constant 1 : index
    %c0_48 = arith.constant 0 : index
    %c0_49 = arith.constant 0 : index
    %79 = vector.load %arg10[%c1_47, %c0_48, %c0_49] : memref<2x256x64xf32, #tpu.memory_space<vmem>>, vector<1x256x64xf32>
    %80 = vector.shape_cast %79 : vector<1x256x64xf32> to vector<256x64xf32>
    %81 = vector.shape_cast %78 : vector<256x64xf32> to vector<1x256x64xf32>
    tpu.vector_store %arg10[%c1_47, %c0_48, %c0_49], %81 {strides = array<i32>} : memref<2x256x64xf32, #tpu.memory_space<vmem>>, vector<1x256x64xf32>,
    %c1_50 = arith.constant 1 : index
    %c0_51 = arith.constant 0 : index
    %c0_52 = arith.constant 0 : index
    %82 = vector.load %arg8[%c1_50, %c0_51, %c0_52] : memref<2x256x1xf32, #tpu.memory_space<vmem>>, vector<1x256x1xf32>
    %83 = vector.shape_cast %82 : vector<1x256x1xf32> to vector<256x1xf32>
    %84 = vector.shape_cast %57 : vector<256x1xf32> to vector<1x256x1xf32>
    tpu.vector_store %arg8[%c1_50, %c0_51, %c0_52], %84 {strides = array<i32>} : memref<2x256x1xf32, #tpu.memory_space<vmem>>, vector<1x256x1xf32>,
    %c0_i32_53 = arith.constant 0 : i32
    %85 = arith.cmpi eq, %arg3, %c0_i32_53 : i32
    %86 = arith.extui %85 : i1 to i32
    %c0_i32_54 = arith.constant 0 : i32
    %87 = arith.cmpi ne, %86, %c0_i32_54 : i32
    scf.if %87 {
      %c0_55 = arith.constant 0 : index
      %c0_56 = arith.constant 0 : index
      %c0_57 = arith.constant 0 : index
      %88 = vector.load %arg9[%c0_55, %c0_56, %c0_57] : memref<2x256x1xf32, #tpu.memory_space<vmem>>, vector<1x256x1xf32>
      %89 = vector.shape_cast %88 : vector<1x256x1xf32> to vector<256x1xf32>
      %90 = tpu.reciprocal %89 {approx = true} : vector<256x1xf32> -> vector<256x1xf32>
      %c0_58 = arith.constant 0 : index
      %c0_59 = arith.constant 0 : index
      %c0_60 = arith.constant 0 : index
      %91 = vector.load %arg10[%c0_58, %c0_59, %c0_60] : memref<2x256x64xf32, #tpu.memory_space<vmem>>, vector<1x256x64xf32>
      %92 = vector.shape_cast %91 : vector<1x256x64xf32> to vector<256x64xf32>
      %93 = vector.broadcast %90 : vector<256x1xf32> to vector<256x64xf32>
      %94 = arith.mulf %92, %93 : vector<256x64xf32>
      %c1_61 = arith.constant 1 : index
      %c0_62 = arith.constant 0 : index
      %c0_63 = arith.constant 0 : index
      %95 = vector.load %arg9[%c1_61, %c0_62, %c0_63] : memref<2x256x1xf32, #tpu.memory_space<vmem>>, vector<1x256x1xf32>
      %96 = vector.shape_cast %95 : vector<1x256x1xf32> to vector<256x1xf32>
      %97 = tpu.reciprocal %96 {approx = true} : vector<256x1xf32> -> vector<256x1xf32>
      %c1_64 = arith.constant 1 : index
      %c0_65 = arith.constant 0 : index
      %c0_66 = arith.constant 0 : index
      %98 = vector.load %arg10[%c1_64, %c0_65, %c0_66] : memref<2x256x64xf32, #tpu.memory_space<vmem>>, vector<1x256x64xf32>
      %99 = vector.shape_cast %98 : vector<1x256x64xf32> to vector<256x64xf32>
      %100 = vector.broadcast %97 : vector<256x1xf32> to vector<256x64xf32>
      %101 = arith.mulf %99, %100 : vector<256x64xf32>
      %102 = tpu.concatenate %94, %101 in 1 : vector<256x64xf32>, vector<256x64xf32> -> vector<256x128xf32>
      %103 = arith.truncf %102 : vector<256x128xf32> to vector<256x128xbf16>
      %c0_67 = arith.constant 0 : index
      %c0_68 = arith.constant 0 : index
      %c0_69 = arith.constant 0 : index
      %104 = vector.load %arg7[%c0_67, %c0_68, %c0_69] : memref<1x256x128xbf16, #tpu.memory_space<vmem>>, vector<1x256x128xbf16>
      %105 = vector.shape_cast %104 : vector<1x256x128xbf16> to vector<256x128xbf16>
      %106 = vector.shape_cast %103 : vector<256x128xbf16> to vector<1x256x128xbf16>
      tpu.vector_store %arg7[%c0_67, %c0_68, %c0_69], %106 {strides = array<i32>} : memref<1x256x128xbf16, #tpu.memory_space<vmem>>, vector<1x256x128xbf16>,
    } else {
    }
    return
  }
  func.func @transform_0(%arg0: i32, %arg1: i32, %arg2: i32, %arg3: i32) -> (i32, i32, i32) {
    %c0_i32 = arith.constant 0 : i32
    return %arg0, %arg2, %arg1 : i32, i32, i32
  }
  func.func @transform_1(%arg0: i32, %arg1: i32, %arg2: i32, %arg3: i32) -> (i32, i32, i32) {
    %c0_i32 = arith.constant 0 : i32
    return %arg0, %arg3, %arg1 : i32, i32, i32
  }
  func.func @transform_2(%arg0: i32, %arg1: i32, %arg2: i32, %arg3: i32) -> (i32, i32, i32) {
    %c0_i32 = arith.constant 0 : i32
    return %arg0, %arg3, %arg1 : i32, i32, i32
  }
  func.func @transform_3(%arg0: i32, %arg1: i32, %arg2: i32, %arg3: i32) -> (i32, i32, i32) {
    %c0_i32 = arith.constant 0 : i32
    return %arg0, %arg2, %arg1 : i32, i32, i32
  }
}

</mosaic_0001>

<bundles_post_ra>
// kernel: tpu_custom_call.1
= control target key start
LH: loop header
LB: loop body
LE: loop exit
PB: predicated region body
PF: predicated region fallthrough
CT: control target
= control target key end

     0   :  { %s14339_s0 = inlined_call_operand.hbm [shape: bf16[2,512,128], index: 0, kind: input, shape index: {}]   ;;  %s14340_s1 = inlined_call_operand.hbm [shape: bf16[2,512,128], index: 1, kind: input, shape index: {}]   ;;  %s14341_s2 = inlined_call_operand.hbm [shape: bf16[2,512,128], index: 2, kind: input, shape index: {}]   ;;  %s14342_s3 = inlined_call_operand.hbm [shape: bf16[2,512,128], index: 3, kind: output, shape index: {}]  }
   0x1   :  { %14666 = sst [smem:[#allocation163_spill]] %s14340_s1 }
   0x2   :  { %14667 = sst [smem:[#allocation164_spill]] %s14342_s3 }
   0x3   :  { %8 = vsyncpa [#allocation6], 0 }
   0x4   :  { %10 = vsyncpa [#allocation6 + $0x1], 0 }
   0x5   :  { %11 = vsyncpa [#allocation9], 0 }
   0x6   :  { %13 = vsyncpa [#allocation9 + $0x1], 0 }
   0x7   :  { %14 = vsyncpa [#allocation7], 0 }
   0x8   :  { %16 = vsyncpa [#allocation7 + $0x1], 0  ;;  %s9769_s12 = smov 0   ;;  %s9771_s13 = smov 0  }
   0x9   :  { %s9773_s14 = smov 0   ;;  %s9775_s15 = smov 0  }
   0xa   :  { %s9777_s16 = smov 0   ;;  %s9779_s17 = smov 0  }
   0xb   :  { %s9781_s18 = smov 0   ;;  %s9783_s19 = smov 0  }
   0xc   :  { %s9785_s20 = smov 0   ;;  %s9787_s21 = smov 0  }
   0xd   :  { %s9789_s22 = smov 0  }
   0xe LB: > { %14668 = sst [smem:[#allocation15_spill]] %s9700_s13  ;;  %s9823_s23 = sadd.s32 4294967295, %s9736_s22   ;;  %s9736_s22 = sphi %s9789_s22, %s22_s22   ;;  %s9732_s21 = sphi %s9787_s21, %s15481_s21   ;;  %s9728_s20 = sphi %s9785_s20, %s15480_s20   ;;  %s9724_s19 = sphi %s9783_s19, %s15479_s19   ;;  %s9720_s18 = sphi %s9781_s18, %s15478_s18   ;;  %s9716_s17 = sphi %s9779_s17, %s15477_s17   ;;  %s9712_s16 = sphi %s9777_s16, %s15476_s16   ;;  %s9708_s15 = sphi %s9775_s15, %s15475_s15   ;;  %s9704_s14 = sphi %s9773_s14, %s15474_s14   ;;  %s9700_s13 = sphi %s9771_s13, %s15473_s13   ;;  %s9696_s12 = sphi %s9769_s12, %s15471_s12  }
   0xf   : > { %14669 = sst [smem:[#allocation16_spill]] %s9708_s15  ;;  %p14345_p0 = scmp.eq.s32.totalorder %s9736_s22, 0 }
  0x10   : > { %14670 = sst [smem:[#allocation17_spill]] %s9720_s18  ;;  %p14344_p1 = scmp.eq.s32.totalorder %s9823_s23, 0 }
  0x11   : > { %14671 = sst [smem:[#allocation18_spill]] %s9724_s19  ;;  %p96_p2 = scmp.ne.s32.totalorder %s9704_s14, %s9700_s13 }
  0x12   : > { %14672 = sst [smem:[#allocation19_spill]] %s9823_s23  ;;  %p102_p3 = scmp.ne.s32.totalorder %s9700_s13, %s9696_s12 }
  0x13   : > { %p98_p4 = por %p96_p2, %p14345_p0  ;;  %p14343_p5 = scmp.lt.s32.totalorder %s9736_s22, 4 }
  0x14   : > { %p9836_p6 = por %p102_p3, %p14344_p1  ;;  %s210_s26 = sand.u32 1, %s9736_s22  }
  0x15   : > { %s212_s27 = sand.u32 1, %s9704_s14   ;;  %s7607_s29 = sshll.u32 %s9732_s21, 12 }
  0x16   : > { %s14673_s25 = scalar_select %p9836_p6, 1, 0 }
  0x17   : > { %s9842_s28 = sshll.u32 %s212_s27, 8  ;;  %s14675_s1 = sld [smem:[#allocation163_spill]] }
  0x18   : > { %14674 = sst [smem:[#allocation20_spill]] %s14673_s25  ;;  %s214_s6 = scalar_lea.vmem [#allocation8], %s9842_s28 }
  0x19   : > { %s224_s7 = sshll.u32 %s214_s6, 4  ;;  %p9855_p7 = pnand %p14343_p5, %p98_p4  ;;  %s9860_s7 = int_to_ptr.vmem [resolvable:$true] %s224_s7 }
  0x1a   : > { %s9862_s10 = scalar_lea.sflag [#allocation9], %s210_s26 }
  0x1b   : > { %p14346_p9 = pneg %p9855_p7 }
  0x1d   : > { %s9850_s5 = scalar_lea.hbm %s14675_s1, %s7607_s29  ;;  %s9525_s30 = scalar_lea.hbm %s14675_s1, 8192 }
  0x1e   : > { %s9520_s11 = scalar_lea.hbm %s9850_s5, 4096  ;;  %p9526_p12 = scmp.lt.u32.totalorder %s9850_s5, %s14675_s1 }
  0x1f   : > { %p9521_p8 = scmp.ne.s32.totalorder %s9850_s5, %s9520_s11  ;;  %p9527_p13 = scmp.lt.u32.totalorder %s9525_s30, %s9520_s11 }
  0x20   : > { %p9529_p3 = scmp.lt.u32.totalorder %s9520_s11, %s9850_s5 }
  0x21   : > { %p9523_p10 = pnand %p14346_p9, %p9521_p8  ;;  %p9528_p2 = por %p9527_p13, %p9526_p12 }
  0x23   : > { %p9524_p11 = pneg %p9523_p10  ;;  %p9530_p4 = por %p9529_p3, %p9528_p2 }
  0x25   : > { %p9531_p5 = pnand %p9530_p4, %p9524_p11 }
  0x27   : > { %9534 = shalt.err (!%p9531_p5)
}
  0x28   : > { %s9535_s26 = scalar_lea.vmem %s9860_s7, 4096  ;;  %s9738_s12 = smov [#allocation8]  }
  0x29   : > { %p9536_p8 = scmp.ne.s32.totalorder %s9860_s7, %s9535_s26  ;;  %s9540_s27 = sshll.u32 %s9738_s12, 4  ;;  %s9541_s27 = int_to_ptr.vmem [resolvable:$false] %s9540_s27 }
  0x2a   : > { %s9542_s4 = scalar_lea.vmem %s9541_s27, 8192  ;;  %p9543_p0 = scmp.lt.s32.totalorder %s9860_s7, %s9541_s27 }
  0x2b   : > { %p9538_p10 = pnand %p9536_p8, %p14346_p9  ;;  %p9544_p12 = scmp.lt.s32.totalorder %s9542_s4, %s9535_s26 }
  0x2d   : > { %p9539_p1 = pneg %p9538_p10  ;;  %p9545_p13 = por %p9544_p12, %p9543_p0 }
  0x2f   : > { %p9546_p2 = pnand %p9545_p13, %p9539_p1 }
  0x31   : > { %9549 = shalt.err (!%p9546_p2)
}
  0x32   : > { %s14347_s11 = smov 64   ;;  %s14349_s30 = smov 4  }
  0x33   : > { %8422 = dma.hbm_to_vmem [thread:$0]  (!%p9855_p7), %s9850_s5, 4096, %s9860_s7, %s9862_s10, %s14347_s11, %s14347_s11, %s14349_s30  }
  0x34   : > { %s9898_s12 = scalar_lea.hbm %s14341_s2, %s7607_s29  ;;  %p7420_p0 = scmp.ge.s32.totalorder %s9736_s22, 1 }
  0x35   : > { %s238_s27 = scalar_lea.vmem [#allocation10], %s9842_s28  ;;  %p256_p1 = scmp.lt.s32.totalorder %s9736_s22, 5 }
  0x36   : > { %s9902_s4 = sshll.u32 %s238_s27, 4  ;;  %s7407_s24 = sadd.s32 4294967294, %s9736_s22   ;;  %s9970_s4 = int_to_ptr.vmem [resolvable:$true] %s9902_s4 }
  0x37   : > { %p9905_p5 = pnand %p7420_p0, %p256_p1  ;;  %s40_s5 = sadd.s32 1, %s9728_s20 }
  0x38   : > { %s59_s7 = sadd.s32 1, %s9716_s17  ;;  %p42_p11 = scmp.ge.s32.totalorder %s40_s5, 2 }
  0x39   : > { %s14677_s9 = scalar_select %p9905_p5, 1, 0 }
  0x3a   : > { %p66_p3 = scmp.ne.s32.totalorder %s9716_s17, %s9712_s16  ;;  %p72_p4 = scmp.ne.s32.totalorder %s9712_s16, %s9708_s15 }
  0x3b   : > { %p160_p8 = scmp.eq.s32.totalorder %s9823_s23, 3  ;;  %s15483_s5 = smov (%p42_p11, %s40_s5), 0 }
  0x3c   : > { %14678 = sst [smem:[#allocation21_spill]] %s15483_s5  ;;  %s14679_s28 = sadd.s32 1, %s9732_s21 }
  0x3d   : > { %s15485_s28 = smov (!%p42_p11, %s14679_s28), %s9732_s21  ;;  %s53_s29 = ssub.s32 %s9728_s20, %s15483_s5 }
  0x3e   : > { %p14680_p10 = scmp.eq.s32.totalorder %s9736_s22, 0  ;;  %p50_p13 = scmp.ge.s32.totalorder %s15485_s28, 2 }
  0x3f   : > { %p14682_p2 = scmp.eq.s32.totalorder %s9823_s23, 0  ;;  %p9936_p1 = por %p160_p8, %p66_p3 }
  0x40   : > { %p9926_p12 = por %p14680_p10, %p66_p3  ;;  %p166_p11 = scmp.eq.s32.totalorder %s7407_s24, 3 }
  0x41   : > { %p9932_p0 = por %p14682_p2, %p72_p4  ;;  %s15487_s28 = smov (%p50_p13, %s15485_s28), 0 }
  0x42   : > { %s14684_s27 = scalar_select %p9936_p1, 1, 0 }
  0x43   : > { %s14683_s26 = scalar_select %p9932_p0, 1, 0 }
  0x44   : > { %14685 = sst [smem:[#allocation22_spill]] %s14684_s27  ;;  %p9942_p9 = por %p166_p11, %p72_p4 }
  0x45   : > { %s186_s30 = sand.u32 1, %s9716_s17   ;;  %s52_s1 = ssub.s32 %s9732_s21, %s15487_s28 }
  0x46   : > { %s14686_s11 = scalar_select %p9942_p9, 1, 0 }
  0x47   : > { %s54_s5 = sor.u32 %s53_s29, %s52_s1  ;;  %p87_p10 = scmp.eq.s32.totalorder %s52_s1, 0 }
  0x48   : > { %14687 = sst [smem:[#allocation23_spill]] %s14686_s11  ;;  %p57_p2 = scmp.eq.s32.totalorder %s54_s5, 0 }
  0x49   : > { %s7410_s15 = sshll.u32 %s186_s30, 7  ;;  %s14688_s3 = sadd.s32 1, %s9704_s14 }
  0x4a   : > { %s9952_s19 = scalar_select %p87_p10, %s9704_s14, %s14688_s3  }
  0x4b   : > { %s9955_s24 = scalar_select %p57_p2, %s9716_s17, %s59_s7  }
  0x4c   : > { %s7411_s27 = sshll.u32 %s9728_s20, 5  ;;  %s7412_s18 = sshll.u32 %s9732_s21, 6 }
  0x4d   : > { %s190_s25 = scalar_lea.vmem [#allocation5], %s7410_s15  ;;  %s197_s23 = sadd.s32 %s7412_s18, %s7411_s27 }
  0x4e   : > { %s200_s13 = sshll.u32 %s190_s25, 4  ;;  %s7413_s11 = sshll.u32 %s197_s23, 6  ;;  %s9959_s13 = int_to_ptr.vmem [resolvable:$true] %s200_s13 }
  0x4f   : > { %p14689_p3 = scmp.lt.s32.totalorder %s9736_s22, 4  ;;  %s9975_s5 = scalar_lea.hbm %s14339_s0, %s7413_s11 }
  0x50   : > { %s9977_s15 = scalar_lea.sflag [#allocation6], %s186_s30  ;;  %s9550_s18 = scalar_lea.hbm %s9975_s5, 2048 }
  0x51   : > { %p9965_p4 = pnand %p14689_p3, %p9926_p12  ;;  %p9551_p8 = scmp.ne.s32.totalorder %s9975_s5, %s9550_s18 }
  0x52   : > { %s9555_s7 = scalar_lea.hbm %s14339_s0, 8192  ;;  %p9556_p10 = scmp.lt.u32.totalorder %s9975_s5, %s14339_s0 }
  0x53   : > { %p9552_p12 = pneg %p9965_p4  ;;  %p9557_p2 = scmp.lt.u32.totalorder %s9555_s7, %s9550_s18 }
  0x54   : > { %p9559_p9 = scmp.lt.u32.totalorder %s9550_s18, %s9975_s5 }
  0x55   : > { %p9553_p13 = pnand %p9552_p12, %p9551_p8  ;;  %p9558_p3 = por %p9557_p2, %p9556_p10 }
  0x57   : > { %p9554_p11 = pneg %p9553_p13  ;;  %p9560_p1 = por %p9559_p9, %p9558_p3 }
  0x59   : > { %p9561_p6 = pnand %p9560_p1, %p9554_p11 }
  0x5b   : > { %9564 = shalt.err (!%p9561_p6)
}
  0x5c   : > { %s9565_s30 = scalar_lea.vmem %s9959_s13, 2048  ;;  %s9741_s27 = smov [#allocation5]  }
  0x5d   : > { %p9566_p8 = scmp.ne.s32.totalorder %s9959_s13, %s9565_s30  ;;  %s9570_s1 = sshll.u32 %s9741_s27, 4  ;;  %s9571_s1 = int_to_ptr.vmem [resolvable:$false] %s9570_s1 }
  0x5e   : > { %s9572_s3 = scalar_lea.vmem %s9571_s1, 4096  ;;  %p9573_p5 = scmp.lt.s32.totalorder %s9959_s13, %s9571_s1 }
  0x5f   : > { %p9568_p13 = pnand %p9566_p8, %p9552_p12  ;;  %p9574_p10 = scmp.lt.s32.totalorder %s9572_s3, %s9565_s30 }
  0x61   : > { %p9569_p0 = pneg %p9568_p13  ;;  %p9575_p2 = por %p9574_p10, %p9573_p5 }
  0x63   : > { %p9576_p9 = pnand %p9575_p2, %p9569_p0 }
  0x65   : > { %9579 = shalt.err (!%p9576_p9)
}
  0x66   : > { %s14691_s18 = smov 4   ;;  %s14692_s23 = smov 64  }
  0x67   : > { %8419 = dma.hbm_to_vmem [thread:$0]  (!%p9965_p4), %s9975_s5, 2048, %s9959_s13, %s9977_s15, %s14692_s23, %s14692_s23, %s14691_s18  }
  0x68   : > { %s9580_s25 = scalar_lea.hbm %s9898_s12, 4096  ;;  %p14693_p5 = pneg %p9855_p7 }
  0x69   : > { %p9581_p6 = scmp.ne.s32.totalorder %s9898_s12, %s9580_s25  ;;  %s9585_s11 = scalar_lea.hbm %s14341_s2, 8192 }
  0x6a   : > { %p9586_p12 = scmp.lt.u32.totalorder %s9898_s12, %s14341_s2  ;;  %p9587_p11 = scmp.lt.u32.totalorder %s9585_s11, %s9580_s25 }
  0x6b   : > { %p9583_p0 = pnand %p9581_p6, %p14693_p5  ;;  %p9589_p8 = scmp.lt.u32.totalorder %s9580_s25, %s9898_s12 }
  0x6c   : > { %p9588_p3 = por %p9587_p11, %p9586_p12 }
  0x6d   : > { %p9584_p1 = pneg %p9583_p0 }
  0x6e   : > { %p9590_p13 = por %p9589_p8, %p9588_p3 }
  0x70   : > { %p9591_p10 = pnand %p9590_p13, %p9584_p1 }
  0x72   : > { %9594 = shalt.err (!%p9591_p10)
}
  0x73   : > { %s9595_s13 = scalar_lea.vmem %s9970_s4, 4096  ;;  %p14694_p2 = pmov %p14693_p5 }
  0x74   : > { %p9596_p4 = scmp.ne.s32.totalorder %s9970_s4, %s9595_s13  ;;  %s9742_s5 = smov [#allocation10]  }
  0x75   : > { %s9600_s15 = sshll.u32 %s9742_s5, 4  ;;  %s9601_s15 = int_to_ptr.vmem [resolvable:$false] %s9600_s15 }
  0x76   : > { %p9598_p9 = pnand %p9596_p4, %p14694_p2  ;;  %s9602_s27 = scalar_lea.vmem %s9601_s15, 8192 }
  0x77   : > { %p9603_p5 = scmp.lt.s32.totalorder %s9970_s4, %s9601_s15  ;;  %p9604_p0 = scmp.lt.s32.totalorder %s9602_s27, %s9595_s13 }
  0x78   : > { %p9599_p6 = pneg %p9598_p9 }
  0x79   : > { %p9605_p12 = por %p9604_p0, %p9603_p5 }
  0x7b   : > { %p9606_p11 = pnand %p9605_p12, %p9599_p6 }
  0x7d   : > { %9609 = shalt.err (!%p9606_p11)
}
  0x7e   : > { %8425 = dma.hbm_to_vmem [thread:$0]  (!%p9855_p7), %s9898_s12, 4096, %s9970_s4, %s9862_s10, %s14692_s23, %s14692_s23, %s14691_s18  }
  0x7f   : > { %p14695_p1 = scmp.ne.s32.totalorder %s14677_s9, 0 }
  0x81   : > { %260 = sbr.rel (%p14695_p1) target bundleno = 2025 (0x7e9), region = 32 }
  0x88   : > { %s10038_s1 = sand.u32 1, %s9712_s16   ;;  %p14696_p3 = scmp.ne.s32.totalorder %s14683_s26, 0 }
  0x89   : > { %s7421_s3 = sshll.u32 %s10038_s1, 7  ;;  %s263_s25 = scalar_lea.sflag [#allocation6], %s10038_s1 }
  0x8a   : > { %s10044_s8 = scalar_lea.vmem [#allocation5], %s7421_s3 }
  0x8b   : > { %9683 = dma.done.wait (%p14696_p3), %s263_s25, 2048  }
  0x8c   : > { %9685 = vsyncadd (%p14696_p3), %s263_s25, 4294965248  ;;  %s14697_s10 = sld [smem:[#allocation19_spill]]  ;;  %s14698_s9 = sld [smem:[#allocation15_spill]] }
  0x8d   : > { %s14699_s12 = sld [smem:[#allocation20_spill]] }
  0x92   : > { %s271_s4 = sand.u32 1, %s14697_s10   ;;  %s273_s18 = sand.u32 1, %s14698_s9  }
  0x93   : > { %s10052_s23 = sshll.u32 %s273_s18, 8  ;;  %s272_s7 = scalar_lea.sflag [#allocation9], %s271_s4 }
  0x94   : > { %s10055_s29 = scalar_lea.vmem [#allocation8], %s10052_s23  ;;  %p14700_p7 = scmp.ne.s32.totalorder %s14699_s12, 0 }
  0x96   : > { %9687 = dma.done.wait (%p14700_p7), %s272_s7, 8192  }
  0x97   : > { %9689 = vsyncadd (%p14700_p7), %s272_s7, 4294959104  ;;  %vm455_vm0 = vcmask 523264   ;;  %v10062_v0 = vld [vmem:[%s10055_s29 + $0x40] sm:$0xff]   ;;  %v10080_v5 = vld [vmem:[%s10055_s29 + $0x48] sm:$0xff]   ;;  %s9743_s26 = smov 64   ;;  %s10263_s11 = scalar_lea.vmem [#allocation10], %s10052_s23 }
  0x98   : > { %v10065_v1 = vld [vmem:[%s10055_s29 + $0xc0] sm:$0xff]   ;;  %8376 = vmatprep.subr.msk.bf16.mxu0 %vm455_vm0, %v10062_v0  ;;  %v10085_v7 = vld [vmem:[%s10055_s29 + $0xc8] sm:$0xff]   ;;  %v10100_v11 = vld [vmem:[%s10055_s29 + $0x50] sm:$0xff]   ;;  %vm326_vm1 = vcmask 7168   ;;  %s14190_s6 = scalar_lea.vmem [#allocation11], %s7421_s3  ;;  %s15457_s30 = sld [smem:[#allocation17_spill]] }
  0x99   : > { %v10070_v2 = vld [vmem:[%s10055_s29] sm:$0xff]   ;;  %8384 = vmatprep.subr.msk.bf16.mxu1 %vm455_vm0, %v10065_v1  ;;  %v10090_v8 = vld [vmem:[%s10055_s29 + $0x8] sm:$0xff]   ;;  %v8618_v13 = vld [vmem:[%s10055_s29 + $0xd0] sm:$0xff]   ;;  %s15458_s13 = sld [smem:[#allocation18_spill]]  ;;  %s7257_s3 = sshll.u32 %s14190_s6, 4  ;;  %s14268_s3 = int_to_ptr.vmem [resolvable:$true] %s7257_s3 }
  0x9a   : > { %v10075_v3 = vld [vmem:[%s10055_s29 + $0x80] sm:$0xff]   ;;  %v970_v4 = vsel %vm455_vm0, %v10070_v2, 0  ;;  %v10095_v9 = vld [vmem:[%s10055_s29 + $0x88] sm:$0xff]   ;;  %v973_v10 = vsel %vm455_vm0, %v10090_v8, 0  ;;  %v10108_v14 = vld [vmem:[%s10055_s29 + $0x10] sm:$0xff]   ;;  %s15464_s25 = sld [smem:[#allocation22_spill]] }
  0x9b   : > { %7737 = vmatpush3.bf16.xpose.msra.mxu0 %v970_v4  ;;  %v1018_v6 = vsel %vm455_vm0, %v10075_v3, 0  ;;  %v1021_v12 = vsel %vm455_vm0, %v10095_v9, 0  ;;  %v8620_v15 = vld [vmem:[%s10055_s29 + $0x90] sm:$0xff]   ;;  %v976_v16 = vsel %vm455_vm0, %v10108_v14, 0  ;;  %v8621_v17 = vld [vmem:[%s10055_s29 + $0x58] sm:$0xff]   ;;  %v8625_v23 = vld [vmem:[%s10055_s29 + $0x60] sm:$0xff]  }
  0x9c   : > { %7785 = vmatpush3.bf16.xpose.msra.mxu1 %v1018_v6  ;;  %8377 = vmatprep.subr.msk.bf16.mxu0 %vm455_vm0, %v10080_v5  ;;  %v1024_v18 = vsel %vm455_vm0, %v8620_v15, 0  ;;  %v8622_v19 = vld [vmem:[%s10055_s29 + $0xd8] sm:$0xff]   ;;  %v8626_v25 = vld [vmem:[%s10055_s29 + $0xe0] sm:$0xff]   ;;  %v8629_v30 = vld [vmem:[%s10055_s29 + $0x68] sm:$0xff]   ;;  %s15465_s12 = sld [smem:[#allocation164_spill]]  ;;  %s7241_s23 = scalar_lea.sflag [#allocation7], %s10038_s1 }
  0x9d   : > { %8385 = vmatprep.subr.msk.bf16.mxu1 %vm455_vm0, %v10085_v7  ;;  %v8623_v20 = vld [vmem:[%s10055_s29 + $0x18] sm:$0xff]   ;;  %v8627_v26 = vld [vmem:[%s10055_s29 + $0x20] sm:$0xff]   ;;  %v8630_v32 = vld [vmem:[%s10055_s29 + $0xe8] sm:$0xff]   ;;  %s9610_s7 = scalar_lea.vmem %s14268_s3, 2048 }
  0x9e   : > { %v8624_v21 = vld [vmem:[%s10055_s29 + $0x98] sm:$0xff]   ;;  %v979_v22 = vsel %vm455_vm0, %v8623_v20, 0  ;;  %v8628_v27 = vld [vmem:[%s10055_s29 + $0xa0] sm:$0xff]   ;;  %v982_v29 = vsel %vm455_vm0, %v8627_v26, 0  ;;  %v8631_v33 = vld [vmem:[%s10055_s29 + $0x28] sm:$0xff]   ;;  %s7602_s5 = sshll.u32 %s15457_s30, 5  ;;  %p9611_p8 = scmp.ne.s32.totalorder %s14268_s3, %s9610_s7 }
  0x9f   : > { %v1027_v24 = vsel %vm455_vm0, %v8624_v21, 0  ;;  %v8641_v28 = vld [vmem:[%s10044_s8] sm:$0xff]   ;;  %v1030_v31 = vsel %vm455_vm0, %v8628_v27, 0  ;;  %v8632_v34 = vld [vmem:[%s10055_s29 + $0xa8] sm:$0xff]   ;;  %v985_v35 = vsel %vm455_vm0, %v8631_v33, 0  ;;  %v8633_v36 = vld [vmem:[%s10055_s29 + $0x70] sm:$0xff]  }
  0xa0   : > { %7752 = vmatprep.mubr.msk.bf16.mxu0 %vm455_vm0, %v8641_v28  ;;  %7800 = vmatprep.mubr.msk.bf16.mxu1 %vm455_vm0, %v8641_v28  ;;  %v1033_v37 = vsel %vm455_vm0, %v8632_v34, 0  ;;  %v8634_v38 = vld [vmem:[%s10055_s29 + $0xf0] sm:$0xff]   ;;  %v8637_v42 = vld [vmem:[%s10055_s29 + $0x78] sm:$0xff]   ;;  %v8642_v49 = vld [vmem:[%s10044_s8 + $0x8] sm:$0xff]   ;;  %s7603_s15 = sshll.u32 %s15458_s13, 6  ;;  %p15467_p13 = scmp.ne.s32.totalorder %s15464_s25, 0 }
  0xa1   : > { %v8635_v39 = vld [vmem:[%s10055_s29 + $0x30] sm:$0xff]   ;;  %v8638_v44 = vld [vmem:[%s10055_s29 + $0xf8] sm:$0xff]   ;;  %3630 = vrot.lane.b32.xlu1 %v8641_v28, %s9743_s26  ;;  %3632 = vrot.lane.b32.xlu0 %v8642_v49, %s9743_s26  ;;  %s7254_s27 = sadd.s32 %s7603_s15, %s7602_s5 }
  0xa2   : > { %v8636_v40 = vld [vmem:[%s10055_s29 + $0xb0] sm:$0xff]   ;;  %v988_v41 = vsel %vm455_vm0, %v8635_v39, 0  ;;  %v8639_v45 = vld [vmem:[%s10055_s29 + $0x38] sm:$0xff]   ;;  %v8645_v52 = vld [vmem:[%s10044_s8 + $0x20] sm:$0xff]   ;;  %s15466_s4 = smov %s15465_s12  ;;  %p9612_p10 = pnand %p9611_p8, %p15467_p13 }
  0xa3   : > { %7739 = vmatpush3.bf16.xpose.msra.mxu0 %v973_v10  ;;  %v1036_v43 = vsel %vm455_vm0, %v8636_v40, 0  ;;  %v8640_v46 = vld [vmem:[%s10055_s29 + $0xb8] sm:$0xff]   ;;  %v991_v47 = vsel %vm455_vm0, %v8639_v45, 0  ;;  %v8643_v50 = vld [vmem:[%s10044_s8 + $0x10] sm:$0xff]   ;;  %v8646_v53 = vld [vmem:[%s10044_s8 + $0x28] sm:$0xff]  }
  0xa4   : > { %7787 = vmatpush3.bf16.xpose.msra.mxu1 %v1021_v12  ;;  %8378 = vmatprep.subr.msk.bf16.mxu0 %vm455_vm0, %v10100_v11  ;;  %v1039_v48 = vsel %vm455_vm0, %v8640_v46, 0  ;;  %v8644_v51 = vld [vmem:[%s10044_s8 + $0x18] sm:$0xff]   ;;  %v8647_v54 = vld [vmem:[%s10044_s8 + $0x30] sm:$0xff]   ;;  %v8649_v56 = vld [vmem:[%s10044_s8 + $0x40] sm:$0xff]   ;;  %p9613_p4 = pneg %p9612_p10 }
  0xa5   : > { %8386 = vmatprep.subr.msk.bf16.mxu1 %vm455_vm0, %v8618_v13  ;;  %3634 = vrot.lane.b32.xlu1 %v8643_v50, %s9743_s26  ;;  %v8648_v55 = vld [vmem:[%s10044_s8 + $0x38] sm:$0xff]   ;;  %v8650_v57 = vld [vmem:[%s10044_s8 + $0x48] sm:$0xff]   ;;  %v8651_v58 = vld [vmem:[%s10044_s8 + $0x50] sm:$0xff]  }
  0xa6   : > { %3636 = vrot.lane.b32.xlu0 %v8644_v51, %s9743_s26  ;;  %v8652_v59 = vld [vmem:[%s10044_s8 + $0x58] sm:$0xff]   ;;  %v8653_v60 = vld [vmem:[%s10044_s8 + $0x60] sm:$0xff]   ;;  %v8654_v61 = vld [vmem:[%s10044_s8 + $0x68] sm:$0xff]  }
  0xa7   : > { %v8655_v62 = vld [vmem:[%s10044_s8 + $0x70] sm:$0xff]   ;;  %v8656_v63 = vld [vmem:[%s10044_s8 + $0x78] sm:$0xff]   ;;  %v8661_v4 = vld [vmem:[%s10263_s11 + $0x8] sm:$0xff]  }
  0xa8   : > { %v8663_v6 = vld [vmem:[%s10263_s11 + $0x50] sm:$0xff]   ;;  %v8667_v10 = vld [vmem:[%s10263_s11 + $0x58] sm:$0xff]   ;;  %v8671_v15 = vld [vmem:[%s10263_s11 + $0x60] sm:$0xff]  }
  0xa9   : > { %3638 = vrot.lane.b32.xlu1 %v8645_v52, %s9743_s26  ;;  %v8669_v13 = vld [vmem:[%s10263_s11 + $0x18] sm:$0xff]   ;;  %v8675_v20 = vld [vmem:[%s10263_s11 + $0x68] sm:$0xff]   ;;  %v8676_v21 = vld [vmem:[%s10263_s11 + $0xe0] sm:$0xff]  }
  0xaa   : > { %3640 = vrot.lane.b32.xlu0 %v8646_v53, %s9743_s26  ;;  %v8680_v26 = vld [vmem:[%s10263_s11 + $0xe8] sm:$0xff]   ;;  %v8681_v27 = vld [vmem:[%s10263_s11 + $0x30] sm:$0xff]  }
  0xab   : > { %7741 = vmatpush3.bf16.xpose.msra.mxu0 %v976_v16  ;;  %v8672_v16 = vld [vmem:[%s10263_s11 + $0xd8] sm:$0xff]   ;;  %v8686_v33 = vld [vmem:[%s10263_s11 + $0xb0] sm:$0xff]  }
  0xac   : > { %7789 = vmatpush3.bf16.xpose.msra.mxu1 %v1024_v18  ;;  %8379 = vmatprep.subr.msk.bf16.mxu0 %vm455_vm0, %v8621_v17  ;;  %v8673_v17 = vld [vmem:[%s10263_s11 + $0x20] sm:$0xff]   ;;  %v8674_v18 = vld [vmem:[%s10263_s11 + $0x98] sm:$0xff]  }
  0xad   : > { %8387 = vmatprep.subr.msk.bf16.mxu1 %vm455_vm0, %v8622_v19  ;;  %3642 = vrot.lane.b32.xlu1 %v8647_v54, %s9743_s26 }
  0xae   : > { %3662 = vrot.lane.b32.xlu0 %v10070_v2, %s9743_s26  ;;  %v8659_v2 = vld [vmem:[%s10263_s11 + $0x48] sm:$0xff]  }
  0xb1   : > { %3678 = vrot.lane.b32.xlu1 %v10062_v0, %s9743_s26  ;;  %v8657_v0 = vld [vmem:[%s10263_s11 + $0x40] sm:$0xff]  }
  0xb2   : > { %3694 = vrot.lane.b32.xlu0 %v10075_v3, %s9743_s26  ;;  %v8660_v3 = vld [vmem:[%s10263_s11 + $0xc0] sm:$0xff]  }
  0xb3   : > { %7743 = vmatpush3.bf16.xpose.msra.mxu0 %v979_v22  ;;  %v8677_v22 = vld [vmem:[%s10263_s11 + $0x28] sm:$0xff]  }
  0xb4   : > { %7791 = vmatpush3.bf16.xpose.msra.mxu1 %v1027_v24  ;;  %8380 = vmatprep.subr.msk.bf16.mxu0 %vm455_vm0, %v8625_v23  ;;  %v8678_v23 = vld [vmem:[%s10263_s11 + $0xa0] sm:$0xff]  }
  0xb5   : > { %8388 = vmatprep.subr.msk.bf16.mxu1 %vm455_vm0, %v8626_v25  ;;  %3710 = vrot.lane.b32.xlu1 %v10065_v1, %s9743_s26  ;;  %v8658_v1 = vld [vmem:[%s10263_s11] sm:$0xff]   ;;  %v8679_v25 = vld [vmem:[%s10263_s11 + $0x70] sm:$0xff]  }
  0xb6   : > { %3664 = vrot.lane.b32.xlu0 %v10090_v8, %s9743_s26  ;;  %v8665_v8 = vld [vmem:[%s10263_s11 + $0x10] sm:$0xff]  }
  0xb9   : > { %3680 = vrot.lane.b32.xlu1 %v10080_v5, %s9743_s26  ;;  %v8662_v5 = vld [vmem:[%s10263_s11 + $0x80] sm:$0xff]  }
  0xba   : > { %3696 = vrot.lane.b32.xlu0 %v10095_v9, %s9743_s26  ;;  %v8666_v9 = vld [vmem:[%s10263_s11 + $0x88] sm:$0xff]  }
  0xbb   : > { %7745 = vmatpush3.bf16.xpose.msra.mxu0 %v982_v29 }
  0xbc   : > { %7793 = vmatpush3.bf16.xpose.msra.mxu1 %v1030_v31  ;;  %8381 = vmatprep.subr.msk.bf16.mxu0 %vm455_vm0, %v8629_v30  ;;  %v8683_v30 = vld [vmem:[%s10263_s11 + $0x78] sm:$0xff]   ;;  %v8684_v31 = vld [vmem:[%s10263_s11 + $0xf0] sm:$0xff]  }
  0xbd   : > { %8389 = vmatprep.subr.msk.bf16.mxu1 %vm455_vm0, %v8630_v32  ;;  %3712 = vrot.lane.b32.xlu1 %v10085_v7, %s9743_s26  ;;  %v8664_v7 = vld [vmem:[%s10263_s11 + $0xc8] sm:$0xff]   ;;  %v8685_v32 = vld [vmem:[%s10263_s11 + $0x38] sm:$0xff]  }
  0xbe   : > { %3666 = vrot.lane.b32.xlu0 %v10108_v14, %s9743_s26  ;;  %v8670_v14 = vld [vmem:[%s10263_s11 + $0x90] sm:$0xff]  }
  0xc1   : > { %3682 = vrot.lane.b32.xlu1 %v10100_v11, %s9743_s26  ;;  %v8668_v11 = vld [vmem:[%s10263_s11 + $0xd0] sm:$0xff]  }
  0xc3   : > { %7747 = vmatpush3.bf16.xpose.msra.mxu0 %v985_v35  ;;  %v8687_v35 = vld [vmem:[%s10263_s11 + $0xf8] sm:$0xff]  }
  0xc4   : > { %7795 = vmatpush3.bf16.xpose.msra.mxu1 %v1033_v37  ;;  %8382 = vmatprep.subr.msk.bf16.mxu0 %vm455_vm0, %v8633_v36  ;;  %v8688_v36 = vld [vmem:[%s10263_s11 + $0xb8] sm:$0xff]  }
  0xc5   : > { %8390 = vmatprep.subr.msk.bf16.mxu1 %vm455_vm0, %v8634_v38 }
  0xcb   : > { %7749 = vmatpush3.bf16.xpose.msra.mxu0 %v988_v41 }
  0xcc   : > { %7797 = vmatpush3.bf16.xpose.msra.mxu1 %v1036_v43  ;;  %8383 = vmatprep.subr.msk.bf16.mxu0 %vm455_vm0, %v8637_v42 }
  0xcd   : > { %8391 = vmatprep.subr.msk.bf16.mxu1 %vm455_vm0, %v8638_v44 }
  0xd3   : > { %7751 = vmatpush3.bf16.xpose.msra.mxu0 %v991_v47 }
  0xd4   : > { %7799 = vmatpush3.bf16.xpose.msra.mxu1 %v1039_v48  ;;  %7832 = vmatprep.subr.bf16.mxu0 %v8657_v0 }
  0xd5   : > { %7944 = vmatprep.subr.bf16.mxu1 %v8660_v3 }
  0xda   : > { %7753 = vmatmul.mubr.msk.bf16.vlgmr.msra.gmra.mrb[0].mxu0 %vm455_vm0, %v8641_v28 }
  0xdb   : > { %7801 = vmatmul.mubr.msk.bf16.vlgmr.msra.gmra.mrb[0].mxu1 %vm455_vm0, %v8641_v28  ;;  %7754 = vmatprep.mubr.msk.bf16.mxu0 %vm455_vm0, %v8642_v49  ;;  %v8682_v28 = vld [vmem:[%s10263_s11 + $0xa8] sm:$0xff]  }
  0xdc   : > { %7802 = vmatprep.mubr.msk.bf16.mxu1 %vm455_vm0, %v8642_v49  ;;  %7833 = vmatpush3.bf16.msra.mxu0 %v8658_v1 }
  0xdd   : > { %7834 = vmatprep.subr.bf16.mxu0 %v8659_v2  ;;  %7945 = vmatpush3.bf16.msra.mxu1 %v8662_v5 }
  0xde   : > { %7946 = vmatprep.subr.bf16.mxu1 %v8664_v7 }
  0xe0   : > { %7835 = vmatpush3.bf16.msra.mxu0 %v8661_v4 }
  0xe1   : > { %7836 = vmatprep.subr.bf16.mxu0 %v8663_v6  ;;  %7947 = vmatpush3.bf16.msra.mxu1 %v8666_v9 }
  0xe2   : > { %7755 = vmatmul.mubr.msk.bf16.gmra.mrb[4].mxu0 %vm455_vm0, %v8642_v49  ;;  %7948 = vmatprep.subr.bf16.mxu1 %v8668_v11 }
  0xe3   : > { %7803 = vmatmul.mubr.msk.bf16.gmra.mrb[4].mxu1 %vm455_vm0, %v8642_v49  ;;  %7756 = vmatprep.mubr.msk.bf16.mxu0 %vm455_vm0, %v8643_v50 }
  0xe4   : > { %7804 = vmatprep.mubr.msk.bf16.mxu1 %vm455_vm0, %v8643_v50  ;;  %7837 = vmatpush3.bf16.msra.mxu0 %v8665_v8 }
  0xe5   : > { %7838 = vmatprep.subr.bf16.mxu0 %v8667_v10  ;;  %7949 = vmatpush3.bf16.msra.mxu1 %v8670_v14 }
  0xe6   : > { %7950 = vmatprep.subr.bf16.mxu1 %v8672_v16 }
  0xe8   : > { %7839 = vmatpush3.bf16.msra.mxu0 %v8669_v13 }
  0xe9   : > { %7840 = vmatprep.subr.bf16.mxu0 %v8671_v15  ;;  %7951 = vmatpush3.bf16.msra.mxu1 %v8674_v18 }
  0xea   : > { %7757 = vmatmul.mubr.msk.bf16.gmra.mrb[8].mxu0 %vm455_vm0, %v8643_v50  ;;  %7952 = vmatprep.subr.bf16.mxu1 %v8676_v21 }
  0xeb   : > { %7805 = vmatmul.mubr.msk.bf16.gmra.mrb[8].mxu1 %vm455_vm0, %v8643_v50  ;;  %7758 = vmatprep.mubr.msk.bf16.mxu0 %vm455_vm0, %v8644_v51 }
  0xec   : > { %7806 = vmatprep.mubr.msk.bf16.mxu1 %vm455_vm0, %v8644_v51  ;;  %7841 = vmatpush3.bf16.msra.mxu0 %v8673_v17 }
  0xed   : > { %7842 = vmatprep.subr.bf16.mxu0 %v8675_v20  ;;  %7953 = vmatpush3.bf16.msra.mxu1 %v8678_v23 }
  0xee   : > { %7954 = vmatprep.subr.bf16.mxu1 %v8680_v26 }
  0xf0   : > { %7843 = vmatpush3.bf16.msra.mxu0 %v8677_v22  ;;  %v9744_v22 = vmov -1e+30  }
  0xf1   : > { %7844 = vmatprep.subr.bf16.mxu0 %v8679_v25  ;;  %7955 = vmatpush3.bf16.msra.mxu1 %v8682_v28  ;;  %327 = vst.msk [vmem:[#allocation2] sm:$0xff] %vm326_vm1, %v9744_v22  ;;  %328 = vst.msk [vmem:[#allocation2 + $0x8] sm:$0xff] %vm326_vm1, %v9744_v22 }
  0xf2   : > { %7759 = vmatmul.mubr.msk.bf16.gmra.mrb[12].mxu0 %vm455_vm0, %v8644_v51  ;;  %7956 = vmatprep.subr.bf16.mxu1 %v8684_v31  ;;  %329 = vst.msk [vmem:[#allocation2 + $0x10] sm:$0xff] %vm326_vm1, %v9744_v22  ;;  %330 = vst.msk [vmem:[#allocation2 + $0x18] sm:$0xff] %vm326_vm1, %v9744_v22 }
  0xf3   : > { %7807 = vmatmul.mubr.msk.bf16.gmra.mrb[12].mxu1 %vm455_vm0, %v8644_v51  ;;  %7760 = vmatprep.mubr.msk.bf16.mxu0 %vm455_vm0, %v8645_v52  ;;  %331 = vst.msk [vmem:[#allocation2 + $0x20] sm:$0xff] %vm326_vm1, %v9744_v22  ;;  %332 = vst.msk [vmem:[#allocation2 + $0x28] sm:$0xff] %vm326_vm1, %v9744_v22 }
  0xf4   : > { %7808 = vmatprep.mubr.msk.bf16.mxu1 %vm455_vm0, %v8645_v52  ;;  %7845 = vmatpush3.bf16.msra.mxu0 %v8681_v27  ;;  %333 = vst.msk [vmem:[#allocation2 + $0x30] sm:$0xff] %vm326_vm1, %v9744_v22  ;;  %334 = vst.msk [vmem:[#allocation2 + $0x38] sm:$0xff] %vm326_vm1, %v9744_v22 }
  0xf5   : > { %7846 = vmatprep.subr.bf16.mxu0 %v8683_v30  ;;  %7957 = vmatpush3.bf16.msra.mxu1 %v8686_v33  ;;  %335 = vst.msk [vmem:[#allocation2 + $0x40] sm:$0xff] %vm326_vm1, %v9744_v22  ;;  %336 = vst.msk [vmem:[#allocation2 + $0x48] sm:$0xff] %vm326_vm1, %v9744_v22 }
  0xf6   : > { %7958 = vmatprep.subr.bf16.mxu1 %v8687_v35  ;;  %337 = vst.msk [vmem:[#allocation2 + $0x50] sm:$0xff] %vm326_vm1, %v9744_v22  ;;  %338 = vst.msk [vmem:[#allocation2 + $0x58] sm:$0xff] %vm326_vm1, %v9744_v22 }
  0xf7   : > { %339 = vst.msk [vmem:[#allocation2 + $0x60] sm:$0xff] %vm326_vm1, %v9744_v22  ;;  %340 = vst.msk [vmem:[#allocation2 + $0x68] sm:$0xff] %vm326_vm1, %v9744_v22 }
  0xf8   : > { %7847 = vmatpush3.bf16.msra.mxu0 %v8685_v32  ;;  %341 = vst.msk [vmem:[#allocation2 + $0x70] sm:$0xff] %vm326_vm1, %v9744_v22  ;;  %342 = vst.msk [vmem:[#allocation2 + $0x78] sm:$0xff] %vm326_vm1, %v9744_v22 }
  0xf9   : > { %7959 = vmatpush3.bf16.msra.mxu1 %v8688_v36  ;;  %343 = vst.msk [vmem:[#allocation2 + $0x80] sm:$0xff] %vm326_vm1, %v9744_v22  ;;  %344 = vst.msk [vmem:[#allocation2 + $0x88] sm:$0xff] %vm326_vm1, %v9744_v22 }
  0xfa   : > { %7761 = vmatmul.mubr.msk.bf16.gmra.mrb[16].mxu0 %vm455_vm0, %v8645_v52  ;;  %345 = vst.msk [vmem:[#allocation2 + $0x90] sm:$0xff] %vm326_vm1, %v9744_v22  ;;  %346 = vst.msk [vmem:[#allocation2 + $0x98] sm:$0xff] %vm326_vm1, %v9744_v22 }
  0xfb   : > { %7809 = vmatmul.mubr.msk.bf16.gmra.mrb[16].mxu1 %vm455_vm0, %v8645_v52  ;;  %7762 = vmatprep.mubr.msk.bf16.mxu0 %vm455_vm0, %v8646_v53  ;;  %347 = vst.msk [vmem:[#allocation2 + $0xa0] sm:$0xff] %vm326_vm1, %v9744_v22  ;;  %348 = vst.msk [vmem:[#allocation2 + $0xa8] sm:$0xff] %vm326_vm1, %v9744_v22 }
  0xfc   : > { %7810 = vmatprep.mubr.msk.bf16.mxu1 %vm455_vm0, %v8646_v53  ;;  %349 = vst.msk [vmem:[#allocation2 + $0xb0] sm:$0xff] %vm326_vm1, %v9744_v22  ;;  %350 = vst.msk [vmem:[#allocation2 + $0xb8] sm:$0xff] %vm326_vm1, %v9744_v22 }
  0xfd   : > { %351 = vst.msk [vmem:[#allocation2 + $0xc0] sm:$0xff] %vm326_vm1, %v9744_v22  ;;  %352 = vst.msk [vmem:[#allocation2 + $0xc8] sm:$0xff] %vm326_vm1, %v9744_v22 }
  0xfe   : > { %353 = vst.msk [vmem:[#allocation2 + $0xd0] sm:$0xff] %vm326_vm1, %v9744_v22  ;;  %354 = vst.msk [vmem:[#allocation2 + $0xd8] sm:$0xff] %vm326_vm1, %v9744_v22 }
  0xff   : > { %355 = vst.msk [vmem:[#allocation2 + $0xe0] sm:$0xff] %vm326_vm1, %v9744_v22  ;;  %356 = vst.msk [vmem:[#allocation2 + $0xe8] sm:$0xff] %vm326_vm1, %v9744_v22 }
 0x100   : > { %357 = vst.msk [vmem:[#allocation2 + $0xf0] sm:$0xff] %vm326_vm1, %v9744_v22  ;;  %358 = vst.msk [vmem:[#allocation2 + $0xf8] sm:$0xff] %vm326_vm1, %v9744_v22 }
 0x101   : > { %359 = vst.msk [vmem:[#allocation2 + $0x100] sm:$0xff] %vm326_vm1, %v9744_v22  ;;  %360 = vst.msk [vmem:[#allocation2 + $0x108] sm:$0xff] %vm326_vm1, %v9744_v22 }
 0x102   : > { %7763 = vmatmul.mubr.msk.bf16.gmra.mrb[20].mxu0 %vm455_vm0, %v8646_v53  ;;  %361 = vst.msk [vmem:[#allocation2 + $0x110] sm:$0xff] %vm326_vm1, %v9744_v22  ;;  %362 = vst.msk [vmem:[#allocation2 + $0x118] sm:$0xff] %vm326_vm1, %v9744_v22 }
 0x103   : > { %7811 = vmatmul.mubr.msk.bf16.gmra.mrb[20].mxu1 %vm455_vm0, %v8646_v53  ;;  %7764 = vmatprep.mubr.msk.bf16.mxu0 %vm455_vm0, %v8647_v54  ;;  %363 = vst.msk [vmem:[#allocation2 + $0x120] sm:$0xff] %vm326_vm1, %v9744_v22  ;;  %364 = vst.msk [vmem:[#allocation2 + $0x128] sm:$0xff] %vm326_vm1, %v9744_v22 }
 0x104   : > { %7812 = vmatprep.mubr.msk.bf16.mxu1 %vm455_vm0, %v8647_v54  ;;  %365 = vst.msk [vmem:[#allocation2 + $0x130] sm:$0xff] %vm326_vm1, %v9744_v22  ;;  %366 = vst.msk [vmem:[#allocation2 + $0x138] sm:$0xff] %vm326_vm1, %v9744_v22 }
 0x105   : > { %367 = vst.msk [vmem:[#allocation2 + $0x140] sm:$0xff] %vm326_vm1, %v9744_v22  ;;  %368 = vst.msk [vmem:[#allocation2 + $0x148] sm:$0xff] %vm326_vm1, %v9744_v22 }
 0x106   : > { %369 = vst.msk [vmem:[#allocation2 + $0x150] sm:$0xff] %vm326_vm1, %v9744_v22  ;;  %370 = vst.msk [vmem:[#allocation2 + $0x158] sm:$0xff] %vm326_vm1, %v9744_v22 }
 0x107   : > { %371 = vst.msk [vmem:[#allocation2 + $0x160] sm:$0xff] %vm326_vm1, %v9744_v22  ;;  %372 = vst.msk [vmem:[#allocation2 + $0x168] sm:$0xff] %vm326_vm1, %v9744_v22 }
 0x108   : > { %373 = vst.msk [vmem:[#allocation2 + $0x170] sm:$0xff] %vm326_vm1, %v9744_v22  ;;  %374 = vst.msk [vmem:[#allocation2 + $0x178] sm:$0xff] %vm326_vm1, %v9744_v22 }
 0x109   : > { %375 = vst.msk [vmem:[#allocation2 + $0x180] sm:$0xff] %vm326_vm1, %v9744_v22  ;;  %376 = vst.msk [vmem:[#allocation2 + $0x188] sm:$0xff] %vm326_vm1, %v9744_v22 }
 0x10a   : > { %7765 = vmatmul.mubr.msk.bf16.gmra.mrb[24].mxu0 %vm455_vm0, %v8647_v54  ;;  %377 = vst.msk [vmem:[#allocation2 + $0x190] sm:$0xff] %vm326_vm1, %v9744_v22  ;;  %378 = vst.msk [vmem:[#allocation2 + $0x198] sm:$0xff] %vm326_vm1, %v9744_v22 }
 0x10b   : > { %7813 = vmatmul.mubr.msk.bf16.gmra.mrb[24].mxu1 %vm455_vm0, %v8647_v54  ;;  %7766 = vmatprep.mubr.msk.bf16.mxu0 %vm455_vm0, %v8648_v55  ;;  %379 = vst.msk [vmem:[#allocation2 + $0x1a0] sm:$0xff] %vm326_vm1, %v9744_v22  ;;  %380 = vst.msk [vmem:[#allocation2 + $0x1a8] sm:$0xff] %vm326_vm1, %v9744_v22 }
 0x10c   : > { %7814 = vmatprep.mubr.msk.bf16.mxu1 %vm455_vm0, %v8648_v55  ;;  %381 = vst.msk [vmem:[#allocation2 + $0x1b0] sm:$0xff] %vm326_vm1, %v9744_v22  ;;  %382 = vst.msk [vmem:[#allocation2 + $0x1b8] sm:$0xff] %vm326_vm1, %v9744_v22 }
 0x10d   : > { %383 = vst.msk [vmem:[#allocation2 + $0x1c0] sm:$0xff] %vm326_vm1, %v9744_v22  ;;  %384 = vst.msk [vmem:[#allocation2 + $0x1c8] sm:$0xff] %vm326_vm1, %v9744_v22 }
 0x10e   : > { %385 = vst.msk [vmem:[#allocation2 + $0x1d0] sm:$0xff] %vm326_vm1, %v9744_v22  ;;  %386 = vst.msk [vmem:[#allocation2 + $0x1d8] sm:$0xff] %vm326_vm1, %v9744_v22 }
 0x10f   : > { %387 = vst.msk [vmem:[#allocation2 + $0x1e0] sm:$0xff] %vm326_vm1, %v9744_v22  ;;  %388 = vst.msk [vmem:[#allocation2 + $0x1e8] sm:$0xff] %vm326_vm1, %v9744_v22 }
 0x110   : > { %389 = vst.msk [vmem:[#allocation2 + $0x1f0] sm:$0xff] %vm326_vm1, %v9744_v22  ;;  %390 = vst.msk [vmem:[#allocation2 + $0x1f8] sm:$0xff] %vm326_vm1, %v9744_v22 }
 0x112   : > { %7767 = vmatmul.mubr.msk.bf16.gmra.mrb[28].mxu0 %vm455_vm0, %v8648_v55 }
 0x113   : > { %7815 = vmatmul.mubr.msk.bf16.gmra.mrb[28].mxu1 %vm455_vm0, %v8648_v55  ;;  %7768 = vmatprep.mubr.msk.bf16.mxu0 %vm455_vm0, %v8649_v56  ;;  %v10277_v12 = vpop.permute.xlu1 %3630 }
 0x114   : > { %7816 = vmatprep.mubr.msk.bf16.mxu1 %vm455_vm0, %v8649_v56  ;;  %14701 = vst [vmem:[#allocation24_spill] sm:$0xff] %v10277_v12 }
 0x117   : > { %v10285_v19 = vpop.permute.xlu1 %3634 }
 0x118   : > { %14702 = vst [vmem:[#allocation25_spill] sm:$0xff] %v10285_v19 }
 0x11a   : > { %7769 = vmatmul.mubr.msk.bf16.gmra.mrb[32].mxu0 %vm455_vm0, %v8649_v56 }
 0x11b   : > { %7817 = vmatmul.mubr.msk.bf16.gmra.mrb[32].mxu1 %vm455_vm0, %v8649_v56  ;;  %7770 = vmatprep.mubr.msk.bf16.mxu0 %vm455_vm0, %v8650_v57  ;;  %v10291_v24 = vpop.permute.xlu1 %3638 }
 0x11c   : > { %7818 = vmatprep.mubr.msk.bf16.mxu1 %vm455_vm0, %v8650_v57  ;;  %14703 = vst [vmem:[#allocation26_spill] sm:$0xff] %v10291_v24 }
 0x11f   : > { %v10297_v29 = vpop.permute.xlu1 %3642 }
 0x120   : > { %14704 = vst [vmem:[#allocation27_spill] sm:$0xff] %v10297_v29 }
 0x122   : > { %7771 = vmatmul.mubr.msk.bf16.gmra.mrb[36].mxu0 %vm455_vm0, %v8650_v57 }
 0x123   : > { %7819 = vmatmul.mubr.msk.bf16.gmra.mrb[36].mxu1 %vm455_vm0, %v8650_v57  ;;  %7772 = vmatprep.mubr.msk.bf16.mxu0 %vm455_vm0, %v8651_v58  ;;  %v3679_v34 = vpop.permute.xlu1 %3678 }
 0x124   : > { %7820 = vmatprep.mubr.msk.bf16.mxu1 %vm455_vm0, %v8651_v58  ;;  %8392 = vmatprep.subr.msk.bf16.mxu0 %vm455_vm0, %v3679_v34 }
 0x127   : > { %v3711_v37 = vpop.permute.xlu1 %3710 }
 0x128   : > { %8400 = vmatprep.subr.msk.bf16.mxu1 %vm455_vm0, %v3711_v37 }
 0x12a   : > { %7773 = vmatmul.mubr.msk.bf16.gmra.mrb[40].mxu0 %vm455_vm0, %v8651_v58 }
 0x12b   : > { %7821 = vmatmul.mubr.msk.bf16.gmra.mrb[40].mxu1 %vm455_vm0, %v8651_v58  ;;  %7774 = vmatprep.mubr.msk.bf16.mxu0 %vm455_vm0, %v8652_v59 }
 0x12c   : > { %7822 = vmatprep.mubr.msk.bf16.mxu1 %vm455_vm0, %v8652_v59 }
 0x132   : > { %7775 = vmatmul.mubr.msk.bf16.gmra.mrb[44].mxu0 %vm455_vm0, %v8652_v59 }
 0x133   : > { %7823 = vmatmul.mubr.msk.bf16.gmra.mrb[44].mxu1 %vm455_vm0, %v8652_v59  ;;  %7776 = vmatprep.mubr.msk.bf16.mxu0 %vm455_vm0, %v8653_v60 }
 0x134   : > { %7824 = vmatprep.mubr.msk.bf16.mxu1 %vm455_vm0, %v8653_v60 }
 0x13a   : > { %7777 = vmatmul.mubr.msk.bf16.gmra.mrb[48].mxu0 %vm455_vm0, %v8653_v60 }
 0x13b   : > { %7825 = vmatmul.mubr.msk.bf16.gmra.mrb[48].mxu1 %vm455_vm0, %v8653_v60  ;;  %7778 = vmatprep.mubr.msk.bf16.mxu0 %vm455_vm0, %v8654_v61 }
 0x13c   : > { %7826 = vmatprep.mubr.msk.bf16.mxu1 %vm455_vm0, %v8654_v61 }
 0x142   : > { %7779 = vmatmul.mubr.msk.bf16.gmra.mrb[52].mxu0 %vm455_vm0, %v8654_v61 }
 0x143   : > { %7827 = vmatmul.mubr.msk.bf16.gmra.mrb[52].mxu1 %vm455_vm0, %v8654_v61  ;;  %7780 = vmatprep.mubr.msk.bf16.mxu0 %vm455_vm0, %v8655_v62 }
 0x144   : > { %7828 = vmatprep.mubr.msk.bf16.mxu1 %vm455_vm0, %v8655_v62 }
 0x14a   : > { %7781 = vmatmul.mubr.msk.bf16.gmra.mrb[56].mxu0 %vm455_vm0, %v8655_v62 }
 0x14b   : > { %7829 = vmatmul.mubr.msk.bf16.gmra.mrb[56].mxu1 %vm455_vm0, %v8655_v62  ;;  %7782 = vmatprep.mubr.msk.bf16.mxu0 %vm455_vm0, %v8656_v63 }
 0x14c   : > { %7830 = vmatprep.mubr.msk.bf16.mxu1 %vm455_vm0, %v8656_v63 }
 0x152   : > { %7783 = vmatmul.mubr.msk.bf16.gmra.mrb[60].mxu0 %vm455_vm0, %v8656_v63 }
 0x153   : > { %7831 = vmatmul.mubr.msk.bf16.gmra.mrb[60].mxu1 %vm455_vm0, %v8656_v63 }
 0x1ad   : > { %v1099_v38 = vpop.f32.mrb[0].mxu0 }
 0x1ae   : > { %v10307_v39 = vmul.f32 0.125, %v1099_v38  ;;  %v1292_v40 = vpop.f32.mrb[0].mxu1  ;;  %v1101_v41 = vpop.f32.mrb[1].mxu0 }
 0x1af   : > { %v10309_v42 = vmul.f32 0.125, %v1292_v40  ;;  %v10311_v43 = vmul.f32 0.125, %v1101_v41  ;;  %v1294_v44 = vpop.f32.mrb[1].mxu1  ;;  %v1103_v45 = vpop.f32.mrb[2].mxu0 }
 0x1b0   : > { %v10313_v46 = vmul.f32 0.125, %v1103_v45  ;;  %v1296_v47 = vpop.f32.mrb[2].mxu1  ;;  %v1105_v48 = vpop.f32.mrb[3].mxu0  ;;  %v10319_v52 = vmul.f32 0.125, %v1294_v44 }
 0x1b1   : > { %v1611_v49 = vmax.f32 %v10307_v39, %v10311_v43  ;;  %v10317_v50 = vmul.f32 0.125, %v1105_v48  ;;  %v1298_v51 = vpop.f32.mrb[3].mxu1  ;;  %v10321_v53 = vmul.f32 0.125, %v1296_v47 }
 0x1b2   : > { %v10330_v62 = vmul.f32 0.125, %v1298_v51 }
 0x1b3   : > { %v1616_v54 = vmax.f32 %v10313_v46, %v10317_v50  ;;  %v1612_v55 = vmax.f32 %v1611_v49, %v10309_v42 }
 0x1b5   : > { %v1109_v56 = vpop.f32.mrb[4].mxu0  ;;  %v1613_v57 = vmax.f32 %v1612_v55, %v10319_v52  ;;  %v1617_v58 = vmax.f32 %v1616_v54, %v10321_v53 }
 0x1b6   : > { %v10328_v59 = vmul.f32 0.125, %v1109_v56  ;;  %v1302_v60 = vpop.f32.mrb[4].mxu1  ;;  %v1111_v61 = vpop.f32.mrb[5].mxu0 }
 0x1b7   : > { %v10332_v63 = vmul.f32 0.125, %v1302_v60  ;;  %v10334_v0 = vmul.f32 0.125, %v1111_v61  ;;  %v1304_v1 = vpop.f32.mrb[5].mxu1  ;;  %1614 = vmax.xlane.f32.xlu0 %v1613_v57  ;;  %v1113_v2 = vpop.f32.mrb[6].mxu0  ;;  %v1618_v9 = vmax.f32 %v1617_v58, %v10330_v62  ;;  %v9745_v61 = vmov 0  }
 0x1b8   : > { %v1306_v3 = vpop.f32.mrb[6].mxu1  ;;  %v10336_v4 = vmul.f32 0.125, %v1113_v2  ;;  %v1115_v5 = vpop.f32.mrb[7].mxu0  ;;  %v10345_v10 = vmul.f32 0.125, %v1304_v1  ;;  %8528 = vset.pattern.permute.xlu1 %v9745_v61  ;;  %8527 = vset.pattern.permute.xlu0 %v9745_v61 }
 0x1b9   : > { %v1621_v6 = vmax.f32 %v10328_v59, %v10334_v0  ;;  %v10340_v7 = vmul.f32 0.125, %v1115_v5  ;;  %v10342_v8 = vpop.f32.mrb[7].mxu1  ;;  %v10347_v11 = vmul.f32 0.125, %v1306_v3 }
 0x1ba   : > { %v10494_v23 = vmul.f32 0.125, %v10342_v8 }
 0x1bb   : > { %v1626_v13 = vmax.f32 %v10336_v4, %v10340_v7  ;;  %1619 = vmax.xlane.f32.xlu0 %v1618_v9  ;;  %v10352_v14 = vmax.f32 %v1621_v6, %v10332_v63 }
 0x1bd   : > { %v1119_v15 = vpop.f32.mrb[8].mxu0  ;;  %v1623_v16 = vmax.f32 %v10352_v14, %v10345_v10  ;;  %v10357_v17 = vmax.f32 %v1626_v13, %v10347_v11 }
 0x1be   : > { %v10359_v18 = vmul.f32 0.125, %v1119_v15  ;;  %v10361_v20 = vpop.f32.mrb[8].mxu1  ;;  %v10363_v21 = vpop.f32.mrb[9].mxu0 }
 0x1bf   : > { %v10497_v25 = vmul.f32 0.125, %v10361_v20  ;;  %v10500_v26 = vmul.f32 0.125, %v10363_v21  ;;  %v1314_v27 = vpop.f32.mrb[9].mxu1  ;;  %1624 = vmax.xlane.f32.xlu1 %v1623_v16  ;;  %v1123_v28 = vpop.f32.mrb[10].mxu0  ;;  %v1628_v36 = vmax.f32 %v10357_v17, %v10494_v23 }
 0x1c0   : > { %v1316_v30 = vpop.f32.mrb[10].mxu1  ;;  %v10505_v31 = vmul.f32 0.125, %v1123_v28  ;;  %v1125_v32 = vpop.f32.mrb[11].mxu0  ;;  %v10513_v37 = vmul.f32 0.125, %v1314_v27 }
 0x1c1   : > { %v1631_v33 = vmax.f32 %v10359_v18, %v10500_v26  ;;  %v10509_v34 = vmul.f32 0.125, %v1125_v32  ;;  %v1318_v35 = vpop.f32.mrb[11].mxu1  ;;  %v10515_v38 = vmul.f32 0.125, %v1316_v30 }
 0x1c2   : > { %v10520_v44 = vmul.f32 0.125, %v1318_v35 }
 0x1c3   : > { %v1636_v40 = vmax.f32 %v10505_v31, %v10509_v34  ;;  %1629 = vmax.xlane.f32.xlu1 %v1628_v36  ;;  %v1632_v41 = vmax.f32 %v1631_v33, %v10497_v25 }
 0x1c5   : > { %v1129_v45 = vpop.f32.mrb[12].mxu0  ;;  %v1633_v47 = vmax.f32 %v1632_v41, %v10513_v37  ;;  %v1637_v48 = vmax.f32 %v1636_v40, %v10515_v38 }
 0x1c6   : > { %v10524_v49 = vmul.f32 0.125, %v1129_v45  ;;  %v1322_v51 = vpop.f32.mrb[12].mxu1  ;;  %v1131_v54 = vpop.f32.mrb[13].mxu0 }
 0x1c7   : > { %v10526_v55 = vmul.f32 0.125, %v1322_v51  ;;  %v10528_v56 = vmul.f32 0.125, %v1131_v54  ;;  %v1324_v57 = vpop.f32.mrb[13].mxu1  ;;  %1634 = vmax.xlane.f32.xlu0 %v1633_v47  ;;  %v1133_v58 = vpop.f32.mrb[14].mxu0  ;;  %v1638_v60 = vmax.f32 %v1637_v48, %v10520_v44  ;;  %v9746_v54 = vmov 0.0  }
 0x1c8   : > { %v1326_v1 = vpop.f32.mrb[14].mxu1  ;;  %v10531_v2 = vmul.f32 0.125, %v1133_v58  ;;  %v1135_v3 = vpop.f32.mrb[15].mxu0  ;;  %v10537_v9 = vmul.f32 0.125, %v1324_v57  ;;  %456 = vst.msk [vmem:[#allocation4] sm:$0xff] %vm455_vm0, %v9746_v54  ;;  %457 = vst.msk [vmem:[#allocation4 + $0x8] sm:$0xff] %vm455_vm0, %v9746_v54 }
 0x1c9   : > { %v1641_v5 = vmax.f32 %v10524_v49, %v10528_v56  ;;  %v10535_v6 = vmul.f32 0.125, %v1135_v3  ;;  %v1328_v8 = vpop.f32.mrb[15].mxu1  ;;  %1639 = vmax.xlane.f32.xlu1 %v1638_v60  ;;  %v10539_v13 = vmul.f32 0.125, %v1326_v1  ;;  %391 = vst.msk [vmem:[#allocation3] sm:$0xff] %vm326_vm1, %v9746_v54  ;;  %392 = vst.msk [vmem:[#allocation3 + $0x8] sm:$0xff] %vm326_vm1, %v9746_v54 }
 0x1ca   : > { %v10544_v16 = vmul.f32 0.125, %v1328_v8  ;;  %393 = vst.msk [vmem:[#allocation3 + $0x10] sm:$0xff] %vm326_vm1, %v9746_v54  ;;  %394 = vst.msk [vmem:[#allocation3 + $0x18] sm:$0xff] %vm326_vm1, %v9746_v54 }
 0x1cb   : > { %v1646_v14 = vmax.f32 %v10531_v2, %v10535_v6  ;;  %v1642_v15 = vmax.f32 %v1641_v5, %v10526_v55  ;;  %395 = vst.msk [vmem:[#allocation3 + $0x20] sm:$0xff] %vm326_vm1, %v9746_v54  ;;  %396 = vst.msk [vmem:[#allocation3 + $0x28] sm:$0xff] %vm326_vm1, %v9746_v54 }
 0x1cc   : > { %397 = vst.msk [vmem:[#allocation3 + $0x30] sm:$0xff] %vm326_vm1, %v9746_v54  ;;  %398 = vst.msk [vmem:[#allocation3 + $0x38] sm:$0xff] %vm326_vm1, %v9746_v54 }
 0x1cd   : > { %v1139_v17 = vpop.f32.mrb[16].mxu0  ;;  %v1643_v20 = vmax.f32 %v1642_v15, %v10537_v9  ;;  %v1647_v21 = vmax.f32 %v1646_v14, %v10539_v13  ;;  %399 = vst.msk [vmem:[#allocation3 + $0x40] sm:$0xff] %vm326_vm1, %v9746_v54  ;;  %400 = vst.msk [vmem:[#allocation3 + $0x48] sm:$0xff] %vm326_vm1, %v9746_v54 }
 0x1ce   : > { %v10548_v22 = vmul.f32 0.125, %v1139_v17  ;;  %v1332_v27 = vpop.f32.mrb[16].mxu1  ;;  %v1141_v28 = vpop.f32.mrb[17].mxu0  ;;  %401 = vst.msk [vmem:[#allocation3 + $0x50] sm:$0xff] %vm326_vm1, %v9746_v54  ;;  %402 = vst.msk [vmem:[#allocation3 + $0x58] sm:$0xff] %vm326_vm1, %v9746_v54 }
 0x1cf   : > { %v10550_v30 = vmul.f32 0.125, %v1332_v27  ;;  %v10552_v32 = vmul.f32 0.125, %v1141_v28  ;;  %v10554_v33 = vpop.f32.mrb[17].mxu1  ;;  %1644 = vmax.xlane.f32.xlu0 %v1643_v20  ;;  %v1143_v35 = vpop.f32.mrb[18].mxu0  ;;  %v1648_v36 = vmax.f32 %v1647_v21, %v10544_v16  ;;  %403 = vst.msk [vmem:[#allocation3 + $0x60] sm:$0xff] %vm326_vm1, %v9746_v54  ;;  %404 = vst.msk [vmem:[#allocation3 + $0x68] sm:$0xff] %vm326_vm1, %v9746_v54 }
 0x1d0   : > { %14705 = vst [vmem:[#allocation28_spill] sm:$0xff] %v10548_v22  ;;  %v10557_v40 = vpop.f32.mrb[18].mxu1  ;;  %v10559_v41 = vmul.f32 0.125, %v1143_v35  ;;  %v1145_v45 = vpop.f32.mrb[19].mxu0  ;;  %405 = vst.msk [vmem:[#allocation3 + $0x70] sm:$0xff] %vm326_vm1, %v9746_v54  ;;  %v10824_v57 = vmul.f32 0.125, %v10554_v33 }
 0x1d1   : > { %14706 = vst [vmem:[#allocation29_spill] sm:$0xff] %v10550_v30  ;;  %14707 = vst [vmem:[#allocation30_spill] sm:$0xff] %v10552_v32  ;;  %v1651_v47 = vmax.f32 %v10548_v22, %v10552_v32  ;;  %v10563_v48 = vmul.f32 0.125, %v1145_v45  ;;  %v10565_v51 = vpop.f32.mrb[19].mxu1  ;;  %1649 = vmax.xlane.f32.xlu1 %v1648_v36  ;;  %v10827_v58 = vmul.f32 0.125, %v10557_v40 }
 0x1d2   : > { %406 = vst.msk [vmem:[#allocation3 + $0x78] sm:$0xff] %vm326_vm1, %v9746_v54  ;;  %407 = vst.msk [vmem:[#allocation3 + $0x80] sm:$0xff] %vm326_vm1, %v9746_v54  ;;  %v10836_v1 = vmul.f32 0.125, %v10565_v51 }
 0x1d3   : > { %408 = vst.msk [vmem:[#allocation3 + $0x88] sm:$0xff] %vm326_vm1, %v9746_v54  ;;  %409 = vst.msk [vmem:[#allocation3 + $0x90] sm:$0xff] %vm326_vm1, %v9746_v54  ;;  %v1656_v60 = vmax.f32 %v10559_v41, %v10563_v48  ;;  %v1652_v61 = vmax.f32 %v1651_v47, %v10550_v30  ;;  %v9461_v30 = vld [vmem:[%s10055_s29 + $0x60] sm:$0xff]  }
 0x1d4   : > { %410 = vst.msk [vmem:[#allocation3 + $0x98] sm:$0xff] %vm326_vm1, %v9746_v54  ;;  %411 = vst.msk [vmem:[#allocation3 + $0xa0] sm:$0xff] %vm326_vm1, %v9746_v54 }
 0x1d5   : > { %412 = vst.msk [vmem:[#allocation3 + $0xa8] sm:$0xff] %vm326_vm1, %v9746_v54  ;;  %413 = vst.msk [vmem:[#allocation3 + $0xb0] sm:$0xff] %vm326_vm1, %v9746_v54  ;;  %v1149_v3 = vpop.f32.mrb[20].mxu0  ;;  %v1653_v5 = vmax.f32 %v1652_v61, %v10824_v57  ;;  %v1657_v8 = vmax.f32 %v1656_v60, %v10827_v58 }
 0x1d6   : > { %414 = vst.msk [vmem:[#allocation3 + $0xb8] sm:$0xff] %vm326_vm1, %v9746_v54  ;;  %415 = vst.msk [vmem:[#allocation3 + $0xc0] sm:$0xff] %vm326_vm1, %v9746_v54  ;;  %v10840_v14 = vmul.f32 0.125, %v1149_v3  ;;  %v1342_v15 = vpop.f32.mrb[20].mxu1  ;;  %v1151_v17 = vpop.f32.mrb[21].mxu0 }
 0x1d7   : > { %416 = vst.msk [vmem:[#allocation3 + $0xc8] sm:$0xff] %vm326_vm1, %v9746_v54  ;;  %417 = vst.msk [vmem:[#allocation3 + $0xd0] sm:$0xff] %vm326_vm1, %v9746_v54  ;;  %v10842_v20 = vmul.f32 0.125, %v1342_v15  ;;  %v10844_v21 = vmul.f32 0.125, %v1151_v17  ;;  %v1344_v27 = vpop.f32.mrb[21].mxu1  ;;  %1654 = vmax.xlane.f32.xlu0 %v1653_v5  ;;  %v1153_v28 = vpop.f32.mrb[22].mxu0  ;;  %v1658_v33 = vmax.f32 %v1657_v8, %v10836_v1 }
 0x1d8   : > { %418 = vst.msk [vmem:[#allocation3 + $0xd8] sm:$0xff] %vm326_vm1, %v9746_v54  ;;  %419 = vst.msk [vmem:[#allocation3 + $0xe0] sm:$0xff] %vm326_vm1, %v9746_v54  ;;  %v1346_v35 = vpop.f32.mrb[22].mxu1  ;;  %v10847_v36 = vmul.f32 0.125, %v1153_v28  ;;  %v1155_v40 = vpop.f32.mrb[23].mxu0 }
 0x1d9   : > { %420 = vst.msk [vmem:[#allocation3 + $0xe8] sm:$0xff] %vm326_vm1, %v9746_v54  ;;  %421 = vst.msk [vmem:[#allocation3 + $0xf0] sm:$0xff] %vm326_vm1, %v9746_v54  ;;  %v1661_v45 = vmax.f32 %v10840_v14, %v10844_v21  ;;  %v10851_v47 = vmul.f32 0.125, %v1155_v40  ;;  %v1348_v51 = vpop.f32.mrb[23].mxu1  ;;  %1659 = vmax.xlane.f32.xlu1 %v1658_v33  ;;  %v10855_v60 = vmul.f32 0.125, %v1346_v35 }
 0x1da   : > { %422 = vst.msk [vmem:[#allocation3 + $0xf8] sm:$0xff] %vm326_vm1, %v9746_v54  ;;  %423 = vst.msk [vmem:[#allocation3 + $0x100] sm:$0xff] %vm326_vm1, %v9746_v54  ;;  %v10860_v5 = vmul.f32 0.125, %v1348_v51 }
 0x1db   : > { %424 = vst.msk [vmem:[#allocation3 + $0x108] sm:$0xff] %vm326_vm1, %v9746_v54  ;;  %425 = vst.msk [vmem:[#allocation3 + $0x110] sm:$0xff] %vm326_vm1, %v9746_v54  ;;  %v1666_v61 = vmax.f32 %v10847_v36, %v10851_v47  ;;  %v1662_v3 = vmax.f32 %v1661_v45, %v10842_v20 }
 0x1dc   : > { %426 = vst.msk [vmem:[#allocation3 + $0x118] sm:$0xff] %vm326_vm1, %v9746_v54  ;;  %427 = vst.msk [vmem:[#allocation3 + $0x120] sm:$0xff] %vm326_vm1, %v9746_v54 }
 0x1dd   : > { %428 = vst.msk [vmem:[#allocation3 + $0x128] sm:$0xff] %vm326_vm1, %v9746_v54  ;;  %429 = vst.msk [vmem:[#allocation3 + $0x130] sm:$0xff] %vm326_vm1, %v9746_v54  ;;  %v1159_v8 = vpop.f32.mrb[24].mxu0  ;;  %v1667_v17 = vmax.f32 %v1666_v61, %v10855_v60 }
 0x1de   : > { %430 = vst.msk [vmem:[#allocation3 + $0x138] sm:$0xff] %vm326_vm1, %v9746_v54  ;;  %431 = vst.msk [vmem:[#allocation3 + $0x140] sm:$0xff] %vm326_vm1, %v9746_v54  ;;  %v10864_v28 = vmul.f32 0.125, %v1159_v8  ;;  %v1352_v40 = vpop.f32.mrb[24].mxu1  ;;  %v1161_v33 = vpop.f32.mrb[25].mxu0 }
 0x1df   : > { %432 = vst.msk [vmem:[#allocation3 + $0x148] sm:$0xff] %vm326_vm1, %v9746_v54  ;;  %433 = vst.msk [vmem:[#allocation3 + $0x150] sm:$0xff] %vm326_vm1, %v9746_v54  ;;  %v10868_v35 = vmul.f32 0.125, %v1161_v33  ;;  %v1354_v29 = vpop.f32.mrb[25].mxu1  ;;  %v1163_v24 = vpop.f32.mrb[26].mxu0  ;;  %v1668_v45 = vmax.f32 %v1667_v17, %v10860_v5 }
 0x1e0   : > { %434 = vst.msk [vmem:[#allocation3 + $0x158] sm:$0xff] %vm326_vm1, %v9746_v54  ;;  %435 = vst.msk [vmem:[#allocation3 + $0x160] sm:$0xff] %vm326_vm1, %v9746_v54  ;;  %v1356_v51 = vpop.f32.mrb[26].mxu1  ;;  %v10871_v19 = vmul.f32 0.125, %v1163_v24  ;;  %v1165_v12 = vpop.f32.mrb[27].mxu0 }
 0x1e1   : > { %436 = vst.msk [vmem:[#allocation3 + $0x168] sm:$0xff] %vm326_vm1, %v9746_v54  ;;  %437 = vst.msk [vmem:[#allocation3 + $0x170] sm:$0xff] %vm326_vm1, %v9746_v54  ;;  %v1671_v61 = vmax.f32 %v10864_v28, %v10868_v35  ;;  %v1358_v8 = vpop.f32.mrb[27].mxu1  ;;  %1669 = vmax.xlane.f32.xlu1 %v1668_v45  ;;  %v10879_v33 = vmul.f32 0.125, %v1356_v51 }
 0x1e2   : > { %438 = vst.msk [vmem:[#allocation3 + $0x178] sm:$0xff] %vm326_vm1, %v9746_v54  ;;  %439 = vst.msk [vmem:[#allocation3 + $0x180] sm:$0xff] %vm326_vm1, %v9746_v54 }
 0x1e3   : > { %440 = vst.msk [vmem:[#allocation3 + $0x188] sm:$0xff] %vm326_vm1, %v9746_v54  ;;  %441 = vst.msk [vmem:[#allocation3 + $0x190] sm:$0xff] %vm326_vm1, %v9746_v54 }
 0x1e4   : > { %442 = vst.msk [vmem:[#allocation3 + $0x198] sm:$0xff] %vm326_vm1, %v9746_v54  ;;  %443 = vst.msk [vmem:[#allocation3 + $0x1a0] sm:$0xff] %vm326_vm1, %v9746_v54 }
 0x1e5   : > { %444 = vst.msk [vmem:[#allocation3 + $0x1a8] sm:$0xff] %vm326_vm1, %v9746_v54  ;;  %445 = vst.msk [vmem:[#allocation3 + $0x1b0] sm:$0xff] %vm326_vm1, %v9746_v54  ;;  %v1169_v24 = vpop.f32.mrb[28].mxu0 }
 0x1e6   : > { %446 = vst.msk [vmem:[#allocation3 + $0x1b8] sm:$0xff] %vm326_vm1, %v9746_v54  ;;  %447 = vst.msk [vmem:[#allocation3 + $0x1c0] sm:$0xff] %vm326_vm1, %v9746_v54  ;;  %v1171_v45 = vpop.f32.mrb[29].mxu0 }
 0x1e7   : > { %448 = vst.msk [vmem:[#allocation3 + $0x1c8] sm:$0xff] %vm326_vm1, %v9746_v54  ;;  %449 = vst.msk [vmem:[#allocation3 + $0x1d0] sm:$0xff] %vm326_vm1, %v9746_v54  ;;  %v10892_v51 = vmul.f32 0.125, %v1171_v45 }
 0x1e8   : > { %450 = vst.msk [vmem:[#allocation3 + $0x1d8] sm:$0xff] %vm326_vm1, %v9746_v54  ;;  %451 = vst.msk [vmem:[#allocation3 + $0x1e0] sm:$0xff] %vm326_vm1, %v9746_v54 }
 0x1e9   : > { %452 = vst.msk [vmem:[#allocation3 + $0x1e8] sm:$0xff] %vm326_vm1, %v9746_v54  ;;  %453 = vst.msk [vmem:[#allocation3 + $0x1f0] sm:$0xff] %vm326_vm1, %v9746_v54 }
 0x1ea   : > { %454 = vst.msk [vmem:[#allocation3 + $0x1f8] sm:$0xff] %vm326_vm1, %v9746_v54  ;;  %14708 = vst [vmem:[#allocation31_spill] sm:$0xff] %v10824_v57 }
 0x1eb   : > { %458 = vst.msk [vmem:[#allocation4 + $0x10] sm:$0xff] %vm455_vm0, %v9746_v54  ;;  %459 = vst.msk [vmem:[#allocation4 + $0x18] sm:$0xff] %vm455_vm0, %v9746_v54 }
 0x1ec   : > { %460 = vst.msk [vmem:[#allocation4 + $0x20] sm:$0xff] %vm455_vm0, %v9746_v54  ;;  %461 = vst.msk [vmem:[#allocation4 + $0x28] sm:$0xff] %vm455_vm0, %v9746_v54 }
 0x1ed   : > { %462 = vst.msk [vmem:[#allocation4 + $0x30] sm:$0xff] %vm455_vm0, %v9746_v54  ;;  %463 = vst.msk [vmem:[#allocation4 + $0x38] sm:$0xff] %vm455_vm0, %v9746_v54 }
 0x1ee   : > { %464 = vst.msk [vmem:[#allocation4 + $0x40] sm:$0xff] %vm455_vm0, %v9746_v54  ;;  %465 = vst.msk [vmem:[#allocation4 + $0x48] sm:$0xff] %vm455_vm0, %v9746_v54 }
 0x1ef   : > { %466 = vst.msk [vmem:[#allocation4 + $0x50] sm:$0xff] %vm455_vm0, %v9746_v54  ;;  %467 = vst.msk [vmem:[#allocation4 + $0x58] sm:$0xff] %vm455_vm0, %v9746_v54 }
 0x1f0   : > { %468 = vst.msk [vmem:[#allocation4 + $0x60] sm:$0xff] %vm455_vm0, %v9746_v54  ;;  %469 = vst.msk [vmem:[#allocation4 + $0x68] sm:$0xff] %vm455_vm0, %v9746_v54 }
 0x1f1   : > { %470 = vst.msk [vmem:[#allocation4 + $0x70] sm:$0xff] %vm455_vm0, %v9746_v54  ;;  %471 = vst.msk [vmem:[#allocation4 + $0x78] sm:$0xff] %vm455_vm0, %v9746_v54 }
 0x1f2   : > { %472 = vst.msk [vmem:[#allocation4 + $0x80] sm:$0xff] %vm455_vm0, %v9746_v54  ;;  %473 = vst.msk [vmem:[#allocation4 + $0x88] sm:$0xff] %vm455_vm0, %v9746_v54 }
 0x1f3   : > { %474 = vst.msk [vmem:[#allocation4 + $0x90] sm:$0xff] %vm455_vm0, %v9746_v54  ;;  %475 = vst.msk [vmem:[#allocation4 + $0x98] sm:$0xff] %vm455_vm0, %v9746_v54 }
 0x1f4   : > { %476 = vst.msk [vmem:[#allocation4 + $0xa0] sm:$0xff] %vm455_vm0, %v9746_v54  ;;  %477 = vst.msk [vmem:[#allocation4 + $0xa8] sm:$0xff] %vm455_vm0, %v9746_v54 }
 0x1f5   : > { %478 = vst.msk [vmem:[#allocation4 + $0xb0] sm:$0xff] %vm455_vm0, %v9746_v54  ;;  %479 = vst.msk [vmem:[#allocation4 + $0xb8] sm:$0xff] %vm455_vm0, %v9746_v54 }
 0x1f6   : > { %480 = vst.msk [vmem:[#allocation4 + $0xc0] sm:$0xff] %vm455_vm0, %v9746_v54  ;;  %481 = vst.msk [vmem:[#allocation4 + $0xc8] sm:$0xff] %vm455_vm0, %v9746_v54 }
 0x1f7   : > { %482 = vst.msk [vmem:[#allocation4 + $0xd0] sm:$0xff] %vm455_vm0, %v9746_v54  ;;  %483 = vst.msk [vmem:[#allocation4 + $0xd8] sm:$0xff] %vm455_vm0, %v9746_v54 }
 0x1f8   : > { %484 = vst.msk [vmem:[#allocation4 + $0xe0] sm:$0xff] %vm455_vm0, %v9746_v54  ;;  %485 = vst.msk [vmem:[#allocation4 + $0xe8] sm:$0xff] %vm455_vm0, %v9746_v54 }
 0x1f9   : > { %486 = vst.msk [vmem:[#allocation4 + $0xf0] sm:$0xff] %vm455_vm0, %v9746_v54  ;;  %487 = vst.msk [vmem:[#allocation4 + $0xf8] sm:$0xff] %vm455_vm0, %v9746_v54 }
 0x1fa   : > { %488 = vst.msk [vmem:[#allocation4 + $0x100] sm:$0xff] %vm455_vm0, %v9746_v54  ;;  %489 = vst.msk [vmem:[#allocation4 + $0x108] sm:$0xff] %vm455_vm0, %v9746_v54 }
 0x1fb   : > { %490 = vst.msk [vmem:[#allocation4 + $0x110] sm:$0xff] %vm455_vm0, %v9746_v54  ;;  %491 = vst.msk [vmem:[#allocation4 + $0x118] sm:$0xff] %vm455_vm0, %v9746_v54 }
 0x1fc   : > { %492 = vst.msk [vmem:[#allocation4 + $0x120] sm:$0xff] %vm455_vm0, %v9746_v54  ;;  %493 = vst.msk [vmem:[#allocation4 + $0x128] sm:$0xff] %vm455_vm0, %v9746_v54 }
 0x1fd   : > { %494 = vst.msk [vmem:[#allocation4 + $0x130] sm:$0xff] %vm455_vm0, %v9746_v54  ;;  %495 = vst.msk [vmem:[#allocation4 + $0x138] sm:$0xff] %vm455_vm0, %v9746_v54 }
 0x1fe   : > { %496 = vst.msk [vmem:[#allocation4 + $0x140] sm:$0xff] %vm455_vm0, %v9746_v54  ;;  %497 = vst.msk [vmem:[#allocation4 + $0x148] sm:$0xff] %vm455_vm0, %v9746_v54 }
 0x1ff   : > { %498 = vst.msk [vmem:[#allocation4 + $0x150] sm:$0xff] %vm455_vm0, %v9746_v54  ;;  %499 = vst.msk [vmem:[#allocation4 + $0x158] sm:$0xff] %vm455_vm0, %v9746_v54 }
 0x200   : > { %500 = vst.msk [vmem:[#allocation4 + $0x160] sm:$0xff] %vm455_vm0, %v9746_v54  ;;  %501 = vst.msk [vmem:[#allocation4 + $0x168] sm:$0xff] %vm455_vm0, %v9746_v54 }
 0x201   : > { %502 = vst.msk [vmem:[#allocation4 + $0x170] sm:$0xff] %vm455_vm0, %v9746_v54  ;;  %503 = vst.msk [vmem:[#allocation4 + $0x178] sm:$0xff] %vm455_vm0, %v9746_v54 }
 0x202   : > { %504 = vst.msk [vmem:[#allocation4 + $0x180] sm:$0xff] %vm455_vm0, %v9746_v54  ;;  %505 = vst.msk [vmem:[#allocation4 + $0x188] sm:$0xff] %vm455_vm0, %v9746_v54 }
 0x203   : > { %506 = vst.msk [vmem:[#allocation4 + $0x190] sm:$0xff] %vm455_vm0, %v9746_v54  ;;  %507 = vst.msk [vmem:[#allocation4 + $0x198] sm:$0xff] %vm455_vm0, %v9746_v54 }
 0x204   : > { %508 = vst.msk [vmem:[#allocation4 + $0x1a0] sm:$0xff] %vm455_vm0, %v9746_v54  ;;  %509 = vst.msk [vmem:[#allocation4 + $0x1a8] sm:$0xff] %vm455_vm0, %v9746_v54 }
 0x205   : > { %510 = vst.msk [vmem:[#allocation4 + $0x1b0] sm:$0xff] %vm455_vm0, %v9746_v54  ;;  %511 = vst.msk [vmem:[#allocation4 + $0x1b8] sm:$0xff] %vm455_vm0, %v9746_v54 }
 0x206   : > { %512 = vst.msk [vmem:[#allocation4 + $0x1c0] sm:$0xff] %vm455_vm0, %v9746_v54  ;;  %513 = vst.msk [vmem:[#allocation4 + $0x1c8] sm:$0xff] %vm455_vm0, %v9746_v54 }
 0x207   : > { %514 = vst.msk [vmem:[#allocation4 + $0x1d0] sm:$0xff] %vm455_vm0, %v9746_v54  ;;  %515 = vst.msk [vmem:[#allocation4 + $0x1d8] sm:$0xff] %vm455_vm0, %v9746_v54 }
 0x208   : > { %516 = vst.msk [vmem:[#allocation4 + $0x1e0] sm:$0xff] %vm455_vm0, %v9746_v54  ;;  %517 = vst.msk [vmem:[#allocation4 + $0x1e8] sm:$0xff] %vm455_vm0, %v9746_v54 }
 0x209   : > { %518 = vst.msk [vmem:[#allocation4 + $0x1f0] sm:$0xff] %vm455_vm0, %v9746_v54  ;;  %519 = vst.msk [vmem:[#allocation4 + $0x1f8] sm:$0xff] %vm455_vm0, %v9746_v54  ;;  %v10853_v54 = vmul.f32 0.125, %v1344_v27  ;;  %v10866_v27 = vmul.f32 0.125, %v1352_v40  ;;  %v10877_v40 = vmul.f32 0.125, %v1354_v29 }
 0x20a   : > { %14709 = vst [vmem:[#allocation32_spill] sm:$0xff] %v10840_v14  ;;  %14710 = vst [vmem:[#allocation33_spill] sm:$0xff] %v10842_v20  ;;  %v1173_v14 = vpop.f32.mrb[30].mxu0 }
 0x20b   : > { %14711 = vst [vmem:[#allocation34_spill] sm:$0xff] %v10844_v21  ;;  %14712 = vst [vmem:[#allocation35_spill] sm:$0xff] %v10851_v47  ;;  %v1663_v15 = vmax.f32 %v1662_v3, %v10853_v54  ;;  %v10875_v3 = vmul.f32 0.125, %v1165_v12  ;;  %v1672_v17 = vmax.f32 %v1671_v61, %v10866_v27  ;;  %v10888_v12 = vmul.f32 0.125, %v1169_v24 }
 0x20c   : > { %14713 = vst [vmem:[#allocation36_spill] sm:$0xff] %v10853_v54  ;;  %14714 = vst [vmem:[#allocation37_spill] sm:$0xff] %v10855_v60  ;;  %v10884_v54 = vmul.f32 0.125, %v1358_v8 }
 0x20d   : > { %14715 = vst [vmem:[#allocation38_spill] sm:$0xff] %v10860_v5  ;;  %14716 = vst [vmem:[#allocation39_spill] sm:$0xff] %v10864_v28  ;;  %1664 = vmax.xlane.f32.xlu0 %v1663_v15  ;;  %v1676_v15 = vmax.f32 %v10871_v19, %v10875_v3  ;;  %v1673_v20 = vmax.f32 %v1672_v17, %v10877_v40  ;;  %v1362_v28 = vpop.f32.mrb[28].mxu1 }
 0x20e   : > { %14717 = vst [vmem:[#allocation40_spill] sm:$0xff] %v10866_v27  ;;  %14718 = vst [vmem:[#allocation41_spill] sm:$0xff] %v10868_v35  ;;  %v10890_v29 = vmul.f32 0.125, %v1362_v28  ;;  %v1364_v21 = vpop.f32.mrb[29].mxu1  ;;  %v10895_v27 = vmul.f32 0.125, %v1173_v14 }
 0x20f   : > { %14719 = vst [vmem:[#allocation42_spill] sm:$0xff] %v10871_v19  ;;  %14720 = vst [vmem:[#allocation43_spill] sm:$0xff] %v10875_v3  ;;  %v1677_v35 = vmax.f32 %v1676_v15, %v10879_v33  ;;  %v1366_v8 = vpop.f32.mrb[30].mxu1  ;;  %v1175_v3 = vpop.f32.mrb[31].mxu0  ;;  %v1681_v15 = vmax.f32 %v10888_v12, %v10892_v51  ;;  %v10901_v28 = vmul.f32 0.125, %v1364_v21 }
 0x210   : > { %14721 = vst [vmem:[#allocation44_spill] sm:$0xff] %v10877_v40  ;;  %14722 = vst [vmem:[#allocation45_spill] sm:$0xff] %v10879_v33  ;;  %v10899_v17 = vmul.f32 0.125, %v1175_v3  ;;  %v1368_v24 = vpop.f32.mrb[31].mxu1  ;;  %v10903_v45 = vmul.f32 0.125, %v1366_v8  ;;  %v1179_v14 = vpop.f32.mrb[32].mxu0 }
 0x211   : > { %14723 = vst [vmem:[#allocation46_spill] sm:$0xff] %v10884_v54  ;;  %14724 = vst [vmem:[#allocation47_spill] sm:$0xff] %v10888_v12  ;;  %1674 = vmax.xlane.f32.xlu0 %v1673_v20  ;;  %v1678_v61 = vmax.f32 %v1677_v35, %v10884_v54  ;;  %v1682_v35 = vmax.f32 %v1681_v15, %v10890_v29  ;;  %v10908_v40 = vmul.f32 0.125, %v1368_v24  ;;  %v10912_v3 = vmul.f32 0.125, %v1179_v14  ;;  %v1372_v12 = vpop.f32.mrb[32].mxu1 }
 0x212   : > { %14725 = vst [vmem:[#allocation48_spill] sm:$0xff] %v10890_v29  ;;  %14726 = vst [vmem:[#allocation49_spill] sm:$0xff] %v10892_v51  ;;  %v1686_v20 = vmax.f32 %v10895_v27, %v10899_v17  ;;  %v10914_v21 = vmul.f32 0.125, %v1372_v12  ;;  %v1374_v33 = vpop.f32.mrb[33].mxu1 }
 0x213   : > { %14727 = vst [vmem:[#allocation50_spill] sm:$0xff] %v10895_v27  ;;  %14728 = vst [vmem:[#allocation51_spill] sm:$0xff] %v10899_v17  ;;  %1679 = vmax.xlane.f32.xlu1 %v1678_v61  ;;  %v1683_v54 = vmax.f32 %v1682_v35, %v10901_v28  ;;  %v1181_v61 = vpop.f32.mrb[33].mxu0  ;;  %v1376_v24 = vpop.f32.mrb[34].mxu1  ;;  %v10925_v12 = vmul.f32 0.125, %v1374_v33 }
 0x214   : > { %14729 = vst [vmem:[#allocation52_spill] sm:$0xff] %v10901_v28  ;;  %14730 = vst [vmem:[#allocation53_spill] sm:$0xff] %v10903_v45  ;;  %v1687_v51 = vmax.f32 %v1686_v20, %v10903_v45  ;;  %v10916_v8 = vmul.f32 0.125, %v1181_v61  ;;  %v1183_v17 = vpop.f32.mrb[34].mxu0  ;;  %v1378_v14 = vpop.f32.mrb[35].mxu1  ;;  %v10927_v61 = vmul.f32 0.125, %v1376_v24 }
 0x215   : > { %14731 = vst [vmem:[#allocation54_spill] sm:$0xff] %v10908_v40  ;;  %14732 = vst [vmem:[#allocation55_spill] sm:$0xff] %v10912_v3  ;;  %1684 = vmax.xlane.f32.xlu0 %v1683_v54  ;;  %v10919_v29 = vmul.f32 0.125, %v1183_v17  ;;  %v1185_v27 = vpop.f32.mrb[35].mxu0  ;;  %v10932_v28 = vmul.f32 0.125, %v1378_v14 }
 0x216   : > { %14733 = vst [vmem:[#allocation56_spill] sm:$0xff] %v10914_v21  ;;  %14734 = vst [vmem:[#allocation57_spill] sm:$0xff] %v10916_v8  ;;  %v1688_v15 = vmax.f32 %v1687_v51, %v10908_v40  ;;  %v1691_v20 = vmax.f32 %v10912_v3, %v10916_v8  ;;  %v10923_v35 = vmul.f32 0.125, %v1185_v27  ;;  %v1189_v17 = vpop.f32.mrb[36].mxu0  ;;  %v1382_v3 = vpop.f32.mrb[36].mxu1 }
 0x217   : > { %14735 = vst [vmem:[#allocation58_spill] sm:$0xff] %v10919_v29  ;;  %14737 = vst [vmem:[#allocation60_spill] sm:$0xff] %v10925_v12  ;;  %v10936_v27 = vmul.f32 0.125, %v1189_v17  ;;  %v10938_v33 = vmul.f32 0.125, %v1382_v3  ;;  %v1384_v45 = vpop.f32.mrb[37].mxu1 }
 0x218   : > { %14736 = vst [vmem:[#allocation59_spill] sm:$0xff] %v10923_v35  ;;  %1689 = vmax.xlane.f32.xlu1 %v1688_v15  ;;  %14738 = vst [vmem:[#allocation61_spill] sm:$0xff] %v10927_v61  ;;  %v1696_v54 = vmax.f32 %v10919_v29, %v10923_v35  ;;  %v1692_v51 = vmax.f32 %v1691_v20, %v10914_v21  ;;  %v1191_v15 = vpop.f32.mrb[37].mxu0  ;;  %v1386_v14 = vpop.f32.mrb[38].mxu1  ;;  %v10949_v3 = vmul.f32 0.125, %v1384_v45 }
 0x219   : > { %14739 = vst [vmem:[#allocation62_spill] sm:$0xff] %v10932_v28  ;;  %14740 = vst [vmem:[#allocation63_spill] sm:$0xff] %v10936_v27  ;;  %v10940_v24 = vmul.f32 0.125, %v1191_v15  ;;  %v1193_v35 = vpop.f32.mrb[38].mxu0  ;;  %v1388_v17 = vpop.f32.mrb[39].mxu1  ;;  %v10951_v15 = vmul.f32 0.125, %v1386_v14 }
 0x21a   : > { %v1693_v40 = vmax.f32 %v1692_v51, %v10925_v12  ;;  %v1697_v8 = vmax.f32 %v1696_v54, %v10927_v61  ;;  %14741 = vst [vmem:[#allocation64_spill] sm:$0xff] %v10938_v33  ;;  %v10943_v21 = vmul.f32 0.125, %v1193_v35  ;;  %v1195_v29 = vpop.f32.mrb[39].mxu0  ;;  %14745 = vst [vmem:[#allocation68_spill] sm:$0xff] %v10949_v3  ;;  %v10956_v12 = vmul.f32 0.125, %v1388_v17 }
 0x21b   : > { %14742 = vst [vmem:[#allocation65_spill] sm:$0xff] %v10940_v24  ;;  %v1701_v54 = vmax.f32 %v10936_v27, %v10940_v24  ;;  %v10947_v51 = vmul.f32 0.125, %v1195_v29  ;;  %14746 = vst [vmem:[#allocation69_spill] sm:$0xff] %v10951_v15  ;;  %v1199_v35 = vpop.f32.mrb[40].mxu0  ;;  %v1392_v27 = vpop.f32.mrb[40].mxu1 }
 0x21c   : > { %1694 = vmax.xlane.f32.xlu0 %v1693_v40  ;;  %v1698_v20 = vmax.f32 %v1697_v8, %v10932_v28  ;;  %14743 = vst [vmem:[#allocation66_spill] sm:$0xff] %v10943_v21  ;;  %14747 = vst [vmem:[#allocation70_spill] sm:$0xff] %v10956_v12  ;;  %v10960_v29 = vmul.f32 0.125, %v1199_v35  ;;  %v10962_v45 = vmul.f32 0.125, %v1392_v27  ;;  %v1394_v61 = vpop.f32.mrb[41].mxu1 }
 0x21d   : > { %14744 = vst [vmem:[#allocation67_spill] sm:$0xff] %v10947_v51  ;;  %v1706_v40 = vmax.f32 %v10943_v21, %v10947_v51  ;;  %v1702_v8 = vmax.f32 %v1701_v54, %v10938_v33  ;;  %v1396_v17 = vpop.f32.mrb[42].mxu1  ;;  %v10973_v27 = vmul.f32 0.125, %v1394_v61 }
 0x21e   : > { %1699 = vmax.xlane.f32.xlu1 %v1698_v20  ;;  %14748 = vst [vmem:[#allocation71_spill] sm:$0xff] %v10960_v29  ;;  %v1201_v20 = vpop.f32.mrb[41].mxu0  ;;  %14749 = vst [vmem:[#allocation72_spill] sm:$0xff] %v10962_v45  ;;  %v1398_v35 = vpop.f32.mrb[43].mxu1 }
 0x21f   : > { %v1703_v28 = vmax.f32 %v1702_v8, %v10949_v3  ;;  %v1707_v24 = vmax.f32 %v1706_v40, %v10951_v15  ;;  %v10964_v14 = vmul.f32 0.125, %v1201_v20  ;;  %v1203_v51 = vpop.f32.mrb[42].mxu0  ;;  %14753 = vst [vmem:[#allocation76_spill] sm:$0xff] %v10973_v27  ;;  %v10975_v20 = vmul.f32 0.125, %v1396_v17 }
 0x220   : > { %v10967_v33 = vmul.f32 0.125, %v1203_v51  ;;  %v1205_v21 = vpop.f32.mrb[43].mxu0  ;;  %v10980_v3 = vmul.f32 0.125, %v1398_v35 }
 0x221   : > { %14750 = vst [vmem:[#allocation73_spill] sm:$0xff] %v10964_v14  ;;  %1704 = vmax.xlane.f32.xlu0 %v1703_v28  ;;  %v1708_v54 = vmax.f32 %v1707_v24, %v10956_v12  ;;  %v1711_v40 = vmax.f32 %v10960_v29, %v10964_v14  ;;  %v10971_v8 = vmul.f32 0.125, %v1205_v21  ;;  %14754 = vst [vmem:[#allocation77_spill] sm:$0xff] %v10975_v20  ;;  %v1209_v51 = vpop.f32.mrb[44].mxu0  ;;  %v1402_v29 = vpop.f32.mrb[44].mxu1 }
 0x222   : > { %14751 = vst [vmem:[#allocation74_spill] sm:$0xff] %v10967_v33  ;;  %14755 = vst [vmem:[#allocation78_spill] sm:$0xff] %v10980_v3  ;;  %v10984_v21 = vmul.f32 0.125, %v1209_v51  ;;  %v10986_v61 = vmul.f32 0.125, %v1402_v29  ;;  %v1404_v15 = vpop.f32.mrb[45].mxu1 }
 0x223   : > { %14752 = vst [vmem:[#allocation75_spill] sm:$0xff] %v10971_v8  ;;  %1709 = vmax.xlane.f32.xlu1 %v1708_v54  ;;  %v1716_v28 = vmax.f32 %v10967_v33, %v10971_v8  ;;  %v1712_v24 = vmax.f32 %v1711_v40, %v10962_v45  ;;  %v1211_v54 = vpop.f32.mrb[45].mxu0  ;;  %v1406_v35 = vpop.f32.mrb[46].mxu1  ;;  %v10997_v29 = vmul.f32 0.125, %v1404_v15 }
 0x224   : > { %14756 = vst [vmem:[#allocation79_spill] sm:$0xff] %v10984_v21  ;;  %14757 = vst [vmem:[#allocation80_spill] sm:$0xff] %v10986_v61  ;;  %v10988_v17 = vmul.f32 0.125, %v1211_v54  ;;  %v1213_v8 = vpop.f32.mrb[46].mxu0  ;;  %v1408_v51 = vpop.f32.mrb[47].mxu1  ;;  %v10999_v54 = vmul.f32 0.125, %v1406_v35 }
 0x225   : > { %v1713_v12 = vmax.f32 %v1712_v24, %v10973_v27  ;;  %v1717_v14 = vmax.f32 %v1716_v28, %v10975_v20  ;;  %v10991_v45 = vmul.f32 0.125, %v1213_v8  ;;  %v1215_v33 = vpop.f32.mrb[47].mxu0  ;;  %14761 = vst [vmem:[#allocation84_spill] sm:$0xff] %v10997_v29  ;;  %v11004_v27 = vpop.permute.xlu0 %3632  ;;  %v11006_v8 = vmul.f32 0.125, %v1408_v51 }
 0x226   : > { %14758 = vst [vmem:[#allocation81_spill] sm:$0xff] %v10988_v17  ;;  %v1721_v28 = vmax.f32 %v10984_v21, %v10988_v17  ;;  %v10995_v24 = vmul.f32 0.125, %v1215_v33  ;;  %14762 = vst [vmem:[#allocation85_spill] sm:$0xff] %v10999_v54  ;;  %v1412_v15 = vpop.f32.mrb[48].mxu1 }
 0x227   : > { %1714 = vmax.xlane.f32.xlu0 %v1713_v12  ;;  %v1718_v40 = vmax.f32 %v1717_v14, %v10980_v3  ;;  %14759 = vst [vmem:[#allocation82_spill] sm:$0xff] %v10991_v45  ;;  %14763 = vst [vmem:[#allocation86_spill] sm:$0xff] %v11004_v27  ;;  %v1219_v3 = vpop.f32.mrb[48].mxu0  ;;  %v11012_v35 = vmul.f32 0.125, %v1412_v15 }
 0x228   : > { %14760 = vst [vmem:[#allocation83_spill] sm:$0xff] %v10995_v24  ;;  %v1726_v12 = vmax.f32 %v10991_v45, %v10995_v24  ;;  %v1722_v14 = vmax.f32 %v1721_v28, %v10986_v61  ;;  %14764 = vst [vmem:[#allocation87_spill] sm:$0xff] %v11006_v8  ;;  %v11010_v21 = vmul.f32 0.125, %v1219_v3  ;;  %v1414_v24 = vpop.f32.mrb[49].mxu1 }
 0x229   : > { %1719 = vmax.xlane.f32.xlu1 %v1718_v40  ;;  %v1221_v40 = vpop.f32.mrb[49].mxu0  ;;  %14766 = vst [vmem:[#allocation89_spill] sm:$0xff] %v11012_v35  ;;  %v1416_v51 = vpop.f32.mrb[50].mxu1  ;;  %v11023_v15 = vmul.f32 0.125, %v1414_v24 }
 0x22a   : > { %v1723_v17 = vmax.f32 %v1722_v14, %v10997_v29  ;;  %v1727_v33 = vmax.f32 %v1726_v12, %v10999_v54  ;;  %14765 = vst [vmem:[#allocation88_spill] sm:$0xff] %v11010_v21  ;;  %v11014_v20 = vmul.f32 0.125, %v1221_v40  ;;  %v1223_v28 = vpop.f32.mrb[50].mxu0  ;;  %v1418_v14 = vpop.f32.mrb[51].mxu1  ;;  %v11025_v40 = vmul.f32 0.125, %v1416_v51 }
 0x22b   : > { %v11017_v61 = vmul.f32 0.125, %v1223_v28  ;;  %v1225_v45 = vpop.f32.mrb[51].mxu0  ;;  %14770 = vst [vmem:[#allocation93_spill] sm:$0xff] %v11023_v15  ;;  %v11030_v29 = vpop.permute.xlu0 %3636  ;;  %v11032_v28 = vmul.f32 0.125, %v1418_v14 }
 0x22c   : > { %14767 = vst [vmem:[#allocation90_spill] sm:$0xff] %v11014_v20  ;;  %1724 = vmax.xlane.f32.xlu0 %v1723_v17  ;;  %v1728_v27 = vmax.f32 %v1727_v33, %v11006_v8  ;;  %v1731_v12 = vmax.f32 %v11010_v21, %v11014_v20  ;;  %v11021_v3 = vmul.f32 0.125, %v1225_v45  ;;  %14771 = vst [vmem:[#allocation94_spill] sm:$0xff] %v11025_v40  ;;  %v1229_v8 = vpop.f32.mrb[52].mxu0 }
 0x22d   : > { %14768 = vst [vmem:[#allocation91_spill] sm:$0xff] %v11017_v61  ;;  %14772 = vst [vmem:[#allocation95_spill] sm:$0xff] %v11030_v29  ;;  %v11036_v21 = vmul.f32 0.125, %v1229_v8  ;;  %v1231_v24 = vpop.f32.mrb[53].mxu0 }
 0x22e   : > { %14769 = vst [vmem:[#allocation92_spill] sm:$0xff] %v11021_v3  ;;  %1729 = vmax.xlane.f32.xlu1 %v1728_v27  ;;  %v1736_v17 = vmax.f32 %v11017_v61, %v11021_v3  ;;  %v1732_v33 = vmax.f32 %v1731_v12, %v11012_v35  ;;  %14773 = vst [vmem:[#allocation96_spill] sm:$0xff] %v11032_v28  ;;  %v1422_v27 = vpop.f32.mrb[52].mxu1  ;;  %v11040_v54 = vmul.f32 0.125, %v1231_v24  ;;  %v1233_v12 = vpop.f32.mrb[54].mxu0 }
 0x22f   : > { %14774 = vst [vmem:[#allocation97_spill] sm:$0xff] %v11036_v21  ;;  %v11038_v51 = vmul.f32 0.125, %v1422_v27  ;;  %v1424_v3 = vpop.f32.mrb[53].mxu1  ;;  %v11043_v35 = vmul.f32 0.125, %v1233_v12  ;;  %v1235_v61 = vpop.f32.mrb[55].mxu0 }
 0x230   : > { %v1733_v20 = vmax.f32 %v1732_v33, %v11023_v15  ;;  %v1737_v45 = vmax.f32 %v1736_v17, %v11025_v40  ;;  %14776 = vst [vmem:[#allocation99_spill] sm:$0xff] %v11040_v54  ;;  %v1426_v14 = vpop.f32.mrb[54].mxu1  ;;  %v1741_v17 = vmax.f32 %v11036_v21, %v11040_v54  ;;  %v11047_v8 = vmul.f32 0.125, %v1235_v61  ;;  %v11056_v15 = vpop.permute.xlu0 %3640 }
 0x231   : > { %14775 = vst [vmem:[#allocation98_spill] sm:$0xff] %v11038_v51  ;;  %14777 = vst [vmem:[#allocation100_spill] sm:$0xff] %v11043_v35  ;;  %v1428_v33 = vpop.f32.mrb[55].mxu1  ;;  %v11049_v27 = vmul.f32 0.125, %v1424_v3  ;;  %v11051_v24 = vmul.f32 0.125, %v1426_v14 }
 0x232   : > { %1734 = vmax.xlane.f32.xlu0 %v1733_v20  ;;  %v1738_v29 = vmax.f32 %v1737_v45, %v11032_v28  ;;  %14778 = vst [vmem:[#allocation101_spill] sm:$0xff] %v11047_v8  ;;  %v1746_v20 = vmax.f32 %v11043_v35, %v11047_v8  ;;  %v1742_v45 = vmax.f32 %v1741_v17, %v11038_v51  ;;  %14781 = vst [vmem:[#allocation104_spill] sm:$0xff] %v11056_v15  ;;  %v1239_v28 = vpop.f32.mrb[56].mxu0 }
 0x233   : > { %14779 = vst [vmem:[#allocation102_spill] sm:$0xff] %v11049_v27  ;;  %14780 = vst [vmem:[#allocation103_spill] sm:$0xff] %v11051_v24  ;;  %v11058_v12 = vmul.f32 0.125, %v1428_v33  ;;  %v11062_v21 = vmul.f32 0.125, %v1239_v28  ;;  %v1241_v3 = vpop.f32.mrb[57].mxu0 }
 0x234   : > { %1739 = vmax.xlane.f32.xlu1 %v1738_v29  ;;  %v1743_v54 = vmax.f32 %v1742_v45, %v11049_v27  ;;  %v1747_v61 = vmax.f32 %v1746_v20, %v11051_v24  ;;  %v1432_v29 = vpop.f32.mrb[56].mxu1  ;;  %v11066_v40 = vmul.f32 0.125, %v1241_v3  ;;  %v1243_v17 = vpop.f32.mrb[58].mxu0 }
 0x235   : > { %14782 = vst [vmem:[#allocation105_spill] sm:$0xff] %v11058_v12  ;;  %14783 = vst [vmem:[#allocation106_spill] sm:$0xff] %v11062_v21  ;;  %v11064_v14 = vmul.f32 0.125, %v1432_v29  ;;  %v1434_v8 = vpop.f32.mrb[57].mxu1  ;;  %v11069_v51 = vmul.f32 0.125, %v1243_v17  ;;  %v1245_v35 = vpop.f32.mrb[59].mxu0 }
 0x236   : > { %14785 = vst [vmem:[#allocation108_spill] sm:$0xff] %v11066_v40  ;;  %1744 = vmax.xlane.f32.xlu0 %v1743_v54  ;;  %v1748_v15 = vmax.f32 %v1747_v61, %v11058_v12  ;;  %v1436_v33 = vpop.f32.mrb[58].mxu1  ;;  %v1751_v20 = vmax.f32 %v11062_v21, %v11066_v40  ;;  %v11073_v28 = vmul.f32 0.125, %v1245_v35  ;;  %v11075_v29 = vmul.f32 0.125, %v1434_v8  ;;  %v11082_v27 = vpop.permute.xlu0 %3662 }
 0x237   : > { %14784 = vst [vmem:[#allocation107_spill] sm:$0xff] %v11064_v14  ;;  %14786 = vst [vmem:[#allocation109_spill] sm:$0xff] %v11069_v51  ;;  %v1438_v45 = vpop.f32.mrb[59].mxu1  ;;  %v11077_v3 = vmul.f32 0.125, %v1436_v33  ;;  %v1249_v12 = vpop.f32.mrb[60].mxu0 }
 0x238   : > { %14787 = vst [vmem:[#allocation110_spill] sm:$0xff] %v11073_v28  ;;  %1749 = vmax.xlane.f32.xlu1 %v1748_v15  ;;  %14788 = vst [vmem:[#allocation111_spill] sm:$0xff] %v11075_v29  ;;  %v1756_v54 = vmax.f32 %v11069_v51, %v11073_v28  ;;  %v1752_v61 = vmax.f32 %v1751_v20, %v11064_v14  ;;  %v11084_v17 = vmul.f32 0.125, %v1438_v45  ;;  %v11088_v21 = vmul.f32 0.125, %v1249_v12  ;;  %v1442_v15 = vpop.f32.mrb[60].mxu1  ;;  %v1251_v8 = vpop.f32.mrb[61].mxu0 }
 0x239   : > { %14789 = vst [vmem:[#allocation112_spill] sm:$0xff] %v11077_v3  ;;  %v11090_v33 = vmul.f32 0.125, %v1442_v15  ;;  %v11092_v24 = vmul.f32 0.125, %v1251_v8  ;;  %v1444_v28 = vpop.f32.mrb[61].mxu1  ;;  %v1253_v20 = vpop.f32.mrb[62].mxu0 }
 0x23a   : > { %14790 = vst [vmem:[#allocation113_spill] sm:$0xff] %v11084_v17  ;;  %v1753_v40 = vmax.f32 %v1752_v61, %v11075_v29  ;;  %v1757_v35 = vmax.f32 %v1756_v54, %v11077_v3  ;;  %14791 = vst [vmem:[#allocation114_spill] sm:$0xff] %v11088_v21  ;;  %v1446_v45 = vpop.f32.mrb[62].mxu1  ;;  %v11095_v51 = vmul.f32 0.125, %v1253_v20  ;;  %v1255_v19 = vpop.f32.mrb[63].mxu0  ;;  %v11101_v15 = vmul.f32 0.125, %v1444_v28 }
 0x23b   : > { %14792 = vst [vmem:[#allocation115_spill] sm:$0xff] %v11090_v33  ;;  %14793 = vst [vmem:[#allocation116_spill] sm:$0xff] %v11092_v24  ;;  %v1761_v54 = vmax.f32 %v11088_v21, %v11092_v24  ;;  %v11099_v12 = vmul.f32 0.125, %v1255_v19  ;;  %v1448_v61 = vpop.f32.mrb[63].mxu1  ;;  %v11103_v8 = vmul.f32 0.125, %v1446_v45  ;;  %v11112_v24 = vpop.permute.xlu0 %3694 }
 0x23c   : > { %1754 = vmax.xlane.f32.xlu0 %v1753_v40  ;;  %v1758_v14 = vmax.f32 %v1757_v35, %v11084_v17  ;;  %14794 = vst [vmem:[#allocation117_spill] sm:$0xff] %v11095_v51  ;;  %14796 = vst [vmem:[#allocation119_spill] sm:$0xff] %v11101_v15  ;;  %v11108_v20 = vmul.f32 0.125, %v1448_v61  ;;  %v11119_v21 = vpop.permute.xlu1 %3680 }
 0x23d   : > { %14795 = vst [vmem:[#allocation118_spill] sm:$0xff] %v11099_v12  ;;  %14797 = vst [vmem:[#allocation120_spill] sm:$0xff] %v11103_v8  ;;  %v1766_v40 = vmax.f32 %v11095_v51, %v11099_v12  ;;  %v1762_v35 = vmax.f32 %v1761_v54, %v11090_v33  ;;  %v9459_v12 = vld [vmem:[%s10055_s29 + $0xd8] sm:$0xff]  }
 0x23e   : > { %1759 = vmax.xlane.f32.xlu1 %v1758_v14  ;;  %14798 = vst [vmem:[#allocation121_spill] sm:$0xff] %v11108_v20 }
 0x23f   : > { %v1763_v29 = vmax.f32 %v1762_v35, %v11101_v15  ;;  %v1767_v19 = vmax.f32 %v1766_v40, %v11103_v8  ;;  %v11115_v28 = vpop.permute.xlu0 %3664  ;;  %v9457_v35 = vld [vmem:[%s10055_s29 + $0xd0] sm:$0xff]   ;;  %v1579_v40 = vld [vmem:[#allocation2] sm:$0xff] }
 0x240   : > { %v11123_v61 = vpop.permute.xlu1 %3712 }
 0x241   : > { %1764 = vmax.xlane.f32.xlu0 %v1763_v29  ;;  %v1768_v14 = vmax.f32 %v1767_v19, %v11108_v20  ;;  %v9458_v19 = vld [vmem:[%s10055_s29 + $0x58] sm:$0xff]  }
 0x243   : > { %1769 = vmax.xlane.f32.xlu1 %v1768_v14  ;;  %v11117_v45 = vpop.permute.xlu0 %3696  ;;  %v1580_v14 = vld [vmem:[#allocation2 + $0x8] sm:$0xff] }
 0x244   : > { %v11130_v33 = vpop.permute.xlu1 %3682 }
 0x247   : > { %v11121_v54 = vpop.permute.xlu0 %3666 }
 0x248   : > { %14799 = vst [vmem:[#allocation122_spill] sm:$0xff] %v11121_v54 }
 0x24b   : > { %v1615_v29 = vpop.xlane.xlu0 %1614 }
 0x24c   : > { %v1771_v15 = vmax.f32 %v1579_v40, %v1615_v29  ;;  %v9460_v29 = vld [vmem:[%s10055_s29 + $0x90] sm:$0xff]   ;;  %v1625_v17 = vpop.xlane.xlu1 %1624 }
 0x24e   : > { %3598 = vst.msk [vmem:[#allocation2] sm:$0xff] %vm326_vm1, %v1771_v15  ;;  %v1803_v8 = vsub.f32 %v1579_v40, %v1771_v15 }
 0x24f   : > { %v1620_v20 = vpop.xlane.xlu0 %1619 }
 0x250   : > { %v1772_v51 = vmax.f32 %v1580_v14, %v1620_v20  ;;  %v9462_v20 = vld [vmem:[%s10055_s29 + $0x18] sm:$0xff]  }
 0x252   : > { %3599 = vst.msk [vmem:[#allocation2 + $0x8] sm:$0xff] %vm326_vm1, %v1772_v51  ;;  %v1804_v57 = vsub.f32 %v1580_v14, %v1772_v51  ;;  %v1584_v14 = vld [vmem:[#allocation2 + $0x28] sm:$0xff] }
 0x254   : > { %3714 = vrot.lane.b32.xlu1 %v9457_v35, %s9743_s26  ;;  %v1581_v35 = vld [vmem:[#allocation2 + $0x10] sm:$0xff]  ;;  %v1837_v32 = vmul.f32 1.442695, %v1804_v57 }
 0x255   : > { %v1773_v3 = vmax.f32 %v1581_v35, %v1625_v17  ;;  %v9463_v17 = vld [vmem:[%s10055_s29 + $0x98] sm:$0xff]  }
 0x257   : > { %1901 = vperm.xlu0 %8527, %v1771_v15   ;;  %v1582_v15 = vld [vmem:[#allocation2 + $0x18] sm:$0xff]  ;;  %3600 = vst.msk [vmem:[#allocation2 + $0x10] sm:$0xff] %vm326_vm1, %v1773_v3 }
 0x258   : > { %3684 = vrot.lane.b32.xlu1 %v9458_v19, %s9743_s26  ;;  %v1835_v19 = vmul.f32 1.442695, %v1803_v8 }
 0x25a   : > { %8689 = vpow2.f32 %v1835_v19  ;;  %v1805_v19 = vsub.f32 %v1581_v35, %v1773_v3 }
 0x25b   : > { %3698 = vrot.lane.b32.xlu0 %v9460_v29, %s9743_s26  ;;  %v1583_v29 = vld [vmem:[#allocation2 + $0x20] sm:$0xff]  ;;  %8691 = vpow2.f32 %v1837_v32 }
 0x25c   : > { %3716 = vrot.lane.b32.xlu1 %v9459_v12, %s9743_s26  ;;  %v1630_v12 = vpop.xlane.xlu1 %1629 }
 0x25d   : > { %v1774_v40 = vmax.f32 %v1582_v15, %v1630_v12  ;;  %v1585_v12 = vld [vmem:[#allocation2 + $0x30] sm:$0xff] }
 0x25f   : > { %3668 = vrot.lane.b32.xlu0 %v9462_v20, %s9743_s26  ;;  %v1806_v8 = vsub.f32 %v1582_v15, %v1774_v40  ;;  %3601 = vst.msk [vmem:[#allocation2 + $0x18] sm:$0xff] %vm326_vm1, %v1774_v40 }
 0x260   : > { %3686 = vrot.lane.b32.xlu1 %v9461_v30, %s9743_s26  ;;  %v1635_v30 = vpop.xlane.xlu0 %1634  ;;  %v1640_v60 = vpop.xlane.xlu1 %1639 }
 0x261   : > { %v1841_v22 = vmul.f32 1.442695, %v1806_v8  ;;  %v1775_v5 = vmax.f32 %v1583_v29, %v1635_v30  ;;  %v1776_v57 = vmax.f32 %v1584_v14, %v1640_v60  ;;  %v1839_v8 = vmul.f32 1.442695, %v1805_v19  ;;  %v1587_v19 = vld [vmem:[#allocation2 + $0x40] sm:$0xff] }
 0x263   : > { %3700 = vrot.lane.b32.xlu0 %v9463_v17, %s9743_s26  ;;  %8693 = vpow2.f32 %v1841_v22  ;;  %3602 = vst.msk [vmem:[#allocation2 + $0x20] sm:$0xff] %vm326_vm1, %v1775_v5  ;;  %v1808_v15 = vsub.f32 %v1584_v14, %v1776_v57  ;;  %3603 = vst.msk [vmem:[#allocation2 + $0x28] sm:$0xff] %vm326_vm1, %v1776_v57 }
 0x264   : > { %1906 = vperm.xlu1 %8528, %v1772_v51   ;;  %v9464_v51 = vld [vmem:[%s10055_s29 + $0x20] sm:$0xff]   ;;  %v11149_v20 = vpop.eup %8689  ;;  %v1645_v32 = vpop.xlane.xlu0 %1644 }
 0x265   : > { %14800 = vst [vmem:[#allocation123_spill] sm:$0xff] %v11149_v20  ;;  %v1845_v17 = vmul.f32 1.442695, %v1808_v15  ;;  %v1777_v22 = vmax.f32 %v1585_v12, %v1645_v32  ;;  %v1650_v35 = vpop.xlane.xlu1 %1649  ;;  %v11153_v30 = vpop.eup %8691  ;;  %v1588_v32 = vld [vmem:[#allocation2 + $0x48] sm:$0xff] }
 0x266   : > { %14801 = vst [vmem:[#allocation124_spill] sm:$0xff] %v11153_v30 }
 0x267   : > { %3670 = vrot.lane.b32.xlu0 %v9464_v51, %s9743_s26  ;;  %8695 = vpow2.f32 %v1845_v17  ;;  %3604 = vst.msk [vmem:[#allocation2 + $0x30] sm:$0xff] %vm326_vm1, %v1777_v22  ;;  %v1807_v51 = vsub.f32 %v1583_v29, %v1775_v5  ;;  %v1809_v29 = vsub.f32 %v1585_v12, %v1777_v22 }
 0x268   : > { %1911 = vperm.xlu1 %8528, %v1773_v3   ;;  %v1586_v3 = vld [vmem:[#allocation2 + $0x38] sm:$0xff]  ;;  %8697 = vpow2.f32 %v1839_v8  ;;  %v1655_v17 = vpop.xlane.xlu0 %1654 }
 0x269   : > { %v1778_v60 = vmax.f32 %v1586_v3, %v1650_v35  ;;  %v1779_v8 = vmax.f32 %v1587_v19, %v1655_v17  ;;  %v1843_v47 = vmul.f32 1.442695, %v1807_v51 }
 0x26b   : > { %2766 = vperm.xlu0 %8527, %v11149_v20   ;;  %3605 = vst.msk [vmem:[#allocation2 + $0x38] sm:$0xff] %vm326_vm1, %v1778_v60  ;;  %v1660_v20 = vpop.xlane.xlu1 %1659  ;;  %3606 = vst.msk [vmem:[#allocation2 + $0x40] sm:$0xff] %vm326_vm1, %v1779_v8  ;;  %v1811_v12 = vsub.f32 %v1587_v19, %v1779_v8 }
 0x26c   : > { %1916 = vperm.xlu1 %8528, %v1774_v40   ;;  %v1810_v40 = vsub.f32 %v1586_v3, %v1778_v60  ;;  %v1780_v3 = vmax.f32 %v1588_v32, %v1660_v20 }
 0x26d   : > { %v11155_v14 = vpop.eup %8693 }
 0x26e   : > { %14802 = vst [vmem:[#allocation125_spill] sm:$0xff] %v11155_v14  ;;  %v1849_v15 = vmul.f32 1.442695, %v1810_v40  ;;  %3607 = vst.msk [vmem:[#allocation2 + $0x48] sm:$0xff] %vm326_vm1, %v1780_v3 }
 0x26f   : > { %2781 = vperm.xlu0 %8527, %v11155_v14   ;;  %v1812_v14 = vsub.f32 %v1588_v32, %v1780_v3  ;;  %v1670_v17 = vpop.xlane.xlu1 %1669 }
 0x270   : > { %1921 = vperm.xlu1 %8528, %v1775_v5   ;;  %8699 = vpow2.f32 %v1849_v15  ;;  %v1589_v5 = vld [vmem:[#allocation2 + $0x50] sm:$0xff]  ;;  %v1590_v15 = vld [vmem:[#allocation2 + $0x58] sm:$0xff] }
 0x271   : > { %v11160_v35 = vpop.eup %8695  ;;  %8701 = vpow2.f32 %v1843_v47  ;;  %v1853_v40 = vmul.f32 1.442695, %v1812_v14  ;;  %v1782_v32 = vmax.f32 %v1590_v15, %v1670_v17  ;;  %v1591_v47 = vld [vmem:[#allocation2 + $0x60] sm:$0xff] }
 0x272   : > { %14803 = vst [vmem:[#allocation126_spill] sm:$0xff] %v11160_v35 }
 0x273   : > { %2791 = vperm.xlu0 %8527, %v11160_v35   ;;  %8703 = vpow2.f32 %v1853_v40  ;;  %v1847_v35 = vmul.f32 1.442695, %v1809_v29  ;;  %3609 = vst.msk [vmem:[#allocation2 + $0x58] sm:$0xff] %vm326_vm1, %v1782_v32  ;;  %v1592_v40 = vld [vmem:[#allocation2 + $0x68] sm:$0xff] }
 0x274   : > { %2771 = vperm.xlu1 %8528, %v11153_v30   ;;  %v11164_v30 = vpop.eup %8697 }
 0x275   : > { %14804 = vst [vmem:[#allocation127_spill] sm:$0xff] %v11164_v30  ;;  %8705 = vpow2.f32 %v1847_v35 }
 0x277   : > { %1946 = vperm.xlu0 %8527, %v1780_v3  }
 0x278   : > { %1926 = vperm.xlu1 %8528, %v1776_v57  }
 0x27a   : > { %v11168_v20 = vpop.eup %8699 }
 0x27b   : > { %14805 = vst [vmem:[#allocation128_spill] sm:$0xff] %v11168_v20  ;;  %2801 = vperm.xlu0 %8527, %v11168_v20  }
 0x27c   : > { %2776 = vperm.xlu1 %8528, %v11164_v30   ;;  %v1814_v30 = vsub.f32 %v1590_v15, %v1782_v32  ;;  %v1851_v15 = vmul.f32 1.442695, %v1811_v12 }
 0x27e   : > { %v1857_v14 = vmul.f32 1.442695, %v1814_v30  ;;  %v1593_v30 = vld [vmem:[#allocation2 + $0x70] sm:$0xff] }
 0x27f   : > { %1956 = vperm.xlu0 %8527, %v1782_v32  }
 0x280   : > { %1931 = vperm.xlu1 %8528, %v1777_v22   ;;  %v11173_v22 = vpop.eup %8701  ;;  %8707 = vpow2.f32 %v1857_v14 }
 0x281   : > { %14806 = vst [vmem:[#allocation129_spill] sm:$0xff] %v11173_v22  ;;  %v11176_v17 = vpop.eup %8703  ;;  %8709 = vpow2.f32 %v1851_v15  ;;  %v1595_v15 = vld [vmem:[#allocation2 + $0x80] sm:$0xff] }
 0x282   : > { %14807 = vst [vmem:[#allocation130_spill] sm:$0xff] %v11176_v17  ;;  %v11181_v20 = vpop.eup %8705 }
 0x283   : > { %2811 = vperm.xlu0 %8527, %v11176_v17   ;;  %14808 = vst [vmem:[#allocation131_spill] sm:$0xff] %v11181_v20 }
 0x284   : > { %1936 = vperm.xlu1 %8528, %v1778_v60  }
 0x288   : > { %2786 = vperm.xlu1 %8528, %v11173_v22  }
 0x28c   : > { %1941 = vperm.xlu1 %8528, %v1779_v8  }
 0x290   : > { %2796 = vperm.xlu1 %8528, %v11181_v20  }
 0x29a   : > { %v1665_v57 = vpop.xlane.xlu0 %1664 }
 0x29b   : > { %v1781_v51 = vmax.f32 %v1589_v5, %v1665_v57 }
 0x29d   : > { %3608 = vst.msk [vmem:[#allocation2 + $0x50] sm:$0xff] %vm326_vm1, %v1781_v51  ;;  %v1813_v35 = vsub.f32 %v1589_v5, %v1781_v51  ;;  %1951 = vperm.xlu1 %8528, %v1781_v51  }
 0x29e   : > { %v1675_v3 = vpop.xlane.xlu0 %1674 }
 0x29f   : > { %v1783_v29 = vmax.f32 %v1591_v47, %v1675_v3  ;;  %v1594_v3 = vld [vmem:[#allocation2 + $0x78] sm:$0xff] }
 0x2a0   : > { %v1680_v57 = vpop.xlane.xlu1 %1679 }
 0x2a1   : > { %3610 = vst.msk [vmem:[#allocation2 + $0x60] sm:$0xff] %vm326_vm1, %v1783_v29  ;;  %v1784_v60 = vmax.f32 %v1592_v40, %v1680_v57  ;;  %v11184_v57 = vpop.eup %8707 }
 0x2a2   : > { %v1685_v14 = vpop.xlane.xlu0 %1684  ;;  %14809 = vst [vmem:[#allocation132_spill] sm:$0xff] %v11184_v57  ;;  %v11189_v17 = vpop.eup %8709 }
 0x2a3   : > { %v1816_v19 = vsub.f32 %v1592_v40, %v1784_v60  ;;  %3611 = vst.msk [vmem:[#allocation2 + $0x68] sm:$0xff] %vm326_vm1, %v1784_v60  ;;  %1966 = vperm.xlu0 %8527, %v1784_v60   ;;  %v1785_v12 = vmax.f32 %v1593_v30, %v1685_v14  ;;  %v1855_v40 = vmul.f32 1.442695, %v1813_v35  ;;  %v1815_v60 = vsub.f32 %v1591_v47, %v1783_v29  ;;  %v1596_v14 = vld [vmem:[#allocation2 + $0x88] sm:$0xff] }
 0x2a4   : > { %14810 = vst [vmem:[#allocation133_spill] sm:$0xff] %v11189_v17  ;;  %2806 = vperm.xlu1 %8528, %v11189_v17  }
 0x2a5   : > { %v1861_v32 = vmul.f32 1.442695, %v1816_v19  ;;  %v1690_v22 = vpop.xlane.xlu1 %1689  ;;  %3612 = vst.msk [vmem:[#allocation2 + $0x70] sm:$0xff] %vm326_vm1, %v1785_v12 }
 0x2a6   : > { %v1786_v8 = vmax.f32 %v1594_v3, %v1690_v22 }
 0x2a7   : > { %8711 = vpow2.f32 %v1861_v32  ;;  %2821 = vperm.xlu0 %8527, %v11184_v57  }
 0x2a8   : > { %v1818_v5 = vsub.f32 %v1594_v3, %v1786_v8  ;;  %3613 = vst.msk [vmem:[#allocation2 + $0x78] sm:$0xff] %vm326_vm1, %v1786_v8  ;;  %8713 = vpow2.f32 %v1855_v40  ;;  %v1859_v3 = vmul.f32 1.442695, %v1815_v60  ;;  %1961 = vperm.xlu1 %8528, %v1783_v29   ;;  %v1597_v40 = vld [vmem:[#allocation2 + $0x90] sm:$0xff] }
 0x2a9   : > { %v1695_v32 = vpop.xlane.xlu0 %1694 }
 0x2aa   : > { %v1865_v19 = vmul.f32 1.442695, %v1818_v5  ;;  %v1787_v35 = vmax.f32 %v1595_v15, %v1695_v32  ;;  %v1598_v32 = vld [vmem:[#allocation2 + $0x98] sm:$0xff] }
 0x2ab   : > { %1976 = vperm.xlu0 %8527, %v1786_v8   ;;  %v1700_v20 = vpop.xlane.xlu1 %1699  ;;  %v1817_v8 = vsub.f32 %v1593_v30, %v1785_v12 }
 0x2ac   : > { %8715 = vpow2.f32 %v1865_v19  ;;  %3614 = vst.msk [vmem:[#allocation2 + $0x80] sm:$0xff] %vm326_vm1, %v1787_v35  ;;  %v1788_v51 = vmax.f32 %v1596_v14, %v1700_v20 }
 0x2ad   : > { %8717 = vpow2.f32 %v1859_v3  ;;  %v1599_v3 = vld [vmem:[#allocation2 + $0xa0] sm:$0xff] }
 0x2ae   : > { %v1820_v47 = vsub.f32 %v1596_v14, %v1788_v51  ;;  %3615 = vst.msk [vmem:[#allocation2 + $0x88] sm:$0xff] %vm326_vm1, %v1788_v51  ;;  %v1705_v19 = vpop.xlane.xlu0 %1704  ;;  %v1863_v14 = vmul.f32 1.442695, %v1817_v8 }
 0x2af   : > { %v1789_v60 = vmax.f32 %v1597_v40, %v1705_v19  ;;  %v1600_v19 = vld [vmem:[#allocation2 + $0xa8] sm:$0xff] }
 0x2b0   : > { %v1869_v5 = vmul.f32 1.442695, %v1820_v47  ;;  %v1710_v17 = vpop.xlane.xlu1 %1709 }
 0x2b1   : > { %v11192_v22 = vpop.eup %8711  ;;  %3616 = vst.msk [vmem:[#allocation2 + $0x90] sm:$0xff] %vm326_vm1, %v1789_v60  ;;  %v1790_v29 = vmax.f32 %v1598_v32, %v1710_v17 }
 0x2b2   : > { %14811 = vst [vmem:[#allocation134_spill] sm:$0xff] %v11192_v22  ;;  %2831 = vperm.xlu0 %8527, %v11192_v22   ;;  %v11197_v57 = vpop.eup %8713  ;;  %8719 = vpow2.f32 %v1869_v5 }
 0x2b3   : > { %14812 = vst [vmem:[#allocation135_spill] sm:$0xff] %v11197_v57  ;;  %2816 = vperm.xlu1 %8528, %v11197_v57   ;;  %v1822_v30 = vsub.f32 %v1598_v32, %v1790_v29  ;;  %3617 = vst.msk [vmem:[#allocation2 + $0x98] sm:$0xff] %vm326_vm1, %v1790_v29  ;;  %8721 = vpow2.f32 %v1863_v14  ;;  %v1601_v14 = vld [vmem:[#allocation2 + $0xb0] sm:$0xff] }
 0x2b4   : > { %v1715_v5 = vpop.xlane.xlu0 %1714 }
 0x2b5   : > { %v1873_v47 = vmul.f32 1.442695, %v1822_v30  ;;  %v1791_v8 = vmax.f32 %v1599_v3, %v1715_v5  ;;  %v1602_v5 = vld [vmem:[#allocation2 + $0xb8] sm:$0xff] }
 0x2b6   : > { %1986 = vperm.xlu0 %8527, %v1788_v51   ;;  %v11200_v20 = vpop.eup %8715  ;;  %v1819_v51 = vsub.f32 %v1595_v15, %v1787_v35  ;;  %v1720_v57 = vpop.xlane.xlu1 %1719 }
 0x2b7   : > { %14813 = vst [vmem:[#allocation136_spill] sm:$0xff] %v11200_v20  ;;  %1971 = vperm.xlu1 %8528, %v1785_v12   ;;  %v11205_v22 = vpop.eup %8717  ;;  %8723 = vpow2.f32 %v1873_v47  ;;  %3618 = vst.msk [vmem:[#allocation2 + $0xa0] sm:$0xff] %vm326_vm1, %v1791_v8  ;;  %v1792_v12 = vmax.f32 %v1600_v19, %v1720_v57 }
 0x2b8   : > { %14814 = vst [vmem:[#allocation137_spill] sm:$0xff] %v11205_v22  ;;  %v1867_v32 = vmul.f32 1.442695, %v1819_v51 }
 0x2b9   : > { %v1824_v15 = vsub.f32 %v1600_v19, %v1792_v12  ;;  %3619 = vst.msk [vmem:[#allocation2 + $0xa8] sm:$0xff] %vm326_vm1, %v1792_v12  ;;  %v1725_v47 = vpop.xlane.xlu0 %1724 }
 0x2ba   : > { %2841 = vperm.xlu0 %8527, %v11200_v20   ;;  %8725 = vpow2.f32 %v1867_v32  ;;  %v1793_v51 = vmax.f32 %v1601_v14, %v1725_v47  ;;  %v1603_v32 = vld [vmem:[#allocation2 + $0xc0] sm:$0xff]  ;;  %v1604_v47 = vld [vmem:[#allocation2 + $0xc8] sm:$0xff] }
 0x2bb   : > { %2826 = vperm.xlu1 %8528, %v11205_v22   ;;  %v1877_v30 = vmul.f32 1.442695, %v1824_v15  ;;  %v1730_v22 = vpop.xlane.xlu1 %1729 }
 0x2bc   : > { %v11208_v17 = vpop.eup %8719  ;;  %3620 = vst.msk [vmem:[#allocation2 + $0xb0] sm:$0xff] %vm326_vm1, %v1793_v51 }
 0x2bd   : > { %14815 = vst [vmem:[#allocation138_spill] sm:$0xff] %v11208_v17  ;;  %v11213_v20 = vpop.eup %8721  ;;  %8727 = vpow2.f32 %v1877_v30 }
 0x2be   : > { %1996 = vperm.xlu0 %8527, %v1790_v29   ;;  %v1821_v29 = vsub.f32 %v1597_v40, %v1789_v60  ;;  %14816 = vst [vmem:[#allocation139_spill] sm:$0xff] %v11213_v20 }
 0x2bf   : > { %1981 = vperm.xlu1 %8528, %v1787_v35   ;;  %v1794_v35 = vmax.f32 %v1602_v5, %v1730_v22  ;;  %v1735_v30 = vpop.xlane.xlu0 %1734 }
 0x2c0   : > { %v1871_v19 = vmul.f32 1.442695, %v1821_v29  ;;  %v1795_v29 = vmax.f32 %v1603_v32, %v1735_v30  ;;  %v1606_v30 = vld [vmem:[#allocation2 + $0xd8] sm:$0xff] }
 0x2c1   : > { %v11216_v57 = vpop.eup %8723  ;;  %v1826_v40 = vsub.f32 %v1602_v5, %v1794_v35  ;;  %3621 = vst.msk [vmem:[#allocation2 + $0xb8] sm:$0xff] %vm326_vm1, %v1794_v35 }
 0x2c2   : > { %2851 = vperm.xlu0 %8527, %v11208_v17   ;;  %14817 = vst [vmem:[#allocation140_spill] sm:$0xff] %v11216_v57  ;;  %8729 = vpow2.f32 %v1871_v19  ;;  %3622 = vst.msk [vmem:[#allocation2 + $0xc0] sm:$0xff] %vm326_vm1, %v1795_v29  ;;  %v1605_v19 = vld [vmem:[#allocation2 + $0xd0] sm:$0xff] }
 0x2c3   : > { %2836 = vperm.xlu1 %8528, %v11213_v20   ;;  %v1881_v15 = vmul.f32 1.442695, %v1826_v40  ;;  %v1740_v20 = vpop.xlane.xlu1 %1739 }
 0x2c4   : > { %v11221_v17 = vpop.eup %8725 }
 0x2c5   : > { %14818 = vst [vmem:[#allocation141_spill] sm:$0xff] %v11221_v17  ;;  %8731 = vpow2.f32 %v1881_v15  ;;  %v1745_v15 = vpop.xlane.xlu0 %1744 }
 0x2c6   : > { %2006 = vperm.xlu0 %8527, %v1792_v12   ;;  %v1823_v12 = vsub.f32 %v1599_v3, %v1791_v8 }
 0x2c7   : > { %1991 = vperm.xlu1 %8528, %v1789_v60   ;;  %v11224_v22 = vpop.eup %8727  ;;  %v1796_v60 = vmax.f32 %v1604_v47, %v1740_v20 }
 0x2c8   : > { %14819 = vst [vmem:[#allocation142_spill] sm:$0xff] %v11224_v22  ;;  %v1875_v5 = vmul.f32 1.442695, %v1823_v12  ;;  %v1797_v12 = vmax.f32 %v1605_v19, %v1745_v15  ;;  %v11239_v15 = vld [vmem:[#allocation2 + $0xe8] sm:$0xff] }
 0x2c9   : > { %v1828_v3 = vsub.f32 %v1604_v47, %v1796_v60  ;;  %3623 = vst.msk [vmem:[#allocation2 + $0xc8] sm:$0xff] %vm326_vm1, %v1796_v60 }
 0x2ca   : > { %2861 = vperm.xlu0 %8527, %v11216_v57   ;;  %8733 = vpow2.f32 %v1875_v5  ;;  %3624 = vst.msk [vmem:[#allocation2 + $0xd0] sm:$0xff] %vm326_vm1, %v1797_v12  ;;  %v11237_v5 = vld [vmem:[#allocation2 + $0xe0] sm:$0xff] }
 0x2cb   : > { %2846 = vperm.xlu1 %8528, %v11221_v17   ;;  %v1885_v40 = vmul.f32 1.442695, %v1828_v3  ;;  %v1750_v17 = vpop.xlane.xlu1 %1749 }
 0x2cc   : > { %v11229_v57 = vpop.eup %8729 }
 0x2cd   : > { %14820 = vst [vmem:[#allocation143_spill] sm:$0xff] %v11229_v57  ;;  %8735 = vpow2.f32 %v1885_v40  ;;  %v1755_v40 = vpop.xlane.xlu0 %1754 }
 0x2ce   : > { %2016 = vperm.xlu0 %8527, %v1794_v35   ;;  %v1825_v35 = vsub.f32 %v1601_v14, %v1793_v51 }
 0x2cf   : > { %2001 = vperm.xlu1 %8528, %v1791_v8   ;;  %v11232_v20 = vpop.eup %8731  ;;  %v1798_v8 = vmax.f32 %v1606_v30, %v1750_v17  ;;  %v11244_v17 = vmax.f32 %v11237_v5, %v1755_v40  ;;  %v11264_v40 = vld [vmem:[#allocation2 + $0xf8] sm:$0xff] }
 0x2d0   : > { %14821 = vst [vmem:[#allocation144_spill] sm:$0xff] %v11232_v20  ;;  %v1879_v47 = vmul.f32 1.442695, %v1825_v35  ;;  %v1760_v35 = vpop.xlane.xlu1 %1759 }
 0x2d1   : > { %v1830_v14 = vsub.f32 %v1606_v30, %v1798_v8  ;;  %3625 = vst.msk [vmem:[#allocation2 + $0xd8] sm:$0xff] %vm326_vm1, %v1798_v8  ;;  %3626 = vst.msk [vmem:[#allocation2 + $0xe0] sm:$0xff] %vm326_vm1, %v11244_v17 }
 0x2d2   : > { %2871 = vperm.xlu0 %8527, %v11224_v22   ;;  %8737 = vpow2.f32 %v1879_v47  ;;  %v11254_v47 = vmax.f32 %v11239_v15, %v1760_v35 }
 0x2d3   : > { %2856 = vperm.xlu1 %8528, %v11229_v57   ;;  %v1889_v3 = vmul.f32 1.442695, %v1830_v14  ;;  %v11261_v14 = vld [vmem:[#allocation2 + $0xf0] sm:$0xff] }
 0x2d4   : > { %v11241_v22 = vpop.eup %8733  ;;  %3627 = vst.msk [vmem:[#allocation2 + $0xe8] sm:$0xff] %vm326_vm1, %v11254_v47 }
 0x2d5   : > { %14822 = vst [vmem:[#allocation145_spill] sm:$0xff] %v11241_v22  ;;  %8739 = vpow2.f32 %v1889_v3  ;;  %v1765_v3 = vpop.xlane.xlu0 %1764 }
 0x2d6   : > { %2026 = vperm.xlu0 %8527, %v1796_v60   ;;  %v1827_v60 = vsub.f32 %v1603_v32, %v1795_v29  ;;  %v11269_v32 = vmax.f32 %v11261_v14, %v1765_v3 }
 0x2d7   : > { %2011 = vperm.xlu1 %8528, %v1793_v51   ;;  %v11247_v30 = vpop.eup %8735 }
 0x2d8   : > { %14823 = vst [vmem:[#allocation146_spill] sm:$0xff] %v11247_v30  ;;  %v1883_v51 = vmul.f32 1.442695, %v1827_v60  ;;  %v1829_v60 = vsub.f32 %v1605_v19, %v1797_v12  ;;  %3628 = vst.msk [vmem:[#allocation2 + $0xf0] sm:$0xff] %vm326_vm1, %v11269_v32 }
 0x2da   : > { %2881 = vperm.xlu0 %8527, %v11232_v20   ;;  %8741 = vpow2.f32 %v1883_v51 }
 0x2db   : > { %2866 = vperm.xlu1 %8528, %v11241_v22   ;;  %v9465_v22 = vld [vmem:[%s10055_s29 + $0xa0] sm:$0xff]  }
 0x2dc   : > { %v11266_v35 = vpop.eup %8737 }
 0x2dd   : > { %14824 = vst [vmem:[#allocation147_spill] sm:$0xff] %v11266_v35 }
 0x2de   : > { %2036 = vperm.xlu0 %8527, %v1798_v8  }
 0x2df   : > { %2021 = vperm.xlu1 %8528, %v1795_v29   ;;  %v11272_v8 = vpop.eup %8739  ;;  %v1887_v29 = vmul.f32 1.442695, %v1829_v60 }
 0x2e0   : > { %14825 = vst [vmem:[#allocation148_spill] sm:$0xff] %v11272_v8 }
 0x2e1   : > { %8743 = vpow2.f32 %v1887_v29 }
 0x2e2   : > { %2891 = vperm.xlu0 %8527, %v11247_v30   ;;  %v1770_v30 = vpop.xlane.xlu1 %1769 }
 0x2e3   : > { %2876 = vperm.xlu1 %8528, %v11266_v35   ;;  %v11279_v19 = vmax.f32 %v11264_v40, %v1770_v30  ;;  %v1902_v30 = vpop.permute.xlu0 %1901 }
 0x2e4   : > { %v11289_v60 = vpop.eup %8741  ;;  %v2060_v3 = vsub.f32 %v10311_v43, %v1902_v30  ;;  %v2061_v35 = vsub.f32 %v10309_v42, %v1902_v30  ;;  %v9466_v43 = vld [vmem:[%s10055_s29 + $0x28] sm:$0xff]  }
 0x2e5   : > { %3629 = vst.msk [vmem:[#allocation2 + $0xf8] sm:$0xff] %vm326_vm1, %v11279_v19  ;;  %14826 = vst [vmem:[#allocation149_spill] sm:$0xff] %v11289_v60 }
 0x2e6   : > { %2046 = vperm.xlu0 %8527, %v11254_v47   ;;  %v11286_v20 = vpop.permute.xlu1 %3714  ;;  %v2189_v57 = vmul.f32 1.442695, %v2060_v3  ;;  %v9467_v3 = vld [vmem:[%s10055_s29 + $0xa8] sm:$0xff]  }
 0x2e7   : > { %2031 = vperm.xlu1 %8528, %v1797_v12   ;;  %v2062_v12 = vsub.f32 %v10319_v52, %v1902_v30 }
 0x2ea   : > { %2901 = vperm.xlu0 %8527, %v11272_v8   ;;  %v11291_v51 = vpop.permute.xlu1 %3684  ;;  %v2059_v8 = vsub.f32 %v10307_v39, %v1902_v30  ;;  %v2191_v39 = vmul.f32 1.442695, %v2061_v35 }
 0x2eb   : > { %2886 = vperm.xlu1 %8528, %v11289_v60   ;;  %v11303_v60 = vpop.permute.xlu0 %3698  ;;  %v11307_v42 = vpop.eup %8743 }
 0x2ec   : > { %v2187_v29 = vmul.f32 1.442695, %v2059_v8  ;;  %14828 = vst [vmem:[#allocation151_spill] sm:$0xff] %v11307_v42 }
 0x2ee   : > { %2056 = vperm.xlu0 %8527, %v11279_v19   ;;  %v11300_v54 = vpop.permute.xlu1 %3716  ;;  %8745 = vpow2.f32 %v2187_v29 }
 0x2ef   : > { %14827 = vst [vmem:[#allocation150_spill] sm:$0xff] %v11300_v54  ;;  %2041 = vperm.xlu1 %8528, %v11244_v17   ;;  %8747 = vpow2.f32 %v2189_v57  ;;  %v11312_v8 = vpop.permute.xlu0 %3668 }
 0x2f0   : > { %14830 = vst [vmem:[#allocation153_spill] sm:$0xff] %v11312_v8  ;;  %8749 = vpow2.f32 %v2191_v39 }
 0x2f2   : > { %3702 = vrot.lane.b32.xlu0 %v9465_v22, %s9743_s26  ;;  %v2193_v22 = vmul.f32 1.442695, %v2062_v12  ;;  %v11309_v52 = vpop.permute.xlu1 %3686 }
 0x2f3   : > { %14829 = vst [vmem:[#allocation152_spill] sm:$0xff] %v11309_v52  ;;  %2896 = vperm.xlu1 %8528, %v11307_v42   ;;  %v9468_v42 = vld [vmem:[%s10055_s29 + $0x30] sm:$0xff]  }
 0x2f4   : > { %8751 = vpow2.f32 %v2193_v22 }
 0x2f6   : > { %3672 = vrot.lane.b32.xlu0 %v9466_v43, %s9743_s26  ;;  %v1907_v35 = vpop.permute.xlu1 %1906  ;;  %v11321_v43 = vpop.permute.xlu0 %3700 }
 0x2f7   : > { %2051 = vperm.xlu1 %8528, %v11269_v32   ;;  %v2063_v57 = vsub.f32 %v10313_v46, %v1907_v35  ;;  %v2064_v30 = vsub.f32 %v10317_v50, %v1907_v35  ;;  %v2065_v12 = vsub.f32 %v10321_v53, %v1907_v35  ;;  %v2066_v29 = vsub.f32 %v10330_v62, %v1907_v35  ;;  %v9469_v50 = vld [vmem:[%s10055_s29 + $0xe0] sm:$0xff]  }
 0x2f8   : > { %v11325_v39 = vpop.eup %8745 }
 0x2f9   : > { %v2195_v22 = vmul.f32 1.442695, %v2063_v57  ;;  %v2199_v52 = vmul.f32 1.442695, %v2065_v12  ;;  %v11327_v8 = vpop.eup %8747  ;;  %v2201_v46 = vmul.f32 1.442695, %v2066_v29 }
 0x2fa   : > { %3704 = vrot.lane.b32.xlu0 %v9467_v3, %s9743_s26  ;;  %v2197_v3 = vmul.f32 1.442695, %v2064_v30  ;;  %v1912_v54 = vpop.permute.xlu1 %1911  ;;  %v9470_v57 = vld [vmem:[%s10055_s29 + $0xb0] sm:$0xff]   ;;  %v2507_v30 = vadd.f32 %v11327_v8, %v11325_v39  ;;  %v11339_v12 = vpop.eup %8749 }
 0x2fb   : > { %3718 = vrot.lane.b32.xlu1 %v9469_v50, %s9743_s26  ;;  %8753 = vpow2.f32 %v2195_v22  ;;  %v2067_v53 = vsub.f32 %v10328_v59, %v1912_v54  ;;  %v2068_v62 = vsub.f32 %v10334_v0, %v1912_v54  ;;  %v2070_v35 = vsub.f32 %v10345_v10, %v1912_v54  ;;  %v11341_v0 = vpop.permute.xlu0 %3670  ;;  %v9471_v50 = vld [vmem:[%s10055_s29 + $0x68] sm:$0xff]  }
 0x2fc   : > { %8755 = vpow2.f32 %v2197_v3  ;;  %v2508_v10 = vadd.f32 %v11339_v12, %v2507_v30 }
 0x2fd   : > { %8757 = vpow2.f32 %v2199_v52  ;;  %v2203_v29 = vmul.f32 1.442695, %v2067_v53  ;;  %v2205_v22 = vmul.f32 1.442695, %v2068_v62 }
 0x2fe   : > { %3674 = vrot.lane.b32.xlu0 %v9468_v42, %s9743_s26  ;;  %v2069_v42 = vsub.f32 %v10332_v63, %v1912_v54  ;;  %8759 = vpow2.f32 %v2201_v46  ;;  %v2209_v63 = vmul.f32 1.442695, %v2070_v35  ;;  %v1917_v3 = vpop.permute.xlu1 %1916  ;;  %v11346_v54 = vpop.eup %8751 }
 0x2ff   : > { %3688 = vrot.lane.b32.xlu1 %v9471_v50, %s9743_s26  ;;  %8761 = vpow2.f32 %v2203_v29  ;;  %v2071_v52 = vsub.f32 %v10336_v4, %v1917_v3  ;;  %v2072_v53 = vsub.f32 %v10340_v7, %v1917_v3  ;;  %v2073_v62 = vsub.f32 %v10347_v11, %v1917_v3  ;;  %v9473_v7 = vld [vmem:[%s10055_s29 + $0xe8] sm:$0xff]   ;;  %v11361_v11 = vpop.permute.xlu0 %2766 }
 0x300   : > { %v2207_v59 = vmul.f32 1.442695, %v2069_v42  ;;  %8763 = vpow2.f32 %v2205_v22  ;;  %v2074_v46 = vsub.f32 %v10494_v23, %v1917_v3  ;;  %v9472_v42 = vld [vmem:[%s10055_s29 + $0x38] sm:$0xff]   ;;  %v11355_v35 = vadd.f32 %v11346_v54, %v2508_v10  ;;  %14832 = vst [vmem:[#allocation155_spill] sm:$0xff] %v11361_v11 }
 0x301   : > { %v2213_v30 = vmul.f32 1.442695, %v2072_v53  ;;  %v2215_v29 = vmul.f32 1.442695, %v2073_v62  ;;  %v9475_v62 = vld [vmem:[%s10055_s29 + $0x70] sm:$0xff]  }
 0x302   : > { %3706 = vrot.lane.b32.xlu0 %v9470_v57, %s9743_s26  ;;  %14831 = vst [vmem:[#allocation154_spill] sm:$0xff] %v11355_v35  ;;  %8765 = vpow2.f32 %v2207_v59  ;;  %v2211_v57 = vmul.f32 1.442695, %v2071_v52  ;;  %v2217_v4 = vmul.f32 1.442695, %v2074_v46  ;;  %v11357_v50 = vpop.permute.xlu1 %1921  ;;  %v9474_v59 = vld [vmem:[%s10055_s29 + $0xb8] sm:$0xff]  }
 0x303   : > { %8767 = vpow2.f32 %v2209_v63  ;;  %3720 = vrot.lane.b32.xlu1 %v9473_v7, %s9743_s26  ;;  %v2075_v23 = vsub.f32 %v10359_v18, %v11357_v50  ;;  %v2076_v22 = vsub.f32 %v10500_v26, %v11357_v50  ;;  %v2078_v53 = vsub.f32 %v10513_v37, %v11357_v50  ;;  %v9511_v35 = vld [vmem:[%s10263_s11 + $0xe8] sm:$0xff]  }
 0x304   : > { %8769 = vpow2.f32 %v2211_v57  ;;  %v14836_v37 = vsub.f32 %v11239_v15, %v11254_v47  ;;  %v3823_v15 = vsel %vm455_vm0, %v11112_v24, 0  ;;  %v2077_v47 = vsub.f32 %v10497_v25, %v11357_v50 }
 0x305   : > { %8771 = vpow2.f32 %v2213_v30  ;;  %v8754_v63 = vpop.eup %8753  ;;  %v2219_v3 = vmul.f32 1.442695, %v2075_v23  ;;  %v2221_v10 = vmul.f32 1.442695, %v2076_v22  ;;  %v11379_v30 = vpop.permute.xlu0 %2781  ;;  %v9476_v22 = vld [vmem:[%s10044_s8 + $0x38] sm:$0xff]   ;;  %v14838_v50 = vsub.f32 %v11261_v14, %v11269_v32 }
 0x306   : > { %3676 = vrot.lane.b32.xlu0 %v9472_v42, %s9743_s26  ;;  %8773 = vpow2.f32 %v2215_v29  ;;  %v8756_v52 = vpop.eup %8755  ;;  %v11373_v18 = vpop.permute.xlu1 %2771  ;;  %v2956_v26 = vpack.c.bf16 %v8754_v63, %v11325_v39  ;;  %v14834_v42 = vsub.f32 %v11237_v5, %v11244_v17  ;;  %14835 = vst [vmem:[#allocation157_spill] sm:$0xff] %v11379_v30  ;;  %v1893_v23 = vmul.f32 1.442695, %v14836_v37  ;;  %v9507_v30 = vld [vmem:[%s10263_s11 + $0xe0] sm:$0xff]  }
 0x307   : > { %8775 = vpow2.f32 %v2217_v4  ;;  %3690 = vrot.lane.b32.xlu1 %v9475_v62, %s9743_s26  ;;  %14833 = vst [vmem:[#allocation156_spill] sm:$0xff] %v11373_v18  ;;  %v8758_v46 = vpop.eup %8757  ;;  %v2957_v29 = vpack.c.bf16 %v8756_v52, %v11327_v8  ;;  %v2512_v4 = vadd.f32 %v8756_v52, %v8754_v63  ;;  %v3775_v63 = vsel %vm455_vm0, %v11082_v27, 0 }
 0x308   : > { %v1891_v57 = vmul.f32 1.442695, %v14834_v42  ;;  %v8760_v7 = vpop.eup %8759  ;;  %8777 = vpow2.f32 %v2219_v3  ;;  %v2958_v39 = vpack.c.bf16 %v8758_v46, %v11339_v12  ;;  %v2225_v3 = vmul.f32 1.442695, %v2078_v53  ;;  %v9477_v12 = vld [vmem:[%s10055_s29 + $0xf0] sm:$0xff]  }
 0x309   : > { %8779 = vpow2.f32 %v2221_v10  ;;  %3244 = vmatprep.mubr.bf16.mxu0 %v2957_v29  ;;  %v2959_v5 = vpack.c.bf16 %v8760_v7, %v11346_v54  ;;  %v2513_v17 = vadd.f32 %v8758_v46, %v2512_v4  ;;  %v11404_v62 = vpop.permute.xlu0 %2791  ;;  %v1895_v53 = vmul.f32 1.442695, %v14838_v50  ;;  %v9479_v4 = vld [vmem:[%s10055_s29 + $0x78] sm:$0xff]  }
 0x30a   : > { %3708 = vrot.lane.b32.xlu0 %v9474_v59, %s9743_s26  ;;  %v11388_v59 = vpop.eup %8761  ;;  %3245 = vmatmul.mubr.bf16.vlgmr.msra.gmra.mrb[64].mxu0 %v2956_v26  ;;  %v1927_v10 = vpop.permute.xlu1 %1926  ;;  %8781 = vpow2.f32 %v1891_v57  ;;  %14837 = vst [vmem:[#allocation158_spill] sm:$0xff] %v11404_v62  ;;  %v9478_v57 = vld [vmem:[%s10044_s8 + $0x48] sm:$0xff]  }
 0x30b   : > { %v8764_v8 = vpop.eup %8763  ;;  %3722 = vrot.lane.b32.xlu1 %v9477_v12, %s9743_s26  ;;  %3405 = vmatprep.mubr.bf16.mxu1 %v2959_v5  ;;  %v2079_v54 = vsub.f32 %v10505_v31, %v1927_v10  ;;  %v2080_v27 = vsub.f32 %v10509_v34, %v1927_v10  ;;  %v2081_v24 = vsub.f32 %v10515_v38, %v1927_v10  ;;  %8783 = vpow2.f32 %v1893_v23 }
 0x30c   : > { %v11399_v52 = vpop.eup %8765  ;;  %8057 = vmatpush3.bf16.xpose.msra.mxu0 %v3775_v63  ;;  %3406 = vmatmul.mubr.bf16.vlgmr.msra.gmra.mrb[64].mxu1 %v2958_v39  ;;  %v2082_v26 = vsub.f32 %v10520_v44, %v1927_v10  ;;  %v11414_v31 = vadd.f32 %v8760_v7, %v2513_v17  ;;  %v2517_v32 = vadd.f32 %v8764_v8, %v11388_v59  ;;  %8785 = vpow2.f32 %v2225_v3 }
 0x30d   : > { %v11406_v25 = vpop.eup %8767  ;;  %8393 = vmatprep.subr.msk.bf16.mxu0 %vm455_vm0, %v11119_v21  ;;  %8105 = vmatpush3.bf16.xpose.msra.mxu1 %v3823_v15  ;;  %v2227_v38 = vmul.f32 1.442695, %v2079_v54  ;;  %v2229_v46 = vmul.f32 1.442695, %v2080_v27  ;;  %v2231_v42 = vmul.f32 1.442695, %v2081_v24  ;;  %v14839_v44 = vsub.f32 %v11264_v40, %v11279_v19  ;;  %v1947_v40 = vpop.permute.xlu0 %1946 }
 0x30e   : > { %3644 = vrot.lane.b32.xlu0 %v9476_v22, %s9743_s26  ;;  %v11416_v34 = vpop.eup %8769  ;;  %v2233_v21 = vmul.f32 1.442695, %v2082_v26  ;;  %8401 = vmatprep.subr.msk.bf16.mxu1 %vm455_vm0, %v11123_v61  ;;  %v11430_v7 = vpop.permute.xlu1 %2776  ;;  %v2223_v22 = vmul.f32 1.442695, %v2077_v47  ;;  %v2518_v39 = vadd.f32 %v11399_v52, %v2517_v32  ;;  %v2095_v61 = vsub.f32 %v10559_v41, %v1947_v40 }
 0x30f   : > { %v11421_v14 = vpop.eup %8771  ;;  %v1897_v29 = vmul.f32 1.442695, %v14839_v44  ;;  %3692 = vrot.lane.b32.xlu1 %v9479_v4, %s9743_s26  ;;  %14840 = vst [vmem:[#allocation159_spill] sm:$0xff] %v11430_v7  ;;  %v2960_v37 = vpack.c.bf16 %v11416_v34, %v11388_v59  ;;  %8787 = vpow2.f32 %v2227_v38  ;;  %v2096_v17 = vsub.f32 %v10563_v48, %v1947_v40 }
 0x310   : > { %v11434_v23 = vpop.eup %8773  ;;  %v2961_v19 = vpack.c.bf16 %v11421_v14, %v8764_v8  ;;  %8789 = vpow2.f32 %v2229_v46  ;;  %v2097_v59 = vsub.f32 %v10827_v58, %v1947_v40  ;;  %v2098_v63 = vsub.f32 %v10836_v1, %v1947_v40  ;;  %v9480_v8 = vld [vmem:[%s10044_s8 + $0x58] sm:$0xff]   ;;  %v9482_v46 = vld [vmem:[%s10044_s8 + $0x68] sm:$0xff]  }
 0x311   : > { %v11438_v5 = vpop.eup %8775  ;;  %8791 = vpow2.f32 %v2231_v42  ;;  %v2962_v47 = vpack.c.bf16 %v11434_v23, %v11399_v52  ;;  %v3778_v41 = vsel %vm455_vm0, %v11115_v28, 0  ;;  %v3826_v48 = vsel %vm455_vm0, %v11117_v45, 0  ;;  %v9481_v1 = vld [vmem:[%s10055_s29 + $0xf8] sm:$0xff]   ;;  %v11462_v27 = vpop.permute.xlu0 %2801  ;;  %s9747_s29 = smov [#allocation11]  }
 0x312   : > { %3648 = vrot.lane.b32.xlu0 %v9478_v57, %s9743_s26  ;;  %3252 = vmatprep.mubr.bf16.mxu0 %v2961_v19  ;;  %v2963_v15 = vpack.c.bf16 %v11438_v5, %v11406_v25  ;;  %v11450_v3 = vpop.eup %8777  ;;  %8793 = vpow2.f32 %v2233_v21  ;;  %v2259_v58 = vmul.f32 1.442695, %v2095_v61  ;;  %v1932_v12 = vpop.permute.xlu1 %1931  ;;  %v2261_v54 = vmul.f32 1.442695, %v2096_v17  ;;  %14841 = vst [vmem:[#allocation160_spill] sm:$0xff] %v11462_v27 }
 0x313   : > { %3253 = vmatmul.mubr.bf16.gmra.mrb[68].mxu0 %v2960_v37  ;;  %3724 = vrot.lane.b32.xlu1 %v9481_v1, %s9743_s26  ;;  %v11458_v10 = vpop.eup %8779  ;;  %8795 = vpow2.f32 %v2223_v22  ;;  %v2083_v52 = vsub.f32 %v10524_v49, %v1932_v12  ;;  %v2084_v28 = vsub.f32 %v10528_v56, %v1932_v12  ;;  %v2263_v45 = vmul.f32 1.442695, %v2097_v59 }
 0x314   : > { %3413 = vmatprep.mubr.bf16.mxu1 %v2963_v15  ;;  %8059 = vmatpush3.bf16.xpose.msra.mxu0 %v3778_v41  ;;  %8797 = vpow2.f32 %v1895_v53  ;;  %v2085_v24 = vsub.f32 %v10526_v55, %v1932_v12  ;;  %v11468_v50 = vadd.f32 %v11406_v25, %v2518_v39  ;;  %v11470_v26 = vpop.eup %8781  ;;  %v2265_v49 = vmul.f32 1.442695, %v2098_v63  ;;  %v9485_v39 = vld [vmem:[%s10044_s8 + $0x50] sm:$0xff]   ;;  %v14846_v63 = vld [vmem:[#allocation35_spill] sm:$0xff] }
 0x315   : > { %3414 = vmatmul.mubr.bf16.gmra.mrb[68].mxu1 %v2962_v47  ;;  %8394 = vmatprep.subr.msk.bf16.mxu0 %vm455_vm0, %v11130_v33  ;;  %14842 = vst [vmem:[#allocation161_spill] sm:$0xff] %v11470_v26  ;;  %8799 = vpow2.f32 %v1897_v29  ;;  %v2235_v56 = vmul.f32 1.442695, %v2083_v52  ;;  %v2237_v38 = vmul.f32 1.442695, %v2084_v28  ;;  %v11474_v53 = vpop.eup %8783  ;;  %v2086_v55 = vsub.f32 %v10537_v9, %v1932_v12  ;;  %v9483_v33 = vld [vmem:[%s10044_s8 + $0x40] sm:$0xff]   ;;  %v11488_v29 = vpop.permute.xlu0 %1956 }
 0x316   : > { %3652 = vrot.lane.b32.xlu0 %v9480_v8, %s9743_s26  ;;  %8107 = vmatpush3.bf16.xpose.msra.mxu1 %v3826_v48  ;;  %14843 = vst [vmem:[#allocation162_spill] sm:$0xff] %v11474_v53  ;;  %8801 = vpow2.f32 %v2259_v58  ;;  %v1937_v25 = vpop.permute.xlu1 %1936  ;;  %v2527_v42 = vadd.f32 %v11458_v10, %v11450_v3  ;;  %v2522_v57 = vadd.f32 %v11421_v14, %v11416_v34  ;;  %v2239_v21 = vmul.f32 1.442695, %v2085_v24  ;;  %v14844_v14 = vld [vmem:[#allocation122_spill] sm:$0xff]  ;;  %v14848_v47 = vld [vmem:[#allocation37_spill] sm:$0xff]  ;;  %v9486_v28 = vld [vmem:[%s10263_s11 + $0x40] sm:$0xff]  }
 0x317   : > { %8402 = vmatprep.subr.msk.bf16.mxu1 %vm455_vm0, %v11286_v20  ;;  %3646 = vrot.lane.b32.xlu1 %v9483_v33, %s9743_s26  ;;  %8803 = vpow2.f32 %v2261_v54  ;;  %v2087_v32 = vsub.f32 %v10531_v2, %v1937_v25  ;;  %v2088_v44 = vsub.f32 %v10535_v6, %v1937_v25  ;;  %v2089_v9 = vsub.f32 %v10539_v13, %v1937_v25  ;;  %v11490_v20 = vpop.eup %8785  ;;  %v9484_v13 = vld [vmem:[%s10044_s8 + $0x78] sm:$0xff]   ;;  %v14849_v48 = vld [vmem:[#allocation38_spill] sm:$0xff] }
 0x318   : > { %8805 = vpow2.f32 %v2235_v56  ;;  %v2090_v4 = vsub.f32 %v10544_v16, %v1937_v25  ;;  %v2103_v37 = vsub.f32 %v10847_v36, %v11488_v29  ;;  %v3781_v2 = vsel %vm455_vm0, %v14844_v14, 0  ;;  %v9487_v56 = vld [vmem:[%s10044_s8 + $0x60] sm:$0xff]   ;;  %v14857_v14 = vld [vmem:[#allocation153_spill] sm:$0xff] }
 0x319   : > { %v11495_v34 = vpop.eup %8787  ;;  %8807 = vpow2.f32 %v2237_v38  ;;  %v2243_v6 = vmul.f32 1.442695, %v2087_v32  ;;  %v3829_v40 = vsel %vm455_vm0, %v11303_v60, 0  ;;  %v2241_v16 = vmul.f32 1.442695, %v2086_v55  ;;  %v11513_v8 = vpop.permute.xlu0 %2811  ;;  %v14854_v32 = vld [vmem:[#allocation30_spill] sm:$0xff] }
 0x31a   : > { %3656 = vrot.lane.b32.xlu0 %v9482_v46, %s9743_s26  ;;  %v11501_v22 = vpop.eup %8789  ;;  %8809 = vpow2.f32 %v2263_v45  ;;  %v2245_v19 = vmul.f32 1.442695, %v2088_v44  ;;  %v11507_v36 = vpop.permute.xlu1 %2786  ;;  %v2247_v17 = vmul.f32 1.442695, %v2089_v9  ;;  %v2249_v59 = vmul.f32 1.442695, %v2090_v4 }
 0x31b   : > { %3650 = vrot.lane.b32.xlu1 %v9485_v39, %s9743_s26  ;;  %14845 = vst [vmem:[#allocation122_spill] sm:$0xff] %v11507_v36  ;;  %v11509_v61 = vpop.eup %8791  ;;  %8811 = vpow2.f32 %v2265_v49  ;;  %v2104_v15 = vsub.f32 %v14846_v63, %v11488_v29  ;;  %14847 = vst [vmem:[#allocation35_spill] sm:$0xff] %v11513_v8  ;;  %v2105_v41 = vsub.f32 %v14848_v47, %v11488_v29  ;;  %v2275_v1 = vmul.f32 1.442695, %v2103_v37  ;;  %v14851_v49 = vld [vmem:[#allocation150_spill] sm:$0xff]  ;;  %v9503_v8 = vld [vmem:[%s10263_s11 + $0xd8] sm:$0xff]  }
 0x31c   : > { %8061 = vmatpush3.bf16.xpose.msra.mxu0 %v3781_v2  ;;  %v11515_v60 = vpop.eup %8793  ;;  %8813 = vpow2.f32 %v2239_v21  ;;  %v2106_v58 = vsub.f32 %v14849_v48, %v11488_v29  ;;  %v2965_v54 = vpack.c.bf16 %v11501_v22, %v11458_v10  ;;  %v2964_v45 = vpack.c.bf16 %v11495_v34, %v11450_v3  ;;  %v14853_v3 = vld [vmem:[#allocation28_spill] sm:$0xff]  ;;  %v9489_v63 = vld [vmem:[%s10044_s8 + $0x70] sm:$0xff]   ;;  %v14860_v48 = vld [vmem:[#allocation43_spill] sm:$0xff]  ;;  %s7604_s8 = sshll.u32 %s7254_s27, 6 }
 0x31d   : > { %8395 = vmatprep.subr.msk.bf16.mxu0 %vm455_vm0, %v11291_v51  ;;  %v8796_v12 = vpop.eup %8795  ;;  %8815 = vpow2.f32 %v2243_v6  ;;  %v2967_v52 = vpack.c.bf16 %v11515_v60, %v11490_v20  ;;  %v2523_v46 = vadd.f32 %v11434_v23, %v2522_v57  ;;  %v2277_v33 = vmul.f32 1.442695, %v2104_v15  ;;  %v14855_v23 = vld [vmem:[#allocation29_spill] sm:$0xff]  ;;  %v14856_v57 = vld [vmem:[#allocation31_spill] sm:$0xff]  ;;  %s14273_s18 = scalar_lea.hbm %s15465_s12, %s7604_s8 }
 0x31e   : > { %3660 = vrot.lane.b32.xlu0 %v9484_v13, %s9743_s26  ;;  %8109 = vmatpush3.bf16.xpose.msra.mxu1 %v3829_v40  ;;  %v11531_v24 = vpop.eup %8797  ;;  %8817 = vpow2.f32 %v2245_v19  ;;  %v2966_v51 = vpack.c.bf16 %v11509_v61, %v8796_v12  ;;  %v1942_v10 = vpop.permute.xlu1 %1941  ;;  %v2528_v38 = vadd.f32 %v8796_v12, %v2527_v42  ;;  %v2279_v21 = vmul.f32 1.442695, %v2105_v41  ;;  %v9488_v13 = vld [vmem:[%s10263_s11] sm:$0xff]  }
 0x31f   : > { %14850 = vst [vmem:[#allocation37_spill] sm:$0xff] %v11531_v24  ;;  %8403 = vmatprep.subr.msk.bf16.mxu1 %vm455_vm0, %v14851_v49  ;;  %3654 = vrot.lane.b32.xlu1 %v9487_v56, %s9743_s26  ;;  %v11539_v55 = vpop.eup %8799  ;;  %8819 = vpow2.f32 %v2249_v59  ;;  %v2091_v25 = vsub.f32 %v14853_v3, %v1942_v10  ;;  %v2092_v44 = vsub.f32 %v14854_v32, %v1942_v10  ;;  %v3784_v2 = vsel %vm455_vm0, %v14857_v14, 0  ;;  %v9490_v56 = vld [vmem:[%s10263_s11 + $0x48] sm:$0xff]  }
 0x320   : > { %14852 = vst [vmem:[#allocation38_spill] sm:$0xff] %v11539_v55  ;;  %3260 = vmatprep.mubr.bf16.mxu0 %v2965_v54  ;;  %3421 = vmatprep.mubr.bf16.mxu1 %v2967_v52  ;;  %v11545_v29 = vpop.eup %8801  ;;  %8821 = vpow2.f32 %v2247_v17  ;;  %v2093_v42 = vsub.f32 %v14855_v23, %v1942_v10  ;;  %v2094_v4 = vsub.f32 %v14856_v57, %v1942_v10  ;;  %v3832_v19 = vsel %vm455_vm0, %v11321_v43, 0  ;;  %v14858_v17 = vld [vmem:[#allocation42_spill] sm:$0xff]  ;;  %v14862_v52 = vld [vmem:[#allocation45_spill] sm:$0xff] }
 0x321   : > { %3261 = vmatmul.mubr.bf16.gmra.mrb[72].mxu0 %v2964_v45  ;;  %3422 = vmatmul.mubr.bf16.gmra.mrb[72].mxu1 %v2966_v51  ;;  %v11549_v37 = vpop.eup %8803  ;;  %8823 = vpow2.f32 %v2241_v16  ;;  %v2251_v6 = vmul.f32 1.442695, %v2091_v25  ;;  %v2253_v39 = vmul.f32 1.442695, %v2092_v44  ;;  %v2281_v47 = vmul.f32 1.442695, %v2106_v58 }
 0x322   : > { %5843 = vrot.lane.b32.xlu0 %v9486_v28, %s9743_s26  ;;  %v11543_v9 = vpop.permute.xlu0 %1966  ;;  %v11555_v40 = vpop.eup %8805  ;;  %8825 = vpow2.f32 %v2275_v1  ;;  %v2257_v41 = vmul.f32 1.442695, %v2094_v4  ;;  %v2255_v54 = vmul.f32 1.442695, %v2093_v42  ;;  %v14863_v45 = vld [vmem:[#allocation46_spill] sm:$0xff]  ;;  %v14864_v51 = vld [vmem:[#allocation152_spill] sm:$0xff]  ;;  %v11584_v10 = vadd.f32 %v11490_v20, %v2528_v38 }
 0x323   : > { %v2111_v59 = vsub.f32 %v14858_v17, %v11543_v9  ;;  %3658 = vrot.lane.b32.xlu1 %v9489_v63, %s9743_s26  ;;  %v11563_v15 = vpop.permute.xlu1 %2796  ;;  %v11565_v16 = vpop.eup %8807  ;;  %8827 = vpow2.f32 %v2277_v33  ;;  %v2112_v12 = vsub.f32 %v14860_v48, %v11543_v9  ;;  %v2113_v28 = vsub.f32 %v14862_v52, %v11543_v9  ;;  %v9491_v44 = vld [vmem:[%s10263_s11 + $0xc0] sm:$0xff]   ;;  %v14868_v42 = vld [vmem:[#allocation34_spill] sm:$0xff] }
 0x324   : > { %14859 = vst [vmem:[#allocation150_spill] sm:$0xff] %v11563_v15  ;;  %8063 = vmatpush3.bf16.xpose.msra.mxu0 %v3784_v2  ;;  %v11571_v1 = vpop.eup %8809  ;;  %8829 = vpow2.f32 %v2279_v21  ;;  %v2114_v49 = vsub.f32 %v14863_v45, %v11543_v9  ;;  %14865 = vst [vmem:[#allocation30_spill] sm:$0xff] %v11584_v10  ;;  %v2537_v33 = vadd.f32 %v11565_v16, %v11555_v40  ;;  %v9493_v52 = vld [vmem:[%s10263_s11 + $0x80] sm:$0xff]   ;;  %v14900_v15 = vld [vmem:[#allocation57_spill] sm:$0xff] }
 0x325   : > { %8396 = vmatprep.subr.msk.bf16.mxu0 %vm455_vm0, %v14864_v51  ;;  %v11579_v58 = vpop.eup %8811  ;;  %8831 = vpow2.f32 %v2251_v6  ;;  %v11589_v3 = vadd.f32 %v11438_v5, %v2523_v46  ;;  %v2291_v32 = vmul.f32 1.442695, %v2111_v59  ;;  %v2532_v21 = vadd.f32 %v11501_v22, %v11495_v34  ;;  %v14867_v46 = vld [vmem:[#allocation32_spill] sm:$0xff]  ;;  %v14869_v22 = vld [vmem:[#allocation33_spill] sm:$0xff] }
 0x326   : > { %5827 = vrot.lane.b32.xlu0 %v9488_v13, %s9743_s26  ;;  %v11569_v43 = vpop.permute.xlu0 %2821  ;;  %8111 = vmatpush3.bf16.xpose.msra.mxu1 %v3832_v19  ;;  %v11591_v25 = vpop.eup %8813  ;;  %8833 = vpow2.f32 %v2253_v39  ;;  %v11599_v20 = vadd.f32 %v11549_v37, %v11545_v29  ;;  %v2293_v5 = vmul.f32 1.442695, %v2112_v12  ;;  %v2295_v34 = vmul.f32 1.442695, %v2113_v28  ;;  %v14870_v6 = vld [vmem:[#allocation36_spill] sm:$0xff]  ;;  %v9492_v59 = vld [vmem:[%s10263_s11 + $0x8] sm:$0xff]  }
 0x327   : > { %14861 = vst [vmem:[#allocation28_spill] sm:$0xff] %v11569_v43  ;;  %14866 = vst [vmem:[#allocation29_spill] sm:$0xff] %v11589_v3  ;;  %5875 = vrot.lane.b32.xlu1 %v9491_v44, %s9743_s26  ;;  %v1952_v9 = vpop.permute.xlu1 %1951  ;;  %v11601_v38 = vpop.eup %8815  ;;  %8835 = vpow2.f32 %v2257_v41  ;;  %v3787_v39 = vsel %vm455_vm0, %v11341_v0, 0  ;;  %v2297_v41 = vmul.f32 1.442695, %v2114_v49  ;;  %v14871_v12 = vld [vmem:[#allocation50_spill] sm:$0xff] }
 0x328   : > { %v2099_v23 = vsub.f32 %v14867_v46, %v1952_v9  ;;  %v2100_v57 = vsub.f32 %v14868_v42, %v1952_v9  ;;  %v11607_v14 = vpop.eup %8817  ;;  %8837 = vpow2.f32 %v2255_v54  ;;  %v2101_v2 = vsub.f32 %v14869_v22, %v1952_v9  ;;  %v14876_v42 = vld [vmem:[#allocation54_spill] sm:$0xff]  ;;  %v14890_v43 = vld [vmem:[#allocation48_spill] sm:$0xff] }
 0x329   : > { %v2102_v13 = vsub.f32 %v14870_v6, %v1952_v9  ;;  %v11611_v19 = vpop.eup %8819  ;;  %8839 = vpow2.f32 %v2281_v47  ;;  %v14873_v47 = vld [vmem:[#allocation51_spill] sm:$0xff]  ;;  %v2969_v49 = vpack.c.bf16 %v11607_v14, %v11565_v16  ;;  %v14875_v9 = vld [vmem:[#allocation53_spill] sm:$0xff]  ;;  %v9494_v22 = vld [vmem:[%s10263_s11 + $0x50] sm:$0xff]  }
 0x32a   : > { %5845 = vrot.lane.b32.xlu0 %v9490_v56, %s9743_s26  ;;  %v11605_v4 = vpop.permute.xlu0 %1976  ;;  %v2267_v17 = vmul.f32 1.442695, %v2099_v23  ;;  %v11617_v63 = vpop.eup %8821  ;;  %8841 = vpow2.f32 %v2291_v32  ;;  %v2269_v48 = vmul.f32 1.442695, %v2100_v57  ;;  %v2271_v44 = vmul.f32 1.442695, %v2101_v2 }
 0x32b   : > { %v2119_v54 = vsub.f32 %v14871_v12, %v11605_v4  ;;  %5859 = vrot.lane.b32.xlu1 %v9493_v52, %s9743_s26  ;;  %v11623_v28 = vpop.permute.xlu1 %2806  ;;  %v11625_v45 = vpop.eup %8823  ;;  %8843 = vpow2.f32 %v2293_v5  ;;  %v2273_v0 = vmul.f32 1.442695, %v2102_v13  ;;  %v2120_v51 = vsub.f32 %v14873_v47, %v11605_v4  ;;  %3268 = vmatprep.mubr.bf16.mxu0 %v2969_v49  ;;  %v9495_v13 = vld [vmem:[%s10263_s11 + $0xc8] sm:$0xff]   ;;  %v14877_v12 = vld [vmem:[#allocation39_spill] sm:$0xff] }
 0x32c   : > { %14872 = vst [vmem:[#allocation31_spill] sm:$0xff] %v11623_v28  ;;  %8065 = vmatpush3.bf16.xpose.msra.mxu0 %v3787_v39  ;;  %v11633_v32 = vpop.eup %8825  ;;  %8845 = vpow2.f32 %v2295_v34  ;;  %v2121_v46 = vsub.f32 %v14875_v9, %v11605_v4  ;;  %v2971_v5 = vpack.c.bf16 %v11611_v19, %v11625_v45  ;;  %v2122_v16 = vsub.f32 %v14876_v42, %v11605_v4 }
 0x32d   : > { %v11639_v23 = vpop.eup %8827  ;;  %8847 = vpow2.f32 %v2267_v17  ;;  %v2968_v57 = vpack.c.bf16 %v11601_v38, %v11555_v40  ;;  %v2970_v34 = vpack.c.bf16 %v11617_v63, %v11591_v25  ;;  %v2307_v6 = vmul.f32 1.442695, %v2119_v54 }
 0x32e   : > { %5829 = vrot.lane.b32.xlu0 %v9492_v59, %s9743_s26  ;;  %v11649_v2 = vpop.eup %8829  ;;  %8849 = vpow2.f32 %v2269_v48  ;;  %3429 = vmatprep.mubr.bf16.mxu1 %v2971_v5  ;;  %v2538_v4 = vadd.f32 %v11591_v25, %v2537_v33  ;;  %v11655_v17 = vadd.f32 %v11509_v61, %v2532_v21  ;;  %v2309_v59 = vmul.f32 1.442695, %v2120_v51  ;;  %v14878_v48 = vld [vmem:[#allocation41_spill] sm:$0xff]  ;;  %v14879_v33 = vld [vmem:[#allocation40_spill] sm:$0xff]  ;;  %v9496_v51 = vld [vmem:[%s10263_s11 + $0x10] sm:$0xff]  }
 0x32f   : > { %5877 = vrot.lane.b32.xlu1 %v9495_v13, %s9743_s26  ;;  %v1962_v39 = vpop.permute.xlu1 %1961  ;;  %v8832_v40 = vpop.eup %8831  ;;  %8851 = vpow2.f32 %v2273_v0  ;;  %3269 = vmatmul.mubr.bf16.gmra.mrb[76].mxu0 %v2968_v57  ;;  %v2311_v9 = vmul.f32 1.442695, %v2121_v46  ;;  %v14880_v61 = vld [vmem:[#allocation44_spill] sm:$0xff]  ;;  %v2313_v57 = vmul.f32 1.442695, %v2122_v16  ;;  %v9497_v46 = vld [vmem:[%s10263_s11 + $0x88] sm:$0xff]  }
 0x330   : > { %3430 = vmatmul.mubr.bf16.gmra.mrb[76].mxu1 %v2970_v34  ;;  %v2107_v52 = vsub.f32 %v14877_v12, %v1962_v39  ;;  %v2108_v54 = vsub.f32 %v14878_v48, %v1962_v39  ;;  %v8834_v49 = vpop.eup %8833  ;;  %8853 = vpow2.f32 %v2271_v44  ;;  %v2109_v25 = vsub.f32 %v14879_v33, %v1962_v39  ;;  %v14883_v12 = vld [vmem:[#allocation59_spill] sm:$0xff]  ;;  %v14885_v33 = vld [vmem:[#allocation61_spill] sm:$0xff] }
 0x331   : > { %v11631_v56 = vpop.permute.xlu0 %2831  ;;  %v2110_v21 = vsub.f32 %v14880_v61, %v1962_v39  ;;  %v11663_v5 = vpop.eup %8835  ;;  %8855 = vpow2.f32 %v2297_v41 }
 0x332   : > { %14874 = vst [vmem:[#allocation153_spill] sm:$0xff] %v11631_v56  ;;  %5847 = vrot.lane.b32.xlu0 %v9494_v22, %s9743_s26  ;;  %v2283_v0 = vmul.f32 1.442695, %v2107_v52  ;;  %v11667_v42 = vpop.eup %8837  ;;  %8857 = vpow2.f32 %v2307_v6  ;;  %v2285_v34 = vmul.f32 1.442695, %v2108_v54  ;;  %v14881_v22 = vld [vmem:[#allocation58_spill] sm:$0xff]  ;;  %v2973_v6 = vpack.c.bf16 %v11549_v37, %v8834_v49 }
 0x333   : > { %5861 = vrot.lane.b32.xlu1 %v9497_v46, %s9743_s26  ;;  %v11673_v13 = vpop.permute.xlu1 %2816  ;;  %v11675_v39 = vpop.eup %8839  ;;  %8859 = vpow2.f32 %v2309_v59  ;;  %v2289_v41 = vmul.f32 1.442695, %v2110_v21  ;;  %v2287_v54 = vmul.f32 1.442695, %v2109_v25  ;;  %v2975_v59 = vpack.c.bf16 %v11579_v58, %v11663_v5  ;;  %v14886_v21 = vld [vmem:[#allocation62_spill] sm:$0xff]  ;;  %v9498_v46 = vld [vmem:[%s10263_s11 + $0x58] sm:$0xff]  }
 0x334   : > { %14882 = vst [vmem:[#allocation42_spill] sm:$0xff] %v11673_v13  ;;  %v11682_v48 = vpop.eup %8841  ;;  %8861 = vpow2.f32 %v2311_v9  ;;  %3276 = vmatprep.mubr.bf16.mxu0 %v2973_v6  ;;  %v2972_v37 = vpack.c.bf16 %v11545_v29, %v8832_v40  ;;  %v2974_v9 = vpack.c.bf16 %v11571_v1, %v11667_v42  ;;  %v2547_v6 = vadd.f32 %v8834_v49, %v8832_v40  ;;  %v14889_v56 = vld [vmem:[#allocation49_spill] sm:$0xff]  ;;  %v9502_v13 = vld [vmem:[%s10263_s11 + $0x60] sm:$0xff]  }
 0x335   : > { %v11659_v47 = vpop.permute.xlu0 %1986  ;;  %8863 = vpow2.f32 %v2283_v0  ;;  %3437 = vmatprep.mubr.bf16.mxu1 %v2975_v59 }
 0x336   : > { %5831 = vrot.lane.b32.xlu0 %v9496_v51, %s9743_s26  ;;  %v2127_v44 = vsub.f32 %v14881_v22, %v11659_v47  ;;  %v2128_v52 = vsub.f32 %v14883_v12, %v11659_v47  ;;  %v2129_v61 = vsub.f32 %v14885_v33, %v11659_v47  ;;  %v11688_v51 = vpop.eup %8843  ;;  %v2130_v22 = vsub.f32 %v14886_v21, %v11659_v47  ;;  %v9499_v33 = vld [vmem:[%s10263_s11 + $0xd0] sm:$0xff]  }
 0x337   : > { %v11697_v25 = vpop.eup %8845  ;;  %8865 = vpow2.f32 %v2285_v34  ;;  %5879 = vrot.lane.b32.xlu1 %v9499_v33, %s9743_s26  ;;  %v1972_v0 = vpop.permute.xlu1 %1971  ;;  %v11702_v47 = vadd.f32 %v11625_v45, %v2538_v4  ;;  %3277 = vmatmul.mubr.bf16.gmra.mrb[80].mxu0 %v2972_v37  ;;  %v14891_v4 = vld [vmem:[#allocation52_spill] sm:$0xff] }
 0x338   : > { %v2323_v12 = vmul.f32 1.442695, %v2127_v44  ;;  %v8848_v29 = vpop.eup %8847  ;;  %8867 = vpow2.f32 %v2289_v41  ;;  %v2325_v21 = vmul.f32 1.442695, %v2128_v52  ;;  %3438 = vmatmul.mubr.bf16.gmra.mrb[80].mxu1 %v2974_v9  ;;  %v2116_v34 = vsub.f32 %v14889_v56, %v1972_v0  ;;  %v9500_v52 = vld [vmem:[%s10263_s11 + $0x18] sm:$0xff]  }
 0x339   : > { %v11680_v16 = vpop.permute.xlu0 %2841  ;;  %14887 = vst [vmem:[#allocation45_spill] sm:$0xff] %v11702_v47  ;;  %v8850_v59 = vpop.eup %8849  ;;  %8869 = vpow2.f32 %v2287_v54  ;;  %v2327_v33 = vmul.f32 1.442695, %v2129_v61  ;;  %v2117_v45 = vsub.f32 %v14890_v43, %v1972_v0  ;;  %v2118_v40 = vsub.f32 %v14891_v4, %v1972_v0  ;;  %v9501_v61 = vld [vmem:[%s10263_s11 + $0x90] sm:$0xff]  }
 0x33a   : > { %14884 = vst [vmem:[#allocation43_spill] sm:$0xff] %v11680_v16  ;;  %5849 = vrot.lane.b32.xlu0 %v9498_v46, %s9743_s26  ;;  %v14888_v46 = vld [vmem:[#allocation47_spill] sm:$0xff]  ;;  %v11710_v49 = vpop.eup %8851  ;;  %8871 = vpow2.f32 %v2313_v57  ;;  %v2329_v56 = vmul.f32 1.442695, %v2130_v22  ;;  %v2301_v9 = vmul.f32 1.442695, %v2116_v34 }
 0x33b   : > { %v2115_v16 = vsub.f32 %v14888_v46, %v1972_v0  ;;  %v11714_v37 = vpop.eup %8853  ;;  %8873 = vpow2.f32 %v2323_v12  ;;  %v14892_v46 = vld [vmem:[#allocation66_spill] sm:$0xff]  ;;  %5863 = vrot.lane.b32.xlu1 %v9501_v61, %s9743_s26  ;;  %v11720_v43 = vpop.permute.xlu1 %2826  ;;  %v2305_v57 = vmul.f32 1.442695, %v2118_v40  ;;  %v2977_v12 = vpack.c.bf16 %v11639_v23, %v8850_v59 }
 0x33c   : > { %14893 = vst [vmem:[#allocation46_spill] sm:$0xff] %v11720_v43  ;;  %v11722_v0 = vpop.eup %8855  ;;  %8875 = vpow2.f32 %v2325_v21  ;;  %v2979_v21 = vpack.c.bf16 %v11675_v39, %v11710_v49  ;;  %v14897_v40 = vld [vmem:[#allocation70_spill] sm:$0xff] }
 0x33d   : > { %v11706_v44 = vpop.permute.xlu0 %1996  ;;  %v2299_v41 = vmul.f32 1.442695, %v2115_v16  ;;  %v14894_v16 = vld [vmem:[#allocation67_spill] sm:$0xff]  ;;  %v11729_v34 = vpop.eup %8857  ;;  %8877 = vpow2.f32 %v2327_v33  ;;  %3284 = vmatprep.mubr.bf16.mxu0 %v2977_v12  ;;  %v2978_v33 = vpack.c.bf16 %v11649_v2, %v11714_v37  ;;  %v2557_v12 = vadd.f32 %v8850_v59, %v8848_v29 }
 0x33e   : > { %5833 = vrot.lane.b32.xlu0 %v9500_v52, %s9743_s26  ;;  %v2135_v54 = vsub.f32 %v14892_v46, %v11706_v44  ;;  %v2136_v4 = vsub.f32 %v14894_v16, %v11706_v44  ;;  %v2303_v52 = vmul.f32 1.442695, %v2117_v45  ;;  %v14896_v46 = vld [vmem:[#allocation69_spill] sm:$0xff]  ;;  %v11735_v43 = vpop.eup %8859  ;;  %v2138_v16 = vsub.f32 %v14897_v40, %v11706_v44  ;;  %3445 = vmatprep.mubr.bf16.mxu1 %v2979_v21 }
 0x33f   : > { %v2137_v61 = vsub.f32 %v14896_v46, %v11706_v44  ;;  %8879 = vpow2.f32 %v2299_v41  ;;  %v11744_v45 = vpop.eup %8861  ;;  %5881 = vrot.lane.b32.xlu1 %v9503_v8, %s9743_s26  ;;  %v1982_v41 = vpop.permute.xlu1 %1981  ;;  %v2548_v44 = vadd.f32 %v11667_v42, %v2547_v6  ;;  %v14901_v42 = vld [vmem:[#allocation56_spill] sm:$0xff] }
 0x340   : > { %14898 = vst [vmem:[#allocation32_spill] sm:$0xff] %v11744_v45  ;;  %8881 = vpow2.f32 %v2301_v9  ;;  %v2339_v46 = vmul.f32 1.442695, %v2135_v54  ;;  %v11749_v40 = vpop.eup %8863  ;;  %v2341_v28 = vmul.f32 1.442695, %v2136_v4  ;;  %3446 = vmatmul.mubr.bf16.gmra.mrb[84].mxu1 %v2978_v33  ;;  %v2124_v9 = vsub.f32 %v14900_v15, %v1982_v41  ;;  %v9504_v4 = vld [vmem:[%s10263_s11 + $0x20] sm:$0xff]  }
 0x341   : > { %v11727_v22 = vpop.permute.xlu0 %2851  ;;  %8883 = vpow2.f32 %v2305_v57  ;;  %v11755_v21 = vpop.eup %8865  ;;  %v2343_v8 = vmul.f32 1.442695, %v2137_v61  ;;  %v2125_v6 = vsub.f32 %v14901_v42, %v1982_v41  ;;  %v2345_v15 = vmul.f32 1.442695, %v2138_v16  ;;  %v9505_v61 = vld [vmem:[%s10263_s11 + $0x98] sm:$0xff]  }
 0x342   : > { %14895 = vst [vmem:[#allocation152_spill] sm:$0xff] %v11727_v22  ;;  %v2976_v22 = vpack.c.bf16 %v11633_v32, %v8848_v29  ;;  %5851 = vrot.lane.b32.xlu0 %v9502_v13, %s9743_s26  ;;  %v14899_v13 = vld [vmem:[#allocation55_spill] sm:$0xff]  ;;  %8885 = vpow2.f32 %v2303_v52  ;;  %v14902_v29 = vld [vmem:[#allocation60_spill] sm:$0xff]  ;;  %v11759_v62 = vpop.eup %8867  ;;  %v2317_v33 = vmul.f32 1.442695, %v2124_v9  ;;  %v2981_v16 = vpack.c.bf16 %v11688_v51, %v11755_v21 }
 0x343   : > { %v2123_v27 = vsub.f32 %v14899_v13, %v1982_v41  ;;  %v2126_v59 = vsub.f32 %v14902_v29, %v1982_v41  ;;  %8887 = vpow2.f32 %v2329_v56  ;;  %v14903_v13 = vld [vmem:[#allocation74_spill] sm:$0xff]  ;;  %5865 = vrot.lane.b32.xlu1 %v9505_v61, %s9743_s26  ;;  %v11769_v42 = vpop.permute.xlu1 %2836  ;;  %v14906_v56 = vld [vmem:[#allocation75_spill] sm:$0xff] }
 0x344   : > { %3285 = vmatmul.mubr.bf16.gmra.mrb[84].mxu0 %v2976_v22  ;;  %v11763_v22 = vpop.eup %8869  ;;  %8889 = vpow2.f32 %v2339_v46  ;;  %14904 = vst [vmem:[#allocation34_spill] sm:$0xff] %v11769_v42 }
 0x345   : > { %v11753_v54 = vpop.permute.xlu0 %2006  ;;  %v2315_v57 = vmul.f32 1.442695, %v2123_v27  ;;  %v11771_v41 = vpop.eup %8871  ;;  %8891 = vpow2.f32 %v2341_v28  ;;  %v2321_v27 = vmul.f32 1.442695, %v2126_v59  ;;  %v2983_v28 = vpack.c.bf16 %v11722_v0, %v11759_v62  ;;  %3292 = vmatprep.mubr.bf16.mxu0 %v2981_v16 }
 0x346   : > { %5835 = vrot.lane.b32.xlu0 %v9504_v4, %s9743_s26  ;;  %v2143_v52 = vsub.f32 %v14903_v13, %v11753_v54  ;;  %14905 = vst [vmem:[#allocation33_spill] sm:$0xff] %v11771_v41  ;;  %v2144_v29 = vsub.f32 %v14906_v56, %v11753_v54  ;;  %v11779_v9 = vpop.eup %8873  ;;  %8893 = vpow2.f32 %v2343_v8  ;;  %v2319_v4 = vmul.f32 1.442695, %v2125_v6  ;;  %v14909_v13 = vld [vmem:[#allocation77_spill] sm:$0xff]  ;;  %v14911_v56 = vld [vmem:[#allocation78_spill] sm:$0xff] }
 0x347   : > { %14908 = vst [vmem:[#allocation50_spill] sm:$0xff] %v11779_v9  ;;  %v2145_v61 = vsub.f32 %v14909_v13, %v11753_v54  ;;  %v11785_v59 = vpop.eup %8875  ;;  %8895 = vpow2.f32 %v2315_v57  ;;  %v2146_v42 = vsub.f32 %v14911_v56, %v11753_v54  ;;  %v2982_v8 = vpack.c.bf16 %v11697_v25, %v11763_v22  ;;  %v9506_v6 = vld [vmem:[%s10263_s11 + $0x68] sm:$0xff]   ;;  %3453 = vmatprep.mubr.bf16.mxu1 %v2983_v28  ;;  %v1992_v57 = vpop.permute.xlu1 %1991 }
 0x348   : > { %14910 = vst [vmem:[#allocation51_spill] sm:$0xff] %v11785_v59  ;;  %v11795_v13 = vpop.eup %8877  ;;  %8897 = vpow2.f32 %v2317_v33  ;;  %v2355_v36 = vmul.f32 1.442695, %v2143_v52  ;;  %5883 = vrot.lane.b32.xlu1 %v9507_v30, %s9743_s26  ;;  %v11800_v54 = vadd.f32 %v11663_v5, %v2548_v44  ;;  %v2558_v16 = vadd.f32 %v11714_v37, %v2557_v12  ;;  %v14915_v52 = vld [vmem:[#allocation65_spill] sm:$0xff]  ;;  %v14916_v44 = vld [vmem:[#allocation64_spill] sm:$0xff] }
 0x349   : > { %v11777_v46 = vpop.permute.xlu0 %2861  ;;  %14912 = vst [vmem:[#allocation53_spill] sm:$0xff] %v11795_v13  ;;  %v11803_v56 = vpop.eup %8879  ;;  %8899 = vpow2.f32 %v2321_v27  ;;  %v2357_v7 = vmul.f32 1.442695, %v2144_v29  ;;  %3454 = vmatmul.mubr.bf16.gmra.mrb[88].mxu1 %v2982_v8  ;;  %v2132_v28 = vsub.f32 %v14915_v52, %v1992_v57  ;;  %v2359_v5 = vmul.f32 1.442695, %v2145_v61  ;;  %v14917_v12 = vld [vmem:[#allocation68_spill] sm:$0xff] }
 0x34a   : > { %14907 = vst [vmem:[#allocation36_spill] sm:$0xff] %v11777_v46  ;;  %v2980_v46 = vpack.c.bf16 %v11682_v48, %v11749_v40  ;;  %5853 = vrot.lane.b32.xlu0 %v9506_v6, %s9743_s26  ;;  %14913 = vst [vmem:[#allocation54_spill] sm:$0xff] %v11800_v54  ;;  %v14914_v6 = vld [vmem:[#allocation63_spill] sm:$0xff]  ;;  %v11809_v30 = vpop.eup %8881  ;;  %8901 = vpow2.f32 %v2319_v4  ;;  %v2133_v37 = vsub.f32 %v14916_v44, %v1992_v57  ;;  %v9508_v29 = vld [vmem:[%s10263_s11 + $0x28] sm:$0xff]   ;;  %v2361_v8 = vmul.f32 1.442695, %v2146_v42 }
 0x34b   : > { %v2131_v33 = vsub.f32 %v14914_v6, %v1992_v57  ;;  %v2134_v11 = vsub.f32 %v14917_v12, %v1992_v57  ;;  %v11813_v3 = vpop.eup %8883  ;;  %8903 = vpow2.f32 %v2345_v15  ;;  %v2333_v6 = vmul.f32 1.442695, %v2132_v28  ;;  %v14918_v52 = vld [vmem:[#allocation82_spill] sm:$0xff]  ;;  %v9509_v61 = vld [vmem:[%s10263_s11 + $0xa0] sm:$0xff]   ;;  %v11823_v44 = vpop.permute.xlu1 %2846 }
 0x34c   : > { %3293 = vmatmul.mubr.bf16.gmra.mrb[88].mxu0 %v2980_v46  ;;  %v11817_v46 = vpop.eup %8885  ;;  %8905 = vpow2.f32 %v2355_v36  ;;  %5867 = vrot.lane.b32.xlu1 %v9509_v61, %s9743_s26  ;;  %14919 = vst [vmem:[#allocation39_spill] sm:$0xff] %v11823_v44  ;;  %v2985_v36 = vpack.c.bf16 %v11735_v43, %v11809_v30 }
 0x34d   : > { %v11807_v18 = vpop.permute.xlu0 %2016  ;;  %v2331_v27 = vmul.f32 1.442695, %v2131_v33  ;;  %v11825_v57 = vpop.eup %8887  ;;  %8907 = vpow2.f32 %v2357_v7  ;;  %v2337_v15 = vmul.f32 1.442695, %v2134_v11  ;;  %v14921_v33 = vld [vmem:[#allocation83_spill] sm:$0xff]  ;;  %v2987_v7 = vpack.c.bf16 %v11771_v41, %v11813_v3 }
 0x34e   : > { %5837 = vrot.lane.b32.xlu0 %v9508_v29, %s9743_s26  ;;  %v2151_v4 = vsub.f32 %v14918_v52, %v11807_v18  ;;  %14920 = vst [vmem:[#allocation41_spill] sm:$0xff] %v11825_v57  ;;  %v2152_v12 = vsub.f32 %v14921_v33, %v11807_v18  ;;  %v11833_v28 = vpop.eup %8889  ;;  %8909 = vpow2.f32 %v2359_v5  ;;  %v2335_v29 = vmul.f32 1.442695, %v2133_v37  ;;  %v14924_v52 = vld [vmem:[#allocation85_spill] sm:$0xff]  ;;  %v14926_v33 = vld [vmem:[#allocation87_spill] sm:$0xff]  ;;  %3300 = vmatprep.mubr.bf16.mxu0 %v2985_v36  ;;  %v9510_v37 = vld [vmem:[%s10263_s11 + $0x70] sm:$0xff]  }
 0x34f   : > { %14923 = vst [vmem:[#allocation44_spill] sm:$0xff] %v11833_v28  ;;  %v2153_v61 = vsub.f32 %v14924_v52, %v11807_v18  ;;  %v11839_v11 = vpop.eup %8891  ;;  %8911 = vpow2.f32 %v2331_v27  ;;  %v2154_v44 = vsub.f32 %v14926_v33, %v11807_v18  ;;  %v2986_v5 = vpack.c.bf16 %v11744_v45, %v11817_v46  ;;  %3461 = vmatprep.mubr.bf16.mxu1 %v2987_v7  ;;  %v2002_v27 = vpop.permute.xlu1 %2001  ;;  %v14931_v7 = vld [vmem:[#allocation73_spill] sm:$0xff]  ;;  %v14960_v45 = vld [vmem:[#allocation110_spill] sm:$0xff] }
 0x350   : > { %14925 = vst [vmem:[#allocation58_spill] sm:$0xff] %v11839_v11  ;;  %v11849_v52 = vpop.eup %8893  ;;  %8913 = vpow2.f32 %v2333_v6  ;;  %v2371_v54 = vmul.f32 1.442695, %v2151_v4  ;;  %5885 = vrot.lane.b32.xlu1 %v9511_v35, %s9743_s26  ;;  %v11854_v18 = vadd.f32 %v11710_v49, %v2558_v16  ;;  %v11858_v36 = vadd.f32 %v11515_v60, %v11655_v17  ;;  %v14930_v6 = vld [vmem:[#allocation71_spill] sm:$0xff]  ;;  %v14932_v60 = vld [vmem:[#allocation72_spill] sm:$0xff] }
 0x351   : > { %v11831_v42 = vpop.permute.xlu0 %2871  ;;  %14927 = vst [vmem:[#allocation59_spill] sm:$0xff] %v11849_v52  ;;  %v11860_v33 = vpop.eup %8895  ;;  %8915 = vpow2.f32 %v2337_v15  ;;  %3462 = vmatmul.mubr.bf16.gmra.mrb[92].mxu1 %v2986_v5  ;;  %v2139_v4 = vsub.f32 %v14930_v6, %v2002_v27  ;;  %v2140_v47 = vsub.f32 %v14931_v7, %v2002_v27  ;;  %v2375_v16 = vmul.f32 1.442695, %v2153_v61  ;;  %v14934_v7 = vld [vmem:[#allocation91_spill] sm:$0xff]  ;;  %v9513_v61 = vld [vmem:[%s10263_s11 + $0xa8] sm:$0xff]  }
 0x352   : > { %14922 = vst [vmem:[#allocation40_spill] sm:$0xff] %v11831_v42  ;;  %v2984_v42 = vpack.c.bf16 %v11729_v34, %v11803_v56  ;;  %5855 = vrot.lane.b32.xlu0 %v9510_v37, %s9743_s26  ;;  %14928 = vst [vmem:[#allocation61_spill] sm:$0xff] %v11854_v18  ;;  %v2373_v37 = vmul.f32 1.442695, %v2152_v12  ;;  %v11866_v49 = vpop.eup %8897  ;;  %8917 = vpow2.f32 %v2335_v29  ;;  %v2141_v17 = vsub.f32 %v14932_v60, %v2002_v27  ;;  %v9512_v12 = vld [vmem:[%s10263_s11 + $0x30] sm:$0xff]  }
 0x353   : > { %14929 = vst [vmem:[#allocation62_spill] sm:$0xff] %v11858_v36  ;;  %v14933_v36 = vld [vmem:[#allocation76_spill] sm:$0xff]  ;;  %v11870_v41 = vpop.eup %8899  ;;  %8919 = vpow2.f32 %v2361_v8  ;;  %v2347_v15 = vmul.f32 1.442695, %v2139_v4  ;;  %v2377_v5 = vmul.f32 1.442695, %v2154_v44  ;;  %v11880_v60 = vpop.permute.xlu1 %2856 }
 0x354   : > { %3301 = vmatmul.mubr.bf16.gmra.mrb[92].mxu0 %v2984_v42  ;;  %v2142_v18 = vsub.f32 %v14933_v36, %v2002_v27  ;;  %v11874_v42 = vpop.eup %8901  ;;  %8921 = vpow2.f32 %v2371_v54  ;;  %v2349_v6 = vmul.f32 1.442695, %v2140_v47  ;;  %5869 = vrot.lane.b32.xlu1 %v9513_v61, %s9743_s26  ;;  %14935 = vst [vmem:[#allocation47_spill] sm:$0xff] %v11880_v60  ;;  %v14937_v36 = vld [vmem:[#allocation92_spill] sm:$0xff]  ;;  %v2989_v54 = vpack.c.bf16 %v11785_v59, %v11866_v49 }
 0x355   : > { %v11864_v35 = vpop.permute.xlu0 %2026  ;;  %v11882_v27 = vpop.eup %8903  ;;  %8923 = vpow2.f32 %v2373_v37  ;;  %v2991_v37 = vpack.c.bf16 %v11825_v57, %v11870_v41  ;;  %v9514_v57 = vld [vmem:[%s10263_s11 + $0xf0] sm:$0xff]  }
 0x356   : > { %5839 = vrot.lane.b32.xlu0 %v9512_v12, %s9743_s26  ;;  %v2159_v29 = vsub.f32 %v14934_v7, %v11864_v35  ;;  %14936 = vst [vmem:[#allocation49_spill] sm:$0xff] %v11882_v27  ;;  %v2353_v8 = vmul.f32 1.442695, %v2142_v18  ;;  %v2160_v4 = vsub.f32 %v14937_v36, %v11864_v35  ;;  %v11890_v47 = vpop.eup %8905  ;;  %8925 = vpow2.f32 %v2375_v16  ;;  %v14939_v7 = vld [vmem:[#allocation94_spill] sm:$0xff]  ;;  %v14941_v36 = vld [vmem:[#allocation96_spill] sm:$0xff]  ;;  %3308 = vmatprep.mubr.bf16.mxu0 %v2989_v54 }
 0x357   : > { %v2351_v12 = vmul.f32 1.442695, %v2141_v17  ;;  %v2161_v61 = vsub.f32 %v14939_v7, %v11864_v35  ;;  %v11896_v18 = vpop.eup %8907  ;;  %8927 = vpow2.f32 %v2347_v15  ;;  %v2162_v60 = vsub.f32 %v14941_v36, %v11864_v35  ;;  %3469 = vmatprep.mubr.bf16.mxu1 %v2991_v37  ;;  %v2012_v15 = vpop.permute.xlu1 %2011 }
 0x358   : > { %14940 = vst [vmem:[#allocation52_spill] sm:$0xff] %v11896_v18  ;;  %v2990_v16 = vpack.c.bf16 %v11795_v13, %v11874_v42  ;;  %v11905_v17 = vpop.eup %8909  ;;  %8929 = vpow2.f32 %v2349_v6  ;;  %v2387_v7 = vmul.f32 1.442695, %v2159_v29  ;;  %5887 = vrot.lane.b32.xlu1 %v9514_v57, %s9743_s26  ;;  %v2567_v35 = vadd.f32 %v11755_v21, %v11749_v40  ;;  %v14944_v29 = vld [vmem:[#allocation81_spill] sm:$0xff]  ;;  %v14945_v21 = vld [vmem:[#allocation80_spill] sm:$0xff] }
 0x359   : > { %v11888_v44 = vpop.permute.xlu0 %2881  ;;  %14942 = vst [vmem:[#allocation66_spill] sm:$0xff] %v11905_v17  ;;  %v2542_v54 = vadd.f32 %v11607_v14, %v11601_v38  ;;  %v11913_v36 = vpop.eup %8911  ;;  %8931 = vpow2.f32 %v2353_v8  ;;  %v2389_v13 = vmul.f32 1.442695, %v2160_v4  ;;  %v2148_v37 = vsub.f32 %v14944_v29, %v2012_v15  ;;  %v14946_v38 = vld [vmem:[#allocation84_spill] sm:$0xff]  ;;  %v9515_v29 = vld [vmem:[%s10263_s11 + $0xb0] sm:$0xff]  }
 0x35a   : > { %14938 = vst [vmem:[#allocation48_spill] sm:$0xff] %v11888_v44  ;;  %v2988_v44 = vpack.c.bf16 %v11779_v9, %v11860_v33  ;;  %2911 = vperm.xlu0 %8527, %v11474_v53   ;;  %3470 = vmatmul.mubr.bf16.gmra.mrb[96].mxu1 %v2990_v16  ;;  %v14943_v53 = vld [vmem:[#allocation79_spill] sm:$0xff]  ;;  %v11919_v57 = vpop.eup %8913  ;;  %8933 = vpow2.f32 %v2351_v12  ;;  %v2391_v40 = vmul.f32 1.442695, %v2161_v61  ;;  %v2149_v59 = vsub.f32 %v14945_v21, %v2012_v15  ;;  %v14947_v4 = vld [vmem:[#allocation100_spill] sm:$0xff]  ;;  %v14948_v12 = vld [vmem:[#allocation101_spill] sm:$0xff] }
 0x35b   : > { %v2147_v6 = vsub.f32 %v14943_v53, %v2012_v15  ;;  %v2150_v14 = vsub.f32 %v14946_v38, %v2012_v15  ;;  %v11923_v9 = vpop.eup %8915  ;;  %8935 = vpow2.f32 %v2377_v5  ;;  %v2365_v16 = vmul.f32 1.442695, %v2148_v37  ;;  %v11934_v15 = vpop.permute.xlu1 %2866 }
 0x35c   : > { %3309 = vmatmul.mubr.bf16.gmra.mrb[96].mxu0 %v2988_v44  ;;  %v11928_v44 = vpop.eup %8917  ;;  %8937 = vpow2.f32 %v2387_v7  ;;  %5871 = vrot.lane.b32.xlu1 %v9515_v29, %s9743_s26  ;;  %14949 = vst [vmem:[#allocation67_spill] sm:$0xff] %v11934_v15  ;;  %v2393_v5 = vmul.f32 1.442695, %v2162_v60  ;;  %v2993_v38 = vpack.c.bf16 %v11839_v11, %v11919_v57  ;;  %v2367_v37 = vmul.f32 1.442695, %v2149_v59 }
 0x35d   : > { %v11917_v10 = vpop.permute.xlu0 %2036  ;;  %v2363_v8 = vmul.f32 1.442695, %v2147_v6  ;;  %v11936_v21 = vpop.eup %8919  ;;  %8939 = vpow2.f32 %v2389_v13  ;;  %v2369_v6 = vmul.f32 1.442695, %v2150_v14  ;;  %v2995_v29 = vpack.c.bf16 %v11882_v27, %v11923_v9 }
 0x35e   : > { %v2167_v53 = vsub.f32 %v14947_v4, %v11917_v10  ;;  %2921 = vperm.xlu0 %8527, %v11539_v55   ;;  %v2168_v61 = vsub.f32 %v14948_v12, %v11917_v10  ;;  %14950 = vst [vmem:[#allocation69_spill] sm:$0xff] %v11936_v21  ;;  %v11942_v7 = vpop.eup %8921  ;;  %8941 = vpow2.f32 %v2391_v40  ;;  %v14952_v12 = vld [vmem:[#allocation103_spill] sm:$0xff]  ;;  %3316 = vmatprep.mubr.bf16.mxu0 %v2993_v38  ;;  %v14954_v38 = vld [vmem:[#allocation88_spill] sm:$0xff] }
 0x35f   : > { %v2169_v55 = vsub.f32 %v14952_v12, %v11917_v10  ;;  %v11948_v15 = vpop.eup %8923  ;;  %8943 = vpow2.f32 %v2363_v8  ;;  %v2992_v60 = vpack.c.bf16 %v11833_v28, %v11913_v36  ;;  %v2994_v14 = vpack.c.bf16 %v11849_v52, %v11928_v44  ;;  %3477 = vmatprep.mubr.bf16.mxu1 %v2995_v29  ;;  %v2022_v40 = vpop.permute.xlu1 %2021  ;;  %v14955_v52 = vld [vmem:[#allocation90_spill] sm:$0xff]  ;;  %v14956_v28 = vld [vmem:[#allocation89_spill] sm:$0xff] }
 0x360   : > { %v2403_v13 = vmul.f32 1.442695, %v2167_v53  ;;  %8945 = vpow2.f32 %v2365_v16  ;;  %v2405_v59 = vmul.f32 1.442695, %v2168_v61  ;;  %2906 = vperm.xlu1 %8528, %v11470_v26   ;;  %v2568_v12 = vadd.f32 %v11763_v22, %v2567_v35  ;;  %v14957_v22 = vld [vmem:[#allocation105_spill] sm:$0xff] }
 0x361   : > { %v11940_v4 = vpop.permute.xlu0 %2891  ;;  %v2543_v8 = vadd.f32 %v11617_v63, %v2542_v54  ;;  %8947 = vpow2.f32 %v2369_v6  ;;  %v2155_v27 = vsub.f32 %v14954_v38, %v2022_v40  ;;  %v2156_v11 = vsub.f32 %v14955_v52, %v2022_v40  ;;  %v14958_v63 = vld [vmem:[#allocation93_spill] sm:$0xff] }
 0x362   : > { %14951 = vst [vmem:[#allocation70_spill] sm:$0xff] %v11940_v4  ;;  %v11954_v4 = vpop.eup %8925  ;;  %3478 = vmatmul.mubr.bf16.gmra.mrb[100].mxu1 %v2994_v14  ;;  %v2157_v16 = vsub.f32 %v14956_v28, %v2022_v40  ;;  %8949 = vpow2.f32 %v2367_v37  ;;  %v2170_v35 = vsub.f32 %v14957_v22, %v11917_v10  ;;  %v2158_v54 = vsub.f32 %v14958_v63, %v2022_v40  ;;  %v14959_v14 = vld [vmem:[#allocation109_spill] sm:$0xff] }
 0x363   : > { %14953 = vst [vmem:[#allocation55_spill] sm:$0xff] %v11954_v4  ;;  %v11959_v53 = vpop.eup %8927  ;;  %8951 = vpow2.f32 %v2393_v5  ;;  %v2379_v6 = vmul.f32 1.442695, %v2155_v27  ;;  %v11980_v10 = vpop.permute.xlu1 %2876  ;;  %v2407_v5 = vmul.f32 1.442695, %v2169_v55 }
 0x364   : > { %3317 = vmatmul.mubr.bf16.gmra.mrb[100].mxu0 %v2992_v60  ;;  %v11966_v29 = vpop.eup %8929  ;;  %v2381_v60 = vmul.f32 1.442695, %v2156_v11  ;;  %8953 = vpow2.f32 %v2403_v13  ;;  %v2383_v28 = vmul.f32 1.442695, %v2157_v16  ;;  %2916 = vperm.xlu1 %8528, %v11531_v24   ;;  %14961 = vst [vmem:[#allocation57_spill] sm:$0xff] %v11980_v10  ;;  %v12006_v24 = vadd.f32 %v11611_v19, %v2543_v8 }
 0x365   : > { %v11964_v61 = vpop.permute.xlu0 %2046  ;;  %v11971_v26 = vpop.eup %8931  ;;  %8955 = vpow2.f32 %v2405_v59  ;;  %v2385_v27 = vmul.f32 1.442695, %v2158_v54  ;;  %v2997_v11 = vpack.c.bf16 %v11896_v18, %v11966_v29  ;;  %v2409_v13 = vmul.f32 1.442695, %v2170_v35  ;;  %v14970_v18 = vld [vmem:[#allocation98_spill] sm:$0xff] }
 0x366   : > { %v2175_v52 = vsub.f32 %v14959_v14, %v11964_v61  ;;  %v11975_v38 = vpop.eup %8933  ;;  %v2176_v37 = vsub.f32 %v14960_v45, %v11964_v61  ;;  %8957 = vpow2.f32 %v2379_v6  ;;  %v14964_v45 = vld [vmem:[#allocation112_spill] sm:$0xff]  ;;  %v2999_v14 = vpack.c.bf16 %v11936_v21, %v11971_v26  ;;  %14966 = vst [vmem:[#allocation75_spill] sm:$0xff] %v12006_v24  ;;  %v14969_v21 = vld [vmem:[#allocation99_spill] sm:$0xff] }
 0x367   : > { %v11982_v40 = vpop.eup %8935  ;;  %v2177_v16 = vsub.f32 %v14964_v45, %v11964_v61  ;;  %8959 = vpow2.f32 %v2381_v60  ;;  %3324 = vmatprep.mubr.bf16.mxu0 %v2997_v11  ;;  %v2996_v59 = vpack.c.bf16 %v11890_v47, %v11959_v53  ;;  %v2998_v54 = vpack.c.bf16 %v11905_v17, %v11975_v38  ;;  %v2032_v6 = vpop.permute.xlu1 %2031 }
 0x368   : > { %14962 = vst [vmem:[#allocation56_spill] sm:$0xff] %v11982_v40  ;;  %v11988_v63 = vpop.eup %8937  ;;  %v2419_v55 = vmul.f32 1.442695, %v2175_v52  ;;  %8961 = vpow2.f32 %v2383_v28  ;;  %v2421_v35 = vmul.f32 1.442695, %v2176_v37  ;;  %3485 = vmatprep.mubr.bf16.mxu1 %v2999_v14  ;;  %v12003_v45 = vadd.f32 %v11759_v62, %v2568_v12  ;;  %v14968_v52 = vld [vmem:[#allocation97_spill] sm:$0xff] }
 0x369   : > { %v11986_v22 = vpop.permute.xlu0 %2901  ;;  %v11994_v10 = vpop.eup %8939  ;;  %8963 = vpow2.f32 %v2385_v27  ;;  %v2163_v11 = vsub.f32 %v14968_v52, %v2032_v6  ;;  %v2164_v17 = vsub.f32 %v14969_v21, %v2032_v6  ;;  %v2165_v28 = vsub.f32 %v14970_v18, %v2032_v6  ;;  %v14972_v62 = vld [vmem:[#allocation113_spill] sm:$0xff]  ;;  %v14973_v12 = vld [vmem:[#allocation102_spill] sm:$0xff] }
 0x36a   : > { %14963 = vst [vmem:[#allocation60_spill] sm:$0xff] %v11986_v22  ;;  %v12000_v22 = vpop.eup %8941  ;;  %14965 = vst [vmem:[#allocation74_spill] sm:$0xff] %v12003_v45  ;;  %3486 = vmatmul.mubr.bf16.gmra.mrb[104].mxu1 %v2998_v54  ;;  %8965 = vpow2.f32 %v2407_v5  ;;  %v2178_v19 = vsub.f32 %v14972_v62, %v11964_v61  ;;  %v2166_v8 = vsub.f32 %v14973_v12, %v2032_v6  ;;  %v14976_v18 = vld [vmem:[#allocation118_spill] sm:$0xff]  ;;  %v2423_v61 = vmul.f32 1.442695, %v2177_v16  ;;  %v14979_v16 = vld [vmem:[#allocation121_spill] sm:$0xff] }
 0x36b   : > { %v12008_v60 = vpop.eup %8943  ;;  %8967 = vpow2.f32 %v2409_v13  ;;  %v2395_v27 = vmul.f32 1.442695, %v2163_v11  ;;  %v2399_v21 = vmul.f32 1.442695, %v2165_v28  ;;  %v12026_v45 = vpop.permute.xlu1 %2886 }
 0x36c   : > { %14967 = vst [vmem:[#allocation77_spill] sm:$0xff] %v12008_v60  ;;  %3325 = vmatmul.mubr.bf16.gmra.mrb[104].mxu0 %v2996_v59  ;;  %v12015_v14 = vpop.eup %8945  ;;  %v2397_v59 = vmul.f32 1.442695, %v2164_v17  ;;  %8969 = vpow2.f32 %v2419_v55  ;;  %14977 = vst [vmem:[#allocation64_spill] sm:$0xff] %v12026_v45  ;;  %v2401_v62 = vmul.f32 1.442695, %v2166_v8  ;;  %v3000_v8 = vpack.c.bf16 %v11942_v7, %v12008_v60 }
 0x36d   : > { %v12013_v37 = vpop.permute.xlu0 %2056  ;;  %14971 = vst [vmem:[#allocation78_spill] sm:$0xff] %v12015_v14  ;;  %v12020_v24 = vpop.eup %8947  ;;  %8971 = vpow2.f32 %v2421_v35  ;;  %v3001_v6 = vpack.c.bf16 %v11948_v15, %v12015_v14  ;;  %v2425_v17 = vmul.f32 1.442695, %v2178_v19  ;;  %v14978_v55 = vld [vmem:[#allocation117_spill] sm:$0xff] }
 0x36e   : > { %14974 = vst [vmem:[#allocation63_spill] sm:$0xff] %v12020_v24  ;;  %v12022_v54 = vpop.eup %8949  ;;  %v2184_v52 = vsub.f32 %v14976_v18, %v12013_v37  ;;  %8973 = vpow2.f32 %v2395_v27  ;;  %v2183_v28 = vsub.f32 %v14978_v55, %v12013_v37  ;;  %v3003_v12 = vpack.c.bf16 %v11982_v40, %v12020_v24  ;;  %v14983_v40 = vld [vmem:[#allocation107_spill] sm:$0xff] }
 0x36f   : > { %14975 = vst [vmem:[#allocation65_spill] sm:$0xff] %v12022_v54  ;;  %v12028_v5 = vpop.eup %8951  ;;  %8975 = vpow2.f32 %v2397_v59  ;;  %v2186_v35 = vsub.f32 %v14979_v16, %v12013_v37  ;;  %3332 = vmatprep.mubr.bf16.mxu0 %v3001_v6  ;;  %v3002_v19 = vpack.c.bf16 %v11954_v4, %v12022_v54  ;;  %v2042_v45 = vpop.permute.xlu1 %2041  ;;  %v2577_v24 = vadd.f32 %v11809_v30, %v11803_v56  ;;  %v14981_v6 = vld [vmem:[#allocation106_spill] sm:$0xff]  ;;  %v14982_v54 = vld [vmem:[#allocation108_spill] sm:$0xff] }
 0x370   : > { %v12032_v11 = vpop.eup %8953  ;;  %8977 = vpow2.f32 %v2399_v21  ;;  %v2437_v55 = vmul.f32 1.442695, %v2184_v52  ;;  %3493 = vmatprep.mubr.bf16.mxu1 %v3003_v12  ;;  %v2553_v59 = vadd.f32 %v11571_v1, %v11599_v20  ;;  %v2171_v14 = vsub.f32 %v14981_v6, %v2042_v45  ;;  %v14984_v56 = vld [vmem:[#allocation120_spill] sm:$0xff]  ;;  %v14985_v1 = vld [vmem:[#allocation111_spill] sm:$0xff] }
 0x371   : > { %v3703_v13 = vpop.permute.xlu0 %3702  ;;  %v12038_v18 = vpop.eup %8955  ;;  %8979 = vpow2.f32 %v2401_v62  ;;  %v2172_v60 = vsub.f32 %v14982_v54, %v2042_v45  ;;  %v2173_v21 = vsub.f32 %v14983_v40, %v2042_v45  ;;  %v2174_v20 = vsub.f32 %v14985_v1, %v2042_v45 }
 0x372   : > { %v12046_v27 = vpop.eup %8957  ;;  %3494 = vmatmul.mubr.bf16.gmra.mrb[108].mxu1 %v3002_v19  ;;  %8981 = vpow2.f32 %v2423_v61  ;;  %v12068_v19 = vmul.f32 1.442695, %v2183_v28  ;;  %v2411_v54 = vmul.f32 1.442695, %v2171_v14  ;;  %v2441_v4 = vmul.f32 1.442695, %v2186_v35 }
 0x373   : > { %v12052_v16 = vpop.eup %8959  ;;  %8983 = vpow2.f32 %v2425_v17  ;;  %v2413_v40 = vmul.f32 1.442695, %v2172_v60  ;;  %v2415_v61 = vmul.f32 1.442695, %v2173_v21  ;;  %v12074_v45 = vpop.permute.xlu1 %2896  ;;  %v3004_v17 = vpack.c.bf16 %v11988_v63, %v12046_v27 }
 0x374   : > { %14980 = vst [vmem:[#allocation68_spill] sm:$0xff] %v12052_v16  ;;  %3333 = vmatmul.mubr.bf16.gmra.mrb[108].mxu0 %v3000_v8  ;;  %v12059_v12 = vpop.eup %8961  ;;  %v3005_v62 = vpack.c.bf16 %v11994_v10, %v12052_v16  ;;  %8985 = vpow2.f32 %v2437_v55  ;;  %14986 = vst [vmem:[#allocation82_spill] sm:$0xff] %v12074_v45  ;;  %v2417_v16 = vmul.f32 1.442695, %v2174_v20  ;;  %v2578_v28 = vadd.f32 %v11817_v46, %v2577_v24 }
 0x375   : > { %v12057_v52 = vpop.permute.xlu0 %3672  ;;  %v12066_v8 = vpop.eup %8963  ;;  %v3006_v60 = vpack.c.bf16 %v12000_v22, %v12059_v12  ;;  %v3835_v55 = vsel %vm455_vm0, %v3703_v13, 0  ;;  %8987 = vpow2.f32 %v2411_v54  ;;  %v12089_v21 = vadd.f32 %v11579_v58, %v2553_v59 }
 0x376   : > { %v12070_v6 = vpop.eup %8965  ;;  %3340 = vmatprep.mubr.bf16.mxu0 %v3005_v62  ;;  %v3007_v30 = vpack.c.bf16 %v12028_v5, %v12066_v8  ;;  %v2587_v20 = vadd.f32 %v11866_v49, %v11860_v33  ;;  %8989 = vpow2.f32 %v2413_v40  ;;  %v12096_v45 = vadd.f32 %v11813_v3, %v2578_v28 }
 0x377   : > { %v12076_v1 = vpop.eup %8967  ;;  %v2562_v24 = vadd.f32 %v11639_v23, %v11633_v32  ;;  %v2597_v46 = vadd.f32 %v11919_v57, %v11913_v36  ;;  %8991 = vpow2.f32 %v2415_v61  ;;  %v2052_v58 = vpop.permute.xlu1 %2051  ;;  %v2572_v33 = vadd.f32 %v11688_v51, %v11682_v48  ;;  %v14987_v32 = vld [vmem:[#allocation114_spill] sm:$0xff]  ;;  %v14988_v36 = vld [vmem:[#allocation116_spill] sm:$0xff]  ;;  %v14990_v48 = vld [vmem:[#allocation119_spill] sm:$0xff] }
 0x378   : > { %v12085_v35 = vpop.eup %8969  ;;  %3501 = vmatprep.mubr.bf16.mxu1 %v3007_v30  ;;  %v2588_v59 = vadd.f32 %v11874_v42, %v2587_v20  ;;  %v2607_v49 = vadd.f32 %v11966_v29, %v11959_v53  ;;  %8993 = vpow2.f32 %v2417_v16  ;;  %v2179_v23 = vsub.f32 %v14987_v32, %v2052_v58  ;;  %v14989_v30 = vld [vmem:[#allocation115_spill] sm:$0xff] }
 0x379   : > { %v12082_v14 = vpop.permute.xlu0 %3704  ;;  %v12093_v62 = vpop.eup %8971  ;;  %v2180_v57 = vsub.f32 %v14988_v36, %v2052_v58  ;;  %v2181_v54 = vsub.f32 %v14989_v30, %v2052_v58  ;;  %8995 = vpow2.f32 %v2441_v4  ;;  %v2182_v51 = vsub.f32 %v14990_v48, %v2052_v58 }
 0x37a   : > { %v12102_v13 = vpop.eup %8973  ;;  %3502 = vmatmul.mubr.bf16.gmra.mrb[112].mxu1 %v3006_v60  ;;  %v2427_v61 = vmul.f32 1.442695, %v2179_v23  ;;  %v12133_v32 = vadd.f32 %v11870_v41, %v2588_v59  ;;  %v2563_v36 = vadd.f32 %v11649_v2, %v2562_v24  ;;  %v2608_v48 = vadd.f32 %v11975_v38, %v2607_v49  ;;  %v14992_v24 = vld [vmem:[#allocation32_spill] sm:$0xff] }
 0x37b   : > { %v12109_v3 = vpop.eup %8975  ;;  %v3008_v29 = vpack.c.bf16 %v12032_v11, %v12102_v13  ;;  %v2431_v60 = vmul.f32 1.442695, %v2181_v54  ;;  %v2433_v4 = vmul.f32 1.442695, %v2182_v51  ;;  %v3719_v58 = vpop.permute.xlu1 %3718  ;;  %v2573_v54 = vadd.f32 %v11697_v25, %v2572_v33  ;;  %v14996_v33 = vld [vmem:[#allocation58_spill] sm:$0xff] }
 0x37c   : > { %3341 = vmatmul.mubr.bf16.gmra.mrb[112].mxu0 %v3004_v17  ;;  %v12116_v42 = vpop.eup %8977  ;;  %v3009_v53 = vpack.c.bf16 %v12038_v18, %v12109_v3  ;;  %v2429_v17 = vmul.f32 1.442695, %v2180_v57  ;;  %8997 = vpow2.f32 %v2427_v61  ;;  %8404 = vmatprep.subr.msk.bf16.mxu1 %vm455_vm0, %v3719_v58  ;;  %v2598_v57 = vadd.f32 %v11928_v44, %v2597_v46 }
 0x37d   : > { %v12114_v40 = vpop.permute.xlu0 %3674  ;;  %2515 = vadd.xlane.f32.xlu0 %v11414_v31  ;;  %v12124_v16 = vpop.eup %8979  ;;  %v3010_v28 = vpack.c.bf16 %v12070_v6, %v12116_v42  ;;  %v14991_v41 = vsub.f32 %v14984_v56, %v12013_v37  ;;  %v12151_v2 = vadd.f32 %v11675_v39, %v2563_v36  ;;  %v2582_v44 = vadd.f32 %v11735_v43, %v11729_v34  ;;  %v14993_v34 = vld [vmem:[#allocation50_spill] sm:$0xff] }
 0x37e   : > { %v12128_v20 = vpop.eup %8981  ;;  %3348 = vmatprep.mubr.bf16.mxu0 %v3009_v53  ;;  %v3011_v31 = vpack.c.bf16 %v12076_v1, %v12124_v16  ;;  %8999 = vpow2.f32 %v2429_v17  ;;  %8113 = vmatpush3.bf16.xpose.msra.mxu1 %v3835_v55  ;;  %v12156_v25 = vadd.f32 %v11923_v9, %v2598_v57  ;;  %v12159_v38 = vadd.f32 %v11722_v0, %v2573_v54  ;;  %v14994_v55 = vld [vmem:[#allocation51_spill] sm:$0xff]  ;;  %v14995_v0 = vld [vmem:[#allocation44_spill] sm:$0xff]  ;;  %v14998_v17 = vld [vmem:[#allocation33_spill] sm:$0xff] }
 0x37f   : > { %v12136_v30 = vpop.eup %8983  ;;  %v2439_v59 = vmul.f32 1.442695, %v14991_v41  ;;  %9001 = vpow2.f32 %v2431_v60  ;;  %v12162_v37 = vadd.f32 %v11971_v26, %v2608_v48  ;;  %v3689_v39 = vpop.permute.xlu1 %3688  ;;  %v2583_v43 = vadd.f32 %v14992_v24, %v2582_v44  ;;  %v15001_v48 = vld [vmem:[#allocation52_spill] sm:$0xff] }
 0x380   : > { %v12144_v51 = vpop.eup %8985  ;;  %3509 = vmatprep.mubr.bf16.mxu1 %v3011_v31  ;;  %9003 = vpow2.f32 %v2433_v4  ;;  %v2592_v46 = vadd.f32 %v14994_v55, %v14993_v34  ;;  %v2602_v49 = vadd.f32 %v14996_v33, %v14995_v0  ;;  %8397 = vmatprep.subr.msk.bf16.mxu0 %vm455_vm0, %v3689_v39  ;;  %v15000_v4 = vld [vmem:[#allocation59_spill] sm:$0xff]  ;;  %v3838_v36 = vsel %vm455_vm0, %v12082_v14, 0  ;;  %v15002_v39 = vld [vmem:[#allocation41_spill] sm:$0xff]  ;;  %v15005_v55 = vld [vmem:[#allocation66_spill] sm:$0xff] }
 0x381   : > { %v12139_v23 = vpop.permute.xlu0 %3706  ;;  %2520 = vadd.xlane.f32.xlu0 %v11468_v50  ;;  %v12164_v56 = vpop.eup %8987  ;;  %v3790_v50 = vsel %vm455_vm0, %v12057_v52, 0  ;;  %9005 = vpow2.f32 %v12068_v19  ;;  %v14997_v52 = vld [vmem:[#allocation30_spill] sm:$0xff]  ;;  %v12185_v60 = vadd.f32 %v14998_v17, %v2583_v43  ;;  %v2612_v41 = vadd.f32 %v15001_v48, %v11890_v47  ;;  %v15003_v14 = vld [vmem:[#allocation49_spill] sm:$0xff] }
 0x382   : > { %v12171_v9 = vpop.eup %8989  ;;  %3510 = vmatmul.mubr.bf16.gmra.mrb[116].mxu1 %v3010_v28  ;;  %9007 = vpow2.f32 %v2439_v59  ;;  %8067 = vmatpush3.bf16.xpose.msra.mxu0 %v3790_v50  ;;  %v2603_v31 = vadd.f32 %v15000_v4, %v2602_v49  ;;  %v3012_v59 = vpack.c.bf16 %v12085_v35, %v12164_v56  ;;  %v15004_v34 = vld [vmem:[#allocation45_spill] sm:$0xff]  ;;  %v2632_v33 = vadd.f32 %v11994_v10, %v11988_v63 }
 0x383   : > { %v12178_v53 = vpop.eup %8991  ;;  %v3013_v61 = vpack.c.bf16 %v12093_v62, %v12171_v9  ;;  %v3721_v54 = vpop.permute.xlu1 %3720  ;;  %v2613_v47 = vadd.f32 %v15005_v55, %v2612_v41  ;;  %v2642_v49 = vadd.f32 %v12038_v18, %v12032_v11 }
 0x384   : > { %3349 = vmatmul.mubr.bf16.gmra.mrb[116].mxu0 %v3008_v29  ;;  %v12187_v19 = vpop.eup %8993  ;;  %v14999_v29 = vld [vmem:[#allocation53_spill] sm:$0xff]  ;;  %v3014_v44 = vpack.c.bf16 %v12128_v20, %v12178_v53  ;;  %8405 = vmatprep.subr.msk.bf16.mxu1 %vm455_vm0, %v3721_v54  ;;  %v12208_v43 = vadd.f32 %v15003_v14, %v2603_v31  ;;  %v2652_v31 = vadd.f32 %v12093_v62, %v12085_v35 }
 0x385   : > { %v12174_v26 = vpop.permute.xlu0 %3676  ;;  %2530 = vadd.xlane.f32.xlu0 %v14997_v52  ;;  %v2593_v28 = vadd.f32 %v14999_v29, %v2592_v46  ;;  %v12191_v58 = vpop.eup %8995  ;;  %3356 = vmatprep.mubr.bf16.mxu0 %v3013_v61  ;;  %v3015_v57 = vpack.c.bf16 %v12136_v30, %v12187_v19  ;;  %v2622_v46 = vadd.f32 %v11948_v15, %v11942_v7  ;;  %v3793_v61 = vsel %vm455_vm0, %v12114_v40, 0  ;;  %v15006_v29 = vld [vmem:[#allocation154_spill] sm:$0xff]  ;;  %v15008_v15 = vld [vmem:[#allocation55_spill] sm:$0xff] }
 0x386   : > { %v12214_v0 = vpop.eup %8997  ;;  %8115 = vmatpush3.bf16.xpose.msra.mxu1 %v3838_v36  ;;  %v15009_v40 = vld [vmem:[#allocation54_spill] sm:$0xff]  ;;  %v15010_v36 = vld [vmem:[#allocation56_spill] sm:$0xff]  ;;  %v2633_v35 = vadd.f32 %v12000_v22, %v2632_v33  ;;  %v2643_v48 = vadd.f32 %v12070_v6, %v2642_v49  ;;  %v2653_v22 = vadd.f32 %v12128_v20, %v2652_v31  ;;  %v3796_v33 = vsel %vm455_vm0, %v12174_v26, 0  ;;  %v15018_v31 = vld [vmem:[#allocation77_spill] sm:$0xff] }
 0x387   : > { %v12205_v24 = vadd.f32 %v15002_v39, %v2593_v28  ;;  %3517 = vmatprep.mubr.bf16.mxu1 %v3015_v57  ;;  %v3691_v17 = vpop.permute.xlu1 %3690  ;;  %v15007_v28 = vld [vmem:[#allocation69_spill] sm:$0xff]  ;;  %v2623_v7 = vadd.f32 %v15008_v15, %v2622_v46  ;;  %v15013_v46 = vld [vmem:[#allocation62_spill] sm:$0xff] }
 0x388   : > { %v12220_v52 = vpop.eup %8999  ;;  %2510 = vadd.xlane.f32.xlu1 %v15006_v29  ;;  %v12226_v4 = vadd.f32 %v15007_v28, %v2613_v47  ;;  %8398 = vmatprep.subr.msk.bf16.mxu0 %vm455_vm0, %v3691_v17  ;;  %v15011_v39 = vld [vmem:[#allocation29_spill] sm:$0xff]  ;;  %v12256_v14 = vadd.f32 %v12028_v5, %v2633_v35  ;;  %v12271_v5 = vadd.f32 %v12136_v30, %v2653_v22  ;;  %v15016_v29 = vld [vmem:[#allocation75_spill] sm:$0xff]  ;;  %v15021_v35 = vld [vmem:[#allocation68_spill] sm:$0xff] }
 0x389   : > { %v3709_v50 = vpop.permute.xlu0 %3708  ;;  %2540 = vadd.xlane.f32.xlu0 %v15004_v34  ;;  %v12231_v10 = vpop.eup %9001  ;;  %v3017_v11 = vpack.c.bf16 %v12144_v51, %v12220_v52  ;;  %v12242_v57 = vadd.f32 %v15010_v36, %v2623_v7  ;;  %v15012_v47 = vld [vmem:[#allocation61_spill] sm:$0xff] }
 0x38a   : > { %3518 = vmatmul.mubr.bf16.gmra.mrb[120].mxu1 %v3014_v44  ;;  %v12237_v18 = vpop.eup %9003  ;;  %8069 = vmatpush3.bf16.xpose.msra.mxu0 %v3793_v61  ;;  %v15014_v61 = vld [vmem:[#allocation24_spill] sm:$0xff]  ;;  %v3844_v30 = vsel %vm455_vm0, %v3709_v50, 0  ;;  %v15017_v50 = vld [vmem:[#allocation86_spill] sm:$0xff]  ;;  %v15020_v36 = vld [vmem:[#allocation65_spill] sm:$0xff] }
 0x38b   : > { %v12245_v62 = vpop.eup %9005  ;;  %v3019_v54 = vpack.c.bf16 %v12191_v58, %v12237_v18  ;;  %v3723_v44 = vpop.permute.xlu1 %3722 }
 0x38c   : > { %3357 = vmatmul.mubr.bf16.gmra.mrb[120].mxu0 %v3012_v59  ;;  %v12250_v41 = vpop.eup %9007  ;;  %v3841_v59 = vsel %vm455_vm0, %v12139_v23, 0  ;;  %2525 = vadd.xlane.f32.xlu1 %v15011_v39  ;;  %v3016_v34 = vpack.c.bf16 %v12245_v62, %v12214_v0  ;;  %v12267_v23 = vadd.f32 %v12076_v1, %v2643_v48  ;;  %v15015_v1 = vld [vmem:[#allocation74_spill] sm:$0xff] }
 0x38d   : > { %v12233_v63 = vpop.permute.xlu0 %3644  ;;  %2550 = vadd.xlane.f32.xlu0 %v15009_v40  ;;  %3364 = vmatprep.mubr.bf16.mxu0 %v3017_v11  ;;  %v3018_v6 = vpack.c.bf16 %v12250_v41, %v12231_v10  ;;  %v15019_v11 = vld [vmem:[#allocation78_spill] sm:$0xff] }
 0x38e   : > { %3525 = vmatprep.mubr.bf16.mxu1 %v3019_v54  ;;  %8406 = vmatprep.subr.msk.bf16.mxu1 %vm455_vm0, %v3723_v44  ;;  %v2617_v40 = vadd.f32 %v15019_v11, %v15018_v31  ;;  %v2627_v54 = vadd.f32 %v15021_v35, %v12046_v27  ;;  %v2637_v27 = vadd.f32 %v12109_v3, %v12102_v13  ;;  %v15024_v13 = vld [vmem:[#allocation95_spill] sm:$0xff] }
 0x38f   : > { %8117 = vmatpush3.bf16.xpose.msra.mxu1 %v3841_v59  ;;  %v3693_v20 = vpop.permute.xlu1 %3692 }
 0x390   : > { %2535 = vadd.xlane.f32.xlu1 %v15013_v46  ;;  %8399 = vmatprep.subr.msk.bf16.mxu0 %vm455_vm0, %v3693_v20  ;;  %v2628_v39 = vadd.f32 %v12059_v12, %v2627_v54  ;;  %v2647_v12 = vadd.f32 %v12171_v9, %v12164_v56  ;;  %v2657_v56 = vadd.f32 %v12220_v52, %v12214_v0  ;;  %v15025_v0 = vld [vmem:[#allocation26_spill] sm:$0xff] }
 0x391   : > { %v12264_v55 = vpop.permute.xlu0 %3648  ;;  %2560 = vadd.xlane.f32.xlu0 %v15012_v47 }
 0x392   : > { %3526 = vmatmul.mubr.bf16.gmra.mrb[124].mxu1 %v3018_v6  ;;  %8071 = vmatpush3.bf16.xpose.msra.mxu0 %v3796_v33 }
 0x393   : > { %8120 = vmatprep.mubr.msk.bf16.mxu1 %vm455_vm0, %v15014_v61  ;;  %v3725_v17 = vpop.permute.xlu1 %3724 }
 0x394   : > { %3365 = vmatmul.mubr.bf16.gmra.mrb[124].mxu0 %v3016_v34  ;;  %2545 = vadd.xlane.f32.xlu1 %v15016_v29  ;;  %v2638_v34 = vadd.f32 %v12116_v42, %v2637_v27  ;;  %v2648_v42 = vadd.f32 %v12178_v53, %v2647_v12  ;;  %v2658_v53 = vadd.f32 %v12231_v10, %v2657_v56 }
 0x395   : > { %v12276_v49 = vpop.permute.xlu0 %3652  ;;  %8072 = vmatprep.mubr.msk.bf16.mxu0 %vm455_vm0, %v15014_v61  ;;  %2570 = vadd.xlane.f32.xlu0 %v15015_v1 }
 0x396   : > { %8407 = vmatprep.subr.msk.bf16.mxu1 %vm455_vm0, %v3725_v17  ;;  %v2659_v6 = vadd.f32 %v12237_v18, %v2658_v53  ;;  %v15026_v18 = vld [vmem:[#allocation104_spill] sm:$0xff] }
 0x397   : > { %8119 = vmatpush3.bf16.xpose.msra.mxu1 %v3844_v30  ;;  %v12290_v28 = vpop.permute.xlu1 %3646 }
 0x398   : > { %2555 = vadd.xlane.f32.xlu1 %v12089_v21 }
 0x399   : > { %v12287_v26 = vpop.permute.xlu0 %3656  ;;  %2580 = vadd.xlane.f32.xlu0 %v12096_v45 }
 0x39b   : > { %v12300_v7 = vpop.permute.xlu1 %3650 }
 0x39c   : > { %8073 = vmatmul.mubr.msk.bf16.vlgmr.msra.gmra.mrb[128].mxu0 %vm455_vm0, %v15014_v61  ;;  %2565 = vadd.xlane.f32.xlu1 %v12151_v2  ;;  %v2618_v2 = vadd.f32 %v15020_v36, %v2617_v40  ;;  %v2732_v36 = vld [vmem:[#allocation4] sm:$0xff] }
 0x39d   : > { %v12293_v15 = vpop.permute.xlu0 %3660  ;;  %2590 = vadd.xlane.f32.xlu0 %v12133_v32  ;;  %8074 = vmatprep.mubr.msk.bf16.mxu0 %vm455_vm0, %v15017_v50 }
 0x39e   : > { %8121 = vmatmul.mubr.msk.bf16.vlgmr.msra.gmra.mrb[128].mxu1 %vm455_vm0, %v15014_v61 }
 0x39f   : > { %8122 = vmatprep.mubr.msk.bf16.mxu1 %vm455_vm0, %v15017_v50  ;;  %v12310_v21 = vpop.permute.xlu1 %3654 }
 0x3a0   : > { %2575 = vadd.xlane.f32.xlu1 %v12159_v38  ;;  %v15023_v38 = vld [vmem:[#allocation63_spill] sm:$0xff] }
 0x3a1   : > { %v5844_v45 = vpop.permute.xlu0 %5843  ;;  %2600 = vadd.xlane.f32.xlu0 %v12156_v25  ;;  %v15022_v25 = vld [vmem:[#allocation25_spill] sm:$0xff]  ;;  %v2619_v59 = vadd.f32 %v15023_v38, %v2618_v2 }
 0x3a2   : > { %8152 = vmatprep.subr.bf16.mxu0 %v5844_v45 }
 0x3a3   : > { %v12321_v48 = vpop.permute.xlu1 %3658 }
 0x3a4   : > { %8075 = vmatmul.mubr.msk.bf16.gmra.mrb[132].mxu0 %vm455_vm0, %v15017_v50  ;;  %2585 = vadd.xlane.f32.xlu1 %v12185_v60  ;;  %v2629_v60 = vadd.f32 %v12066_v8, %v2628_v39  ;;  %v2639_v8 = vadd.f32 %v12124_v16, %v2638_v34  ;;  %v2649_v16 = vadd.f32 %v12187_v19, %v2648_v42 }
 0x3a5   : > { %v5828_v32 = vpop.permute.xlu0 %5827  ;;  %2610 = vadd.xlane.f32.xlu0 %v12162_v37  ;;  %8076 = vmatprep.mubr.msk.bf16.mxu0 %vm455_vm0, %v15022_v25 }
 0x3a6   : > { %8153 = vmatpush3.bf16.msra.mxu0 %v5828_v32  ;;  %8123 = vmatmul.mubr.msk.bf16.gmra.mrb[132].mxu1 %vm455_vm0, %v15017_v50 }
 0x3a7   : > { %8124 = vmatprep.mubr.msk.bf16.mxu1 %vm455_vm0, %v15022_v25  ;;  %v5876_v37 = vpop.permute.xlu1 %5875 }
 0x3a8   : > { %2595 = vadd.xlane.f32.xlu1 %v12205_v24  ;;  %8264 = vmatprep.subr.bf16.mxu1 %v5876_v37 }
 0x3a9   : > { %v5846_v44 = vpop.permute.xlu0 %5845  ;;  %2620 = vadd.xlane.f32.xlu0 %v2619_v59  ;;  %v2733_v59 = vld [vmem:[#allocation4 + $0x8] sm:$0xff] }
 0x3aa   : > { %8154 = vmatprep.subr.bf16.mxu0 %v5846_v44 }
 0x3ab   : > { %v5860_v3 = vpop.permute.xlu1 %5859 }
 0x3ac   : > { %8077 = vmatmul.mubr.msk.bf16.gmra.mrb[136].mxu0 %vm455_vm0, %v15022_v25  ;;  %2605 = vadd.xlane.f32.xlu1 %v12208_v43 }
 0x3ad   : > { %v5830_v22 = vpop.permute.xlu0 %5829  ;;  %2630 = vadd.xlane.f32.xlu0 %v2629_v60  ;;  %8078 = vmatprep.mubr.msk.bf16.mxu0 %vm455_vm0, %v15024_v13  ;;  %v15029_v60 = vld [vmem:[#allocation156_spill] sm:$0xff] }
 0x3ae   : > { %8155 = vmatpush3.bf16.msra.mxu0 %v5830_v22  ;;  %8265 = vmatpush3.bf16.msra.mxu1 %v5860_v3  ;;  %v2925_v22 = vmul.f32 %v15029_v60, %v2733_v59  ;;  %v2738_v59 = vld [vmem:[#allocation4 + $0x30] sm:$0xff]  ;;  %v2739_v60 = vld [vmem:[#allocation4 + $0x38] sm:$0xff] }
 0x3af   : > { %8125 = vmatmul.mubr.msk.bf16.gmra.mrb[136].mxu1 %vm455_vm0, %v15022_v25  ;;  %v5878_v9 = vpop.permute.xlu1 %5877 }
 0x3b0   : > { %8126 = vmatprep.mubr.msk.bf16.mxu1 %vm455_vm0, %v15024_v13  ;;  %2615 = vadd.xlane.f32.xlu1 %v12226_v4 }
 0x3b1   : > { %v5848_v24 = vpop.permute.xlu0 %5847  ;;  %2640 = vadd.xlane.f32.xlu0 %v2639_v8  ;;  %8266 = vmatprep.subr.bf16.mxu1 %v5878_v9  ;;  %v2734_v9 = vld [vmem:[#allocation4 + $0x10] sm:$0xff] }
 0x3b2   : > { %8156 = vmatprep.subr.bf16.mxu0 %v5848_v24 }
 0x3b3   : > { %v5862_v52 = vpop.permute.xlu1 %5861 }
 0x3b4   : > { %8079 = vmatmul.mubr.msk.bf16.gmra.mrb[140].mxu0 %vm455_vm0, %v15024_v13  ;;  %2625 = vadd.xlane.f32.xlu1 %v12242_v57  ;;  %v2662_v57 = vadd.f32 %v12245_v62, %v12144_v51 }
 0x3b5   : > { %v5832_v43 = vpop.permute.xlu0 %5831  ;;  %2650 = vadd.xlane.f32.xlu0 %v2649_v16  ;;  %8080 = vmatprep.mubr.msk.bf16.mxu0 %vm455_vm0, %v15025_v0 }
 0x3b6   : > { %8157 = vmatpush3.bf16.msra.mxu0 %v5832_v43  ;;  %8267 = vmatpush3.bf16.msra.mxu1 %v5862_v52  ;;  %v2735_v52 = vld [vmem:[#allocation4 + $0x18] sm:$0xff] }
 0x3b7   : > { %8127 = vmatmul.mubr.msk.bf16.gmra.mrb[140].mxu1 %vm455_vm0, %v15024_v13  ;;  %v5880_v19 = vpop.permute.xlu1 %5879 }
 0x3b8   : > { %8128 = vmatprep.mubr.msk.bf16.mxu1 %vm455_vm0, %v15025_v0  ;;  %2635 = vadd.xlane.f32.xlu1 %v12256_v14  ;;  %v2663_v14 = vadd.f32 %v12250_v41, %v2662_v57 }
 0x3b9   : > { %v5850_v4 = vpop.permute.xlu0 %5849  ;;  %2660 = vadd.xlane.f32.xlu0 %v2659_v6  ;;  %8268 = vmatprep.subr.bf16.mxu1 %v5880_v19 }
 0x3ba   : > { %8158 = vmatprep.subr.bf16.mxu0 %v5850_v4  ;;  %v2664_v46 = vadd.f32 %v12191_v58, %v2663_v14  ;;  %v15030_v4 = vld [vmem:[#allocation159_spill] sm:$0xff] }
 0x3bb   : > { %v5864_v47 = vpop.permute.xlu1 %5863  ;;  %v2926_v19 = vmul.f32 %v15030_v4, %v2734_v9 }
 0x3bc   : > { %8081 = vmatmul.mubr.msk.bf16.gmra.mrb[144].mxu0 %vm455_vm0, %v15025_v0  ;;  %2645 = vadd.xlane.f32.xlu1 %v12267_v23  ;;  %v15027_v23 = vld [vmem:[#allocation27_spill] sm:$0xff] }
 0x3bd   : > { %v5834_v10 = vpop.permute.xlu0 %5833  ;;  %8082 = vmatprep.mubr.msk.bf16.mxu0 %vm455_vm0, %v15026_v18  ;;  %8269 = vmatpush3.bf16.msra.mxu1 %v5864_v47 }
 0x3be   : > { %8159 = vmatpush3.bf16.msra.mxu0 %v5834_v10 }
 0x3bf   : > { %8129 = vmatmul.mubr.msk.bf16.gmra.mrb[144].mxu1 %vm455_vm0, %v15025_v0  ;;  %v5882_v51 = vpop.permute.xlu1 %5881 }
 0x3c0   : > { %8130 = vmatprep.mubr.msk.bf16.mxu1 %vm455_vm0, %v15026_v18  ;;  %2655 = vadd.xlane.f32.xlu1 %v12271_v5 }
 0x3c1   : > { %v5852_v20 = vpop.permute.xlu0 %5851  ;;  %8270 = vmatprep.subr.bf16.mxu1 %v5882_v51 }
 0x3c2   : > { %8160 = vmatprep.subr.bf16.mxu0 %v5852_v20 }
 0x3c3   : > { %v5866_v33 = vpop.permute.xlu1 %5865 }
 0x3c4   : > { %8083 = vmatmul.mubr.msk.bf16.gmra.mrb[148].mxu0 %vm455_vm0, %v15026_v18  ;;  %2665 = vadd.xlane.f32.xlu1 %v2664_v46  ;;  %v2736_v46 = vld [vmem:[#allocation4 + $0x20] sm:$0xff] }
 0x3c5   : > { %v5836_v62 = vpop.permute.xlu0 %5835  ;;  %8084 = vmatprep.mubr.msk.bf16.mxu0 %vm455_vm0, %v15027_v23  ;;  %8271 = vmatpush3.bf16.msra.mxu1 %v5866_v33 }
 0x3c6   : > { %8161 = vmatpush3.bf16.msra.mxu0 %v5836_v62 }
 0x3c7   : > { %8131 = vmatmul.mubr.msk.bf16.gmra.mrb[148].mxu1 %vm455_vm0, %v15026_v18  ;;  %v5884_v5 = vpop.permute.xlu1 %5883  ;;  %v15031_v18 = vld [vmem:[#allocation157_spill] sm:$0xff] }
 0x3c8   : > { %8132 = vmatprep.mubr.msk.bf16.mxu1 %vm455_vm0, %v15027_v23  ;;  %8272 = vmatprep.subr.bf16.mxu1 %v5884_v5  ;;  %v2927_v47 = vmul.f32 %v15031_v18, %v2735_v52 }
 0x3c9   : > { %v5854_v41 = vpop.permute.xlu0 %5853 }
 0x3ca   : > { %8162 = vmatprep.subr.bf16.mxu0 %v5854_v41 }
 0x3cb   : > { %v5868_v61 = vpop.permute.xlu1 %5867 }
 0x3cc   : > { %8085 = vmatmul.mubr.msk.bf16.gmra.mrb[152].mxu0 %vm455_vm0, %v15027_v23  ;;  %8273 = vmatpush3.bf16.msra.mxu1 %v5868_v61 }
 0x3cd   : > { %v5838_v58 = vpop.permute.xlu0 %5837  ;;  %8086 = vmatprep.mubr.msk.bf16.mxu0 %vm455_vm0, %v12233_v63 }
 0x3ce   : > { %8163 = vmatpush3.bf16.msra.mxu0 %v5838_v58 }
 0x3cf   : > { %8133 = vmatmul.mubr.msk.bf16.gmra.mrb[152].mxu1 %vm455_vm0, %v15027_v23  ;;  %v5886_v30 = vpop.permute.xlu1 %5885 }
 0x3d0   : > { %8134 = vmatprep.mubr.msk.bf16.mxu1 %vm455_vm0, %v12233_v63  ;;  %8274 = vmatprep.subr.bf16.mxu1 %v5886_v30 }
 0x3d1   : > { %v5856_v1 = vpop.permute.xlu0 %5855 }
 0x3d2   : > { %8164 = vmatprep.subr.bf16.mxu0 %v5856_v1  ;;  %v2737_v1 = vld [vmem:[#allocation4 + $0x28] sm:$0xff] }
 0x3d3   : > { %v5870_v29 = vpop.permute.xlu1 %5869 }
 0x3d4   : > { %8087 = vmatmul.mubr.msk.bf16.gmra.mrb[156].mxu0 %vm455_vm0, %v12233_v63  ;;  %8275 = vmatpush3.bf16.msra.mxu1 %v5870_v29  ;;  %v15032_v29 = vld [vmem:[#allocation122_spill] sm:$0xff] }
 0x3d5   : > { %v5840_v17 = vpop.permute.xlu0 %5839  ;;  %8088 = vmatprep.mubr.msk.bf16.mxu0 %vm455_vm0, %v12290_v28 }
 0x3d6   : > { %8165 = vmatpush3.bf16.msra.mxu0 %v5840_v17 }
 0x3d7   : > { %8135 = vmatmul.mubr.msk.bf16.gmra.mrb[156].mxu1 %vm455_vm0, %v12233_v63  ;;  %v5888_v50 = vpop.permute.xlu1 %5887 }
 0x3d8   : > { %8136 = vmatprep.mubr.msk.bf16.mxu1 %vm455_vm0, %v12290_v28  ;;  %8276 = vmatprep.subr.bf16.mxu1 %v5888_v50  ;;  %v2928_v50 = vmul.f32 %v15032_v29, %v2736_v46  ;;  %v2447_v29 = vld [vmem:[#allocation3 + $0x20] sm:$0xff] }
 0x3db   : > { %v5872_v45 = vpop.permute.xlu1 %5871 }
 0x3dc   : > { %8089 = vmatmul.mubr.msk.bf16.gmra.mrb[160].mxu0 %vm455_vm0, %v12290_v28  ;;  %8277 = vmatpush3.bf16.msra.mxu1 %v5872_v45 }
 0x3dd   : > { %8090 = vmatprep.mubr.msk.bf16.mxu0 %vm455_vm0, %v12264_v55  ;;  %v7848_v31 = vpop.f32.mrb[64].mxu0 }
 0x3de   : > { %v7849_v63 = vpop.f32.mrb[65].mxu0 }
 0x3df   : > { %8137 = vmatmul.mubr.msk.bf16.gmra.mrb[160].mxu1 %vm455_vm0, %v12290_v28  ;;  %v7960_v11 = vpop.f32.mrb[64].mxu1  ;;  %v7850_v40 = vadd.f32 %v7849_v63, %v7848_v31  ;;  %v7851_v32 = vpop.f32.mrb[66].mxu0  ;;  %v15028_v28 = vld [vmem:[#allocation155_spill] sm:$0xff] }
 0x3e0   : > { %8138 = vmatprep.mubr.msk.bf16.mxu1 %vm455_vm0, %v12264_v55  ;;  %v7961_v2 = vpop.f32.mrb[65].mxu1  ;;  %v7852_v35 = vpop.f32.mrb[67].mxu0  ;;  %v2924_v39 = vmul.f32 %v15028_v28, %v2732_v36 }
 0x3e1   : > { %v7962_v54 = vadd.f32 %v7961_v2, %v7960_v11  ;;  %v7963_v25 = vpop.f32.mrb[66].mxu1  ;;  %v7853_v38 = vadd.f32 %v7852_v35, %v7851_v32  ;;  %v15033_v11 = vld [vmem:[#allocation158_spill] sm:$0xff] }
 0x3e2   : > { %v7964_v44 = vpop.f32.mrb[67].mxu1 }
 0x3e3   : > { %v3408_v27 = vadd.f32 %v7962_v54, %v7850_v40  ;;  %v7965_v37 = vadd.f32 %v7964_v44, %v7963_v25  ;;  %v2929_v40 = vmul.f32 %v15033_v11, %v2737_v1 }
 0x3e4   : > { %8091 = vmatmul.mubr.msk.bf16.gmra.mrb[164].mxu0 %vm455_vm0, %v12264_v55 }
 0x3e5   : > { %8092 = vmatprep.mubr.msk.bf16.mxu0 %vm455_vm0, %v12300_v7  ;;  %v3534_v34 = vadd.f32 %v3408_v27, %v2924_v39  ;;  %v3411_v12 = vadd.f32 %v7965_v37, %v7853_v38  ;;  %v2444_v38 = vld [vmem:[#allocation3 + $0x8] sm:$0xff] }
 0x3e6   : > { %v7854_v13 = vpop.f32.mrb[68].mxu0 }
 0x3e7   : > { %8139 = vmatmul.mubr.msk.bf16.gmra.mrb[164].mxu1 %vm455_vm0, %v12264_v55  ;;  %v7855_v3 = vpop.f32.mrb[69].mxu0  ;;  %3566 = vst.msk [vmem:[#allocation4] sm:$0xff] %vm455_vm0, %v3534_v34  ;;  %v3535_v8 = vadd.f32 %v3411_v12, %v2925_v22  ;;  %v15034_v12 = vld [vmem:[#allocation124_spill] sm:$0xff] }
 0x3e8   : > { %8140 = vmatprep.mubr.msk.bf16.mxu1 %vm455_vm0, %v12300_v7  ;;  %v7966_v24 = vpop.f32.mrb[68].mxu1  ;;  %v7856_v42 = vadd.f32 %v7855_v3, %v7854_v13  ;;  %v7857_v56 = vpop.f32.mrb[70].mxu0  ;;  %v2476_v13 = vmul.f32 %v15034_v12, %v2444_v38  ;;  %v15035_v3 = vld [vmem:[#allocation150_spill] sm:$0xff] }
 0x3e9   : > { %v7967_v16 = vpop.f32.mrb[69].mxu1  ;;  %v7858_v43 = vpop.f32.mrb[71].mxu0  ;;  %3567 = vst.msk [vmem:[#allocation4 + $0x8] sm:$0xff] %vm455_vm0, %v3535_v8  ;;  %v2930_v8 = vmul.f32 %v15035_v3, %v2738_v59  ;;  %v2449_v59 = vld [vmem:[#allocation3 + $0x30] sm:$0xff] }
 0x3ea   : > { %v7968_v55 = vadd.f32 %v7967_v16, %v7966_v24  ;;  %v7969_v53 = vpop.f32.mrb[70].mxu1  ;;  %v7859_v0 = vadd.f32 %v7858_v43, %v7857_v56  ;;  %v15036_v43 = vld [vmem:[#allocation160_spill] sm:$0xff] }
 0x3eb   : > { %v7970_v6 = vpop.f32.mrb[71].mxu1 }
 0x3ec   : > { %8093 = vmatmul.mubr.msk.bf16.gmra.mrb[168].mxu0 %vm455_vm0, %v12300_v7  ;;  %v3416_v10 = vadd.f32 %v7968_v55, %v7856_v42  ;;  %v7971_v57 = vadd.f32 %v7970_v6, %v7969_v53  ;;  %v2931_v55 = vmul.f32 %v15036_v43, %v2739_v60 }
 0x3ed   : > { %8094 = vmatprep.mubr.msk.bf16.mxu0 %vm455_vm0, %v12276_v49 }
 0x3ee   : > { %v3536_v20 = vadd.f32 %v3416_v10, %v2926_v19  ;;  %v3419_v14 = vadd.f32 %v7971_v57, %v7859_v0  ;;  %v2445_v19 = vld [vmem:[#allocation3 + $0x10] sm:$0xff]  ;;  %v2740_v10 = vld [vmem:[#allocation4 + $0x40] sm:$0xff] }
 0x3ef   : > { %8141 = vmatmul.mubr.msk.bf16.gmra.mrb[168].mxu1 %vm455_vm0, %v12300_v7 }
 0x3f0   : > { %8142 = vmatprep.mubr.msk.bf16.mxu1 %vm455_vm0, %v12276_v49  ;;  %3568 = vst.msk [vmem:[#allocation4 + $0x10] sm:$0xff] %vm455_vm0, %v3536_v20  ;;  %v3537_v51 = vadd.f32 %v3419_v14, %v2927_v47 }
 0x3f2   : > { %3569 = vst.msk [vmem:[#allocation4 + $0x18] sm:$0xff] %vm455_vm0, %v3537_v51 }
 0x3f4   : > { %8095 = vmatmul.mubr.msk.bf16.gmra.mrb[172].mxu0 %vm455_vm0, %v12276_v49  ;;  %v7860_v62 = vpop.f32.mrb[72].mxu0  ;;  %v7972_v7 = vpop.f32.mrb[72].mxu1 }
 0x3f5   : > { %8096 = vmatprep.mubr.msk.bf16.mxu0 %vm455_vm0, %v12310_v21  ;;  %v7861_v23 = vpop.f32.mrb[73].mxu0  ;;  %v7973_v33 = vpop.f32.mrb[73].mxu1 }
 0x3f6   : > { %v7862_v41 = vadd.f32 %v7861_v23, %v7860_v62  ;;  %v7974_v5 = vadd.f32 %v7973_v33, %v7972_v7  ;;  %v7863_v58 = vpop.f32.mrb[74].mxu0  ;;  %v7975_v61 = vpop.f32.mrb[74].mxu1  ;;  %v2741_v62 = vld [vmem:[#allocation4 + $0x48] sm:$0xff]  ;;  %v15037_v23 = vld [vmem:[#allocation127_spill] sm:$0xff] }
 0x3f7   : > { %8143 = vmatmul.mubr.msk.bf16.gmra.mrb[172].mxu1 %vm455_vm0, %v12276_v49  ;;  %v7864_v30 = vpop.f32.mrb[75].mxu0  ;;  %v7976_v17 = vpop.f32.mrb[75].mxu1  ;;  %v2477_v33 = vmul.f32 %v15037_v23, %v2445_v19  ;;  %v2744_v23 = vld [vmem:[#allocation4 + $0x60] sm:$0xff] }
 0x3f8   : > { %8144 = vmatprep.mubr.msk.bf16.mxu1 %vm455_vm0, %v12310_v21  ;;  %v3424_v45 = vadd.f32 %v7974_v5, %v7862_v41  ;;  %v7865_v31 = vadd.f32 %v7864_v30, %v7863_v58  ;;  %v7977_v63 = vadd.f32 %v7976_v17, %v7975_v61  ;;  %v12448_v49 = vpop.permute.xlu0 %2911  ;;  %v15038_v41 = vld [vmem:[#allocation31_spill] sm:$0xff] }
 0x3f9   : > { %v2932_v5 = vmul.f32 %v15038_v41, %v2740_v10 }
 0x3fa   : > { %v3538_v32 = vadd.f32 %v3424_v45, %v2928_v50  ;;  %v3427_v36 = vadd.f32 %v7977_v63, %v7865_v31  ;;  %v15039_v50 = vld [vmem:[#allocation35_spill] sm:$0xff] }
 0x3fb   : > { %v2933_v45 = vmul.f32 %v15039_v50, %v2741_v62  ;;  %v2448_v50 = vld [vmem:[#allocation3 + $0x28] sm:$0xff] }
 0x3fc   : > { %8097 = vmatmul.mubr.msk.bf16.gmra.mrb[176].mxu0 %vm455_vm0, %v12310_v21  ;;  %3570 = vst.msk [vmem:[#allocation4 + $0x20] sm:$0xff] %vm455_vm0, %v3538_v32  ;;  %v3539_v2 = vadd.f32 %v3427_v36, %v2929_v40  ;;  %v12456_v35 = vpop.permute.xlu0 %2921  ;;  %v15040_v36 = vld [vmem:[#allocation129_spill] sm:$0xff] }
 0x3fd   : > { %8098 = vmatprep.mubr.msk.bf16.mxu0 %vm455_vm0, %v12287_v26 }
 0x3fe   : > { %3571 = vst.msk [vmem:[#allocation4 + $0x28] sm:$0xff] %vm455_vm0, %v3539_v2  ;;  %v2479_v2 = vmul.f32 %v15040_v36, %v2447_v29  ;;  %v15048_v36 = vld [vmem:[#allocation46_spill] sm:$0xff] }
 0x3ff   : > { %8145 = vmatmul.mubr.msk.bf16.gmra.mrb[176].mxu1 %vm455_vm0, %v12310_v21 }
 0x400   : > { %8146 = vmatprep.mubr.msk.bf16.mxu1 %vm455_vm0, %v12287_v26 }
 0x402   : > { %v7866_v54 = vpop.f32.mrb[76].mxu0 }
 0x403   : > { %v7978_v25 = vpop.f32.mrb[76].mxu1  ;;  %v7867_v44 = vpop.f32.mrb[77].mxu0 }
 0x404   : > { %8099 = vmatmul.mubr.msk.bf16.gmra.mrb[180].mxu0 %vm455_vm0, %v12287_v26  ;;  %v7979_v28 = vpop.f32.mrb[77].mxu1  ;;  %v7868_v21 = vadd.f32 %v7867_v44, %v7866_v54  ;;  %v7869_v27 = vpop.f32.mrb[78].mxu0  ;;  %v2443_v54 = vld [vmem:[#allocation3] sm:$0xff]  ;;  %v2742_v44 = vld [vmem:[#allocation4 + $0x50] sm:$0xff] }
 0x405   : > { %8100 = vmatprep.mubr.msk.bf16.mxu0 %vm455_vm0, %v12321_v48  ;;  %v7980_v39 = vadd.f32 %v7979_v28, %v7978_v25  ;;  %v7981_v37 = vpop.f32.mrb[78].mxu1  ;;  %v7870_v22 = vpop.f32.mrb[79].mxu0 }
 0x406   : > { %v7982_v34 = vpop.f32.mrb[79].mxu1  ;;  %v7871_v42 = vadd.f32 %v7870_v22, %v7869_v27 }
 0x407   : > { %8147 = vmatmul.mubr.msk.bf16.gmra.mrb[180].mxu1 %vm455_vm0, %v12287_v26  ;;  %v3432_v24 = vadd.f32 %v7980_v39, %v7868_v21  ;;  %v7983_v56 = vadd.f32 %v7982_v34, %v7981_v37  ;;  %v12469_v26 = vpop.permute.xlu1 %2906  ;;  %v15041_v34 = vld [vmem:[#allocation123_spill] sm:$0xff] }
 0x408   : > { %8148 = vmatprep.mubr.msk.bf16.mxu1 %vm455_vm0, %v12321_v48  ;;  %v2475_v12 = vmul.f32 %v15041_v34, %v2443_v54 }
 0x409   : > { %v3540_v53 = vadd.f32 %v3432_v24, %v2930_v8  ;;  %v3435_v0 = vadd.f32 %v7983_v56, %v7871_v42  ;;  %v15042_v24 = vld [vmem:[#allocation131_spill] sm:$0xff] }
 0x40a   : > { %v2516_v9 = vpop.xlane.xlu0 %2515  ;;  %v7872_v6 = vpop.f32.mrb[80].mxu0  ;;  %v2481_v42 = vmul.f32 %v15042_v24, %v2449_v59  ;;  %v15051_v24 = vld [vmem:[#allocation137_spill] sm:$0xff] }
 0x40b   : > { %v2668_v16 = vadd.f32 %v2516_v9, %v2476_v13  ;;  %3572 = vst.msk [vmem:[#allocation4 + $0x30] sm:$0xff] %vm455_vm0, %v3540_v53  ;;  %v3541_v52 = vadd.f32 %v3435_v0, %v2931_v55  ;;  %v7984_v4 = vpop.f32.mrb[80].mxu1  ;;  %v7873_v57 = vpop.f32.mrb[81].mxu0  ;;  %v2743_v13 = vld [vmem:[#allocation4 + $0x58] sm:$0xff]  ;;  %v15043_v9 = vld [vmem:[#allocation42_spill] sm:$0xff] }
 0x40c   : > { %8101 = vmatmul.mubr.msk.bf16.gmra.mrb[184].mxu0 %vm455_vm0, %v12321_v48  ;;  %v7985_v18 = vpop.f32.mrb[81].mxu1  ;;  %v7874_v47 = vadd.f32 %v7873_v57, %v7872_v6  ;;  %v7875_v14 = vpop.f32.mrb[82].mxu0  ;;  %v15044_v6 = vld [vmem:[#allocation28_spill] sm:$0xff]  ;;  %v2446_v57 = vld [vmem:[#allocation3 + $0x18] sm:$0xff] }
 0x40d   : > { %2701 = vst.msk [vmem:[#allocation3 + $0x8] sm:$0xff] %vm326_vm1, %v2668_v16  ;;  %8102 = vmatprep.mubr.msk.bf16.mxu0 %vm455_vm0, %v12293_v15  ;;  %v7986_v20 = vadd.f32 %v7985_v18, %v7984_v4  ;;  %v7987_v51 = vpop.f32.mrb[82].mxu1  ;;  %v7876_v7 = vpop.f32.mrb[83].mxu0  ;;  %v2934_v16 = vmul.f32 %v15043_v9, %v2742_v44  ;;  %v2935_v4 = vmul.f32 %v15044_v6, %v2743_v13  ;;  %v2455_v44 = vld [vmem:[#allocation3 + $0x60] sm:$0xff] }
 0x40e   : > { %3573 = vst.msk [vmem:[#allocation4 + $0x38] sm:$0xff] %vm455_vm0, %v3541_v52  ;;  %v7988_v46 = vpop.f32.mrb[83].mxu1  ;;  %v7877_v61 = vadd.f32 %v7876_v7, %v7875_v14  ;;  %v2521_v30 = vpop.xlane.xlu0 %2520  ;;  %v15052_v6 = vld [vmem:[#allocation128_spill] sm:$0xff] }
 0x40f   : > { %8149 = vmatmul.mubr.msk.bf16.gmra.mrb[184].mxu1 %vm455_vm0, %v12321_v48  ;;  %v3440_v58 = vadd.f32 %v7986_v20, %v7874_v47  ;;  %v7989_v1 = vadd.f32 %v7988_v46, %v7987_v51  ;;  %v2669_v17 = vadd.f32 %v2521_v30, %v2477_v33  ;;  %v12485_v63 = vpop.permute.xlu1 %2916  ;;  %v15045_v20 = vld [vmem:[#allocation133_spill] sm:$0xff]  ;;  %v2453_v46 = vld [vmem:[#allocation3 + $0x50] sm:$0xff] }
 0x410   : > { %8150 = vmatprep.mubr.msk.bf16.mxu1 %vm455_vm0, %v12293_v15 }
 0x411   : > { %v3542_v31 = vadd.f32 %v3440_v58, %v2932_v5  ;;  %v3443_v48 = vadd.f32 %v7989_v1, %v7877_v61  ;;  %2702 = vst.msk [vmem:[#allocation3 + $0x10] sm:$0xff] %vm326_vm1, %v2669_v17  ;;  %v15046_v61 = vld [vmem:[#allocation125_spill] sm:$0xff] }
 0x412   : > { %v2531_v25 = vpop.xlane.xlu0 %2530  ;;  %v2478_v1 = vmul.f32 %v15046_v61, %v2446_v57  ;;  %v2459_v61 = vld [vmem:[#allocation3 + $0x80] sm:$0xff] }
 0x413   : > { %3574 = vst.msk [vmem:[#allocation4 + $0x40] sm:$0xff] %vm455_vm0, %v3542_v31  ;;  %v3543_v11 = vadd.f32 %v3443_v48, %v2933_v45  ;;  %v7990_v32 = vpop.f32.mrb[84].mxu1  ;;  %v2671_v28 = vadd.f32 %v2531_v25, %v2479_v2  ;;  %v2745_v45 = vld [vmem:[#allocation4 + $0x68] sm:$0xff]  ;;  %v2936_v2 = vmul.f32 %v15048_v36, %v2744_v23 }
 0x414   : > { %8103 = vmatmul.mubr.msk.bf16.gmra.mrb[188].mxu0 %vm455_vm0, %v12293_v15  ;;  %v7991_v39 = vpop.f32.mrb[85].mxu1 }
 0x415   : > { %3575 = vst.msk [vmem:[#allocation4 + $0x48] sm:$0xff] %vm455_vm0, %v3543_v11  ;;  %v7992_v37 = vadd.f32 %v7991_v39, %v7990_v32  ;;  %v7993_v60 = vpop.f32.mrb[86].mxu1  ;;  %v2511_v56 = vpop.xlane.xlu1 %2510 }
 0x416   : > { %2704 = vst.msk [vmem:[#allocation3 + $0x20] sm:$0xff] %vm326_vm1, %v2671_v28  ;;  %v7994_v8 = vpop.f32.mrb[87].mxu1  ;;  %v2541_v53 = vpop.xlane.xlu0 %2540  ;;  %v2667_v0 = vadd.f32 %v2511_v56, %v2475_v12  ;;  %v2450_v12 = vld [vmem:[#allocation3 + $0x38] sm:$0xff] }
 0x417   : > { %v7878_v40 = vpop.f32.mrb[84].mxu0  ;;  %8151 = vmatmul.mubr.msk.bf16.gmra.mrb[188].mxu1 %vm455_vm0, %v12293_v15  ;;  %v7995_v55 = vadd.f32 %v7994_v8, %v7993_v60  ;;  %v2451_v15 = vld [vmem:[#allocation3 + $0x40] sm:$0xff]  ;;  %v2673_v52 = vadd.f32 %v2541_v53, %v2481_v42  ;;  %v2487_v42 = vmul.f32 %v15051_v24, %v2455_v44  ;;  %v2461_v44 = vld [vmem:[#allocation3 + $0x90] sm:$0xff] }
 0x418   : > { %v7879_v38 = vpop.f32.mrb[85].mxu0  ;;  %2700 = vst.msk [vmem:[#allocation3] sm:$0xff] %vm326_vm1, %v2667_v0  ;;  %v2483_v14 = vmul.f32 %v15045_v20, %v2451_v15 }
 0x419   : > { %v7880_v21 = vadd.f32 %v7879_v38, %v7878_v40  ;;  %v7881_v27 = vpop.f32.mrb[86].mxu0  ;;  %2706 = vst.msk [vmem:[#allocation3 + $0x30] sm:$0xff] %vm326_vm1, %v2673_v52  ;;  %v2526_v29 = vpop.xlane.xlu1 %2525  ;;  %v15047_v40 = vld [vmem:[#allocation135_spill] sm:$0xff] }
 0x41a   : > { %v7882_v22 = vpop.f32.mrb[87].mxu0  ;;  %v2551_v62 = vpop.xlane.xlu0 %2550  ;;  %v2670_v31 = vadd.f32 %v2526_v29, %v2478_v1  ;;  %v2485_v32 = vmul.f32 %v15047_v40, %v2453_v46  ;;  %v15054_v46 = vld [vmem:[#allocation34_spill] sm:$0xff]  ;;  %v15056_v29 = vld [vmem:[#allocation43_spill] sm:$0xff] }
 0x41b   : > { %v7883_v3 = vadd.f32 %v7882_v22, %v7881_v27  ;;  %v3448_v43 = vadd.f32 %v7992_v37, %v7880_v21  ;;  %v2675_v33 = vadd.f32 %v2551_v62, %v2483_v14  ;;  %v15049_v21 = vld [vmem:[#allocation126_spill] sm:$0xff]  ;;  %v15050_v27 = vld [vmem:[#allocation153_spill] sm:$0xff]  ;;  %v15053_v62 = vld [vmem:[#allocation139_spill] sm:$0xff] }
 0x41c   : > { %v7996_v47 = vpop.f32.mrb[88].mxu1  ;;  %2703 = vst.msk [vmem:[#allocation3 + $0x18] sm:$0xff] %vm326_vm1, %v2670_v31  ;;  %v2480_v39 = vmul.f32 %v15049_v21, %v2448_v50  ;;  %v2937_v37 = vmul.f32 %v15050_v27, %v2745_v45 }
 0x41d   : > { %v3544_v19 = vadd.f32 %v3448_v43, %v2934_v16  ;;  %v3451_v10 = vadd.f32 %v7995_v55, %v7883_v3  ;;  %v7997_v5 = vpop.f32.mrb[89].mxu1  ;;  %2708 = vst.msk [vmem:[#allocation3 + $0x40] sm:$0xff] %vm326_vm1, %v2675_v33  ;;  %v2536_v34 = vpop.xlane.xlu1 %2535  ;;  %v2457_v43 = vld [vmem:[#allocation3 + $0x70] sm:$0xff] }
 0x41e   : > { %v7998_v30 = vadd.f32 %v7997_v5, %v7996_v47  ;;  %v7999_v17 = vpop.f32.mrb[90].mxu1  ;;  %v2561_v59 = vpop.xlane.xlu0 %2560  ;;  %v2672_v13 = vadd.f32 %v2536_v34, %v2480_v39  ;;  %v2746_v55 = vld [vmem:[#allocation4 + $0x70] sm:$0xff]  ;;  %v2747_v47 = vld [vmem:[#allocation4 + $0x78] sm:$0xff] }
 0x41f   : > { %v7884_v18 = vpop.f32.mrb[88].mxu0  ;;  %3576 = vst.msk [vmem:[#allocation4 + $0x50] sm:$0xff] %vm455_vm0, %v3544_v19  ;;  %v3545_v51 = vadd.f32 %v3451_v10, %v2935_v4  ;;  %v8000_v11 = vpop.f32.mrb[91].mxu1  ;;  %v2677_v28 = vadd.f32 %v2561_v59, %v2485_v32  ;;  %v2482_v4 = vmul.f32 %v15052_v6, %v2450_v12  ;;  %v2938_v23 = vmul.f32 %v15054_v46, %v2746_v55  ;;  %v2463_v6 = vld [vmem:[#allocation3 + $0xa0] sm:$0xff] }
 0x420   : > { %v7885_v7 = vpop.f32.mrb[89].mxu0  ;;  %v8001_v38 = vadd.f32 %v8000_v11, %v7999_v17  ;;  %2705 = vst.msk [vmem:[#allocation3 + $0x28] sm:$0xff] %vm326_vm1, %v2672_v13  ;;  %v2939_v50 = vmul.f32 %v15056_v29, %v2747_v47  ;;  %v2454_v11 = vld [vmem:[#allocation3 + $0x58] sm:$0xff] }
 0x421   : > { %v7886_v41 = vadd.f32 %v7885_v7, %v7884_v18  ;;  %v7887_v58 = vpop.f32.mrb[90].mxu0  ;;  %3577 = vst.msk [vmem:[#allocation4 + $0x58] sm:$0xff] %vm455_vm0, %v3545_v51  ;;  %v2546_v57 = vpop.xlane.xlu1 %2545  ;;  %v2452_v18 = vld [vmem:[#allocation3 + $0x48] sm:$0xff]  ;;  %v2489_v7 = vmul.f32 %v15053_v62, %v2457_v43  ;;  %v15060_v43 = vld [vmem:[#allocation39_spill] sm:$0xff] }
 0x422   : > { %v7888_v48 = vpop.f32.mrb[91].mxu0  ;;  %2710 = vst.msk [vmem:[#allocation3 + $0x50] sm:$0xff] %vm326_vm1, %v2677_v28  ;;  %v2571_v9 = vpop.xlane.xlu0 %2570  ;;  %v2674_v20 = vadd.f32 %v2546_v57, %v2482_v4  ;;  %v2748_v28 = vld [vmem:[#allocation4 + $0x80] sm:$0xff] }
 0x423   : > { %v3456_v54 = vadd.f32 %v7998_v30, %v7886_v41  ;;  %v7889_v25 = vadd.f32 %v7888_v48, %v7887_v58  ;;  %v2679_v53 = vadd.f32 %v2571_v9, %v2487_v42  ;;  %v15055_v30 = vld [vmem:[#allocation130_spill] sm:$0xff]  ;;  %v15059_v9 = vld [vmem:[#allocation143_spill] sm:$0xff]  ;;  %v2940_v55 = vmul.f32 %v15060_v43, %v2748_v28  ;;  %v15062_v57 = vld [vmem:[#allocation152_spill] sm:$0xff] }
 0x424   : > { %v8002_v8 = vpop.f32.mrb[92].mxu1  ;;  %2707 = vst.msk [vmem:[#allocation3 + $0x38] sm:$0xff] %vm326_vm1, %v2674_v20  ;;  %v2484_v17 = vmul.f32 %v15055_v30, %v2452_v18 }
 0x425   : > { %v3546_v60 = vadd.f32 %v3456_v54, %v2936_v2  ;;  %v3459_v22 = vadd.f32 %v8001_v38, %v7889_v25  ;;  %v8003_v15 = vpop.f32.mrb[93].mxu1  ;;  %2712 = vst.msk [vmem:[#allocation3 + $0x60] sm:$0xff] %vm326_vm1, %v2679_v53  ;;  %v2556_v48 = vpop.xlane.xlu1 %2555  ;;  %v15057_v2 = vld [vmem:[#allocation141_spill] sm:$0xff] }
 0x426   : > { %v8004_v19 = vadd.f32 %v8003_v15, %v8002_v8  ;;  %v8005_v10 = vpop.f32.mrb[94].mxu1  ;;  %v2581_v58 = vpop.xlane.xlu0 %2580  ;;  %v2676_v40 = vadd.f32 %v2556_v48, %v2484_v17  ;;  %v2491_v54 = vmul.f32 %v15057_v2, %v2459_v61  ;;  %v2749_v8 = vld [vmem:[#allocation4 + $0x88] sm:$0xff]  ;;  %v2465_v61 = vld [vmem:[#allocation3 + $0xb0] sm:$0xff] }
 0x427   : > { %v7890_v3 = vpop.f32.mrb[92].mxu0  ;;  %3578 = vst.msk [vmem:[#allocation4 + $0x60] sm:$0xff] %vm455_vm0, %v3546_v60  ;;  %v3547_v56 = vadd.f32 %v3459_v22, %v2937_v37  ;;  %v8006_v51 = vpop.f32.mrb[95].mxu1  ;;  %v2681_v1 = vadd.f32 %v2581_v58, %v2489_v7  ;;  %v15058_v60 = vld [vmem:[#allocation132_spill] sm:$0xff]  ;;  %v2941_v18 = vmul.f32 %v15062_v57, %v2749_v8 }
 0x428   : > { %v7891_v16 = vpop.f32.mrb[93].mxu0  ;;  %v8007_v5 = vadd.f32 %v8006_v51, %v8005_v10  ;;  %2709 = vst.msk [vmem:[#allocation3 + $0x48] sm:$0xff] %vm326_vm1, %v2676_v40  ;;  %v2486_v22 = vmul.f32 %v15058_v60, %v2454_v11  ;;  %v2458_v51 = vld [vmem:[#allocation3 + $0x78] sm:$0xff]  ;;  %v2467_v60 = vld [vmem:[#allocation3 + $0xc0] sm:$0xff] }
 0x429   : > { %v7892_v0 = vadd.f32 %v7891_v16, %v7890_v3  ;;  %v7893_v52 = vpop.f32.mrb[94].mxu0  ;;  %3579 = vst.msk [vmem:[#allocation4 + $0x68] sm:$0xff] %vm455_vm0, %v3547_v56  ;;  %v2566_v13 = vpop.xlane.xlu1 %2565  ;;  %v2456_v3 = vld [vmem:[#allocation3 + $0x68] sm:$0xff]  ;;  %v2493_v16 = vmul.f32 %v15059_v9, %v2461_v44  ;;  %v15066_v44 = vld [vmem:[#allocation47_spill] sm:$0xff] }
 0x42a   : > { %v7894_v14 = vpop.f32.mrb[95].mxu0  ;;  %2714 = vst.msk [vmem:[#allocation3 + $0x70] sm:$0xff] %vm326_vm1, %v2681_v1  ;;  %v2591_v38 = vpop.xlane.xlu0 %2590  ;;  %v2678_v24 = vadd.f32 %v2566_v13, %v2486_v22  ;;  %v2750_v1 = vld [vmem:[#allocation4 + $0x90] sm:$0xff]  ;;  %v15068_v13 = vld [vmem:[#allocation36_spill] sm:$0xff] }
 0x42b   : > { %v3464_v33 = vadd.f32 %v8004_v19, %v7892_v0  ;;  %v7895_v41 = vadd.f32 %v7894_v14, %v7893_v52  ;;  %v2683_v21 = vadd.f32 %v2591_v38, %v2491_v54  ;;  %v15061_v19 = vld [vmem:[#allocation134_spill] sm:$0xff]  ;;  %v15065_v38 = vld [vmem:[#allocation147_spill] sm:$0xff]  ;;  %v2942_v28 = vmul.f32 %v15066_v44, %v2750_v1  ;;  %v15075_v44 = vld [vmem:[#allocation161_spill] sm:$0xff] }
 0x42c   : > { %2711 = vst.msk [vmem:[#allocation3 + $0x58] sm:$0xff] %vm326_vm1, %v2678_v24  ;;  %v2488_v10 = vmul.f32 %v15061_v19, %v2456_v3 }
 0x42d   : > { %v3548_v45 = vadd.f32 %v3464_v33, %v2938_v23  ;;  %v3467_v31 = vadd.f32 %v8007_v5, %v7895_v41  ;;  %v8008_v36 = vpop.f32.mrb[96].mxu1  ;;  %2716 = vst.msk [vmem:[#allocation3 + $0x80] sm:$0xff] %vm326_vm1, %v2683_v21  ;;  %v2576_v14 = vpop.xlane.xlu1 %2575  ;;  %v15063_v23 = vld [vmem:[#allocation145_spill] sm:$0xff] }
 0x42e   : > { %v8009_v27 = vpop.f32.mrb[97].mxu1  ;;  %v2601_v52 = vpop.xlane.xlu0 %2600  ;;  %v2680_v62 = vadd.f32 %v2576_v14, %v2488_v10  ;;  %v2495_v33 = vmul.f32 %v15063_v23, %v2463_v6  ;;  %v2469_v6 = vld [vmem:[#allocation3 + $0xd0] sm:$0xff] }
 0x42f   : > { %v7896_v32 = vpop.f32.mrb[96].mxu0  ;;  %3580 = vst.msk [vmem:[#allocation4 + $0x70] sm:$0xff] %vm455_vm0, %v3548_v45  ;;  %v3549_v25 = vadd.f32 %v3467_v31, %v2939_v50  ;;  %v8010_v34 = vadd.f32 %v8009_v27, %v8008_v36  ;;  %v8011_v12 = vpop.f32.mrb[98].mxu1  ;;  %v2685_v4 = vadd.f32 %v2601_v52, %v2493_v16  ;;  %v15064_v45 = vld [vmem:[#allocation136_spill] sm:$0xff]  ;;  %v2751_v36 = vld [vmem:[#allocation4 + $0x98] sm:$0xff] }
 0x430   : > { %v7897_v59 = vpop.f32.mrb[97].mxu0  ;;  %v8012_v56 = vpop.f32.mrb[99].mxu1  ;;  %2713 = vst.msk [vmem:[#allocation3 + $0x68] sm:$0xff] %vm326_vm1, %v2680_v62  ;;  %v2490_v31 = vmul.f32 %v15064_v45, %v2458_v51  ;;  %v2943_v3 = vmul.f32 %v15068_v13, %v2751_v36  ;;  %v2471_v45 = vld [vmem:[#allocation3 + $0xe0] sm:$0xff] }
 0x431   : > { %v7898_v39 = vadd.f32 %v7897_v59, %v7896_v32  ;;  %v7899_v37 = vpop.f32.mrb[98].mxu0  ;;  %3581 = vst.msk [vmem:[#allocation4 + $0x78] sm:$0xff] %vm455_vm0, %v3549_v25  ;;  %v8013_v15 = vadd.f32 %v8012_v56, %v8011_v12  ;;  %v2586_v40 = vpop.xlane.xlu1 %2585  ;;  %v2460_v32 = vld [vmem:[#allocation3 + $0x88] sm:$0xff]  ;;  %v2497_v59 = vmul.f32 %v15065_v38, %v2465_v61  ;;  %v2462_v56 = vld [vmem:[#allocation3 + $0x98] sm:$0xff] }
 0x432   : > { %v7900_v42 = vpop.f32.mrb[99].mxu0  ;;  %2718 = vst.msk [vmem:[#allocation3 + $0x90] sm:$0xff] %vm326_vm1, %v2685_v4  ;;  %v2611_v5 = vpop.xlane.xlu0 %2610  ;;  %v2682_v2 = vadd.f32 %v2586_v40, %v2490_v31  ;;  %v2752_v4 = vld [vmem:[#allocation4 + $0xa0] sm:$0xff]  ;;  %v15072_v61 = vld [vmem:[#allocation67_spill] sm:$0xff] }
 0x433   : > { %v3472_v53 = vadd.f32 %v8010_v34, %v7898_v39  ;;  %v7901_v0 = vadd.f32 %v7900_v42, %v7899_v37  ;;  %v2687_v30 = vadd.f32 %v2611_v5, %v2495_v33  ;;  %v15067_v34 = vld [vmem:[#allocation138_spill] sm:$0xff]  ;;  %v15071_v5 = vld [vmem:[#allocation151_spill] sm:$0xff]  ;;  %v2944_v1 = vmul.f32 %v15072_v61, %v2752_v4  ;;  %v15074_v40 = vld [vmem:[#allocation40_spill] sm:$0xff] }
 0x434   : > { %2715 = vst.msk [vmem:[#allocation3 + $0x78] sm:$0xff] %vm326_vm1, %v2682_v2  ;;  %v2492_v12 = vmul.f32 %v15067_v34, %v2460_v32 }
 0x435   : > { %v3550_v47 = vadd.f32 %v3472_v53, %v2940_v55  ;;  %v3475_v20 = vadd.f32 %v8013_v15, %v7901_v0  ;;  %v8014_v46 = vpop.f32.mrb[100].mxu1  ;;  %2720 = vst.msk [vmem:[#allocation3 + $0xa0] sm:$0xff] %vm326_vm1, %v2687_v30  ;;  %v2596_v42 = vpop.xlane.xlu1 %2595  ;;  %v15069_v55 = vld [vmem:[#allocation149_spill] sm:$0xff] }
 0x436   : > { %v8015_v29 = vpop.f32.mrb[101].mxu1  ;;  %v2621_v37 = vpop.xlane.xlu0 %2620  ;;  %v2684_v9 = vadd.f32 %v2596_v42, %v2492_v12  ;;  %v2499_v53 = vmul.f32 %v15069_v55, %v2467_v60  ;;  %v2473_v60 = vld [vmem:[#allocation3 + $0xf0] sm:$0xff] }
 0x437   : > { %v7902_v7 = vpop.f32.mrb[100].mxu0  ;;  %3582 = vst.msk [vmem:[#allocation4 + $0x80] sm:$0xff] %vm455_vm0, %v3550_v47  ;;  %v3551_v41 = vadd.f32 %v3475_v20, %v2941_v18  ;;  %v8016_v48 = vadd.f32 %v8015_v29, %v8014_v46  ;;  %v8017_v11 = vpop.f32.mrb[102].mxu1  ;;  %v2689_v22 = vadd.f32 %v2621_v37, %v2497_v59  ;;  %v15070_v47 = vld [vmem:[#allocation140_spill] sm:$0xff]  ;;  %v2753_v46 = vld [vmem:[#allocation4 + $0xa8] sm:$0xff] }
 0x438   : > { %v7903_v58 = vpop.f32.mrb[101].mxu0  ;;  %v8018_v25 = vpop.f32.mrb[103].mxu1  ;;  %2717 = vst.msk [vmem:[#allocation3 + $0x88] sm:$0xff] %vm326_vm1, %v2684_v9  ;;  %v2494_v20 = vmul.f32 %v15070_v47, %v2462_v56  ;;  %v2945_v32 = vmul.f32 %v15074_v40, %v2753_v46  ;;  %v15076_v56 = vld [vmem:[#allocation144_spill] sm:$0xff] }
 0x439   : > { %v7904_v17 = vadd.f32 %v7903_v58, %v7902_v7  ;;  %v7905_v50 = vpop.f32.mrb[102].mxu0  ;;  %3583 = vst.msk [vmem:[#allocation4 + $0x88] sm:$0xff] %vm455_vm0, %v3551_v41  ;;  %v8019_v27 = vadd.f32 %v8018_v25, %v8017_v11  ;;  %v2606_v62 = vpop.xlane.xlu1 %2605  ;;  %v2464_v7 = vld [vmem:[#allocation3 + $0xa8] sm:$0xff]  ;;  %v2501_v58 = vmul.f32 %v15071_v5, %v2469_v6 }
 0x43a   : > { %v7906_v54 = vpop.f32.mrb[103].mxu0  ;;  %2722 = vst.msk [vmem:[#allocation3 + $0xb0] sm:$0xff] %vm326_vm1, %v2689_v22  ;;  %v2631_v15 = vpop.xlane.xlu0 %2630  ;;  %v2686_v23 = vadd.f32 %v2606_v62, %v2494_v20  ;;  %v2754_v22 = vld [vmem:[#allocation4 + $0xb0] sm:$0xff]  ;;  %v15078_v6 = vld [vmem:[#allocation57_spill] sm:$0xff]  ;;  %v15079_v20 = vld [vmem:[#allocation48_spill] sm:$0xff] }
 0x43b   : > { %v3480_v21 = vadd.f32 %v8016_v48, %v7904_v17  ;;  %v7907_v39 = vadd.f32 %v7906_v54, %v7905_v50  ;;  %v2691_v19 = vadd.f32 %v2631_v15, %v2499_v53  ;;  %v15073_v48 = vld [vmem:[#allocation142_spill] sm:$0xff]  ;;  %v2946_v4 = vmul.f32 %v15078_v6, %v2754_v22 }
 0x43c   : > { %2719 = vst.msk [vmem:[#allocation3 + $0x98] sm:$0xff] %vm326_vm1, %v2686_v23  ;;  %v2496_v11 = vmul.f32 %v15073_v48, %v2464_v7  ;;  %v15080_v7 = vld [vmem:[#allocation146_spill] sm:$0xff] }
 0x43d   : > { %v3552_v8 = vadd.f32 %v3480_v21, %v2942_v28  ;;  %v3483_v24 = vadd.f32 %v8019_v27, %v7907_v39  ;;  %v8020_v43 = vpop.f32.mrb[104].mxu1  ;;  %2724 = vst.msk [vmem:[#allocation3 + $0xc0] sm:$0xff] %vm326_vm1, %v2691_v19  ;;  %v2616_v54 = vpop.xlane.xlu1 %2615  ;;  %v2503_v28 = vmul.f32 %v15075_v44, %v2471_v45  ;;  %v2466_v21 = vld [vmem:[#allocation3 + $0xb8] sm:$0xff]  ;;  %v15084_v22 = vld [vmem:[#allocation162_spill] sm:$0xff] }
 0x43e   : > { %v8021_v57 = vpop.f32.mrb[105].mxu1  ;;  %v2641_v50 = vpop.xlane.xlu0 %2640  ;;  %v2688_v25 = vadd.f32 %v2616_v54, %v2496_v11  ;;  %v2498_v9 = vmul.f32 %v15076_v56, %v2466_v21  ;;  %v15081_v11 = vld [vmem:[#allocation148_spill] sm:$0xff] }
 0x43f   : > { %v7908_v16 = vpop.f32.mrb[104].mxu0  ;;  %3584 = vst.msk [vmem:[#allocation4 + $0x90] sm:$0xff] %vm455_vm0, %v3552_v8  ;;  %v3553_v0 = vadd.f32 %v3483_v24, %v2943_v3  ;;  %v8022_v14 = vadd.f32 %v8021_v57, %v8020_v43  ;;  %v8023_v51 = vpop.f32.mrb[106].mxu1  ;;  %v2693_v31 = vadd.f32 %v2641_v50, %v2501_v58 }
 0x440   : > { %v7909_v52 = vpop.f32.mrb[105].mxu0  ;;  %v8024_v41 = vpop.f32.mrb[107].mxu1  ;;  %2721 = vst.msk [vmem:[#allocation3 + $0xa8] sm:$0xff] %vm326_vm1, %v2688_v25  ;;  %v2472_v25 = vld [vmem:[#allocation3 + $0xe8] sm:$0xff] }
 0x441   : > { %v7910_v10 = vadd.f32 %v7909_v52, %v7908_v16  ;;  %v7911_v18 = vpop.f32.mrb[106].mxu0  ;;  %3585 = vst.msk [vmem:[#allocation4 + $0x98] sm:$0xff] %vm455_vm0, %v3553_v0  ;;  %v8025_v29 = vadd.f32 %v8024_v41, %v8023_v51  ;;  %v2755_v16 = vld [vmem:[#allocation4 + $0xb8] sm:$0xff]  ;;  %v2626_v53 = vpop.xlane.xlu1 %2625  ;;  %v15077_v0 = vld [vmem:[#allocation37_spill] sm:$0xff] }
 0x442   : > { %v7912_v33 = vpop.f32.mrb[107].mxu0  ;;  %2726 = vst.msk [vmem:[#allocation3 + $0xd0] sm:$0xff] %vm326_vm1, %v2693_v31  ;;  %v2651_v27 = vpop.xlane.xlu0 %2650  ;;  %v2505_v15 = vmul.f32 %v15077_v0, %v2473_v60  ;;  %v2468_v52 = vld [vmem:[#allocation3 + $0xc8] sm:$0xff]  ;;  %v2690_v57 = vadd.f32 %v2626_v53, %v2498_v9  ;;  %v2470_v41 = vld [vmem:[#allocation3 + $0xd8] sm:$0xff]  ;;  %v2758_v9 = vld [vmem:[#allocation4 + $0xd0] sm:$0xff] }
 0x443   : > { %v3488_v30 = vadd.f32 %v8022_v14, %v7910_v10  ;;  %v7913_v17 = vadd.f32 %v7912_v33, %v7911_v18  ;;  %v2695_v34 = vadd.f32 %v2651_v27, %v2503_v28  ;;  %v2947_v14 = vmul.f32 %v15079_v20, %v2755_v16 }
 0x444   : > { %2723 = vst.msk [vmem:[#allocation3 + $0xb8] sm:$0xff] %vm326_vm1, %v2690_v57  ;;  %v2500_v46 = vmul.f32 %v15080_v7, %v2468_v52  ;;  %v2502_v40 = vmul.f32 %v15081_v11, %v2470_v41  ;;  %v15085_v52 = vld [vmem:[#allocation38_spill] sm:$0xff] }
 0x445   : > { %v3554_v36 = vadd.f32 %v3488_v30, %v2944_v1  ;;  %v3491_v2 = vadd.f32 %v8025_v29, %v7913_v17  ;;  %v8026_v59 = vpop.f32.mrb[108].mxu1  ;;  %2728 = vst.msk [vmem:[#allocation3 + $0xe0] sm:$0xff] %vm326_vm1, %v2695_v34  ;;  %v2636_v23 = vpop.xlane.xlu1 %2635  ;;  %v2756_v30 = vld [vmem:[#allocation4 + $0xc0] sm:$0xff]  ;;  %v2504_v34 = vmul.f32 %v15084_v22, %v2472_v25  ;;  %v2763_v22 = vld [vmem:[#allocation4 + $0xf8] sm:$0xff] }
 0x446   : > { %v8027_v13 = vpop.f32.mrb[109].mxu1  ;;  %v2661_v18 = vpop.xlane.xlu0 %2660  ;;  %v2692_v58 = vadd.f32 %v2636_v23, %v2500_v46 }
 0x447   : > { %v7914_v38 = vpop.f32.mrb[108].mxu0  ;;  %3586 = vst.msk [vmem:[#allocation4 + $0xa0] sm:$0xff] %vm455_vm0, %v3554_v36  ;;  %v3555_v39 = vadd.f32 %v3491_v2, %v2945_v32  ;;  %v8028_v8 = vadd.f32 %v8027_v13, %v8026_v59  ;;  %v8029_v24 = vpop.f32.mrb[110].mxu1  ;;  %v2697_v47 = vadd.f32 %v2661_v18, %v2505_v15  ;;  %v2757_v32 = vld [vmem:[#allocation4 + $0xc8] sm:$0xff]  ;;  %v15086_v18 = vld [vmem:[#allocation82_spill] sm:$0xff] }
 0x448   : > { %v7915_v37 = vpop.f32.mrb[109].mxu0  ;;  %v8030_v55 = vpop.f32.mrb[111].mxu1  ;;  %2725 = vst.msk [vmem:[#allocation3 + $0xc8] sm:$0xff] %vm326_vm1, %v2692_v58 }
 0x449   : > { %v7916_v12 = vadd.f32 %v7915_v37, %v7914_v38  ;;  %v7917_v3 = vpop.f32.mrb[110].mxu0  ;;  %3587 = vst.msk [vmem:[#allocation4 + $0xa8] sm:$0xff] %vm455_vm0, %v3555_v39  ;;  %v8031_v10 = vadd.f32 %v8030_v55, %v8029_v24  ;;  %v2646_v54 = vpop.xlane.xlu1 %2645  ;;  %v15082_v38 = vld [vmem:[#allocation64_spill] sm:$0xff]  ;;  %v15083_v39 = vld [vmem:[#allocation70_spill] sm:$0xff] }
 0x44a   : > { %v7918_v42 = vpop.f32.mrb[111].mxu0  ;;  %2730 = vst.msk [vmem:[#allocation3 + $0xf0] sm:$0xff] %vm326_vm1, %v2697_v47  ;;  %v2948_v59 = vmul.f32 %v15082_v38, %v2756_v30  ;;  %v2694_v21 = vadd.f32 %v2646_v54, %v2502_v40  ;;  %v2949_v27 = vmul.f32 %v15083_v39, %v2757_v32  ;;  %v2950_v47 = vmul.f32 %v15086_v18, %v2758_v9 }
 0x44b   : > { %v7919_v43 = vadd.f32 %v7918_v42, %v7917_v3  ;;  %v3496_v19 = vadd.f32 %v8028_v8, %v7916_v12  ;;  %v2474_v3 = vld [vmem:[#allocation3 + $0xf8] sm:$0xff] }
 0x44c   : > { %2727 = vst.msk [vmem:[#allocation3 + $0xd8] sm:$0xff] %vm326_vm1, %v2694_v21  ;;  %v2506_v6 = vmul.f32 %v15085_v52, %v2474_v3 }
 0x44d   : > { %v3556_v51 = vadd.f32 %v3496_v19, %v2946_v4  ;;  %v3499_v62 = vadd.f32 %v8031_v10, %v7919_v43  ;;  %v8032_v61 = vpop.f32.mrb[112].mxu1  ;;  %v2656_v12 = vpop.xlane.xlu1 %2655  ;;  %v2759_v4 = vld [vmem:[#allocation4 + $0xd8] sm:$0xff] }
 0x44e   : > { %v8033_v29 = vpop.f32.mrb[113].mxu1  ;;  %v2696_v24 = vadd.f32 %v2656_v12, %v2504_v34 }
 0x44f   : > { %v7920_v33 = vpop.f32.mrb[112].mxu0  ;;  %3588 = vst.msk [vmem:[#allocation4 + $0xb0] sm:$0xff] %vm455_vm0, %v3556_v51  ;;  %v3557_v5 = vadd.f32 %v3499_v62, %v2947_v14  ;;  %v8034_v45 = vadd.f32 %v8033_v29, %v8032_v61  ;;  %v8035_v31 = vpop.f32.mrb[114].mxu1  ;;  %v15087_v62 = vld [vmem:[#allocation60_spill] sm:$0xff] }
 0x450   : > { %v7921_v1 = vpop.f32.mrb[113].mxu0  ;;  %v8036_v2 = vpop.f32.mrb[115].mxu1  ;;  %2729 = vst.msk [vmem:[#allocation3 + $0xe8] sm:$0xff] %vm326_vm1, %v2696_v24  ;;  %v2951_v7 = vmul.f32 %v15087_v62, %v2759_v4  ;;  %v2955_v24 = vmul.f32 %v12456_v35, %v2763_v22 }
 0x451   : > { %v7922_v17 = vadd.f32 %v7921_v1, %v7920_v33  ;;  %v7923_v50 = vpop.f32.mrb[114].mxu0  ;;  %3589 = vst.msk [vmem:[#allocation4 + $0xb8] sm:$0xff] %vm455_vm0, %v3557_v5  ;;  %v8037_v28 = vadd.f32 %v8036_v2, %v8035_v31  ;;  %v2666_v57 = vpop.xlane.xlu1 %2665  ;;  %v2760_v5 = vld [vmem:[#allocation4 + $0xe0] sm:$0xff] }
 0x452   : > { %v7924_v48 = vpop.f32.mrb[115].mxu0  ;;  %v2698_v51 = vadd.f32 %v2666_v57, %v2506_v6  ;;  %v2952_v11 = vmul.f32 %v12469_v26, %v2760_v5 }
 0x453   : > { %v7925_v36 = vadd.f32 %v7924_v48, %v7923_v50  ;;  %v3504_v44 = vadd.f32 %v8034_v45, %v7922_v17  ;;  %v2761_v45 = vld [vmem:[#allocation4 + $0xe8] sm:$0xff] }
 0x454   : > { %2731 = vst.msk [vmem:[#allocation3 + $0xf8] sm:$0xff] %vm326_vm1, %v2698_v51  ;;  %v2953_v2 = vmul.f32 %v12448_v49, %v2761_v45 }
 0x455   : > { %v3558_v37 = vadd.f32 %v3504_v44, %v2948_v59  ;;  %v3507_v60 = vadd.f32 %v8037_v28, %v7925_v36  ;;  %v8038_v42 = vpop.f32.mrb[116].mxu1  ;;  %v2762_v28 = vld [vmem:[#allocation4 + $0xf0] sm:$0xff] }
 0x456   : > { %v8039_v43 = vpop.f32.mrb[117].mxu1  ;;  %v2954_v49 = vmul.f32 %v12485_v63, %v2762_v28 }
 0x457   : > { %v7926_v13 = vpop.f32.mrb[116].mxu0  ;;  %3590 = vst.msk [vmem:[#allocation4 + $0xc0] sm:$0xff] %vm455_vm0, %v3558_v37  ;;  %v3559_v8 = vadd.f32 %v3507_v60, %v2949_v27  ;;  %v8040_v53 = vadd.f32 %v8039_v43, %v8038_v42  ;;  %v8041_v0 = vpop.f32.mrb[118].mxu1 }
 0x458   : > { %v7927_v56 = vpop.f32.mrb[117].mxu0  ;;  %v8042_v10 = vpop.f32.mrb[119].mxu1 }
 0x459   : > { %v7928_v16 = vadd.f32 %v7927_v56, %v7926_v13  ;;  %v7929_v55 = vpop.f32.mrb[118].mxu0  ;;  %3591 = vst.msk [vmem:[#allocation4 + $0xc8] sm:$0xff] %vm455_vm0, %v3559_v8  ;;  %v8043_v14 = vadd.f32 %v8042_v10, %v8041_v0 }
 0x45a   : > { %v7930_v15 = vpop.f32.mrb[119].mxu0 }
 0x45b   : > { %v7931_v19 = vadd.f32 %v7930_v15, %v7929_v55  ;;  %v3512_v20 = vadd.f32 %v8040_v53, %v7928_v16 }
 0x45d   : > { %v3560_v46 = vadd.f32 %v3512_v20, %v2950_v47  ;;  %v3515_v23 = vadd.f32 %v8043_v14, %v7931_v19  ;;  %v8044_v41 = vpop.f32.mrb[120].mxu1 }
 0x45e   : > { %v8045_v1 = vpop.f32.mrb[121].mxu1 }
 0x45f   : > { %v7932_v33 = vpop.f32.mrb[120].mxu0  ;;  %3592 = vst.msk [vmem:[#allocation4 + $0xd0] sm:$0xff] %vm455_vm0, %v3560_v46  ;;  %v3561_v58 = vadd.f32 %v3515_v23, %v2951_v7  ;;  %v8046_v17 = vadd.f32 %v8045_v1, %v8044_v41  ;;  %v8047_v50 = vpop.f32.mrb[122].mxu1 }
 0x460   : > { %v7933_v61 = vpop.f32.mrb[121].mxu0  ;;  %v8048_v48 = vpop.f32.mrb[123].mxu1 }
 0x461   : > { %v7934_v30 = vadd.f32 %v7933_v61, %v7932_v33  ;;  %v7935_v29 = vpop.f32.mrb[122].mxu0  ;;  %3593 = vst.msk [vmem:[#allocation4 + $0xd8] sm:$0xff] %vm455_vm0, %v3561_v58  ;;  %v8049_v36 = vadd.f32 %v8048_v48, %v8047_v50 }
 0x462   : > { %v7936_v31 = vpop.f32.mrb[123].mxu0 }
 0x463   : > { %v3520_v40 = vadd.f32 %v8046_v17, %v7934_v30  ;;  %v7937_v32 = vadd.f32 %v7936_v31, %v7935_v29 }
 0x465   : > { %v3562_v54 = vadd.f32 %v3520_v40, %v2952_v11  ;;  %v3523_v25 = vadd.f32 %v8049_v36, %v7937_v32  ;;  %v8050_v44 = vpop.f32.mrb[124].mxu1 }
 0x466   : > { %v8051_v39 = vpop.f32.mrb[125].mxu1 }
 0x467   : > { %3594 = vst.msk [vmem:[#allocation4 + $0xe0] sm:$0xff] %vm455_vm0, %v3562_v54  ;;  %v3563_v38 = vadd.f32 %v3523_v25, %v2953_v2  ;;  %v7938_v59 = vpop.f32.mrb[124].mxu0  ;;  %v8052_v37 = vadd.f32 %v8051_v39, %v8050_v44  ;;  %v8053_v60 = vpop.f32.mrb[126].mxu1 }
 0x468   : > { %v7939_v21 = vpop.f32.mrb[125].mxu0  ;;  %v8054_v12 = vpop.f32.mrb[127].mxu1 }
 0x469   : > { %3595 = vst.msk [vmem:[#allocation4 + $0xe8] sm:$0xff] %vm455_vm0, %v3563_v38  ;;  %v7940_v27 = vadd.f32 %v7939_v21, %v7938_v59  ;;  %v7941_v26 = vpop.f32.mrb[126].mxu0  ;;  %v8055_v8 = vadd.f32 %v8054_v12, %v8053_v60 }
 0x46a   : > { %v7942_v34 = vpop.f32.mrb[127].mxu0 }
 0x46b   : > { %v3528_v13 = vadd.f32 %v8052_v37, %v7940_v27  ;;  %v7943_v3 = vadd.f32 %v7942_v34, %v7941_v26 }
 0x46d   : > { %v3564_v42 = vadd.f32 %v3528_v13, %v2954_v49  ;;  %v3531_v56 = vadd.f32 %v8055_v8, %v7943_v3 }
 0x46f   : > { %3596 = vst.msk [vmem:[#allocation4 + $0xf0] sm:$0xff] %vm455_vm0, %v3564_v42  ;;  %v3565_v9 = vadd.f32 %v3531_v56, %v2955_v24  ;;  %v3904_v16 = vpop.f32.mrb[128].mxu0 }
 0x470   : > { %v12598_v43 = vmul.f32 0.125, %v3904_v16  ;;  %v3906_v55 = vpop.f32.mrb[129].mxu0 }
 0x471   : > { %3597 = vst.msk [vmem:[#allocation4 + $0xf8] sm:$0xff] %vm455_vm0, %v3565_v9  ;;  %v12600_v53 = vmul.f32 0.125, %v3906_v55  ;;  %v3908_v0 = vpop.f32.mrb[130].mxu0  ;;  %v4097_v52 = vpop.f32.mrb[128].mxu1 }
 0x472   : > { %v12602_v63 = vmul.f32 0.125, %v3908_v0  ;;  %v3910_v15 = vpop.f32.mrb[131].mxu0  ;;  %v12608_v4 = vmul.f32 0.125, %v4097_v52  ;;  %v4099_v19 = vpop.f32.mrb[129].mxu1 }
 0x473   : > { %v4417_v35 = vmax.f32 %v12598_v43, %v12600_v53  ;;  %v12606_v6 = vmul.f32 0.125, %v3910_v15  ;;  %v12610_v10 = vmul.f32 0.125, %v4099_v19  ;;  %v4101_v57 = vpop.f32.mrb[130].mxu1 }
 0x474   : > { %v12615_v20 = vmul.f32 0.125, %v4101_v57  ;;  %v4103_v14 = vpop.f32.mrb[131].mxu1 }
 0x475   : > { %v4422_v18 = vmax.f32 %v12602_v63, %v12606_v6  ;;  %v4418_v47 = vmax.f32 %v4417_v35, %v12608_v4  ;;  %v12617_v51 = vmul.f32 0.125, %v4103_v14 }
 0x477   : > { %v4419_v62 = vmax.f32 %v4418_v47, %v12610_v10  ;;  %v4423_v7 = vmax.f32 %v4422_v18, %v12615_v20  ;;  %v3914_v46 = vpop.f32.mrb[132].mxu0 }
 0x478   : > { %v12621_v23 = vmul.f32 0.125, %v3914_v46  ;;  %v3916_v33 = vpop.f32.mrb[133].mxu0 }
 0x479   : > { %v4424_v41 = vmax.f32 %v4423_v7, %v12617_v51  ;;  %v12624_v5 = vmul.f32 0.125, %v3916_v33  ;;  %v3918_v58 = vpop.f32.mrb[134].mxu0  ;;  %4420 = vmax.xlane.f32.xlu1 %v4419_v62  ;;  %v4107_v30 = vpop.f32.mrb[132].mxu1 }
 0x47a   : > { %v12626_v61 = vmul.f32 0.125, %v3918_v58  ;;  %v3920_v1 = vpop.f32.mrb[135].mxu0  ;;  %v12632_v50 = vmul.f32 0.125, %v4107_v30  ;;  %v4109_v45 = vpop.f32.mrb[133].mxu1 }
 0x47b   : > { %v4427_v17 = vmax.f32 %v12621_v23, %v12624_v5  ;;  %v12630_v29 = vmul.f32 0.125, %v3920_v1  ;;  %4425 = vmax.xlane.f32.xlu0 %v4424_v41  ;;  %v12634_v31 = vmul.f32 0.125, %v4109_v45  ;;  %v4111_v48 = vpop.f32.mrb[134].mxu1 }
 0x47c   : > { %v12639_v32 = vmul.f32 0.125, %v4111_v48  ;;  %v4113_v36 = vpop.f32.mrb[135].mxu1 }
 0x47d   : > { %v4432_v11 = vmax.f32 %v12626_v61, %v12630_v29  ;;  %v4428_v40 = vmax.f32 %v4427_v17, %v12632_v50  ;;  %v12641_v2 = vmul.f32 0.125, %v4113_v36 }
 0x47f   : > { %v4429_v54 = vmax.f32 %v4428_v40, %v12634_v31  ;;  %v4433_v25 = vmax.f32 %v4432_v11, %v12639_v32  ;;  %v3924_v38 = vpop.f32.mrb[136].mxu0 }
 0x480   : > { %v12645_v59 = vmul.f32 0.125, %v3924_v38  ;;  %v3926_v44 = vpop.f32.mrb[137].mxu0 }
 0x481   : > { %v4434_v28 = vmax.f32 %v4433_v25, %v12641_v2  ;;  %v12648_v21 = vmul.f32 0.125, %v3926_v44  ;;  %v3928_v39 = vpop.f32.mrb[138].mxu0  ;;  %4430 = vmax.xlane.f32.xlu0 %v4429_v54 }
 0x482   : > { %v12650_v27 = vmul.f32 0.125, %v3928_v39  ;;  %v3930_v37 = vpop.f32.mrb[139].mxu0  ;;  %v4117_v26 = vpop.f32.mrb[136].mxu1 }
 0x483   : > { %v4437_v60 = vmax.f32 %v12645_v59, %v12648_v21  ;;  %v12654_v22 = vmul.f32 0.125, %v3930_v37  ;;  %v12656_v34 = vmul.f32 0.125, %v4117_v26  ;;  %4435 = vmax.xlane.f32.xlu1 %v4434_v28  ;;  %v4119_v12 = vpop.f32.mrb[137].mxu1 }
 0x484   : > { %v12658_v49 = vmul.f32 0.125, %v4119_v12  ;;  %v4121_v13 = vpop.f32.mrb[138].mxu1 }
 0x485   : > { %v4442_v3 = vmax.f32 %v12650_v27, %v12654_v22  ;;  %v4438_v8 = vmax.f32 %v4437_v60, %v12656_v34  ;;  %v12663_v24 = vmul.f32 0.125, %v4121_v13  ;;  %v4123_v42 = vpop.f32.mrb[139].mxu1 }
 0x486   : > { %v12665_v56 = vmul.f32 0.125, %v4123_v42 }
 0x487   : > { %v4439_v9 = vmax.f32 %v4438_v8, %v12658_v49  ;;  %v4443_v16 = vmax.f32 %v4442_v3, %v12663_v24  ;;  %v3934_v55 = vpop.f32.mrb[140].mxu0 }
 0x488   : > { %v12669_v0 = vmul.f32 0.125, %v3934_v55  ;;  %v3936_v15 = vpop.f32.mrb[141].mxu0 }
 0x489   : > { %v4444_v52 = vmax.f32 %v4443_v16, %v12665_v56  ;;  %v12672_v35 = vmul.f32 0.125, %v3936_v15  ;;  %v3938_v19 = vpop.f32.mrb[142].mxu0  ;;  %4440 = vmax.xlane.f32.xlu0 %v4439_v9 }
 0x48a   : > { %v12674_v57 = vmul.f32 0.125, %v3938_v19  ;;  %v3940_v18 = vpop.f32.mrb[143].mxu0  ;;  %v4127_v47 = vpop.f32.mrb[140].mxu1 }
 0x48b   : > { %v4447_v14 = vmax.f32 %v12669_v0, %v12672_v35  ;;  %v12678_v62 = vmul.f32 0.125, %v3940_v18  ;;  %v12680_v7 = vmul.f32 0.125, %v4127_v47  ;;  %4445 = vmax.xlane.f32.xlu1 %v4444_v52  ;;  %v4129_v46 = vpop.f32.mrb[141].mxu1 }
 0x48c   : > { %v12682_v33 = vmul.f32 0.125, %v4129_v46  ;;  %v4131_v41 = vpop.f32.mrb[142].mxu1 }
 0x48d   : > { %v4452_v58 = vmax.f32 %v12674_v57, %v12678_v62  ;;  %v4448_v1 = vmax.f32 %v4447_v14, %v12680_v7  ;;  %v12687_v30 = vmul.f32 0.125, %v4131_v41  ;;  %v4133_v17 = vpop.f32.mrb[143].mxu1 }
 0x48e   : > { %15088 = vst [vmem:[#allocation83_spill] sm:$0xff] %v12682_v33  ;;  %v12689_v45 = vmul.f32 0.125, %v4133_v17 }
 0x48f   : > { %v4449_v48 = vmax.f32 %v4448_v1, %v12682_v33  ;;  %v4453_v11 = vmax.f32 %v4452_v58, %v12687_v30  ;;  %v3944_v40 = vpop.f32.mrb[144].mxu0 }
 0x490   : > { %v12693_v36 = vmul.f32 0.125, %v3944_v40  ;;  %v3946_v54 = vpop.f32.mrb[145].mxu0 }
 0x491   : > { %v4454_v25 = vmax.f32 %v4453_v11, %v12689_v45  ;;  %v12696_v38 = vmul.f32 0.125, %v3946_v54  ;;  %v3948_v44 = vpop.f32.mrb[146].mxu0  ;;  %4450 = vmax.xlane.f32.xlu0 %v4449_v48 }
 0x492   : > { %15089 = vst [vmem:[#allocation85_spill] sm:$0xff] %v12693_v36  ;;  %v12698_v28 = vmul.f32 0.125, %v3948_v44  ;;  %v3950_v39 = vpop.f32.mrb[147].mxu0  ;;  %v4137_v37 = vpop.f32.mrb[144].mxu1 }
 0x493   : > { %15090 = vst [vmem:[#allocation87_spill] sm:$0xff] %v12696_v38  ;;  %v4457_v26 = vmax.f32 %v12693_v36, %v12696_v38  ;;  %v12702_v60 = vmul.f32 0.125, %v3950_v39  ;;  %v12704_v12 = vmul.f32 0.125, %v4137_v37  ;;  %4455 = vmax.xlane.f32.xlu1 %v4454_v25  ;;  %v4139_v13 = vpop.f32.mrb[145].mxu1 }
 0x494   : > { %15091 = vst [vmem:[#allocation71_spill] sm:$0xff] %v12698_v28  ;;  %v12706_v3 = vmul.f32 0.125, %v4139_v13  ;;  %v4141_v8 = vpop.f32.mrb[146].mxu1 }
 0x495   : > { %15092 = vst [vmem:[#allocation73_spill] sm:$0xff] %v12702_v60  ;;  %15093 = vst [vmem:[#allocation72_spill] sm:$0xff] %v12704_v12  ;;  %v4462_v42 = vmax.f32 %v12698_v28, %v12702_v60  ;;  %v4458_v9 = vmax.f32 %v4457_v26, %v12704_v12  ;;  %v12711_v16 = vmul.f32 0.125, %v4141_v8  ;;  %v4143_v55 = vpop.f32.mrb[147].mxu1 }
 0x496   : > { %15094 = vst [vmem:[#allocation76_spill] sm:$0xff] %v12706_v3  ;;  %v12713_v15 = vmul.f32 0.125, %v4143_v55 }
 0x497   : > { %15095 = vst [vmem:[#allocation91_spill] sm:$0xff] %v12711_v16  ;;  %v4459_v52 = vmax.f32 %v4458_v9, %v12706_v3  ;;  %v4463_v19 = vmax.f32 %v4462_v42, %v12711_v16  ;;  %v3954_v18 = vpop.f32.mrb[148].mxu0  ;;  %v6359_v3 = vld [vmem:[#allocation3 + $0x78] sm:$0xff] }
 0x498   : > { %15096 = vst [vmem:[#allocation92_spill] sm:$0xff] %v12713_v15  ;;  %v12717_v47 = vmul.f32 0.125, %v3954_v18  ;;  %v3956_v14 = vpop.f32.mrb[149].mxu0 }
 0x499   : > { %v4464_v46 = vmax.f32 %v4463_v19, %v12713_v15  ;;  %v12720_v41 = vmul.f32 0.125, %v3956_v14  ;;  %v3958_v58 = vpop.f32.mrb[150].mxu0  ;;  %4460 = vmax.xlane.f32.xlu0 %v4459_v52 }
 0x49a   : > { %15097 = vst [vmem:[#allocation94_spill] sm:$0xff] %v12717_v47  ;;  %v12722_v1 = vmul.f32 0.125, %v3958_v58  ;;  %v3960_v17 = vpop.f32.mrb[151].mxu0  ;;  %v4147_v48 = vpop.f32.mrb[148].mxu1 }
 0x49b   : > { %15098 = vst [vmem:[#allocation96_spill] sm:$0xff] %v12720_v41  ;;  %v4467_v11 = vmax.f32 %v12717_v47, %v12720_v41  ;;  %v12726_v40 = vmul.f32 0.125, %v3960_v17  ;;  %v12728_v54 = vmul.f32 0.125, %v4147_v48  ;;  %4465 = vmax.xlane.f32.xlu1 %v4464_v46  ;;  %v4149_v25 = vpop.f32.mrb[149].mxu1 }
 0x49c   : > { %15099 = vst [vmem:[#allocation79_spill] sm:$0xff] %v12722_v1  ;;  %v12730_v44 = vmul.f32 0.125, %v4149_v25  ;;  %v4151_v39 = vpop.f32.mrb[150].mxu1 }
 0x49d   : > { %15100 = vst [vmem:[#allocation81_spill] sm:$0xff] %v12726_v40  ;;  %15101 = vst [vmem:[#allocation80_spill] sm:$0xff] %v12728_v54  ;;  %v4472_v37 = vmax.f32 %v12722_v1, %v12726_v40  ;;  %v4468_v26 = vmax.f32 %v4467_v11, %v12728_v54  ;;  %v12735_v13 = vmul.f32 0.125, %v4151_v39  ;;  %v4153_v8 = vpop.f32.mrb[151].mxu1  ;;  %v13112_v40 = vld [vmem:[#allocation2 + $0x1e8] sm:$0xff] }
 0x49e   : > { %15102 = vst [vmem:[#allocation84_spill] sm:$0xff] %v12730_v44  ;;  %v12737_v42 = vmul.f32 0.125, %v4153_v8 }
 0x49f   : > { %15103 = vst [vmem:[#allocation100_spill] sm:$0xff] %v12735_v13  ;;  %v4469_v9 = vmax.f32 %v4468_v26, %v12730_v44  ;;  %v4473_v55 = vmax.f32 %v4472_v37, %v12735_v13  ;;  %v3964_v52 = vpop.f32.mrb[152].mxu0 }
 0x4a0   : > { %15104 = vst [vmem:[#allocation101_spill] sm:$0xff] %v12737_v42  ;;  %v12741_v19 = vmul.f32 0.125, %v3964_v52  ;;  %v3966_v18 = vpop.f32.mrb[153].mxu0 }
 0x4a1   : > { %v4474_v14 = vmax.f32 %v4473_v55, %v12737_v42  ;;  %v12744_v46 = vmul.f32 0.125, %v3966_v18  ;;  %v3968_v58 = vpop.f32.mrb[154].mxu0  ;;  %4470 = vmax.xlane.f32.xlu0 %v4469_v9 }
 0x4a2   : > { %15105 = vst [vmem:[#allocation103_spill] sm:$0xff] %v12741_v19  ;;  %v12746_v17 = vmul.f32 0.125, %v3968_v58  ;;  %v3970_v48 = vpop.f32.mrb[155].mxu0  ;;  %v4157_v11 = vpop.f32.mrb[152].mxu1 }
 0x4a3   : > { %15106 = vst [vmem:[#allocation88_spill] sm:$0xff] %v12744_v46  ;;  %v4477_v25 = vmax.f32 %v12741_v19, %v12744_v46  ;;  %v12750_v39 = vmul.f32 0.125, %v3970_v48  ;;  %v12752_v37 = vmul.f32 0.125, %v4157_v11  ;;  %4475 = vmax.xlane.f32.xlu1 %v4474_v14  ;;  %v4159_v26 = vpop.f32.mrb[153].mxu1 }
 0x4a4   : > { %15107 = vst [vmem:[#allocation90_spill] sm:$0xff] %v12746_v17  ;;  %v12754_v8 = vmul.f32 0.125, %v4159_v26  ;;  %v4161_v55 = vpop.f32.mrb[154].mxu1 }
 0x4a5   : > { %15108 = vst [vmem:[#allocation89_spill] sm:$0xff] %v12750_v39  ;;  %15109 = vst [vmem:[#allocation105_spill] sm:$0xff] %v12752_v37  ;;  %v4482_v52 = vmax.f32 %v12746_v17, %v12750_v39  ;;  %v4478_v9 = vmax.f32 %v4477_v25, %v12752_v37  ;;  %v12759_v18 = vmul.f32 0.125, %v4161_v55  ;;  %v4163_v58 = vpop.f32.mrb[155].mxu1 }
 0x4a6   : > { %15110 = vst [vmem:[#allocation93_spill] sm:$0xff] %v12754_v8  ;;  %v12761_v44 = vmul.f32 0.125, %v4163_v58 }
 0x4a7   : > { %15111 = vst [vmem:[#allocation109_spill] sm:$0xff] %v12759_v18  ;;  %v4479_v48 = vmax.f32 %v4478_v9, %v12754_v8  ;;  %v4483_v11 = vmax.f32 %v4482_v52, %v12759_v18  ;;  %v3974_v46 = vpop.f32.mrb[156].mxu0 }
 0x4a8   : > { %15112 = vst [vmem:[#allocation110_spill] sm:$0xff] %v12761_v44  ;;  %v12765_v14 = vmul.f32 0.125, %v3974_v46  ;;  %v3976_v26 = vpop.f32.mrb[157].mxu0 }
 0x4a9   : > { %v4484_v19 = vmax.f32 %v4483_v11, %v12761_v44  ;;  %4480 = vmax.xlane.f32.xlu0 %v4479_v48  ;;  %v12768_v54 = vmul.f32 0.125, %v3976_v26  ;;  %v3978_v39 = vpop.f32.mrb[158].mxu0 }
 0x4aa   : > { %15113 = vst [vmem:[#allocation112_spill] sm:$0xff] %v12765_v14  ;;  %v12770_v25 = vmul.f32 0.125, %v3978_v39  ;;  %v3980_v55 = vpop.f32.mrb[159].mxu0  ;;  %v4167_v37 = vpop.f32.mrb[156].mxu1 }
 0x4ab   : > { %15114 = vst [vmem:[#allocation97_spill] sm:$0xff] %v12768_v54  ;;  %v4487_v58 = vmax.f32 %v12765_v14, %v12768_v54  ;;  %4485 = vmax.xlane.f32.xlu1 %v4484_v19  ;;  %v12774_v9 = vmul.f32 0.125, %v3980_v55  ;;  %v12776_v52 = vmul.f32 0.125, %v4167_v37  ;;  %v4169_v46 = vpop.f32.mrb[157].mxu1 }
 0x4ac   : > { %15115 = vst [vmem:[#allocation99_spill] sm:$0xff] %v12770_v25  ;;  %v12778_v8 = vmul.f32 0.125, %v4169_v46  ;;  %v4171_v11 = vpop.f32.mrb[158].mxu1 }
 0x4ad   : > { %15116 = vst [vmem:[#allocation98_spill] sm:$0xff] %v12774_v9  ;;  %15117 = vst [vmem:[#allocation113_spill] sm:$0xff] %v12776_v52  ;;  %v4492_v48 = vmax.f32 %v12770_v25, %v12774_v9  ;;  %v4488_v39 = vmax.f32 %v4487_v58, %v12776_v52  ;;  %v12783_v26 = vmul.f32 0.125, %v4171_v11  ;;  %v4173_v44 = vpop.f32.mrb[159].mxu1 }
 0x4ae   : > { %15118 = vst [vmem:[#allocation102_spill] sm:$0xff] %v12778_v8  ;;  %v12785_v18 = vmul.f32 0.125, %v4173_v44 }
 0x4af   : > { %15119 = vst [vmem:[#allocation118_spill] sm:$0xff] %v12783_v26  ;;  %v4489_v19 = vmax.f32 %v4488_v39, %v12778_v8  ;;  %v4493_v55 = vmax.f32 %v4492_v48, %v12783_v26  ;;  %v3984_v37 = vpop.f32.mrb[160].mxu0 }
 0x4b0   : > { %15120 = vst [vmem:[#allocation117_spill] sm:$0xff] %v12785_v18  ;;  %v12789_v54 = vmul.f32 0.125, %v3984_v37  ;;  %v3986_v46 = vpop.f32.mrb[161].mxu0 }
 0x4b1   : > { %v4494_v14 = vmax.f32 %v4493_v55, %v12785_v18  ;;  %v12792_v17 = vmul.f32 0.125, %v3986_v46  ;;  %v3988_v9 = vpop.f32.mrb[162].mxu0  ;;  %4490 = vmax.xlane.f32.xlu0 %v4489_v19 }
 0x4b2   : > { %15121 = vst [vmem:[#allocation121_spill] sm:$0xff] %v12789_v54  ;;  %v12794_v58 = vmul.f32 0.125, %v3988_v9  ;;  %v3990_v11 = vpop.f32.mrb[163].mxu0  ;;  %v4177_v52 = vpop.f32.mrb[160].mxu1 }
 0x4b3   : > { %15122 = vst [vmem:[#allocation106_spill] sm:$0xff] %v12792_v17  ;;  %v4497_v44 = vmax.f32 %v12789_v54, %v12792_v17  ;;  %v12798_v39 = vmul.f32 0.125, %v3990_v11  ;;  %v12800_v48 = vmul.f32 0.125, %v4177_v52  ;;  %v4179_v37 = vpop.f32.mrb[161].mxu1  ;;  %4495 = vmax.xlane.f32.xlu1 %v4494_v14 }
 0x4b4   : > { %15123 = vst [vmem:[#allocation108_spill] sm:$0xff] %v12794_v58  ;;  %v12802_v8 = vmul.f32 0.125, %v4179_v37  ;;  %v4181_v55 = vpop.f32.mrb[162].mxu1 }
 0x4b5   : > { %15124 = vst [vmem:[#allocation107_spill] sm:$0xff] %v12798_v39  ;;  %15125 = vst [vmem:[#allocation120_spill] sm:$0xff] %v12800_v48  ;;  %v4502_v46 = vmax.f32 %v12794_v58, %v12798_v39  ;;  %v4498_v9 = vmax.f32 %v4497_v44, %v12800_v48  ;;  %v12807_v19 = vmul.f32 0.125, %v4181_v55  ;;  %v4183_v18 = vpop.f32.mrb[163].mxu1 }
 0x4b6   : > { %15126 = vst [vmem:[#allocation111_spill] sm:$0xff] %v12802_v8  ;;  %v12809_v26 = vmul.f32 0.125, %v4183_v18 }
 0x4b7   : > { %15127 = vst [vmem:[#allocation114_spill] sm:$0xff] %v12807_v19  ;;  %v4499_v11 = vmax.f32 %v4498_v9, %v12802_v8  ;;  %v4503_v52 = vmax.f32 %v4502_v46, %v12807_v19  ;;  %v3994_v17 = vpop.f32.mrb[164].mxu0 }
 0x4b8   : > { %15128 = vst [vmem:[#allocation116_spill] sm:$0xff] %v12809_v26  ;;  %v12813_v54 = vmul.f32 0.125, %v3994_v17  ;;  %v3996_v14 = vpop.f32.mrb[165].mxu0 }
 0x4b9   : > { %v4504_v37 = vmax.f32 %v4503_v52, %v12809_v26  ;;  %v12816_v25 = vmul.f32 0.125, %v3996_v14  ;;  %v3998_v39 = vpop.f32.mrb[166].mxu0  ;;  %4500 = vmax.xlane.f32.xlu0 %v4499_v11 }
 0x4ba   : > { %15129 = vst [vmem:[#allocation115_spill] sm:$0xff] %v12813_v54  ;;  %v12818_v44 = vmul.f32 0.125, %v3998_v39  ;;  %v4000_v55 = vpop.f32.mrb[167].mxu0  ;;  %v4187_v48 = vpop.f32.mrb[164].mxu1 }
 0x4bb   : > { %15130 = vst [vmem:[#allocation119_spill] sm:$0xff] %v12816_v25  ;;  %v4507_v18 = vmax.f32 %v12813_v54, %v12816_v25  ;;  %v12822_v9 = vmul.f32 0.125, %v4000_v55  ;;  %v12824_v46 = vmul.f32 0.125, %v4187_v48  ;;  %4505 = vmax.xlane.f32.xlu1 %v4504_v37  ;;  %v4189_v17 = vpop.f32.mrb[165].mxu1 }
 0x4bc   : > { %15131 = vst [vmem:[#allocation32_spill] sm:$0xff] %v12818_v44  ;;  %v12826_v8 = vmul.f32 0.125, %v4189_v17  ;;  %v4191_v52 = vpop.f32.mrb[166].mxu1 }
 0x4bd   : > { %15132 = vst [vmem:[#allocation50_spill] sm:$0xff] %v12822_v9  ;;  %15133 = vst [vmem:[#allocation51_spill] sm:$0xff] %v12824_v46  ;;  %v4512_v14 = vmax.f32 %v12818_v44, %v12822_v9  ;;  %v4508_v39 = vmax.f32 %v4507_v18, %v12824_v46  ;;  %v12831_v11 = vmul.f32 0.125, %v4191_v52  ;;  %v4193_v26 = vpop.f32.mrb[167].mxu1 }
 0x4be   : > { %15134 = vst [vmem:[#allocation44_spill] sm:$0xff] %v12826_v8  ;;  %v12833_v19 = vmul.f32 0.125, %v4193_v26 }
 0x4bf   : > { %15135 = vst [vmem:[#allocation58_spill] sm:$0xff] %v12831_v11  ;;  %v4509_v55 = vmax.f32 %v4508_v39, %v12826_v8  ;;  %v4513_v48 = vmax.f32 %v4512_v14, %v12831_v11  ;;  %v4004_v25 = vpop.f32.mrb[168].mxu0 }
 0x4c0   : > { %15136 = vst [vmem:[#allocation30_spill] sm:$0xff] %v12833_v19  ;;  %v12837_v37 = vmul.f32 0.125, %v4004_v25  ;;  %v4006_v17 = vpop.f32.mrb[169].mxu0 }
 0x4c1   : > { %v4514_v54 = vmax.f32 %v4513_v48, %v12833_v19  ;;  %v12840_v58 = vmul.f32 0.125, %v4006_v17  ;;  %v4008_v9 = vpop.f32.mrb[170].mxu0  ;;  %4510 = vmax.xlane.f32.xlu0 %v4509_v55 }
 0x4c2   : > { %15137 = vst [vmem:[#allocation33_spill] sm:$0xff] %v12837_v37  ;;  %v12842_v18 = vmul.f32 0.125, %v4008_v9  ;;  %v4010_v52 = vpop.f32.mrb[171].mxu0  ;;  %v4197_v46 = vpop.f32.mrb[168].mxu1 }
 0x4c3   : > { %15138 = vst [vmem:[#allocation53_spill] sm:$0xff] %v12840_v58  ;;  %v4517_v26 = vmax.f32 %v12837_v37, %v12840_v58  ;;  %v12846_v39 = vmul.f32 0.125, %v4010_v52  ;;  %v12848_v14 = vmul.f32 0.125, %v4197_v46  ;;  %v4199_v25 = vpop.f32.mrb[169].mxu1  ;;  %4515 = vmax.xlane.f32.xlu1 %v4514_v54 }
 0x4c4   : > { %15139 = vst [vmem:[#allocation59_spill] sm:$0xff] %v12842_v18  ;;  %v12850_v8 = vmul.f32 0.125, %v4199_v25  ;;  %v4201_v48 = vpop.f32.mrb[170].mxu1 }
 0x4c5   : > { %15140 = vst [vmem:[#allocation52_spill] sm:$0xff] %v12846_v39  ;;  %15141 = vst [vmem:[#allocation41_spill] sm:$0xff] %v12848_v14  ;;  %v4522_v17 = vmax.f32 %v12842_v18, %v12846_v39  ;;  %v4518_v9 = vmax.f32 %v4517_v26, %v12848_v14  ;;  %v12855_v55 = vmul.f32 0.125, %v4201_v48  ;;  %v4203_v19 = vpop.f32.mrb[171].mxu1 }
 0x4c6   : > { %15142 = vst [vmem:[#allocation49_spill] sm:$0xff] %v12850_v8  ;;  %v12857_v11 = vmul.f32 0.125, %v4203_v19 }
 0x4c7   : > { %15143 = vst [vmem:[#allocation45_spill] sm:$0xff] %v12855_v55  ;;  %v4519_v52 = vmax.f32 %v4518_v9, %v12850_v8  ;;  %v4523_v46 = vmax.f32 %v4522_v17, %v12855_v55  ;;  %v4014_v58 = vpop.f32.mrb[172].mxu0 }
 0x4c8   : > { %15144 = vst [vmem:[#allocation66_spill] sm:$0xff] %v12857_v11  ;;  %v12861_v37 = vmul.f32 0.125, %v4014_v58  ;;  %v4016_v54 = vpop.f32.mrb[173].mxu0 }
 0x4c9   : > { %v4524_v25 = vmax.f32 %v4523_v46, %v12857_v11  ;;  %v12864_v44 = vmul.f32 0.125, %v4016_v54  ;;  %v4018_v39 = vpop.f32.mrb[174].mxu0  ;;  %4520 = vmax.xlane.f32.xlu0 %v4519_v52 }
 0x4ca   : > { %15145 = vst [vmem:[#allocation154_spill] sm:$0xff] %v12861_v37  ;;  %v12866_v26 = vmul.f32 0.125, %v4018_v39  ;;  %v4020_v48 = vpop.f32.mrb[175].mxu0  ;;  %v4207_v14 = vpop.f32.mrb[172].mxu1 }
 0x4cb   : > { %15146 = vst [vmem:[#allocation69_spill] sm:$0xff] %v12864_v44  ;;  %v4527_v19 = vmax.f32 %v12861_v37, %v12864_v44  ;;  %v12870_v9 = vmul.f32 0.125, %v4020_v48  ;;  %v12872_v17 = vmul.f32 0.125, %v4207_v14  ;;  %4525 = vmax.xlane.f32.xlu1 %v4524_v25  ;;  %v4209_v58 = vpop.f32.mrb[173].mxu1 }
 0x4cc   : > { %15147 = vst [vmem:[#allocation55_spill] sm:$0xff] %v12866_v26  ;;  %v12874_v8 = vmul.f32 0.125, %v4209_v58  ;;  %v4211_v46 = vpop.f32.mrb[174].mxu1 }
 0x4cd   : > { %15148 = vst [vmem:[#allocation54_spill] sm:$0xff] %v12870_v9  ;;  %15149 = vst [vmem:[#allocation56_spill] sm:$0xff] %v12872_v17  ;;  %v4532_v54 = vmax.f32 %v12866_v26, %v12870_v9  ;;  %v4528_v39 = vmax.f32 %v4527_v19, %v12872_v17  ;;  %v12879_v52 = vmul.f32 0.125, %v4211_v46  ;;  %v4213_v11 = vpop.f32.mrb[175].mxu1 }
 0x4ce   : > { %15150 = vst [vmem:[#allocation29_spill] sm:$0xff] %v12874_v8  ;;  %v12881_v55 = vmul.f32 0.125, %v4213_v11 }
 0x4cf   : > { %15151 = vst [vmem:[#allocation61_spill] sm:$0xff] %v12879_v52  ;;  %v4529_v48 = vmax.f32 %v4528_v39, %v12874_v8  ;;  %v4533_v14 = vmax.f32 %v4532_v54, %v12879_v52  ;;  %v4024_v44 = vpop.f32.mrb[176].mxu0 }
 0x4d0   : > { %15152 = vst [vmem:[#allocation62_spill] sm:$0xff] %v12881_v55  ;;  %v12885_v25 = vmul.f32 0.125, %v4024_v44  ;;  %v4026_v58 = vpop.f32.mrb[177].mxu0 }
 0x4d1   : > { %v4534_v37 = vmax.f32 %v4533_v14, %v12881_v55  ;;  %v12888_v18 = vmul.f32 0.125, %v4026_v58  ;;  %v4028_v9 = vpop.f32.mrb[178].mxu0  ;;  %4530 = vmax.xlane.f32.xlu0 %v4529_v48 }
 0x4d2   : > { %15153 = vst [vmem:[#allocation24_spill] sm:$0xff] %v12885_v25  ;;  %v12890_v19 = vmul.f32 0.125, %v4028_v9  ;;  %v4030_v46 = vpop.f32.mrb[179].mxu0  ;;  %v4217_v17 = vpop.f32.mrb[176].mxu1 }
 0x4d3   : > { %15154 = vst [vmem:[#allocation74_spill] sm:$0xff] %v12888_v18  ;;  %v4537_v11 = vmax.f32 %v12885_v25, %v12888_v18  ;;  %v12894_v39 = vmul.f32 0.125, %v4030_v46  ;;  %v12896_v54 = vmul.f32 0.125, %v4217_v17  ;;  %v4219_v44 = vpop.f32.mrb[177].mxu1  ;;  %4535 = vmax.xlane.f32.xlu1 %v4534_v37 }
 0x4d4   : > { %15155 = vst [vmem:[#allocation75_spill] sm:$0xff] %v12890_v19  ;;  %v12898_v8 = vmul.f32 0.125, %v4219_v44  ;;  %v4221_v14 = vpop.f32.mrb[178].mxu1 }
 0x4d5   : > { %15156 = vst [vmem:[#allocation86_spill] sm:$0xff] %v12894_v39  ;;  %15157 = vst [vmem:[#allocation77_spill] sm:$0xff] %v12896_v54  ;;  %v4542_v58 = vmax.f32 %v12890_v19, %v12894_v39  ;;  %v4538_v9 = vmax.f32 %v4537_v11, %v12896_v54  ;;  %v12903_v48 = vmul.f32 0.125, %v4221_v14  ;;  %v4223_v55 = vpop.f32.mrb[179].mxu1 }
 0x4d6   : > { %15158 = vst [vmem:[#allocation78_spill] sm:$0xff] %v12898_v8  ;;  %v12905_v52 = vmul.f32 0.125, %v4223_v55 }
 0x4d7   : > { %15159 = vst [vmem:[#allocation65_spill] sm:$0xff] %v12903_v48  ;;  %v4539_v46 = vmax.f32 %v4538_v9, %v12898_v8  ;;  %v4543_v17 = vmax.f32 %v4542_v58, %v12903_v48  ;;  %v4034_v18 = vpop.f32.mrb[180].mxu0 }
 0x4d8   : > { %15160 = vst [vmem:[#allocation68_spill] sm:$0xff] %v12905_v52  ;;  %v12909_v25 = vmul.f32 0.125, %v4034_v18  ;;  %v4036_v37 = vpop.f32.mrb[181].mxu0 }
 0x4d9   : > { %v4544_v44 = vmax.f32 %v4543_v17, %v12905_v52  ;;  %v12912_v26 = vmul.f32 0.125, %v4036_v37  ;;  %v4038_v39 = vpop.f32.mrb[182].mxu0  ;;  %4540 = vmax.xlane.f32.xlu0 %v4539_v46 }
 0x4da   : > { %15161 = vst [vmem:[#allocation25_spill] sm:$0xff] %v12909_v25  ;;  %v12914_v11 = vmul.f32 0.125, %v4038_v39  ;;  %v4040_v14 = vpop.f32.mrb[183].mxu0  ;;  %v4227_v54 = vpop.f32.mrb[180].mxu1 }
 0x4db   : > { %15162 = vst [vmem:[#allocation63_spill] sm:$0xff] %v12912_v26  ;;  %v4547_v55 = vmax.f32 %v12909_v25, %v12912_v26  ;;  %v12918_v9 = vmul.f32 0.125, %v4040_v14  ;;  %v12920_v58 = vmul.f32 0.125, %v4227_v54  ;;  %4545 = vmax.xlane.f32.xlu1 %v4544_v44  ;;  %v4229_v18 = vpop.f32.mrb[181].mxu1 }
 0x4dc   : > { %15163 = vst [vmem:[#allocation95_spill] sm:$0xff] %v12914_v11  ;;  %v12922_v8 = vmul.f32 0.125, %v4229_v18  ;;  %v4231_v17 = vpop.f32.mrb[182].mxu1 }
 0x4dd   : > { %15164 = vst [vmem:[#allocation26_spill] sm:$0xff] %v12918_v9  ;;  %15165 = vst [vmem:[#allocation104_spill] sm:$0xff] %v12920_v58  ;;  %v4552_v37 = vmax.f32 %v12914_v11, %v12918_v9  ;;  %v4548_v39 = vmax.f32 %v4547_v55, %v12920_v58  ;;  %v12927_v46 = vmul.f32 0.125, %v4231_v17  ;;  %v4233_v52 = vpop.f32.mrb[183].mxu1 }
 0x4de   : > { %15166 = vst [vmem:[#allocation27_spill] sm:$0xff] %v12922_v8  ;;  %v12929_v48 = vmul.f32 0.125, %v4233_v52 }
 0x4df   : > { %15167 = vst [vmem:[#allocation155_spill] sm:$0xff] %v12927_v46  ;;  %v4549_v14 = vmax.f32 %v4548_v39, %v12922_v8  ;;  %v4553_v54 = vmax.f32 %v4552_v37, %v12927_v46  ;;  %v4044_v25 = vpop.f32.mrb[184].mxu0 }
 0x4e0   : > { %15168 = vst [vmem:[#allocation156_spill] sm:$0xff] %v12929_v48  ;;  %v12933_v44 = vmul.f32 0.125, %v4044_v25  ;;  %v4046_v18 = vpop.f32.mrb[185].mxu0 }
 0x4e1   : > { %v4554_v26 = vmax.f32 %v4553_v54, %v12929_v48  ;;  %v12936_v19 = vmul.f32 0.125, %v4046_v18  ;;  %v4048_v9 = vpop.f32.mrb[186].mxu0  ;;  %4550 = vmax.xlane.f32.xlu0 %v4549_v14 }
 0x4e2   : > { %15169 = vst [vmem:[#allocation159_spill] sm:$0xff] %v12933_v44  ;;  %v12938_v55 = vmul.f32 0.125, %v4048_v9  ;;  %v4050_v17 = vpop.f32.mrb[187].mxu0  ;;  %v4237_v58 = vpop.f32.mrb[184].mxu1 }
 0x4e3   : > { %15170 = vst [vmem:[#allocation157_spill] sm:$0xff] %v12936_v19  ;;  %v4557_v52 = vmax.f32 %v12933_v44, %v12936_v19  ;;  %v12942_v39 = vmul.f32 0.125, %v4050_v17  ;;  %v12944_v37 = vmul.f32 0.125, %v4237_v58  ;;  %v4239_v25 = vpop.f32.mrb[185].mxu1  ;;  %4555 = vmax.xlane.f32.xlu1 %v4554_v26 }
 0x4e4   : > { %15171 = vst [vmem:[#allocation122_spill] sm:$0xff] %v12938_v55  ;;  %v12946_v8 = vmul.f32 0.125, %v4239_v25  ;;  %v4241_v54 = vpop.f32.mrb[186].mxu1 }
 0x4e5   : > { %15172 = vst [vmem:[#allocation158_spill] sm:$0xff] %v12942_v39  ;;  %15173 = vst [vmem:[#allocation124_spill] sm:$0xff] %v12944_v37  ;;  %v4562_v18 = vmax.f32 %v12938_v55, %v12942_v39  ;;  %v4558_v9 = vmax.f32 %v4557_v52, %v12944_v37  ;;  %v12951_v14 = vmul.f32 0.125, %v4241_v54  ;;  %v4243_v48 = vpop.f32.mrb[187].mxu1  ;;  %v6348_v55 = vld [vmem:[#allocation3 + $0x20] sm:$0xff] }
 0x4e6   : > { %15174 = vst [vmem:[#allocation150_spill] sm:$0xff] %v12946_v8  ;;  %v12953_v46 = vmul.f32 0.125, %v4243_v48 }
 0x4e7   : > { %15175 = vst [vmem:[#allocation160_spill] sm:$0xff] %v12951_v14  ;;  %v4559_v17 = vmax.f32 %v4558_v9, %v12946_v8  ;;  %v4563_v58 = vmax.f32 %v4562_v18, %v12951_v14  ;;  %v4054_v44 = vpop.f32.mrb[188].mxu0 }
 0x4e8   : > { %15176 = vst [vmem:[#allocation127_spill] sm:$0xff] %v12953_v46  ;;  %v12957_v19 = vmul.f32 0.125, %v4054_v44  ;;  %v4056_v26 = vpop.f32.mrb[189].mxu0 }
 0x4e9   : > { %v4564_v25 = vmax.f32 %v4563_v58, %v12953_v46  ;;  %v12960_v11 = vmul.f32 0.125, %v4056_v26  ;;  %v4058_v39 = vpop.f32.mrb[190].mxu0  ;;  %4560 = vmax.xlane.f32.xlu0 %v4559_v17 }
 0x4ea   : > { %15177 = vst [vmem:[#allocation31_spill] sm:$0xff] %v12957_v19  ;;  %v12962_v52 = vmul.f32 0.125, %v4058_v39  ;;  %v4060_v54 = vpop.f32.mrb[191].mxu0  ;;  %v4247_v37 = vpop.f32.mrb[188].mxu1 }
 0x4eb   : > { %15178 = vst [vmem:[#allocation35_spill] sm:$0xff] %v12960_v11  ;;  %v4567_v48 = vmax.f32 %v12957_v19, %v12960_v11  ;;  %v12966_v9 = vmul.f32 0.125, %v4060_v54  ;;  %v12968_v18 = vmul.f32 0.125, %v4247_v37  ;;  %4565 = vmax.xlane.f32.xlu1 %v4564_v25  ;;  %v4249_v44 = vpop.f32.mrb[189].mxu1  ;;  %v9516_v19 = vld [vmem:[%s10263_s11 + $0xf8] sm:$0xff]  }
 0x4ec   : > { %15179 = vst [vmem:[#allocation129_spill] sm:$0xff] %v12962_v52  ;;  %v12970_v8 = vmul.f32 0.125, %v4249_v44  ;;  %v4251_v58 = vpop.f32.mrb[190].mxu1  ;;  %v4385_v44 = vld [vmem:[#allocation2 + $0x100] sm:$0xff] }
 0x4ed   : > { %15180 = vst [vmem:[#allocation123_spill] sm:$0xff] %v12966_v9  ;;  %15181 = vst [vmem:[#allocation131_spill] sm:$0xff] %v12968_v18  ;;  %v4572_v17 = vmax.f32 %v12962_v52, %v12966_v9  ;;  %v4568_v39 = vmax.f32 %v4567_v48, %v12968_v18  ;;  %v12975_v26 = vmul.f32 0.125, %v4251_v58  ;;  %v4253_v46 = vpop.f32.mrb[191].mxu1  ;;  %v4386_v48 = vld [vmem:[#allocation2 + $0x108] sm:$0xff] }
 0x4ee   : > { %15182 = vst [vmem:[#allocation42_spill] sm:$0xff] %v12970_v8  ;;  %v12977_v14 = vmul.f32 0.125, %v4253_v46 }
 0x4ef   : > { %15183 = vst [vmem:[#allocation28_spill] sm:$0xff] %v12975_v26  ;;  %v4569_v54 = vmax.f32 %v4568_v39, %v12970_v8  ;;  %v4573_v37 = vmax.f32 %v4572_v17, %v12975_v26  ;;  %v4388_v26 = vld [vmem:[#allocation2 + $0x118] sm:$0xff] }
 0x4f0   : > { %15184 = vst [vmem:[#allocation133_spill] sm:$0xff] %v12977_v14 }
 0x4f1   : > { %v4574_v25 = vmax.f32 %v4573_v37, %v12977_v14  ;;  %4570 = vmax.xlane.f32.xlu0 %v4569_v54  ;;  %v4387_v54 = vld [vmem:[#allocation2 + $0x110] sm:$0xff]  ;;  %v9517_v37 = vld [vmem:[%s10263_s11 + $0x78] sm:$0xff]  }
 0x4f2   : > { %v9518_v14 = vld [vmem:[%s10263_s11 + $0x38] sm:$0xff]  }
 0x4f3   : > { %4575 = vmax.xlane.f32.xlu1 %v4574_v25 }
 0x504   : > { %5889 = vrot.lane.b32.xlu1 %v9516_v19, %s9743_s26 }
 0x506   : > { %v4421_v11 = vpop.xlane.xlu1 %4420 }
 0x507   : > { %v4577_v58 = vmax.f32 %v4385_v44, %v4421_v11 }
 0x508   : > { %v4426_v18 = vpop.xlane.xlu0 %4425 }
 0x509   : > { %v4609_v52 = vsub.f32 %v4385_v44, %v4577_v58  ;;  %6309 = vst.msk [vmem:[#allocation2 + $0x100] sm:$0xff] %vm326_vm1, %v4577_v58  ;;  %v4578_v46 = vmax.f32 %v4386_v48, %v4426_v18  ;;  %4707 = vperm.xlu0 %8527, %v4577_v58  }
 0x50b   : > { %v4641_v39 = vmul.f32 1.442695, %v4609_v52  ;;  %v4610_v17 = vsub.f32 %v4386_v48, %v4578_v46  ;;  %6310 = vst.msk [vmem:[#allocation2 + $0x108] sm:$0xff] %vm326_vm1, %v4578_v46  ;;  %4712 = vperm.xlu1 %8528, %v4578_v46   ;;  %v4389_v48 = vld [vmem:[#allocation2 + $0x120] sm:$0xff] }
 0x50d   : > { %9009 = vpow2.f32 %v4641_v39  ;;  %5857 = vrot.lane.b32.xlu0 %v9517_v37, %s9743_s26  ;;  %v4643_v19 = vmul.f32 1.442695, %v4610_v17  ;;  %v4390_v39 = vld [vmem:[#allocation2 + $0x128] sm:$0xff] }
 0x50e   : > { %v4431_v25 = vpop.xlane.xlu0 %4430 }
 0x50f   : > { %v4579_v11 = vmax.f32 %v4387_v54, %v4431_v25  ;;  %9011 = vpow2.f32 %v4643_v19 }
 0x510   : > { %v4436_v8 = vpop.xlane.xlu1 %4435 }
 0x511   : > { %v4611_v44 = vsub.f32 %v4387_v54, %v4579_v11  ;;  %6311 = vst.msk [vmem:[#allocation2 + $0x110] sm:$0xff] %vm326_vm1, %v4579_v11  ;;  %v4580_v18 = vmax.f32 %v4388_v26, %v4436_v8  ;;  %4717 = vperm.xlu1 %8528, %v4579_v11  }
 0x513   : > { %v4645_v52 = vmul.f32 1.442695, %v4611_v44  ;;  %6312 = vst.msk [vmem:[#allocation2 + $0x118] sm:$0xff] %vm326_vm1, %v4580_v18  ;;  %4722 = vperm.xlu0 %8527, %v4580_v18   ;;  %v4612_v58 = vsub.f32 %v4388_v26, %v4580_v18  ;;  %v4391_v26 = vld [vmem:[#allocation2 + $0x130] sm:$0xff] }
 0x515   : > { %9013 = vpow2.f32 %v4645_v52  ;;  %v4647_v54 = vmul.f32 1.442695, %v4612_v58  ;;  %v4392_v52 = vld [vmem:[#allocation2 + $0x138] sm:$0xff] }
 0x516   : > { %v4441_v46 = vpop.xlane.xlu0 %4440 }
 0x517   : > { %v12990_v17 = vpop.eup %9009  ;;  %v4581_v37 = vmax.f32 %v4389_v48, %v4441_v46  ;;  %9015 = vpow2.f32 %v4647_v54 }
 0x518   : > { %15185 = vst [vmem:[#allocation125_spill] sm:$0xff] %v12990_v17  ;;  %v4446_v25 = vpop.xlane.xlu1 %4445  ;;  %5573 = vperm.xlu0 %8527, %v12990_v17  }
 0x519   : > { %6313 = vst.msk [vmem:[#allocation2 + $0x120] sm:$0xff] %vm326_vm1, %v4581_v37  ;;  %v4582_v8 = vmax.f32 %v4390_v39, %v4446_v25  ;;  %4727 = vperm.xlu1 %8528, %v4581_v37   ;;  %v12995_v19 = vpop.eup %9011  ;;  %v4613_v44 = vsub.f32 %v4389_v48, %v4581_v37  ;;  %v4393_v48 = vld [vmem:[#allocation2 + $0x140] sm:$0xff] }
 0x51a   : > { %15186 = vst [vmem:[#allocation135_spill] sm:$0xff] %v12995_v19 }
 0x51b   : > { %6314 = vst.msk [vmem:[#allocation2 + $0x128] sm:$0xff] %vm326_vm1, %v4582_v8  ;;  %v4614_v11 = vsub.f32 %v4390_v39, %v4582_v8  ;;  %v4649_v54 = vmul.f32 1.442695, %v4613_v44 }
 0x51c   : > { %4732 = vperm.xlu0 %8527, %v4582_v8  }
 0x51d   : > { %5578 = vperm.xlu1 %8528, %v12995_v19   ;;  %v4651_v25 = vmul.f32 1.442695, %v4614_v11 }
 0x51e   : > { %v4451_v18 = vpop.xlane.xlu0 %4450 }
 0x51f   : > { %v12998_v46 = vpop.eup %9013  ;;  %v4583_v58 = vmax.f32 %v4391_v26, %v4451_v18  ;;  %9017 = vpow2.f32 %v4651_v25  ;;  %v4394_v18 = vld [vmem:[#allocation2 + $0x148] sm:$0xff] }
 0x520   : > { %15187 = vst [vmem:[#allocation46_spill] sm:$0xff] %v12998_v46  ;;  %v4456_v17 = vpop.xlane.xlu1 %4455  ;;  %5841 = vrot.lane.b32.xlu0 %v9518_v14, %s9743_s26  ;;  %9019 = vpow2.f32 %v4649_v54  ;;  %v4396_v54 = vld [vmem:[#allocation2 + $0x158] sm:$0xff] }
 0x521   : > { %6315 = vst.msk [vmem:[#allocation2 + $0x130] sm:$0xff] %vm326_vm1, %v4583_v58  ;;  %v4584_v9 = vmax.f32 %v4392_v52, %v4456_v17  ;;  %5583 = vperm.xlu1 %8528, %v12998_v46   ;;  %v4615_v37 = vsub.f32 %v4391_v26, %v4583_v58  ;;  %v13005_v14 = vpop.eup %9015  ;;  %v9519_v46 = vld [vmem:[%s10263_s11 + $0xb8] sm:$0xff]   ;;  %s9614_s11 = sshll.u32 %s9747_s29, 4  ;;  %s9615_s11 = int_to_ptr.vmem [resolvable:$false] %s9614_s11 }
 0x522   : > { %15188 = vst [vmem:[#allocation126_spill] sm:$0xff] %v13005_v14  ;;  %s9616_s30 = scalar_lea.vmem %s9615_s11, 4096  ;;  %p9617_p2 = scmp.lt.s32.totalorder %s14268_s3, %s9615_s11 }
 0x523   : > { %6316 = vst.msk [vmem:[#allocation2 + $0x138] sm:$0xff] %vm326_vm1, %v4584_v9  ;;  %v4616_v39 = vsub.f32 %v4392_v52, %v4584_v9  ;;  %v4653_v25 = vmul.f32 1.442695, %v4615_v37  ;;  %p9618_p9 = scmp.lt.s32.totalorder %s9616_s30, %s9610_s7 }
 0x524   : > { %4742 = vperm.xlu0 %8527, %v4584_v9   ;;  %v4395_v9 = vld [vmem:[#allocation2 + $0x150] sm:$0xff] }
 0x525   : > { %4737 = vperm.xlu1 %8528, %v4583_v58   ;;  %v4655_v17 = vmul.f32 1.442695, %v4616_v39  ;;  %p9619_p6 = por %p9618_p9, %p9617_p2 }
 0x526   : > { %v4461_v8 = vpop.xlane.xlu0 %4460 }
 0x527   : > { %v4585_v11 = vmax.f32 %v4393_v48, %v4461_v8  ;;  %9021 = vpow2.f32 %v4655_v17  ;;  %p9620_p5 = pnand %p9619_p6, %p9613_p4 }
 0x528   : > { %v4466_v19 = vpop.xlane.xlu1 %4465  ;;  %5588 = vperm.xlu0 %8527, %v13005_v14   ;;  %9023 = vpow2.f32 %v4653_v25  ;;  %v4398_v25 = vld [vmem:[#allocation2 + $0x168] sm:$0xff] }
 0x529   : > { %6317 = vst.msk [vmem:[#allocation2 + $0x140] sm:$0xff] %vm326_vm1, %v4585_v11  ;;  %v4586_v44 = vmax.f32 %v4394_v18, %v4466_v19  ;;  %5873 = vrot.lane.b32.xlu1 %v9519_v46, %s9743_s26  ;;  %v4617_v52 = vsub.f32 %v4393_v48, %v4585_v11  ;;  %v13012_v8 = vpop.eup %9017  ;;  %v4397_v48 = vld [vmem:[#allocation2 + $0x160] sm:$0xff] }
 0x52a   : > { %15189 = vst [vmem:[#allocation153_spill] sm:$0xff] %v13012_v8  ;;  %v13014_v14 = vpop.eup %9019 }
 0x52b   : > { %6318 = vst.msk [vmem:[#allocation2 + $0x148] sm:$0xff] %vm326_vm1, %v4586_v44  ;;  %v4618_v26 = vsub.f32 %v4394_v18, %v4586_v44  ;;  %15190 = vst [vmem:[#allocation137_spill] sm:$0xff] %v13014_v14  ;;  %v4657_v18 = vmul.f32 1.442695, %v4617_v52 }
 0x52c   : > { %4752 = vperm.xlu0 %8527, %v4586_v44  }
 0x52d   : > { %4747 = vperm.xlu1 %8528, %v4585_v11   ;;  %v4659_v46 = vmul.f32 1.442695, %v4618_v26 }
 0x52e   : > { %v4471_v58 = vpop.xlane.xlu0 %4470 }
 0x52f   : > { %v4587_v39 = vmax.f32 %v4395_v9, %v4471_v58  ;;  %9025 = vpow2.f32 %v4659_v46 }
 0x530   : > { %v4476_v19 = vpop.xlane.xlu1 %4475  ;;  %5598 = vperm.xlu0 %8527, %v13012_v8   ;;  %9027 = vpow2.f32 %v4657_v18 }
 0x531   : > { %6319 = vst.msk [vmem:[#allocation2 + $0x150] sm:$0xff] %vm326_vm1, %v4587_v39  ;;  %v4588_v37 = vmax.f32 %v4396_v54, %v4476_v19  ;;  %5593 = vperm.xlu1 %8528, %v13014_v14   ;;  %v4619_v17 = vsub.f32 %v4395_v9, %v4587_v39  ;;  %v13020_v58 = vpop.eup %9021  ;;  %v4399_v9 = vld [vmem:[#allocation2 + $0x170] sm:$0xff] }
 0x532   : > { %15191 = vst [vmem:[#allocation128_spill] sm:$0xff] %v13020_v58  ;;  %v13022_v8 = vpop.eup %9023 }
 0x533   : > { %6320 = vst.msk [vmem:[#allocation2 + $0x158] sm:$0xff] %vm326_vm1, %v4588_v37  ;;  %v4620_v11 = vsub.f32 %v4396_v54, %v4588_v37  ;;  %15192 = vst [vmem:[#allocation139_spill] sm:$0xff] %v13022_v8  ;;  %v4661_v54 = vmul.f32 1.442695, %v4619_v17 }
 0x534   : > { %4762 = vperm.xlu0 %8527, %v4588_v37   ;;  %v4400_v37 = vld [vmem:[#allocation2 + $0x178] sm:$0xff] }
 0x535   : > { %4757 = vperm.xlu1 %8528, %v4587_v39   ;;  %v4663_v52 = vmul.f32 1.442695, %v4620_v11 }
 0x536   : > { %v4481_v44 = vpop.xlane.xlu0 %4480 }
 0x537   : > { %v4589_v26 = vmax.f32 %v4397_v48, %v4481_v44  ;;  %9029 = vpow2.f32 %v4663_v52  ;;  %v4402_v52 = vld [vmem:[#allocation2 + $0x188] sm:$0xff] }
 0x538   : > { %v4486_v19 = vpop.xlane.xlu1 %4485  ;;  %5608 = vperm.xlu0 %8527, %v13020_v58   ;;  %9031 = vpow2.f32 %v4661_v54 }
 0x539   : > { %6321 = vst.msk [vmem:[#allocation2 + $0x160] sm:$0xff] %vm326_vm1, %v4589_v26  ;;  %v4590_v14 = vmax.f32 %v4398_v25, %v4486_v19  ;;  %5603 = vperm.xlu1 %8528, %v13022_v8   ;;  %v4621_v46 = vsub.f32 %v4397_v48, %v4589_v26  ;;  %v13028_v44 = vpop.eup %9025  ;;  %v4401_v48 = vld [vmem:[#allocation2 + $0x180] sm:$0xff] }
 0x53a   : > { %15193 = vst [vmem:[#allocation34_spill] sm:$0xff] %v13028_v44  ;;  %v13030_v58 = vpop.eup %9027 }
 0x53b   : > { %6322 = vst.msk [vmem:[#allocation2 + $0x168] sm:$0xff] %vm326_vm1, %v4590_v14  ;;  %v4622_v39 = vsub.f32 %v4398_v25, %v4590_v14  ;;  %15194 = vst [vmem:[#allocation130_spill] sm:$0xff] %v13030_v58 }
 0x53c   : > { %4772 = vperm.xlu0 %8527, %v4590_v14   ;;  %v4665_v14 = vmul.f32 1.442695, %v4621_v46 }
 0x53d   : > { %4767 = vperm.xlu1 %8528, %v4589_v26   ;;  %v4667_v17 = vmul.f32 1.442695, %v4622_v39 }
 0x53e   : > { %v4491_v18 = vpop.xlane.xlu0 %4490 }
 0x53f   : > { %v4591_v11 = vmax.f32 %v4399_v9, %v4491_v18  ;;  %9033 = vpow2.f32 %v4667_v17  ;;  %v4404_v17 = vld [vmem:[#allocation2 + $0x198] sm:$0xff] }
 0x540   : > { %5618 = vperm.xlu0 %8527, %v13028_v44   ;;  %v4496_v19 = vpop.xlane.xlu1 %4495  ;;  %9035 = vpow2.f32 %v4665_v14 }
 0x541   : > { %v4592_v8 = vmax.f32 %v4400_v37, %v4496_v19  ;;  %5613 = vperm.xlu1 %8528, %v13030_v58   ;;  %6323 = vst.msk [vmem:[#allocation2 + $0x170] sm:$0xff] %vm326_vm1, %v4591_v11  ;;  %v4623_v26 = vsub.f32 %v4399_v9, %v4591_v11  ;;  %v13036_v18 = vpop.eup %9029  ;;  %v4403_v9 = vld [vmem:[#allocation2 + $0x190] sm:$0xff] }
 0x542   : > { %15195 = vst [vmem:[#allocation43_spill] sm:$0xff] %v13036_v18  ;;  %v13038_v19 = vpop.eup %9031 }
 0x543   : > { %6324 = vst.msk [vmem:[#allocation2 + $0x178] sm:$0xff] %vm326_vm1, %v4592_v8  ;;  %v4624_v25 = vsub.f32 %v4400_v37, %v4592_v8  ;;  %15196 = vst [vmem:[#allocation141_spill] sm:$0xff] %v13038_v19 }
 0x544   : > { %4782 = vperm.xlu0 %8527, %v4592_v8   ;;  %v4669_v8 = vmul.f32 1.442695, %v4623_v26 }
 0x545   : > { %4777 = vperm.xlu1 %8528, %v4591_v11   ;;  %v4671_v46 = vmul.f32 1.442695, %v4624_v25 }
 0x546   : > { %v4501_v54 = vpop.xlane.xlu0 %4500 }
 0x547   : > { %v4593_v39 = vmax.f32 %v4401_v48, %v4501_v54  ;;  %9037 = vpow2.f32 %v4671_v46  ;;  %v4406_v46 = vld [vmem:[#allocation2 + $0x1a8] sm:$0xff] }
 0x548   : > { %5628 = vperm.xlu0 %8527, %v13036_v18   ;;  %v4506_v44 = vpop.xlane.xlu1 %4505  ;;  %9039 = vpow2.f32 %v4669_v8 }
 0x549   : > { %v4594_v58 = vmax.f32 %v4402_v52, %v4506_v44  ;;  %5623 = vperm.xlu1 %8528, %v13038_v19   ;;  %6325 = vst.msk [vmem:[#allocation2 + $0x180] sm:$0xff] %vm326_vm1, %v4593_v39  ;;  %v4625_v11 = vsub.f32 %v4401_v48, %v4593_v39  ;;  %v13044_v54 = vpop.eup %9033  ;;  %v4405_v48 = vld [vmem:[#allocation2 + $0x1a0] sm:$0xff] }
 0x54a   : > { %15197 = vst [vmem:[#allocation132_spill] sm:$0xff] %v13044_v54  ;;  %v13046_v44 = vpop.eup %9035 }
 0x54b   : > { %6326 = vst.msk [vmem:[#allocation2 + $0x188] sm:$0xff] %vm326_vm1, %v4594_v58  ;;  %v4626_v37 = vsub.f32 %v4402_v52, %v4594_v58  ;;  %15198 = vst [vmem:[#allocation143_spill] sm:$0xff] %v13046_v44 }
 0x54c   : > { %4792 = vperm.xlu0 %8527, %v4594_v58   ;;  %v4673_v58 = vmul.f32 1.442695, %v4625_v11 }
 0x54d   : > { %4787 = vperm.xlu1 %8528, %v4593_v39   ;;  %v4675_v26 = vmul.f32 1.442695, %v4626_v37 }
 0x54e   : > { %v4511_v14 = vpop.xlane.xlu0 %4510 }
 0x54f   : > { %v4595_v25 = vmax.f32 %v4403_v9, %v4511_v14  ;;  %9041 = vpow2.f32 %v4675_v26  ;;  %v4408_v26 = vld [vmem:[#allocation2 + $0x1b8] sm:$0xff] }
 0x550   : > { %5638 = vperm.xlu0 %8527, %v13044_v54   ;;  %v4516_v18 = vpop.xlane.xlu1 %4515  ;;  %9043 = vpow2.f32 %v4673_v58 }
 0x551   : > { %v4596_v19 = vmax.f32 %v4404_v17, %v4516_v18  ;;  %5633 = vperm.xlu1 %8528, %v13046_v44   ;;  %6327 = vst.msk [vmem:[#allocation2 + $0x190] sm:$0xff] %vm326_vm1, %v4595_v25  ;;  %v4627_v39 = vsub.f32 %v4403_v9, %v4595_v25  ;;  %v13052_v14 = vpop.eup %9037  ;;  %v4407_v9 = vld [vmem:[#allocation2 + $0x1b0] sm:$0xff] }
 0x552   : > { %15199 = vst [vmem:[#allocation39_spill] sm:$0xff] %v13052_v14  ;;  %v13054_v18 = vpop.eup %9039 }
 0x553   : > { %6328 = vst.msk [vmem:[#allocation2 + $0x198] sm:$0xff] %vm326_vm1, %v4596_v19  ;;  %v4628_v52 = vsub.f32 %v4404_v17, %v4596_v19  ;;  %15200 = vst [vmem:[#allocation134_spill] sm:$0xff] %v13054_v18 }
 0x554   : > { %4802 = vperm.xlu0 %8527, %v4596_v19   ;;  %v4677_v19 = vmul.f32 1.442695, %v4627_v39 }
 0x555   : > { %4797 = vperm.xlu1 %8528, %v4595_v25   ;;  %v4679_v11 = vmul.f32 1.442695, %v4628_v52  ;;  %v6345_v52 = vld [vmem:[#allocation3 + $0x8] sm:$0xff] }
 0x556   : > { %v4521_v8 = vpop.xlane.xlu0 %4520 }
 0x557   : > { %v4597_v37 = vmax.f32 %v4405_v48, %v4521_v8  ;;  %9045 = vpow2.f32 %v4679_v11 }
 0x558   : > { %5648 = vperm.xlu0 %8527, %v13052_v14   ;;  %v4526_v54 = vpop.xlane.xlu1 %4525  ;;  %9047 = vpow2.f32 %v4677_v19  ;;  %v6352_v19 = vld [vmem:[#allocation3 + $0x40] sm:$0xff] }
 0x559   : > { %v4598_v44 = vmax.f32 %v4406_v46, %v4526_v54  ;;  %5643 = vperm.xlu1 %8528, %v13054_v18   ;;  %6329 = vst.msk [vmem:[#allocation2 + $0x1a0] sm:$0xff] %vm326_vm1, %v4597_v37  ;;  %v4629_v25 = vsub.f32 %v4405_v48, %v4597_v37  ;;  %v13060_v8 = vpop.eup %9041  ;;  %v6346_v18 = vld [vmem:[#allocation3 + $0x10] sm:$0xff]  ;;  %9049 = vrcp.f32 %v6345_v52  ;;  %v6344_v48 = vld [vmem:[#allocation3] sm:$0xff] }
 0x55a   : > { %15201 = vst [vmem:[#allocation152_spill] sm:$0xff] %v13060_v8  ;;  %v13062_v14 = vpop.eup %9043  ;;  %9051 = vrcp.f32 %v6346_v18  ;;  %v6347_v18 = vld [vmem:[#allocation3 + $0x18] sm:$0xff]  ;;  %v6354_v52 = vld [vmem:[#allocation3 + $0x50] sm:$0xff] }
 0x55b   : > { %6330 = vst.msk [vmem:[#allocation2 + $0x1a8] sm:$0xff] %vm326_vm1, %v4598_v44  ;;  %v4630_v17 = vsub.f32 %v4406_v46, %v4598_v44  ;;  %15202 = vst [vmem:[#allocation145_spill] sm:$0xff] %v13062_v14  ;;  %9053 = vrcp.f32 %v6348_v55  ;;  %v13068_v46 = vld [vmem:[#allocation2 + $0x1c0] sm:$0xff] }
 0x55c   : > { %4812 = vperm.xlu0 %8527, %v4598_v44   ;;  %v4681_v44 = vmul.f32 1.442695, %v4629_v25 }
 0x55d   : > { %4807 = vperm.xlu1 %8528, %v4597_v37   ;;  %v4683_v41 = vmul.f32 1.442695, %v4630_v17  ;;  %v6350_v37 = vld [vmem:[#allocation3 + $0x30] sm:$0xff] }
 0x55e   : > { %v4531_v58 = vpop.xlane.xlu0 %4530 }
 0x55f   : > { %v4599_v54 = vmax.f32 %v4407_v9, %v4531_v58  ;;  %9055 = vpow2.f32 %v4683_v41  ;;  %v4410_v58 = vld [vmem:[#allocation2 + $0x1c8] sm:$0xff] }
 0x560   : > { %5658 = vperm.xlu0 %8527, %v13060_v8   ;;  %v4536_v39 = vpop.xlane.xlu1 %4535  ;;  %9057 = vpow2.f32 %v4681_v44 }
 0x561   : > { %v4600_v47 = vmax.f32 %v4408_v26, %v4536_v39  ;;  %5653 = vperm.xlu1 %8528, %v13062_v14   ;;  %6331 = vst.msk [vmem:[#allocation2 + $0x1b0] sm:$0xff] %vm326_vm1, %v4599_v54  ;;  %v4631_v17 = vsub.f32 %v4407_v9, %v4599_v54  ;;  %v13070_v8 = vpop.eup %9045  ;;  %9059 = vrcp.f32 %v6344_v48  ;;  %v6356_v48 = vld [vmem:[#allocation3 + $0x60] sm:$0xff] }
 0x562   : > { %15203 = vst [vmem:[#allocation136_spill] sm:$0xff] %v13070_v8  ;;  %v13073_v55 = vpop.eup %9047  ;;  %9061 = vrcp.f32 %v6350_v37  ;;  %v13081_v37 = vld [vmem:[#allocation2 + $0x1d0] sm:$0xff] }
 0x563   : > { %6332 = vst.msk [vmem:[#allocation2 + $0x1b8] sm:$0xff] %vm326_vm1, %v4600_v47  ;;  %v4632_v11 = vsub.f32 %v4408_v26, %v4600_v47  ;;  %15204 = vst [vmem:[#allocation147_spill] sm:$0xff] %v13073_v55  ;;  %9063 = vrcp.f32 %v6352_v19  ;;  %v4685_v9 = vmul.f32 1.442695, %v4631_v17 }
 0x564   : > { %4822 = vperm.xlu0 %8527, %v4600_v47   ;;  %v6349_v47 = vld [vmem:[#allocation3 + $0x28] sm:$0xff]  ;;  %9065 = vrcp.f32 %v6347_v18  ;;  %v6358_v18 = vld [vmem:[#allocation3 + $0x70] sm:$0xff] }
 0x565   : > { %4817 = vperm.xlu1 %8528, %v4599_v54   ;;  %v4687_v26 = vmul.f32 1.442695, %v4632_v11  ;;  %9067 = vrcp.f32 %v6354_v52  ;;  %v13079_v54 = vpop.eup %9049  ;;  %v6351_v11 = vld [vmem:[#allocation3 + $0x38] sm:$0xff] }
 0x566   : > { %v4541_v39 = vpop.xlane.xlu0 %4540  ;;  %9069 = vrcp.f32 %v6349_v47  ;;  %v13083_v19 = vpop.eup %9051  ;;  %v4412_v52 = vld [vmem:[#allocation2 + $0x1d8] sm:$0xff]  ;;  %v6353_v47 = vld [vmem:[#allocation3 + $0x48] sm:$0xff] }
 0x567   : > { %v4601_v25 = vmax.f32 %v13068_v46, %v4541_v39  ;;  %9071 = vpow2.f32 %v4687_v26  ;;  %v6360_v26 = vld [vmem:[#allocation3 + $0x80] sm:$0xff] }
 0x568   : > { %5668 = vperm.xlu0 %8527, %v13070_v8   ;;  %v4546_v41 = vpop.xlane.xlu1 %4545  ;;  %9073 = vpow2.f32 %v4685_v9  ;;  %v6355_v9 = vld [vmem:[#allocation3 + $0x58] sm:$0xff] }
 0x569   : > { %v4602_v44 = vmax.f32 %v4410_v58, %v4546_v41  ;;  %5663 = vperm.xlu1 %8528, %v13073_v55   ;;  %6333 = vst.msk [vmem:[#allocation2 + $0x1c0] sm:$0xff] %vm326_vm1, %v4601_v25  ;;  %v13085_v41 = vpop.eup %9053  ;;  %v4633_v17 = vsub.f32 %v13068_v46, %v4601_v25  ;;  %9075 = vrcp.f32 %v6356_v48 }
 0x56a   : > { %v13088_v55 = vpop.eup %9055  ;;  %9077 = vrcp.f32 %v6351_v11 }
 0x56b   : > { %6334 = vst.msk [vmem:[#allocation2 + $0x1c8] sm:$0xff] %vm326_vm1, %v4602_v44  ;;  %v4634_v39 = vsub.f32 %v4410_v58, %v4602_v44  ;;  %15205 = vst [vmem:[#allocation47_spill] sm:$0xff] %v13088_v55  ;;  %v13091_v42 = vpop.eup %9057  ;;  %9079 = vrcp.f32 %v6358_v18  ;;  %v6362_v18 = vld [vmem:[#allocation3 + $0x90] sm:$0xff] }
 0x56c   : > { %4832 = vperm.xlu0 %8527, %v4602_v44   ;;  %15206 = vst [vmem:[#allocation138_spill] sm:$0xff] %v13091_v42  ;;  %v13094_v44 = vpop.eup %9059  ;;  %9081 = vrcp.f32 %v6353_v47 }
 0x56d   : > { %4827 = vperm.xlu1 %8528, %v4601_v25   ;;  %v4691_v46 = vmul.f32 1.442695, %v4634_v39  ;;  %v13098_v48 = vpop.eup %9061  ;;  %9083 = vrcp.f32 %v6360_v26  ;;  %v13105_v39 = vld [vmem:[#allocation2 + $0x1e0] sm:$0xff] }
 0x56e   : > { %v4551_v8 = vpop.xlane.xlu0 %4550  ;;  %v13100_v13 = vpop.eup %9063  ;;  %9085 = vrcp.f32 %v6355_v9 }
 0x56f   : > { %v4603_v14 = vmax.f32 %v13081_v37, %v4551_v8  ;;  %v4689_v8 = vmul.f32 1.442695, %v4633_v17  ;;  %v13103_v11 = vpop.eup %9065  ;;  %9087 = vpow2.f32 %v4691_v46  ;;  %v6364_v17 = vld [vmem:[#allocation3 + $0xa0] sm:$0xff] }
 0x570   : > { %5678 = vperm.xlu0 %8527, %v13088_v55   ;;  %v4556_v58 = vpop.xlane.xlu1 %4555  ;;  %v6357_v55 = vld [vmem:[#allocation3 + $0x68] sm:$0xff] }
 0x571   : > { %v4604_v25 = vmax.f32 %v4412_v52, %v4556_v58  ;;  %5673 = vperm.xlu1 %8528, %v13091_v42   ;;  %6335 = vst.msk [vmem:[#allocation2 + $0x1d0] sm:$0xff] %vm326_vm1, %v4603_v14  ;;  %v13107_v58 = vpop.eup %9067  ;;  %9089 = vpow2.f32 %v4689_v8  ;;  %v4635_v26 = vsub.f32 %v13081_v37, %v4603_v14 }
 0x572   : > { %v13109_v47 = vpop.eup %9069  ;;  %9091 = vrcp.f32 %v6362_v18 }
 0x573   : > { %6336 = vst.msk [vmem:[#allocation2 + $0x1d8] sm:$0xff] %vm326_vm1, %v4604_v25  ;;  %v4636_v42 = vsub.f32 %v4412_v52, %v4604_v25  ;;  %v13114_v9 = vpop.eup %9071  ;;  %9093 = vrcp.f32 %v6357_v55  ;;  %v6366_v52 = vld [vmem:[#allocation3 + $0xb0] sm:$0xff]  ;;  %v4693_v18 = vmul.f32 1.442695, %v4635_v26 }
 0x574   : > { %4842 = vperm.xlu0 %8527, %v4604_v25   ;;  %15207 = vst [vmem:[#allocation36_spill] sm:$0xff] %v13114_v9  ;;  %v13119_v38 = vpop.eup %9073  ;;  %9095 = vrcp.f32 %v6364_v17  ;;  %v6368_v17 = vld [vmem:[#allocation3 + $0xc0] sm:$0xff]  ;;  %v6370_v26 = vld [vmem:[#allocation3 + $0xd0] sm:$0xff] }
 0x575   : > { %4837 = vperm.xlu1 %8528, %v4603_v14   ;;  %15208 = vst [vmem:[#allocation149_spill] sm:$0xff] %v13119_v38  ;;  %v13122_v25 = vpop.eup %9075  ;;  %v6361_v14 = vld [vmem:[#allocation3 + $0x88] sm:$0xff]  ;;  %v4695_v37 = vmul.f32 1.442695, %v4636_v42  ;;  %9097 = vrcp.f32 %v6359_v3 }
 0x576   : > { %v4561_v1 = vpop.xlane.xlu0 %4560  ;;  %v13132_v55 = vpop.eup %9077  ;;  %9099 = vrcp.f32 %v6366_v52  ;;  %v13148_v52 = vld [vmem:[#allocation2 + $0x1f8] sm:$0xff] }
 0x577   : > { %v13117_v12 = vmax.f32 %v13105_v39, %v4561_v1  ;;  %9101 = vrcp.f32 %v6361_v14  ;;  %v6365_v14 = vld [vmem:[#allocation3 + $0xa8] sm:$0xff] }
 0x578   : > { %5688 = vperm.xlu0 %8527, %v13114_v9   ;;  %v4566_v46 = vpop.xlane.xlu1 %4565  ;;  %v13134_v9 = vpop.eup %9079  ;;  %9103 = vpow2.f32 %v4695_v37 }
 0x579   : > { %v13125_v8 = vmax.f32 %v13112_v40, %v4566_v46  ;;  %5683 = vperm.xlu1 %8528, %v13119_v38   ;;  %v4637_v1 = vsub.f32 %v13105_v39, %v13117_v12  ;;  %6337 = vst.msk [vmem:[#allocation2 + $0x1e0] sm:$0xff] %vm326_vm1, %v13117_v12  ;;  %15209 = vst [vmem:[#allocation140_spill] sm:$0xff] %v13134_v9  ;;  %v13138_v42 = vpop.eup %9081  ;;  %v13141_v39 = vld [vmem:[#allocation2 + $0x1f0] sm:$0xff]  ;;  %v6363_v38 = vld [vmem:[#allocation3 + $0x98] sm:$0xff]  ;;  %9105 = vpow2.f32 %v4693_v18 }
 0x57a   : > { %v13143_v46 = vpop.eup %9083  ;;  %9107 = vrcp.f32 %v6368_v17  ;;  %v6367_v18 = vld [vmem:[#allocation3 + $0xb8] sm:$0xff] }
 0x57b   : > { %6338 = vst.msk [vmem:[#allocation2 + $0x1e8] sm:$0xff] %vm326_vm1, %v13125_v8  ;;  %15210 = vst [vmem:[#allocation151_spill] sm:$0xff] %v13143_v46  ;;  %v13146_v3 = vpop.eup %9085  ;;  %9109 = vrcp.f32 %v6363_v38  ;;  %v6372_v46 = vld [vmem:[#allocation3 + $0xe0] sm:$0xff]  ;;  %v6374_v38 = vld [vmem:[#allocation3 + $0xf0] sm:$0xff] }
 0x57c   : > { %4852 = vperm.xlu0 %8527, %v13125_v8   ;;  %v13150_v15 = vpop.eup %9087  ;;  %9111 = vrcp.f32 %v6370_v26 }
 0x57d   : > { %4847 = vperm.xlu1 %8528, %v13117_v12   ;;  %15211 = vst [vmem:[#allocation67_spill] sm:$0xff] %v13150_v15  ;;  %v13153_v60 = vpop.eup %9089  ;;  %9113 = vrcp.f32 %v6365_v14  ;;  %v6373_v14 = vld [vmem:[#allocation3 + $0xe8] sm:$0xff] }
 0x57e   : > { %v4571_v36 = vpop.xlane.xlu0 %4570  ;;  %15212 = vst [vmem:[#allocation142_spill] sm:$0xff] %v13153_v60  ;;  %v13156_v37 = vpop.eup %9091  ;;  %9115 = vrcp.f32 %v6372_v46 }
 0x57f   : > { %v4607_v16 = vmax.f32 %v13141_v39, %v4571_v36  ;;  %15213 = vst [vmem:[#allocation40_spill] sm:$0xff] %v13156_v37  ;;  %v13164_v36 = vpop.eup %9093  ;;  %9117 = vrcp.f32 %v6367_v18 }
 0x580   : > { %5698 = vperm.xlu0 %8527, %v13150_v15   ;;  %v4576_v12 = vpop.xlane.xlu1 %4575  ;;  %v13166_v9 = vpop.eup %9095  ;;  %v6369_v15 = vld [vmem:[#allocation3 + $0xc8] sm:$0xff]  ;;  %9119 = vrcp.f32 %v6374_v38 }
 0x581   : > { %v13159_v28 = vmax.f32 %v13148_v52, %v4576_v12  ;;  %5693 = vperm.xlu1 %8528, %v13153_v60   ;;  %v4639_v17 = vsub.f32 %v13141_v39, %v4607_v16  ;;  %6339 = vst.msk [vmem:[#allocation2 + $0x1f0] sm:$0xff] %vm326_vm1, %v4607_v16  ;;  %15214 = vst [vmem:[#allocation161_spill] sm:$0xff] %v13166_v9  ;;  %v13170_v26 = vpop.eup %9097  ;;  %v6371_v12 = vld [vmem:[#allocation3 + $0xd8] sm:$0xff]  ;;  %v4638_v39 = vsub.f32 %v13112_v40, %v13125_v8 }
 0x582   : > { %15215 = vst [vmem:[#allocation144_spill] sm:$0xff] %v13170_v26  ;;  %v13175_v37 = vpop.eup %9099  ;;  %9121 = vrcp.f32 %v6369_v15  ;;  %v4697_v9 = vmul.f32 1.442695, %v4637_v1 }
 0x583   : > { %6340 = vst.msk [vmem:[#allocation2 + $0x1f8] sm:$0xff] %vm326_vm1, %v13159_v28  ;;  %15216 = vst [vmem:[#allocation37_spill] sm:$0xff] %v13175_v37  ;;  %v13177_v46 = vpop.eup %9101  ;;  %9123 = vrcp.f32 %v6371_v12  ;;  %v4699_v40 = vmul.f32 1.442695, %v4638_v39 }
 0x584   : > { %4862 = vperm.xlu0 %8527, %v13159_v28   ;;  %v5890_v60 = vpop.permute.xlu1 %5889  ;;  %v13179_v33 = vpop.eup %9103  ;;  %9125 = vrcp.f32 %v6373_v14  ;;  %v4701_v14 = vmul.f32 1.442695, %v4639_v17 }
 0x585   : > { %4857 = vperm.xlu1 %8528, %v4607_v16   ;;  %8278 = vmatprep.subr.bf16.mxu1 %v5890_v60  ;;  %15217 = vst [vmem:[#allocation57_spill] sm:$0xff] %v13179_v33  ;;  %v13181_v18 = vpop.eup %9105  ;;  %9127 = vpow2.f32 %v4697_v9 }
 0x586   : > { %15218 = vst [vmem:[#allocation48_spill] sm:$0xff] %v13181_v18  ;;  %v13184_v26 = vpop.eup %9107  ;;  %9129 = vpow2.f32 %v4699_v40 }
 0x587   : > { %15219 = vst [vmem:[#allocation146_spill] sm:$0xff] %v13184_v26  ;;  %v13191_v1 = vpop.eup %9109 }
 0x588   : > { %5708 = vperm.xlu0 %8527, %v13179_v33   ;;  %v4708_v8 = vpop.permute.xlu0 %4707  ;;  %v13193_v39 = vpop.eup %9111 }
 0x589   : > { %v4865_v38 = vsub.f32 %v12598_v43, %v4708_v8  ;;  %v4866_v60 = vsub.f32 %v12600_v53, %v4708_v8  ;;  %v4867_v16 = vsub.f32 %v12608_v4, %v4708_v8  ;;  %v4868_v15 = vsub.f32 %v12610_v10, %v4708_v8  ;;  %5703 = vperm.xlu1 %8528, %v13181_v18   ;;  %v13196_v43 = vpop.eup %9113 }
 0x58a   : > { %v4713_v12 = vpop.permute.xlu1 %4712  ;;  %v13201_v9 = vpop.eup %9115 }
 0x58b   : > { %v4993_v33 = vmul.f32 1.442695, %v4865_v38  ;;  %v4995_v37 = vmul.f32 1.442695, %v4866_v60  ;;  %v4869_v26 = vsub.f32 %v12602_v63, %v4713_v12  ;;  %v4997_v53 = vmul.f32 1.442695, %v4867_v16  ;;  %v13204_v17 = vpop.eup %9117 }
 0x58c   : > { %v4870_v4 = vsub.f32 %v12606_v6, %v4713_v12  ;;  %v4872_v10 = vsub.f32 %v12617_v51, %v4713_v12  ;;  %6447 = vperm.xlu0 %8527, %v13079_v54   ;;  %v5858_v8 = vpop.permute.xlu0 %5857  ;;  %v4999_v18 = vmul.f32 1.442695, %v4868_v15  ;;  %v13206_v40 = vpop.eup %9119  ;;  %v4871_v6 = vsub.f32 %v12615_v20, %v4713_v12 }
 0x58d   : > { %9131 = vpow2.f32 %v4993_v33  ;;  %6442 = vperm.xlu1 %8528, %v13094_v44   ;;  %8166 = vmatprep.subr.bf16.mxu0 %v5858_v8  ;;  %v5001_v51 = vmul.f32 1.442695, %v4869_v26  ;;  %v13209_v38 = vpop.eup %9121  ;;  %v4640_v54 = vsub.f32 %v13148_v52, %v13159_v28 }
 0x58e   : > { %9133 = vpow2.f32 %v4995_v37  ;;  %v5003_v63 = vmul.f32 1.442695, %v4870_v4  ;;  %v5007_v33 = vmul.f32 1.442695, %v4872_v10  ;;  %v13214_v60 = vpop.eup %9123  ;;  %v5005_v52 = vmul.f32 1.442695, %v4871_v6 }
 0x58f   : > { %9135 = vpow2.f32 %v4701_v14  ;;  %v13220_v26 = vpop.eup %9125 }
 0x590   : > { %9137 = vpow2.f32 %v4997_v53  ;;  %6457 = vperm.xlu0 %8527, %v13103_v11   ;;  %v4718_v44 = vpop.permute.xlu1 %4717  ;;  %v13222_v12 = vpop.eup %9127 }
 0x591   : > { %9139 = vpow2.f32 %v4999_v18  ;;  %v4873_v37 = vsub.f32 %v12621_v23, %v4718_v44  ;;  %v4874_v16 = vsub.f32 %v12624_v5, %v4718_v44  ;;  %v4875_v20 = vsub.f32 %v12632_v50, %v4718_v44  ;;  %6452 = vperm.xlu1 %8528, %v13083_v19   ;;  %15220 = vst [vmem:[#allocation148_spill] sm:$0xff] %v13222_v12  ;;  %v13229_v14 = vpop.eup %9129 }
 0x592   : > { %9141 = vpow2.f32 %v5003_v63  ;;  %v4723_v28 = vpop.permute.xlu0 %4722  ;;  %v4703_v50 = vmul.f32 1.442695, %v4640_v54  ;;  %15221 = vst [vmem:[#allocation64_spill] sm:$0xff] %v13229_v14  ;;  %v4876_v10 = vsub.f32 %v12634_v31, %v4718_v44 }
 0x593   : > { %9143 = vpow2.f32 %v5001_v51  ;;  %v5009_v15 = vmul.f32 1.442695, %v4873_v37  ;;  %v5011_v11 = vmul.f32 1.442695, %v4874_v16  ;;  %v5013_v18 = vmul.f32 1.442695, %v4875_v20 }
 0x594   : > { %9145 = vpow2.f32 %v5007_v33  ;;  %v4877_v23 = vsub.f32 %v12626_v61, %v4723_v28  ;;  %v4878_v5 = vsub.f32 %v12630_v29, %v4723_v28  ;;  %6467 = vperm.xlu0 %8527, %v13109_v47   ;;  %v4880_v19 = vsub.f32 %v12641_v2, %v4723_v28 }
 0x595   : > { %9147 = vpow2.f32 %v5009_v15  ;;  %6462 = vperm.xlu1 %8528, %v13085_v41   ;;  %v4879_v47 = vsub.f32 %v12639_v32, %v4723_v28 }
 0x596   : > { %9149 = vpow2.f32 %v5011_v11  ;;  %v5019_v53 = vmul.f32 1.442695, %v4878_v5  ;;  %v5017_v61 = vmul.f32 1.442695, %v4877_v23  ;;  %v5023_v63 = vmul.f32 1.442695, %v4880_v19 }
 0x597   : > { %v13231_v4 = vpop.eup %9131  ;;  %9151 = vpow2.f32 %v5005_v52  ;;  %v13234_v8 = vpop.permute.xlu0 %5573  ;;  %v5021_v28 = vmul.f32 1.442695, %v4879_v47 }
 0x598   : > { %15222 = vst [vmem:[#allocation70_spill] sm:$0xff] %v13234_v8  ;;  %v9134_v29 = vpop.eup %9133  ;;  %9153 = vpow2.f32 %v5013_v18  ;;  %v4728_v2 = vpop.permute.xlu1 %4727  ;;  %6477 = vperm.xlu0 %8527, %v13132_v55   ;;  %v5015_v55 = vmul.f32 1.442695, %v4876_v10 }
 0x599   : > { %v13238_v41 = vpop.eup %9135  ;;  %9155 = vpow2.f32 %v4703_v50  ;;  %v4881_v6 = vsub.f32 %v12645_v59, %v4728_v2  ;;  %v4882_v51 = vsub.f32 %v12648_v21, %v4728_v2  ;;  %v4883_v31 = vsub.f32 %v12656_v34, %v4728_v2  ;;  %6472 = vperm.xlu1 %8528, %v13098_v48  }
 0x59a   : > { %15223 = vst [vmem:[#allocation162_spill] sm:$0xff] %v13238_v41  ;;  %v13244_v54 = vpop.eup %9137  ;;  %9157 = vpow2.f32 %v5019_v53  ;;  %v4884_v32 = vsub.f32 %v12658_v49, %v4728_v2  ;;  %v5314_v33 = vadd.f32 %v9134_v29, %v13231_v4 }
 0x59b   : > { %v9140_v44 = vpop.eup %9139  ;;  %9159 = vpow2.f32 %v5017_v61  ;;  %v5025_v37 = vmul.f32 1.442695, %v4881_v6  ;;  %v5027_v16 = vmul.f32 1.442695, %v4882_v51  ;;  %v4733_v20 = vpop.permute.xlu0 %4732  ;;  %v5029_v52 = vmul.f32 1.442695, %v4883_v31 }
 0x59c   : > { %v9142_v59 = vpop.eup %9141  ;;  %9161 = vpow2.f32 %v5023_v63  ;;  %v4885_v21 = vsub.f32 %v12650_v27, %v4733_v20  ;;  %v4886_v34 = vsub.f32 %v12654_v22, %v4733_v20  ;;  %v13250_v48 = vpop.permute.xlu1 %5578  ;;  %6487 = vperm.xlu0 %8527, %v13138_v42   ;;  %v5031_v11 = vmul.f32 1.442695, %v4884_v32 }
 0x59d   : > { %15224 = vst [vmem:[#allocation38_spill] sm:$0xff] %v13250_v48  ;;  %v9144_v49 = vpop.eup %9143  ;;  %9163 = vpow2.f32 %v5025_v37  ;;  %6482 = vperm.xlu1 %8528, %v13100_v13   ;;  %v4888_v18 = vsub.f32 %v12665_v56, %v4733_v20  ;;  %v5764_v23 = vpack.c.bf16 %v9142_v59, %v9134_v29  ;;  %v4887_v27 = vsub.f32 %v12663_v24, %v4733_v20  ;;  %v15301_v48 = vld [vmem:[#allocation51_spill] sm:$0xff] }
 0x59e   : > { %v13254_v15 = vpop.eup %9145  ;;  %9165 = vpow2.f32 %v5027_v16  ;;  %v5035_v22 = vmul.f32 1.442695, %v4886_v34  ;;  %v5033_v53 = vmul.f32 1.442695, %v4885_v21  ;;  %v5319_v10 = vadd.f32 %v9144_v49, %v9142_v59 }
 0x59f   : > { %v13257_v5 = vpop.eup %9147  ;;  %9167 = vpow2.f32 %v5015_v55  ;;  %v5766_v42 = vpack.c.bf16 %v13254_v15, %v9140_v44  ;;  %v5842_v50 = vpop.permute.xlu0 %5841  ;;  %5955 = vmatprep.mubr.bf16.mxu0 %v5764_v23  ;;  %v5315_v61 = vadd.f32 %v13244_v54, %v5314_v33  ;;  %v5039_v47 = vmul.f32 1.442695, %v4888_v18  ;;  %v15229_v18 = vld [vmem:[#allocation144_spill] sm:$0xff] }
 0x5a0   : > { %v9150_v19 = vpop.eup %9149  ;;  %9169 = vpow2.f32 %v5021_v28  ;;  %v13261_v13 = vpop.permute.xlu1 %5583  ;;  %6497 = vperm.xlu0 %8527, %v13146_v3   ;;  %8167 = vmatpush3.bf16.msra.mxu0 %v5842_v50  ;;  %v5763_v63 = vpack.c.bf16 %v9144_v49, %v13231_v4  ;;  %v5037_v6 = vmul.f32 1.442695, %v4887_v27  ;;  %v15227_v49 = vld [vmem:[#allocation83_spill] sm:$0xff] }
 0x5a1   : > { %15225 = vst [vmem:[#allocation82_spill] sm:$0xff] %v13261_v13  ;;  %v13264_v56 = vpop.eup %9151  ;;  %9171 = vpow2.f32 %v5029_v52  ;;  %6116 = vmatprep.mubr.bf16.mxu1 %v5766_v42  ;;  %v5324_v24 = vadd.f32 %v9150_v19, %v13257_v5  ;;  %6492 = vperm.xlu1 %8528, %v13107_v58   ;;  %v13276_v32 = vadd.f32 %v9140_v44, %v5315_v61 }
 0x5a2   : > { %v13268_v29 = vpop.eup %9153  ;;  %9173 = vpow2.f32 %v5031_v11  ;;  %v5320_v3 = vadd.f32 %v13264_v56, %v5319_v10  ;;  %v5765_v23 = vpack.c.bf16 %v13264_v56, %v13244_v54 }
 0x5a3   : > { %v13273_v2 = vpop.eup %9155  ;;  %9175 = vpow2.f32 %v5035_v22  ;;  %v4743_v51 = vpop.permute.xlu0 %4742  ;;  %v5325_v31 = vadd.f32 %v13268_v29, %v5324_v24  ;;  %5956 = vmatmul.mubr.bf16.vlgmr.msra.gmra.mrb[192].mxu0 %v5763_v63 }
 0x5a4   : > { %15226 = vst [vmem:[#allocation60_spill] sm:$0xff] %v13273_v2  ;;  %v9158_v33 = vpop.eup %9157  ;;  %9177 = vpow2.f32 %v5033_v53  ;;  %v4893_v55 = vsub.f32 %v12674_v57, %v4743_v51  ;;  %v4894_v58 = vsub.f32 %v12678_v62, %v4743_v51  ;;  %v4895_v4 = vsub.f32 %v12687_v30, %v4743_v51  ;;  %v4738_v37 = vpop.permute.xlu1 %4737  ;;  %6507 = vperm.xlu0 %8527, %v13164_v36  }
 0x5a5   : > { %v9160_v16 = vpop.eup %9159  ;;  %v4896_v20 = vsub.f32 %v12689_v45, %v4743_v51  ;;  %v4889_v59 = vsub.f32 %v12669_v0, %v4738_v37  ;;  %v4890_v44 = vsub.f32 %v12672_v35, %v4738_v37  ;;  %v4891_v28 = vsub.f32 %v12680_v7, %v4738_v37  ;;  %6502 = vperm.xlu1 %8528, %v13122_v25  }
 0x5a6   : > { %v13286_v21 = vpop.eup %9161  ;;  %9179 = vpow2.f32 %v5039_v47  ;;  %v5049_v57 = vmul.f32 1.442695, %v4893_v55  ;;  %v5051_v34 = vmul.f32 1.442695, %v4894_v58  ;;  %v5053_v62 = vmul.f32 1.442695, %v4895_v4 }
 0x5a7   : > { %v13289_v30 = vpop.eup %9163  ;;  %9181 = vpow2.f32 %v5037_v6  ;;  %v5055_v36 = vmul.f32 1.442695, %v4896_v20  ;;  %v4892_v45 = vsub.f32 %v15227_v49, %v4738_v37  ;;  %v5768_v52 = vpack.c.bf16 %v9158_v33, %v9150_v19  ;;  %v13292_v0 = vpop.permute.xlu0 %5588  ;;  %v15230_v19 = vld [vmem:[#allocation140_spill] sm:$0xff]  ;;  %v15231_v6 = vld [vmem:[#allocation71_spill] sm:$0xff] }
 0x5a8   : > { %15228 = vst [vmem:[#allocation83_spill] sm:$0xff] %v13292_v0  ;;  %v13294_v35 = vpop.eup %9165  ;;  %9183 = vpow2.f32 %v5049_v57  ;;  %v5041_v7 = vmul.f32 1.442695, %v4889_v59  ;;  %v5874_v11 = vpop.permute.xlu1 %5873  ;;  %6517 = vperm.xlu0 %8527, %v15229_v18   ;;  %v5043_v27 = vmul.f32 1.442695, %v4890_v44  ;;  %v5767_v42 = vpack.c.bf16 %v9160_v16, %v13257_v5  ;;  %v15234_v37 = vld [vmem:[#allocation92_spill] sm:$0xff] }
 0x5a9   : > { %v9168_v25 = vpop.eup %9167  ;;  %9185 = vpow2.f32 %v5051_v34  ;;  %v5045_v22 = vmul.f32 1.442695, %v4891_v28  ;;  %5963 = vmatprep.mubr.bf16.mxu0 %v5768_v52  ;;  %8279 = vmatpush3.bf16.msra.mxu1 %v5874_v11  ;;  %v13304_v53 = vadd.f32 %v13254_v15, %v5320_v3  ;;  %v5334_v54 = vadd.f32 %v13294_v35, %v13289_v30  ;;  %v15232_v3 = vld [vmem:[#allocation73_spill] sm:$0xff]  ;;  %v15238_v49 = vld [vmem:[#allocation72_spill] sm:$0xff]  ;;  %v15299_v0 = vld [vmem:[#allocation119_spill] sm:$0xff] }
 0x5aa   : > { %v13300_v50 = vpop.eup %9169  ;;  %9187 = vpow2.f32 %v5053_v62  ;;  %6512 = vperm.xlu1 %8528, %v15230_v19   ;;  %v13306_v10 = vadd.f32 %v9168_v25, %v5325_v31  ;;  %v5047_v24 = vmul.f32 1.442695, %v4892_v45  ;;  %v5770_v5 = vpack.c.bf16 %v13286_v21, %v9168_v25  ;;  %v15233_v31 = vld [vmem:[#allocation91_spill] sm:$0xff]  ;;  %v15235_v59 = vld [vmem:[#allocation85_spill] sm:$0xff]  ;;  %v15239_v52 = vld [vmem:[#allocation76_spill] sm:$0xff] }
 0x5ab   : > { %v13310_v56 = vpop.eup %9171  ;;  %9189 = vpow2.f32 %v5055_v36  ;;  %v4753_v61 = vpop.permute.xlu0 %4752  ;;  %v5329_v47 = vadd.f32 %v9160_v16, %v9158_v33  ;;  %5964 = vmatmul.mubr.bf16.gmra.mrb[196].mxu0 %v5767_v42  ;;  %v15236_v16 = vld [vmem:[#allocation87_spill] sm:$0xff]  ;;  %v5769_v19 = vpack.c.bf16 %v13300_v50, %v13268_v29 }
 0x5ac   : > { %v13313_v63 = vpop.eup %9173  ;;  %9191 = vpow2.f32 %v5041_v7  ;;  %v4901_v15 = vsub.f32 %v15231_v6, %v4753_v61  ;;  %v4902_v51 = vsub.f32 %v15232_v3, %v4753_v61  ;;  %v4903_v55 = vsub.f32 %v15233_v31, %v4753_v61  ;;  %v4748_v58 = vpop.permute.xlu1 %4747  ;;  %6527 = vperm.xlu0 %8527, %v13177_v46   ;;  %6117 = vmatmul.mubr.bf16.vlgmr.msra.gmra.mrb[192].mxu1 %v5765_v23  ;;  %v15237_v36 = vld [vmem:[#allocation151_spill] sm:$0xff]  ;;  %v15242_v6 = vld [vmem:[#allocation40_spill] sm:$0xff] }
 0x5ad   : > { %v13319_v4 = vpop.eup %9175  ;;  %9193 = vpow2.f32 %v5043_v27  ;;  %v4904_v20 = vsub.f32 %v15234_v37, %v4753_v61  ;;  %v4897_v33 = vsub.f32 %v15235_v59, %v4748_v58  ;;  %v4898_v44 = vsub.f32 %v15236_v16, %v4748_v58  ;;  %6124 = vmatprep.mubr.bf16.mxu1 %v5770_v5  ;;  %v15244_v37 = vld [vmem:[#allocation81_spill] sm:$0xff] }
 0x5ae   : > { %v13324_v28 = vpop.eup %9177  ;;  %9195 = vpow2.f32 %v5045_v22  ;;  %v5065_v57 = vmul.f32 1.442695, %v4901_v15  ;;  %v5067_v34 = vmul.f32 1.442695, %v4902_v51  ;;  %v5069_v62 = vmul.f32 1.442695, %v4903_v55  ;;  %6522 = vperm.xlu1 %8528, %v15237_v36  }
 0x5af   : > { %9197 = vpow2.f32 %v5047_v24  ;;  %v5071_v46 = vmul.f32 1.442695, %v4904_v20  ;;  %v4899_v45 = vsub.f32 %v15238_v49, %v4748_v58  ;;  %v4900_v7 = vsub.f32 %v15239_v52, %v4748_v58  ;;  %v13329_v11 = vpop.permute.xlu0 %5598  ;;  %v15243_v55 = vld [vmem:[#allocation79_spill] sm:$0xff]  ;;  %v15245_v20 = vld [vmem:[#allocation100_spill] sm:$0xff] }
 0x5b0   : > { %15240 = vst [vmem:[#allocation144_spill] sm:$0xff] %v13329_v11  ;;  %v13331_v18 = vpop.eup %9179  ;;  %9199 = vpow2.f32 %v5065_v57  ;;  %v5057_v23 = vmul.f32 1.442695, %v4897_v33  ;;  %v5772_v25 = vpack.c.bf16 %v13319_v4, %v13294_v35  ;;  %v13335_v27 = vpop.permute.xlu1 %5593  ;;  %6537 = vperm.xlu0 %8527, %v13191_v1   ;;  %v5059_v42 = vmul.f32 1.442695, %v4898_v44  ;;  %v15248_v57 = vld [vmem:[#allocation96_spill] sm:$0xff] }
 0x5b1   : > { %15241 = vst [vmem:[#allocation140_spill] sm:$0xff] %v13335_v27  ;;  %v13338_v22 = vpop.eup %9181  ;;  %9201 = vpow2.f32 %v5067_v34  ;;  %v5061_v61 = vmul.f32 1.442695, %v4899_v45  ;;  %v5063_v5 = vmul.f32 1.442695, %v4900_v7  ;;  %v5771_v35 = vpack.c.bf16 %v13324_v28, %v13289_v30  ;;  %v15249_v45 = vld [vmem:[#allocation161_spill] sm:$0xff] }
 0x5b2   : > { %v13342_v24 = vpop.eup %9183  ;;  %9203 = vpow2.f32 %v5069_v62  ;;  %5971 = vmatprep.mubr.bf16.mxu0 %v5772_v25  ;;  %6532 = vperm.xlu1 %8528, %v15242_v6   ;;  %v5774_v3 = vpack.c.bf16 %v13331_v18, %v13313_v63  ;;  %v5335_v29 = vadd.f32 %v13310_v56, %v5334_v54  ;;  %v13353_v51 = vadd.f32 %v13300_v50, %v5329_v47  ;;  %v15246_v54 = vld [vmem:[#allocation101_spill] sm:$0xff]  ;;  %v15247_v50 = vld [vmem:[#allocation94_spill] sm:$0xff]  ;;  %v15250_v7 = vld [vmem:[#allocation80_spill] sm:$0xff] }
 0x5b3   : > { %v13347_v15 = vpop.eup %9185  ;;  %9205 = vpow2.f32 %v5071_v46  ;;  %v4763_v1 = vpop.permute.xlu0 %4762  ;;  %5972 = vmatmul.mubr.bf16.gmra.mrb[200].mxu0 %v5771_v35  ;;  %v15251_v25 = vld [vmem:[#allocation84_spill] sm:$0xff] }
 0x5b4   : > { %v13355_v31 = vpop.eup %9187  ;;  %9207 = vpow2.f32 %v5057_v23  ;;  %v4909_v58 = vsub.f32 %v15243_v55, %v4763_v1  ;;  %v4910_v30 = vsub.f32 %v15244_v37, %v4763_v1  ;;  %v4911_v59 = vsub.f32 %v15245_v20, %v4763_v1  ;;  %v4758_v33 = vpop.permute.xlu1 %4757  ;;  %6547 = vperm.xlu0 %8527, %v13196_v43   ;;  %6125 = vmatmul.mubr.bf16.gmra.mrb[196].mxu1 %v5769_v19  ;;  %v15254_v20 = vld [vmem:[#allocation37_spill] sm:$0xff] }
 0x5b5   : > { %v13361_v16 = vpop.eup %9189  ;;  %9209 = vpow2.f32 %v5059_v42  ;;  %v4912_v44 = vsub.f32 %v15246_v54, %v4763_v1  ;;  %v4905_v47 = vsub.f32 %v15247_v50, %v4758_v33  ;;  %v4906_v34 = vsub.f32 %v15248_v57, %v4758_v33  ;;  %6132 = vmatprep.mubr.bf16.mxu1 %v5774_v3 }
 0x5b6   : > { %v9192_v62 = vpop.eup %9191  ;;  %9211 = vpow2.f32 %v5061_v61  ;;  %v5081_v36 = vmul.f32 1.442695, %v4909_v58  ;;  %v5083_v46 = vmul.f32 1.442695, %v4910_v30  ;;  %v5085_v49 = vmul.f32 1.442695, %v4911_v59  ;;  %6542 = vperm.xlu1 %8528, %v15249_v45  }
 0x5b7   : > { %v9194_v52 = vpop.eup %9193  ;;  %9213 = vpow2.f32 %v5063_v5  ;;  %v5087_v43 = vmul.f32 1.442695, %v4912_v44  ;;  %v4907_v23 = vsub.f32 %v15250_v7, %v4758_v33  ;;  %v4908_v42 = vsub.f32 %v15251_v25, %v4758_v33  ;;  %v13369_v6 = vpop.permute.xlu0 %5608  ;;  %v15260_v7 = vld [vmem:[#allocation88_spill] sm:$0xff] }
 0x5b8   : > { %15252 = vst [vmem:[#allocation71_spill] sm:$0xff] %v13369_v6  ;;  %v13371_v35 = vpop.eup %9195  ;;  %9215 = vpow2.f32 %v5081_v36  ;;  %v5073_v19 = vmul.f32 1.442695, %v4905_v47  ;;  %v5776_v61 = vpack.c.bf16 %v13347_v15, %v9194_v52  ;;  %v13374_v1 = vpop.permute.xlu1 %5603  ;;  %6557 = vperm.xlu0 %8527, %v13204_v17   ;;  %v5075_v5 = vmul.f32 1.442695, %v4906_v34  ;;  %v15255_v47 = vld [vmem:[#allocation90_spill] sm:$0xff] }
 0x5b9   : > { %15253 = vst [vmem:[#allocation73_spill] sm:$0xff] %v13374_v1  ;;  %v13377_v3 = vpop.eup %9197  ;;  %9217 = vpow2.f32 %v5083_v46  ;;  %v5773_v55 = vpack.c.bf16 %v13338_v22, %v13310_v56  ;;  %v5077_v37 = vmul.f32 1.442695, %v4907_v23  ;;  %v5079_v30 = vmul.f32 1.442695, %v4908_v42  ;;  %v15256_v34 = vld [vmem:[#allocation89_spill] sm:$0xff] }
 0x5ba   : > { %v13381_v58 = vpop.eup %9199  ;;  %9219 = vpow2.f32 %v5085_v49  ;;  %5979 = vmatprep.mubr.bf16.mxu0 %v5776_v61  ;;  %6552 = vperm.xlu1 %8528, %v15254_v20   ;;  %v5775_v59 = vpack.c.bf16 %v13342_v24, %v9192_v62  ;;  %v5778_v54 = vpack.c.bf16 %v13361_v16, %v13377_v3  ;;  %v13390_v44 = vadd.f32 %v13313_v63, %v5335_v29  ;;  %v15257_v46 = vld [vmem:[#allocation109_spill] sm:$0xff]  ;;  %v15258_v63 = vld [vmem:[#allocation110_spill] sm:$0xff] }
 0x5bb   : > { %v13385_v33 = vpop.eup %9201  ;;  %9221 = vpow2.f32 %v5087_v43  ;;  %v4773_v17 = vpop.permute.xlu0 %4772  ;;  %v13392_v56 = vadd.f32 %v9194_v52, %v9192_v62  ;;  %v15259_v62 = vld [vmem:[#allocation103_spill] sm:$0xff]  ;;  %v15261_v20 = vld [vmem:[#allocation146_spill] sm:$0xff] }
 0x5bc   : > { %v13394_v50 = vpop.eup %9203  ;;  %9223 = vpow2.f32 %v5073_v19  ;;  %5980 = vmatmul.mubr.bf16.gmra.mrb[204].mxu0 %v5775_v59  ;;  %v4917_v57 = vsub.f32 %v15255_v47, %v4773_v17  ;;  %v4918_v36 = vsub.f32 %v15256_v34, %v4773_v17  ;;  %v4919_v49 = vsub.f32 %v15257_v46, %v4773_v17  ;;  %v4768_v45 = vpop.permute.xlu1 %4767  ;;  %6567 = vperm.xlu0 %8527, %v13209_v38   ;;  %v15262_v59 = vld [vmem:[#allocation105_spill] sm:$0xff] }
 0x5bd   : > { %v13400_v43 = vpop.eup %9205  ;;  %9225 = vpow2.f32 %v5075_v5  ;;  %v4920_v29 = vsub.f32 %v15258_v63, %v4773_v17  ;;  %v4913_v52 = vsub.f32 %v15259_v62, %v4768_v45  ;;  %v4914_v23 = vsub.f32 %v15260_v7, %v4768_v45  ;;  %6133 = vmatmul.mubr.bf16.gmra.mrb[200].mxu1 %v5773_v55  ;;  %v15263_v47 = vld [vmem:[#allocation93_spill] sm:$0xff] }
 0x5be   : > { %v13405_v25 = vpop.eup %9207  ;;  %9227 = vpow2.f32 %v5077_v37  ;;  %v5097_v42 = vmul.f32 1.442695, %v4917_v57  ;;  %v5099_v19 = vmul.f32 1.442695, %v4918_v36  ;;  %v5101_v61 = vmul.f32 1.442695, %v4919_v49  ;;  %6140 = vmatprep.mubr.bf16.mxu1 %v5778_v54  ;;  %6562 = vperm.xlu1 %8528, %v15261_v20  }
 0x5bf   : > { %v13408_v38 = vpop.eup %9209  ;;  %9229 = vpow2.f32 %v5079_v30  ;;  %v5103_v5 = vmul.f32 1.442695, %v4920_v29  ;;  %v4915_v17 = vsub.f32 %v15262_v59, %v4768_v45  ;;  %v4916_v34 = vsub.f32 %v15263_v47, %v4768_v45  ;;  %v13412_v46 = vpop.permute.xlu0 %5618  ;;  %v15269_v59 = vld [vmem:[#allocation118_spill] sm:$0xff] }
 0x5c0   : > { %15264 = vst [vmem:[#allocation91_spill] sm:$0xff] %v13412_v46  ;;  %v13414_v55 = vpop.eup %9211  ;;  %9231 = vpow2.f32 %v5097_v42  ;;  %v5089_v37 = vmul.f32 1.442695, %v4913_v52  ;;  %v5780_v57 = vpack.c.bf16 %v13385_v33, %v13408_v38  ;;  %v13418_v54 = vpop.permute.xlu1 %5613  ;;  %6577 = vperm.xlu0 %8527, %v13214_v60   ;;  %v5091_v30 = vmul.f32 1.442695, %v4914_v23 }
 0x5c1   : > { %15265 = vst [vmem:[#allocation92_spill] sm:$0xff] %v13418_v54  ;;  %v13421_v36 = vpop.eup %9213  ;;  %9233 = vpow2.f32 %v5099_v19  ;;  %v5093_v45 = vmul.f32 1.442695, %v4915_v17  ;;  %v5779_v63 = vpack.c.bf16 %v13381_v58, %v13405_v25  ;;  %v5777_v29 = vpack.c.bf16 %v13355_v31, %v13371_v35 }
 0x5c2   : > { %v13423_v49 = vpop.eup %9215  ;;  %9235 = vpow2.f32 %v5101_v61  ;;  %5987 = vmatprep.mubr.bf16.mxu0 %v5780_v57  ;;  %6572 = vperm.xlu1 %8528, %v13193_v39   ;;  %v5095_v60 = vmul.f32 1.442695, %v4916_v34  ;;  %v5782_v7 = vpack.c.bf16 %v13400_v43, %v13421_v36  ;;  %v13436_v23 = vadd.f32 %v13286_v21, %v13353_v51  ;;  %v15267_v39 = vld [vmem:[#allocation99_spill] sm:$0xff]  ;;  %v15268_v61 = vld [vmem:[#allocation98_spill] sm:$0xff]  ;;  %v15271_v34 = vld [vmem:[#allocation112_spill] sm:$0xff] }
 0x5c3   : > { %v13430_v62 = vpop.eup %9217  ;;  %9237 = vpow2.f32 %v5103_v5  ;;  %v4783_v52 = vpop.permute.xlu0 %4782  ;;  %v15272_v21 = vld [vmem:[#allocation97_spill] sm:$0xff] }
 0x5c4   : > { %v13438_v42 = vpop.eup %9219  ;;  %9239 = vpow2.f32 %v5089_v37  ;;  %5988 = vmatmul.mubr.bf16.gmra.mrb[208].mxu0 %v5779_v63  ;;  %v4925_v19 = vsub.f32 %v15267_v39, %v4783_v52  ;;  %v4926_v20 = vsub.f32 %v15268_v61, %v4783_v52  ;;  %v4927_v17 = vsub.f32 %v15269_v59, %v4783_v52  ;;  %v4778_v5 = vpop.permute.xlu1 %4777  ;;  %6587 = vperm.xlu0 %8527, %v13220_v26   ;;  %v15273_v37 = vld [vmem:[#allocation117_spill] sm:$0xff] }
 0x5c5   : > { %15266 = vst [vmem:[#allocation85_spill] sm:$0xff] %v13438_v42  ;;  %v13444_v47 = vpop.eup %9221  ;;  %9241 = vpow2.f32 %v5091_v30  ;;  %v4921_v57 = vsub.f32 %v15271_v34, %v4778_v5  ;;  %v4922_v51 = vsub.f32 %v15272_v21, %v4778_v5  ;;  %6141 = vmatmul.mubr.bf16.gmra.mrb[204].mxu1 %v5777_v29  ;;  %v4928_v63 = vsub.f32 %v15273_v37, %v4783_v52  ;;  %v15274_v59 = vld [vmem:[#allocation113_spill] sm:$0xff]  ;;  %v15275_v21 = vld [vmem:[#allocation102_spill] sm:$0xff] }
 0x5c6   : > { %15270 = vst [vmem:[#allocation87_spill] sm:$0xff] %v13444_v47  ;;  %v13448_v46 = vpop.eup %9223  ;;  %v5113_v39 = vmul.f32 1.442695, %v4925_v19  ;;  %v5115_v54 = vmul.f32 1.442695, %v4926_v20  ;;  %6148 = vmatprep.mubr.bf16.mxu1 %v5782_v7  ;;  %6582 = vperm.xlu1 %8528, %v13201_v9   ;;  %v5345_v26 = vadd.f32 %v13371_v35, %v13392_v56  ;;  %9243 = vpow2.f32 %v5095_v60 }
 0x5c7   : > { %v13454_v61 = vpop.eup %9225  ;;  %v5117_v30 = vmul.f32 1.442695, %v4927_v17  ;;  %v4923_v34 = vsub.f32 %v15274_v59, %v4778_v5  ;;  %v4924_v29 = vsub.f32 %v15275_v21, %v4778_v5  ;;  %v13458_v6 = vpop.permute.xlu0 %5628  ;;  %9245 = vpow2.f32 %v5093_v45  ;;  %v15282_v59 = vld [vmem:[#allocation107_spill] sm:$0xff]  ;;  %v15283_v21 = vld [vmem:[#allocation114_spill] sm:$0xff] }
 0x5c8   : > { %15276 = vst [vmem:[#allocation151_spill] sm:$0xff] %v13458_v6  ;;  %v13460_v1 = vpop.eup %9227  ;;  %v5105_v52 = vmul.f32 1.442695, %v4921_v57  ;;  %v5784_v9 = vpack.c.bf16 %v13430_v62, %v13454_v61  ;;  %v13464_v7 = vpop.permute.xlu1 %5623  ;;  %5718 = vperm.xlu0 %8527, %v13229_v14   ;;  %9247 = vpow2.f32 %v5113_v39  ;;  %v5107_v56 = vmul.f32 1.442695, %v4922_v51 }
 0x5c9   : > { %15277 = vst [vmem:[#allocation72_spill] sm:$0xff] %v13464_v7  ;;  %v13467_v35 = vpop.eup %9229  ;;  %v5781_v60 = vpack.c.bf16 %v13394_v50, %v13414_v55  ;;  %9249 = vpow2.f32 %v5115_v54  ;;  %v5119_v20 = vmul.f32 1.442695, %v4928_v63  ;;  %v5109_v45 = vmul.f32 1.442695, %v4923_v34  ;;  %v15281_v63 = vld [vmem:[#allocation108_spill] sm:$0xff] }
 0x5ca   : > { %v13471_v19 = vpop.eup %9231  ;;  %5995 = vmatprep.mubr.bf16.mxu0 %v5784_v9  ;;  %6592 = vperm.xlu1 %8528, %v13206_v40   ;;  %v5783_v17 = vpack.c.bf16 %v13423_v49, %v13448_v46  ;;  %9251 = vpow2.f32 %v5117_v30  ;;  %v5111_v57 = vmul.f32 1.442695, %v4924_v29  ;;  %v5786_v51 = vpack.c.bf16 %v13444_v47, %v13467_v35  ;;  %v15285_v29 = vld [vmem:[#allocation121_spill] sm:$0xff] }
 0x5cb   : > { %15278 = vst [vmem:[#allocation76_spill] sm:$0xff] %v13471_v19  ;;  %v13476_v5 = vpop.eup %9233  ;;  %v4793_v37 = vpop.permute.xlu0 %4792  ;;  %v13481_v39 = vadd.f32 %v13377_v3, %v5345_v26  ;;  %9253 = vpow2.f32 %v5105_v52  ;;  %v15286_v3 = vld [vmem:[#allocation106_spill] sm:$0xff]  ;;  %v15287_v52 = vld [vmem:[#allocation116_spill] sm:$0xff] }
 0x5cc   : > { %15279 = vst [vmem:[#allocation40_spill] sm:$0xff] %v13476_v5  ;;  %v13483_v54 = vpop.eup %9235  ;;  %5996 = vmatmul.mubr.bf16.gmra.mrb[212].mxu0 %v5783_v17  ;;  %v4933_v40 = vsub.f32 %v15281_v63, %v4793_v37  ;;  %v4934_v34 = vsub.f32 %v15282_v59, %v4793_v37  ;;  %v4935_v9 = vsub.f32 %v15283_v21, %v4793_v37  ;;  %v4788_v14 = vpop.permute.xlu1 %4787  ;;  %9255 = vpow2.f32 %v5107_v56  ;;  %v15288_v56 = vld [vmem:[#allocation120_spill] sm:$0xff] }
 0x5cd   : > { %15280 = vst [vmem:[#allocation79_spill] sm:$0xff] %v13483_v54  ;;  %5728 = vperm.xlu0 %8527, %v13273_v2   ;;  %v13489_v30 = vpop.eup %9237  ;;  %v4929_v6 = vsub.f32 %v15285_v29, %v4788_v14  ;;  %v4930_v26 = vsub.f32 %v15286_v3, %v4788_v14  ;;  %6149 = vmatmul.mubr.bf16.gmra.mrb[208].mxu1 %v5781_v60  ;;  %9257 = vpow2.f32 %v5119_v20  ;;  %v15289_v29 = vld [vmem:[#allocation111_spill] sm:$0xff] }
 0x5ce   : > { %15284 = vst [vmem:[#allocation81_spill] sm:$0xff] %v13489_v30  ;;  %v13493_v7 = vpop.eup %9239  ;;  %v4936_v17 = vsub.f32 %v15287_v52, %v4793_v37  ;;  %v5129_v63 = vmul.f32 1.442695, %v4933_v40  ;;  %v5131_v59 = vmul.f32 1.442695, %v4934_v34  ;;  %6156 = vmatprep.mubr.bf16.mxu1 %v5786_v51  ;;  %5713 = vperm.xlu1 %8528, %v13222_v12   ;;  %9259 = vpow2.f32 %v5111_v57 }
 0x5cf   : > { %v13497_v21 = vpop.eup %9241  ;;  %v5133_v2 = vmul.f32 1.442695, %v4935_v9  ;;  %v4931_v11 = vsub.f32 %v15288_v56, %v4788_v14  ;;  %v4932_v27 = vsub.f32 %v15289_v29, %v4788_v14  ;;  %v13501_v3 = vpop.permute.xlu0 %5638  ;;  %9261 = vpow2.f32 %v5109_v45  ;;  %v15295_v29 = vld [vmem:[#allocation50_spill] sm:$0xff] }
 0x5d0   : > { %15290 = vst [vmem:[#allocation100_spill] sm:$0xff] %v13501_v3  ;;  %v5121_v60 = vmul.f32 1.442695, %v4929_v6  ;;  %v5788_v20 = vpack.c.bf16 %v13476_v5, %v13497_v21  ;;  %v13505_v37 = vpop.permute.xlu1 %5633  ;;  %v13507_v51 = vpop.eup %9243  ;;  %9263 = vpow2.f32 %v5129_v63  ;;  %v5123_v40 = vmul.f32 1.442695, %v4930_v26  ;;  %v15316_v5 = vld [vmem:[#allocation41_spill] sm:$0xff] }
 0x5d1   : > { %15291 = vst [vmem:[#allocation101_spill] sm:$0xff] %v13505_v37  ;;  %v5785_v57 = vpack.c.bf16 %v13438_v42, %v13460_v1  ;;  %v13511_v34 = vpop.eup %9245  ;;  %9265 = vpow2.f32 %v5131_v59  ;;  %v5135_v14 = vmul.f32 1.442695, %v4936_v17  ;;  %v5125_v9 = vmul.f32 1.442695, %v4931_v11  ;;  %v15294_v11 = vld [vmem:[#allocation32_spill] sm:$0xff] }
 0x5d2   : > { %6003 = vmatprep.mubr.bf16.mxu0 %v5788_v20  ;;  %5723 = vperm.xlu1 %8528, %v13238_v41   ;;  %v5787_v6 = vpack.c.bf16 %v13471_v19, %v13493_v7  ;;  %v13516_v45 = vpop.eup %9247  ;;  %9267 = vpow2.f32 %v5133_v2  ;;  %v5127_v52 = vmul.f32 1.442695, %v4932_v27  ;;  %v5790_v26 = vpack.c.bf16 %v13489_v30, %v13507_v51  ;;  %v15296_v41 = vld [vmem:[#allocation58_spill] sm:$0xff]  ;;  %v15298_v27 = vld [vmem:[#allocation115_spill] sm:$0xff] }
 0x5d3   : > { %15292 = vst [vmem:[#allocation94_spill] sm:$0xff] %v13516_v45  ;;  %v4803_v63 = vpop.permute.xlu0 %4802  ;;  %v5339_v56 = vadd.f32 %v13324_v28, %v13319_v4  ;;  %v13522_v59 = vpop.eup %9249  ;;  %9269 = vpow2.f32 %v5121_v60  ;;  %v15300_v28 = vld [vmem:[#allocation30_spill] sm:$0xff] }
 0x5d4   : > { %15293 = vst [vmem:[#allocation96_spill] sm:$0xff] %v13522_v59  ;;  %6004 = vmatmul.mubr.bf16.gmra.mrb[216].mxu0 %v5787_v6  ;;  %v4941_v17 = vsub.f32 %v15294_v11, %v4803_v63  ;;  %v4942_v20 = vsub.f32 %v15295_v29, %v4803_v63  ;;  %v4943_v3 = vsub.f32 %v15296_v41, %v4803_v63  ;;  %v4798_v12 = vpop.permute.xlu1 %4797  ;;  %v13527_v2 = vpop.eup %9251  ;;  %9271 = vpow2.f32 %v5123_v40  ;;  %v15302_v40 = vld [vmem:[#allocation44_spill] sm:$0xff] }
 0x5d5   : > { %15297 = vst [vmem:[#allocation161_spill] sm:$0xff] %v13527_v2  ;;  %v4937_v37 = vsub.f32 %v15298_v27, %v4798_v12  ;;  %v4938_v13 = vsub.f32 %v15299_v0, %v4798_v12  ;;  %6157 = vmatmul.mubr.bf16.gmra.mrb[212].mxu1 %v5785_v57  ;;  %v13531_v4 = vpop.eup %9253  ;;  %9273 = vpow2.f32 %v5135_v14  ;;  %v4944_v60 = vsub.f32 %v15300_v28, %v4803_v63 }
 0x5d6   : > { %v5145_v6 = vmul.f32 1.442695, %v4941_v17  ;;  %v5147_v11 = vmul.f32 1.442695, %v4942_v20  ;;  %6164 = vmatprep.mubr.bf16.mxu1 %v5790_v26  ;;  %v13534_v29 = vpop.eup %9255  ;;  %9275 = vpow2.f32 %v5127_v52  ;;  %v5149_v41 = vmul.f32 1.442695, %v4943_v3 }
 0x5d7   : > { %v4939_v8 = vsub.f32 %v15301_v48, %v4798_v12  ;;  %v4940_v30 = vsub.f32 %v15302_v40, %v4798_v12  ;;  %v13538_v27 = vpop.permute.xlu0 %5648  ;;  %v13540_v0 = vpop.eup %9257  ;;  %9277 = vpow2.f32 %v5125_v9  ;;  %v5137_v57 = vmul.f32 1.442695, %v4937_v37 }
 0x5d8   : > { %15303 = vst [vmem:[#allocation80_spill] sm:$0xff] %v13538_v27  ;;  %15304 = vst [vmem:[#allocation84_spill] sm:$0xff] %v13540_v0  ;;  %v5792_v14 = vpack.c.bf16 %v13522_v59, %v13534_v29  ;;  %v13544_v63 = vpop.permute.xlu1 %5643  ;;  %v13546_v26 = vpop.eup %9259  ;;  %9279 = vpow2.f32 %v5145_v6  ;;  %v5139_v52 = vmul.f32 1.442695, %v4938_v13  ;;  %v5789_v48 = vpack.c.bf16 %v13483_v54, %v13511_v34  ;;  %v15310_v27 = vld [vmem:[#allocation45_spill] sm:$0xff] }
 0x5d9   : > { %15305 = vst [vmem:[#allocation37_spill] sm:$0xff] %v13544_v63  ;;  %v13550_v3 = vpop.eup %9261  ;;  %9281 = vpow2.f32 %v5147_v11  ;;  %v5151_v12 = vmul.f32 1.442695, %v4944_v60  ;;  %v5141_v17 = vmul.f32 1.442695, %v4939_v8  ;;  %v5791_v37 = vpack.c.bf16 %v13516_v45, %v13531_v4  ;;  %v15308_v60 = vld [vmem:[#allocation59_spill] sm:$0xff] }
 0x5da   : > { %6011 = vmatprep.mubr.bf16.mxu0 %v5792_v14  ;;  %v13554_v9 = vpop.eup %9263  ;;  %9283 = vpow2.f32 %v5149_v41  ;;  %v5143_v20 = vmul.f32 1.442695, %v4940_v30  ;;  %v5794_v13 = vpack.c.bf16 %v13540_v0, %v13546_v26  ;;  %v5340_v6 = vadd.f32 %v13338_v22, %v5339_v56  ;;  %v15309_v11 = vld [vmem:[#allocation52_spill] sm:$0xff]  ;;  %v15312_v30 = vld [vmem:[#allocation33_spill] sm:$0xff]  ;;  %v15314_v56 = vld [vmem:[#allocation66_spill] sm:$0xff] }
 0x5db   : > { %15306 = vst [vmem:[#allocation90_spill] sm:$0xff] %v13554_v9  ;;  %v4813_v28 = vpop.permute.xlu0 %4812  ;;  %v13559_v40 = vpop.eup %9265  ;;  %9285 = vpow2.f32 %v5137_v57  ;;  %v15313_v45 = vld [vmem:[#allocation53_spill] sm:$0xff] }
 0x5dc   : > { %15307 = vst [vmem:[#allocation89_spill] sm:$0xff] %v13559_v40  ;;  %6012 = vmatmul.mubr.bf16.gmra.mrb[220].mxu0 %v5791_v37  ;;  %v4949_v8 = vsub.f32 %v15308_v60, %v4813_v28  ;;  %v4950_v14 = vsub.f32 %v15309_v11, %v4813_v28  ;;  %v4951_v63 = vsub.f32 %v15310_v27, %v4813_v28  ;;  %v4808_v54 = vpop.permute.xlu1 %4807  ;;  %v13564_v59 = vpop.eup %9267  ;;  %9287 = vpow2.f32 %v5139_v52  ;;  %v15317_v52 = vld [vmem:[#allocation49_spill] sm:$0xff] }
 0x5dd   : > { %15311 = vst [vmem:[#allocation109_spill] sm:$0xff] %v13564_v59  ;;  %v4945_v41 = vsub.f32 %v15312_v30, %v4808_v54  ;;  %v4946_v0 = vsub.f32 %v15313_v45, %v4808_v54  ;;  %6165 = vmatmul.mubr.bf16.gmra.mrb[216].mxu1 %v5789_v48  ;;  %v13568_v22 = vpop.eup %9269  ;;  %9289 = vpow2.f32 %v5151_v12  ;;  %v4952_v57 = vsub.f32 %v15314_v56, %v4813_v28 }
 0x5de   : > { %v5161_v37 = vmul.f32 1.442695, %v4949_v8  ;;  %v5163_v60 = vmul.f32 1.442695, %v4950_v14  ;;  %6172 = vmatprep.mubr.bf16.mxu1 %v5794_v13  ;;  %v13571_v11 = vpop.eup %9271  ;;  %9291 = vpow2.f32 %v5143_v20  ;;  %v5165_v27 = vmul.f32 1.442695, %v4951_v63 }
 0x5df   : > { %15315 = vst [vmem:[#allocation110_spill] sm:$0xff] %v13571_v11  ;;  %v4947_v19 = vsub.f32 %v15316_v5, %v4808_v54  ;;  %v4948_v47 = vsub.f32 %v15317_v52, %v4808_v54  ;;  %v13575_v30 = vpop.permute.xlu0 %5658  ;;  %v13577_v45 = vpop.eup %9273  ;;  %9293 = vpow2.f32 %v5141_v17  ;;  %v5153_v48 = vmul.f32 1.442695, %v4945_v41 }
 0x5e0   : > { %15318 = vst [vmem:[#allocation103_spill] sm:$0xff] %v13575_v30  ;;  %15319 = vst [vmem:[#allocation88_spill] sm:$0xff] %v13577_v45  ;;  %v5796_v12 = vpack.c.bf16 %v13559_v40, %v13571_v11  ;;  %v13581_v28 = vpop.permute.xlu1 %5653  ;;  %v13583_v13 = vpop.eup %9275  ;;  %9295 = vpow2.f32 %v5161_v37  ;;  %v5155_v20 = vmul.f32 1.442695, %v4946_v0  ;;  %v5793_v5 = vpack.c.bf16 %v13527_v2, %v13550_v3  ;;  %v15326_v30 = vld [vmem:[#allocation61_spill] sm:$0xff] }
 0x5e1   : > { %15320 = vst [vmem:[#allocation146_spill] sm:$0xff] %v13581_v28  ;;  %15321 = vst [vmem:[#allocation105_spill] sm:$0xff] %v13583_v13  ;;  %v13587_v63 = vpop.eup %9277  ;;  %9297 = vpow2.f32 %v5163_v60  ;;  %v5167_v54 = vmul.f32 1.442695, %v4952_v57  ;;  %v5157_v8 = vmul.f32 1.442695, %v4947_v19  ;;  %v5795_v17 = vpack.c.bf16 %v13554_v9, %v13568_v22 }
 0x5e2   : > { %6019 = vmatprep.mubr.bf16.mxu0 %v5796_v12  ;;  %v13591_v14 = vpop.eup %9279  ;;  %9299 = vpow2.f32 %v5165_v27  ;;  %v5159_v41 = vmul.f32 1.442695, %v4948_v47  ;;  %v5798_v0 = vpack.c.bf16 %v13577_v45, %v13583_v13  ;;  %v13596_v37 = vadd.f32 %v13331_v18, %v5340_v6  ;;  %v15324_v19 = vld [vmem:[#allocation55_spill] sm:$0xff]  ;;  %v15325_v60 = vld [vmem:[#allocation54_spill] sm:$0xff]  ;;  %v15328_v45 = vld [vmem:[#allocation69_spill] sm:$0xff] }
 0x5e3   : > { %15322 = vst [vmem:[#allocation93_spill] sm:$0xff] %v13591_v14  ;;  %v4823_v56 = vpop.permute.xlu0 %4822  ;;  %v13598_v52 = vpop.eup %9281  ;;  %9301 = vpow2.f32 %v5153_v48  ;;  %v15327_v47 = vld [vmem:[#allocation154_spill] sm:$0xff]  ;;  %v15330_v13 = vld [vmem:[#allocation56_spill] sm:$0xff] }
 0x5e4   : > { %15323 = vst [vmem:[#allocation99_spill] sm:$0xff] %v13598_v52  ;;  %6020 = vmatmul.mubr.bf16.gmra.mrb[224].mxu0 %v5795_v17  ;;  %v4957_v57 = vsub.f32 %v15324_v19, %v4823_v56  ;;  %v4958_v12 = vsub.f32 %v15325_v60, %v4823_v56  ;;  %v4959_v28 = vsub.f32 %v15326_v30, %v4823_v56  ;;  %v4818_v40 = vpop.permute.xlu1 %4817  ;;  %v13603_v27 = vpop.eup %9283  ;;  %9303 = vpow2.f32 %v5155_v20  ;;  %v15329_v6 = vld [vmem:[#allocation62_spill] sm:$0xff]  ;;  %v15331_v20 = vld [vmem:[#allocation29_spill] sm:$0xff] }
 0x5e5   : > { %v4953_v9 = vsub.f32 %v15327_v47, %v4818_v40  ;;  %v4954_v2 = vsub.f32 %v15328_v45, %v4818_v40  ;;  %6173 = vmatmul.mubr.bf16.gmra.mrb[220].mxu1 %v5793_v5  ;;  %v13607_v18 = vpop.eup %9285  ;;  %9305 = vpow2.f32 %v5167_v54  ;;  %v4960_v48 = vsub.f32 %v15329_v6, %v4823_v56 }
 0x5e6   : > { %v5177_v17 = vmul.f32 1.442695, %v4957_v57  ;;  %v5179_v19 = vmul.f32 1.442695, %v4958_v12  ;;  %6180 = vmatprep.mubr.bf16.mxu1 %v5798_v0  ;;  %v13610_v60 = vpop.eup %9287  ;;  %9307 = vpow2.f32 %v5159_v41  ;;  %v5181_v30 = vmul.f32 1.442695, %v4959_v28 }
 0x5e7   : > { %v4955_v42 = vsub.f32 %v15330_v13, %v4818_v40  ;;  %v4956_v11 = vsub.f32 %v15331_v20, %v4818_v40  ;;  %v13614_v47 = vpop.permute.xlu0 %5668  ;;  %v13616_v45 = vpop.eup %9289  ;;  %9309 = vpow2.f32 %v5157_v8  ;;  %v5169_v5 = vmul.f32 1.442695, %v4953_v9  ;;  %v15337_v20 = vld [vmem:[#allocation86_spill] sm:$0xff] }
 0x5e8   : > { %15332 = vst [vmem:[#allocation98_spill] sm:$0xff] %v13614_v47  ;;  %15333 = vst [vmem:[#allocation118_spill] sm:$0xff] %v13616_v45  ;;  %v5800_v54 = vpack.c.bf16 %v13598_v52, %v13610_v60  ;;  %v13620_v56 = vpop.permute.xlu1 %5663  ;;  %v13622_v0 = vpop.eup %9291  ;;  %9311 = vpow2.f32 %v5177_v17  ;;  %v5171_v41 = vmul.f32 1.442695, %v4954_v2  ;;  %v5797_v28 = vpack.c.bf16 %v13564_v59, %v13587_v63  ;;  %v15338_v47 = vld [vmem:[#allocation65_spill] sm:$0xff] }
 0x5e9   : > { %15334 = vst [vmem:[#allocation112_spill] sm:$0xff] %v13620_v56  ;;  %15335 = vst [vmem:[#allocation97_spill] sm:$0xff] %v13622_v0  ;;  %v13626_v13 = vpop.eup %9293  ;;  %9313 = vpow2.f32 %v5179_v19  ;;  %v5183_v40 = vmul.f32 1.442695, %v4960_v48  ;;  %v5173_v57 = vmul.f32 1.442695, %v4955_v42  ;;  %v5799_v9 = vpack.c.bf16 %v13591_v14, %v13607_v18 }
 0x5ea   : > { %6027 = vmatprep.mubr.bf16.mxu0 %v5800_v54  ;;  %v13630_v8 = vpop.eup %9295  ;;  %9315 = vpow2.f32 %v5181_v30  ;;  %v5175_v12 = vmul.f32 1.442695, %v4956_v11  ;;  %v5802_v2 = vpack.c.bf16 %v13616_v45, %v13622_v0  ;;  %v5349_v17 = vadd.f32 %v13347_v15, %v13342_v24  ;;  %v15336_v42 = vld [vmem:[#allocation75_spill] sm:$0xff]  ;;  %v15340_v45 = vld [vmem:[#allocation74_spill] sm:$0xff]  ;;  %v15342_v59 = vld [vmem:[#allocation77_spill] sm:$0xff] }
 0x5eb   : > { %v4833_v6 = vpop.permute.xlu0 %4832  ;;  %v13637_v19 = vpop.eup %9297  ;;  %9317 = vpow2.f32 %v5169_v5  ;;  %v5354_v24 = vadd.f32 %v13408_v38, %v13405_v25  ;;  %v15341_v5 = vld [vmem:[#allocation68_spill] sm:$0xff]  ;;  %v15343_v0 = vld [vmem:[#allocation78_spill] sm:$0xff] }
 0x5ec   : > { %5322 = vadd.xlane.f32.xlu0 %v13304_v53  ;;  %6028 = vmatmul.mubr.bf16.gmra.mrb[228].mxu0 %v5799_v9  ;;  %v4965_v48 = vsub.f32 %v15336_v42, %v4833_v6  ;;  %v4966_v54 = vsub.f32 %v15337_v20, %v4833_v6  ;;  %v4967_v30 = vsub.f32 %v15338_v47, %v4833_v6  ;;  %v4828_v11 = vpop.permute.xlu1 %4827  ;;  %v13642_v56 = vpop.eup %9299  ;;  %9319 = vpow2.f32 %v5171_v41  ;;  %v15339_v53 = vld [vmem:[#allocation24_spill] sm:$0xff] }
 0x5ed   : > { %v4961_v52 = vsub.f32 %v15339_v53, %v4828_v11  ;;  %v4962_v14 = vsub.f32 %v15340_v45, %v4828_v11  ;;  %6181 = vmatmul.mubr.bf16.gmra.mrb[224].mxu1 %v5797_v28  ;;  %v13648_v15 = vpop.eup %9301  ;;  %9321 = vpow2.f32 %v5183_v40  ;;  %v4968_v9 = vsub.f32 %v15341_v5, %v4833_v6  ;;  %v15347_v5 = vld [vmem:[#allocation95_spill] sm:$0xff] }
 0x5ee   : > { %v5193_v42 = vmul.f32 1.442695, %v4965_v48  ;;  %v5195_v20 = vmul.f32 1.442695, %v4966_v54  ;;  %6188 = vmatprep.mubr.bf16.mxu1 %v5802_v2  ;;  %v13651_v47 = vpop.eup %9303  ;;  %9323 = vpow2.f32 %v5175_v12  ;;  %v5197_v41 = vmul.f32 1.442695, %v4967_v30 }
 0x5ef   : > { %v4963_v53 = vsub.f32 %v15342_v59, %v4828_v11  ;;  %v4964_v45 = vsub.f32 %v15343_v0, %v4828_v11  ;;  %v13656_v28 = vpop.permute.xlu0 %5678  ;;  %v13658_v25 = vpop.eup %9305  ;;  %9325 = vpow2.f32 %v5173_v57  ;;  %v5185_v38 = vmul.f32 1.442695, %v4961_v52 }
 0x5f0   : > { %5327 = vadd.xlane.f32.xlu0 %v13306_v10  ;;  %15344 = vst [vmem:[#allocation117_spill] sm:$0xff] %v13656_v28  ;;  %15345 = vst [vmem:[#allocation113_spill] sm:$0xff] %v13658_v25  ;;  %v5804_v40 = vpack.c.bf16 %v13637_v19, %v13651_v47  ;;  %v13662_v6 = vpop.permute.xlu1 %5673  ;;  %v13664_v2 = vpop.eup %9307  ;;  %9327 = vpow2.f32 %v5193_v42  ;;  %v5187_v12 = vmul.f32 1.442695, %v4962_v14  ;;  %v5801_v59 = vpack.c.bf16 %v13603_v27, %v13626_v13  ;;  %v15348_v42 = vld [vmem:[#allocation26_spill] sm:$0xff] }
 0x5f1   : > { %15346 = vst [vmem:[#allocation102_spill] sm:$0xff] %v13662_v6  ;;  %v5355_v10 = vadd.f32 %v13414_v55, %v5354_v24  ;;  %v13669_v0 = vpop.eup %9309  ;;  %9329 = vpow2.f32 %v5195_v20  ;;  %v5199_v48 = vmul.f32 1.442695, %v4968_v9  ;;  %v5189_v57 = vmul.f32 1.442695, %v4963_v53  ;;  %v15349_v53 = vld [vmem:[#allocation155_spill] sm:$0xff] }
 0x5f2   : > { %6035 = vmatprep.mubr.bf16.mxu0 %v5804_v40  ;;  %v5803_v52 = vpack.c.bf16 %v13630_v8, %v13648_v15  ;;  %v13673_v54 = vpop.eup %9311  ;;  %9331 = vpow2.f32 %v5197_v41  ;;  %v5191_v30 = vmul.f32 1.442695, %v4964_v45  ;;  %v5806_v11 = vpack.c.bf16 %v13658_v25, %v13664_v2 }
 0x5f3   : > { %v4843_v14 = vpop.permute.xlu0 %4842  ;;  %v13679_v55 = vadd.f32 %v13355_v31, %v5349_v17  ;;  %v13681_v24 = vpop.eup %9313  ;;  %9333 = vpow2.f32 %v5185_v38  ;;  %v5364_v31 = vadd.f32 %v13454_v61, %v13448_v46  ;;  %v15351_v38 = vld [vmem:[#allocation156_spill] sm:$0xff] }
 0x5f4   : > { %5337 = vadd.xlane.f32.xlu0 %v13390_v44  ;;  %6036 = vmatmul.mubr.bf16.gmra.mrb[232].mxu0 %v5803_v52  ;;  %v4973_v9 = vsub.f32 %v15347_v5, %v4843_v14  ;;  %v4974_v20 = vsub.f32 %v15348_v42, %v4843_v14  ;;  %v4975_v41 = vsub.f32 %v15349_v53, %v4843_v14  ;;  %v4838_v45 = vpop.permute.xlu1 %4837  ;;  %v13686_v40 = vpop.eup %9315  ;;  %9335 = vpow2.f32 %v5187_v12  ;;  %v15350_v44 = vld [vmem:[#allocation63_spill] sm:$0xff]  ;;  %v15352_v53 = vld [vmem:[#allocation25_spill] sm:$0xff] }
 0x5f5   : > { %v4970_v28 = vsub.f32 %v15350_v44, %v4838_v45  ;;  %6189 = vmatmul.mubr.bf16.gmra.mrb[228].mxu1 %v5801_v59  ;;  %v13691_v17 = vpop.eup %9317  ;;  %9337 = vpow2.f32 %v5199_v48  ;;  %v4976_v52 = vsub.f32 %v15351_v38, %v4843_v14  ;;  %v4969_v44 = vsub.f32 %v15352_v53, %v4838_v45  ;;  %v15353_v59 = vld [vmem:[#allocation104_spill] sm:$0xff] }
 0x5f6   : > { %v5209_v5 = vmul.f32 1.442695, %v4973_v9  ;;  %v5211_v6 = vmul.f32 1.442695, %v4974_v20  ;;  %6196 = vmatprep.mubr.bf16.mxu1 %v5806_v11  ;;  %5317 = vadd.xlane.f32.xlu1 %v13276_v32  ;;  %v13695_v42 = vpop.eup %9319  ;;  %9339 = vpow2.f32 %v5191_v30  ;;  %v5213_v12 = vmul.f32 1.442695, %v4975_v41 }
 0x5f7   : > { %v4971_v25 = vsub.f32 %v15353_v59, %v4838_v45  ;;  %v13700_v46 = vpop.permute.xlu0 %5688  ;;  %v13702_v61 = vpop.eup %9321  ;;  %9341 = vpow2.f32 %v5189_v57  ;;  %v5808_v48 = vpack.c.bf16 %v13681_v24, %v13695_v42  ;;  %v5356_v32 = vadd.f32 %v13421_v36, %v5355_v10  ;;  %v15357_v11 = vld [vmem:[#allocation27_spill] sm:$0xff] }
 0x5f8   : > { %5347 = vadd.xlane.f32.xlu0 %v13481_v39  ;;  %15354 = vst [vmem:[#allocation108_spill] sm:$0xff] %v13700_v46  ;;  %15355 = vst [vmem:[#allocation107_spill] sm:$0xff] %v13702_v61  ;;  %v13706_v14 = vpop.permute.xlu1 %5683  ;;  %v13709_v30 = vpop.eup %9323  ;;  %9343 = vpow2.f32 %v5209_v5  ;;  %v4972_v9 = vsub.f32 %v15357_v11, %v4838_v45  ;;  %v5203_v20 = vmul.f32 1.442695, %v4970_v28  ;;  %v5365_v39 = vadd.f32 %v13460_v1, %v5364_v31  ;;  %v15360_v5 = vld [vmem:[#allocation160_spill] sm:$0xff] }
 0x5f9   : > { %15356 = vst [vmem:[#allocation114_spill] sm:$0xff] %v13706_v14  ;;  %v13713_v41 = vpop.eup %9325  ;;  %9345 = vpow2.f32 %v5211_v6  ;;  %v5215_v38 = vmul.f32 1.442695, %v4976_v52  ;;  %6043 = vmatprep.mubr.bf16.mxu0 %v5808_v48  ;;  %v5807_v57 = vpack.c.bf16 %v13673_v54, %v13691_v17  ;;  %v5201_v36 = vmul.f32 1.442695, %v4969_v44  ;;  %v15358_v6 = vld [vmem:[#allocation122_spill] sm:$0xff] }
 0x5fa   : > { %5332 = vadd.xlane.f32.xlu1 %v13436_v23  ;;  %v13718_v53 = vpop.eup %9327  ;;  %9347 = vpow2.f32 %v5213_v12  ;;  %v5205_v10 = vmul.f32 1.442695, %v4971_v25  ;;  %v5805_v1 = vpack.c.bf16 %v13642_v56, %v13669_v0  ;;  %v15359_v52 = vld [vmem:[#allocation158_spill] sm:$0xff]  ;;  %v5810_v12 = vpack.c.bf16 %v13702_v61, %v13709_v30 }
 0x5fb   : > { %v4853_v45 = vpop.permute.xlu0 %4852  ;;  %v13722_v28 = vpop.eup %9329  ;;  %9349 = vpow2.f32 %v5203_v20  ;;  %v5207_v25 = vmul.f32 1.442695, %v4972_v9  ;;  %v5366_v46 = vadd.f32 %v13467_v35, %v5365_v39  ;;  %v15363_v9 = vld [vmem:[#allocation127_spill] sm:$0xff] }
 0x5fc   : > { %5357 = vadd.xlane.f32.xlu0 %v5356_v32  ;;  %6044 = vmatmul.mubr.bf16.gmra.mrb[236].mxu0 %v5807_v57  ;;  %v4981_v31 = vsub.f32 %v15358_v6, %v4853_v45  ;;  %v4982_v23 = vsub.f32 %v15359_v52, %v4853_v45  ;;  %v4983_v59 = vsub.f32 %v15360_v5, %v4853_v45  ;;  %v4848_v48 = vpop.permute.xlu1 %4847  ;;  %v13729_v44 = vpop.eup %9331  ;;  %v15361_v32 = vld [vmem:[#allocation157_spill] sm:$0xff]  ;;  %9351 = vpow2.f32 %v5215_v38  ;;  %v15362_v52 = vld [vmem:[#allocation159_spill] sm:$0xff] }
 0x5fd   : > { %v4978_v11 = vsub.f32 %v15361_v32, %v4848_v48  ;;  %6197 = vmatmul.mubr.bf16.gmra.mrb[232].mxu1 %v5805_v1  ;;  %v13733_v57 = vpop.eup %9333  ;;  %v4977_v14 = vsub.f32 %v15362_v52, %v4848_v48  ;;  %v5374_v5 = vadd.f32 %v13497_v21, %v13493_v7  ;;  %9353 = vpow2.f32 %v5201_v36  ;;  %v15364_v32 = vld [vmem:[#allocation150_spill] sm:$0xff]  ;;  %v15365_v36 = vld [vmem:[#allocation124_spill] sm:$0xff] }
 0x5fe   : > { %v5225_v6 = vmul.f32 1.442695, %v4981_v31  ;;  %6204 = vmatprep.mubr.bf16.mxu1 %v5810_v12  ;;  %5342 = vadd.xlane.f32.xlu1 %v13596_v37  ;;  %v13739_v61 = vpop.eup %9335  ;;  %v4984_v20 = vsub.f32 %v15363_v9, %v4853_v45  ;;  %v5227_v1 = vmul.f32 1.442695, %v4982_v23  ;;  %v4980_v35 = vsub.f32 %v15364_v32, %v4848_v48 }
 0x5ff   : > { %v13743_v39 = vpop.permute.xlu0 %5698  ;;  %v13745_v38 = vpop.eup %9337  ;;  %9355 = vpow2.f32 %v5205_v10  ;;  %v5229_v31 = vmul.f32 1.442695, %v4983_v59  ;;  %v5812_v37 = vpack.c.bf16 %v13722_v28, %v13739_v61  ;;  %v5351_v7 = vadd.f32 %v13361_v16, %v13679_v55 }
 0x600   : > { %5367 = vadd.xlane.f32.xlu0 %v5366_v46  ;;  %v13749_v12 = vpop.permute.xlu1 %5693  ;;  %v13753_v21 = vpop.eup %9339  ;;  %9357 = vpow2.f32 %v5207_v25  ;;  %v4979_v45 = vsub.f32 %v15365_v36, %v4848_v48  ;;  %v5219_v46 = vmul.f32 1.442695, %v4978_v11  ;;  %v5217_v52 = vmul.f32 1.442695, %v4977_v14 }
 0x601   : > { %v13756_v23 = vpop.eup %9341  ;;  %9359 = vpow2.f32 %v5225_v6  ;;  %6051 = vmatprep.mubr.bf16.mxu0 %v5812_v37  ;;  %v5375_v10 = vadd.f32 %v13511_v34, %v5374_v5  ;;  %v5811_v59 = vpack.c.bf16 %v13718_v53, %v13733_v57  ;;  %v5231_v16 = vmul.f32 1.442695, %v4984_v20  ;;  %v15366_v34 = vld [vmem:[#allocation123_spill] sm:$0xff] }
 0x602   : > { %5352 = vadd.xlane.f32.xlu1 %v5351_v7  ;;  %v13761_v9 = vpop.eup %9343  ;;  %9361 = vpow2.f32 %v5227_v1  ;;  %v5223_v55 = vmul.f32 1.442695, %v4980_v35  ;;  %v5809_v48 = vpack.c.bf16 %v13686_v40, %v13713_v41  ;;  %v5814_v20 = vpack.c.bf16 %v13745_v38, %v13753_v21  ;;  %v15368_v37 = vld [vmem:[#allocation35_spill] sm:$0xff] }
 0x603   : > { %v13763_v25 = vpop.permute.xlu0 %4862  ;;  %v13767_v11 = vpop.eup %9345  ;;  %9363 = vpow2.f32 %v5229_v31  ;;  %v5376_v14 = vadd.f32 %v13507_v51, %v5375_v10  ;;  %v5221_v32 = vmul.f32 1.442695, %v4979_v45  ;;  %v5359_v35 = vadd.f32 %v13385_v33, %v13381_v58  ;;  %v15367_v51 = vld [vmem:[#allocation129_spill] sm:$0xff] }
 0x604   : > { %6052 = vmatmul.mubr.bf16.gmra.mrb[240].mxu0 %v5811_v59  ;;  %v4990_v6 = vsub.f32 %v15366_v34, %v13763_v25  ;;  %v13772_v5 = vpop.permute.xlu1 %4857  ;;  %v13776_v1 = vpop.eup %9347  ;;  %9365 = vpow2.f32 %v5219_v46  ;;  %v4989_v31 = vsub.f32 %v15367_v51, %v13763_v25  ;;  %v5384_v36 = vadd.f32 %v13534_v29, %v13531_v4  ;;  %v15369_v46 = vld [vmem:[#allocation31_spill] sm:$0xff]  ;;  %v15370_v33 = vld [vmem:[#allocation133_spill] sm:$0xff] }
 0x605   : > { %6205 = vmatmul.mubr.bf16.gmra.mrb[236].mxu1 %v5809_v48  ;;  %9367 = vpow2.f32 %v5217_v52  ;;  %5377 = vadd.xlane.f32.xlu0 %v5376_v14  ;;  %v4986_v7 = vsub.f32 %v15368_v37, %v13772_v5  ;;  %v13786_v10 = vpop.eup %9349  ;;  %v4985_v59 = vsub.f32 %v15369_v46, %v13772_v5  ;;  %v4992_v52 = vsub.f32 %v15370_v33, %v13763_v25  ;;  %v15371_v14 = vld [vmem:[#allocation42_spill] sm:$0xff] }
 0x606   : > { %6212 = vmatprep.mubr.bf16.mxu1 %v5814_v20  ;;  %9369 = vpow2.f32 %v5231_v16  ;;  %v5243_v45 = vmul.f32 1.442695, %v4990_v6  ;;  %v13790_v58 = vpop.eup %9351  ;;  %v4988_v34 = vsub.f32 %v15371_v14, %v13772_v5  ;;  %v5360_v4 = vadd.f32 %v13394_v50, %v5359_v35  ;;  %v15372_v6 = vld [vmem:[#allocation28_spill] sm:$0xff] }
 0x607   : > { %9371 = vpow2.f32 %v5223_v55  ;;  %v13794_v48 = vpop.eup %9353  ;;  %v5235_v20 = vmul.f32 1.442695, %v4986_v7  ;;  %v5816_v29 = vpack.c.bf16 %v13767_v11, %v13786_v10  ;;  %v4991_v55 = vsub.f32 %v15372_v6, %v13763_v25  ;;  %v15373_v25 = vld [vmem:[#allocation110_spill] sm:$0xff] }
 0x608   : > { %9373 = vpow2.f32 %v5221_v32  ;;  %v5241_v51 = vmul.f32 1.442695, %v4989_v31  ;;  %v5385_v37 = vadd.f32 %v13550_v3, %v5384_v36  ;;  %v5233_v33 = vmul.f32 1.442695, %v4985_v59 }
 0x609   : > { %v13801_v16 = vpop.eup %9355  ;;  %9375 = vpow2.f32 %v5243_v45  ;;  %v5361_v7 = vadd.f32 %v13400_v43, %v5360_v4  ;;  %6059 = vmatprep.mubr.bf16.mxu0 %v5816_v29  ;;  %v5369_v50 = vadd.f32 %v13430_v62, %v13423_v49  ;;  %v5247_v14 = vmul.f32 1.442695, %v4992_v52  ;;  %v15374_v43 = vld [vmem:[#allocation85_spill] sm:$0xff]  ;;  %v15376_v29 = vld [vmem:[#allocation87_spill] sm:$0xff] }
 0x60a   : > { %v13806_v46 = vpop.eup %9357  ;;  %v5386_v32 = vadd.f32 %v13546_v26, %v5385_v37  ;;  %v5394_v31 = vadd.f32 %v15373_v25, %v13568_v22  ;;  %v5815_v3 = vpack.c.bf16 %v13761_v9, %v13794_v48  ;;  %9377 = vpow2.f32 %v5235_v20  ;;  %v15375_v26 = vld [vmem:[#allocation131_spill] sm:$0xff]  ;;  %v13827_v22 = vpop.permute.xlu0 %5708  ;;  %v15377_v37 = vld [vmem:[#allocation76_spill] sm:$0xff] }
 0x60b   : > { %v13811_v35 = vpop.eup %9359  ;;  %v5239_v45 = vmul.f32 1.442695, %v4988_v34  ;;  %5362 = vadd.xlane.f32.xlu1 %v5361_v7  ;;  %v5370_v59 = vadd.f32 %v15374_v43, %v5369_v50  ;;  %v5813_v49 = vpack.c.bf16 %v13729_v44, %v13756_v23  ;;  %9379 = vpow2.f32 %v5241_v51  ;;  %v15378_v51 = vld [vmem:[#allocation40_spill] sm:$0xff] }
 0x60c   : > { %v13818_v36 = vpop.eup %9361  ;;  %v4987_v52 = vsub.f32 %v15375_v26, %v13772_v5  ;;  %5387 = vadd.xlane.f32.xlu0 %v5386_v32  ;;  %v5395_v4 = vadd.f32 %v13587_v63, %v5394_v31  ;;  %6060 = vmatmul.mubr.bf16.gmra.mrb[244].mxu0 %v5815_v3  ;;  %v5818_v34 = vpack.c.bf16 %v13790_v58, %v13806_v46  ;;  %9381 = vpow2.f32 %v5233_v33  ;;  %v15379_v63 = vld [vmem:[#allocation105_spill] sm:$0xff]  ;;  %v15380_v31 = vld [vmem:[#allocation94_spill] sm:$0xff]  ;;  %v15381_v33 = vld [vmem:[#allocation96_spill] sm:$0xff] }
 0x60d   : > { %v13823_v62 = vpop.eup %9363  ;;  %v5371_v6 = vadd.f32 %v15376_v29, %v5370_v59  ;;  %6213 = vmatmul.mubr.bf16.gmra.mrb[240].mxu1 %v5813_v49  ;;  %v5379_v7 = vadd.f32 %v15378_v51, %v15377_v37  ;;  %v5404_v5 = vadd.f32 %v13610_v60, %v13607_v18  ;;  %9383 = vpow2.f32 %v5247_v14  ;;  %v15382_v59 = vld [vmem:[#allocation79_spill] sm:$0xff]  ;;  %v13855_v37 = vpop.permute.xlu1 %5703  ;;  %v15384_v51 = vld [vmem:[#allocation81_spill] sm:$0xff] }
 0x60e   : > { %v13832_v20 = vpop.eup %9365  ;;  %v5396_v32 = vadd.f32 %v15379_v63, %v5395_v4  ;;  %6220 = vmatprep.mubr.bf16.mxu1 %v5818_v34  ;;  %v5389_v3 = vadd.f32 %v15381_v33, %v15380_v31  ;;  %9385 = vpow2.f32 %v5239_v45  ;;  %v5414_v60 = vadd.f32 %v13651_v47, %v13648_v15  ;;  %v15383_v4 = vld [vmem:[#allocation161_spill] sm:$0xff] }
 0x60f   : > { %v13839_v50 = vpop.eup %9367  ;;  %v5820_v25 = vpack.c.bf16 %v13818_v36, %v13832_v20  ;;  %5372 = vadd.xlane.f32.xlu1 %v5371_v6  ;;  %v5380_v49 = vadd.f32 %v15382_v59, %v5379_v7  ;;  %v5405_v18 = vadd.f32 %v13626_v13, %v5404_v5  ;;  %v5245_v26 = vmul.f32 1.442695, %v4991_v55  ;;  %v13861_v5 = vpop.permute.xlu0 %6447  ;;  %v15385_v15 = vld [vmem:[#allocation97_spill] sm:$0xff]  ;;  %v15386_v55 = vld [vmem:[#allocation84_spill] sm:$0xff] }
 0x610   : > { %v13846_v43 = vpop.eup %9369  ;;  %5397 = vadd.xlane.f32.xlu0 %v5396_v32  ;;  %v5390_v34 = vadd.f32 %v15383_v4, %v5389_v3  ;;  %v5237_v29 = vmul.f32 1.442695, %v4987_v52  ;;  %v5415_v6 = vadd.f32 %v13669_v0, %v5414_v60  ;;  %v5819_v13 = vpack.c.bf16 %v13811_v35, %v13839_v50  ;;  %v15387_v32 = vld [vmem:[#allocation90_spill] sm:$0xff]  ;;  %v15389_v59 = vld [vmem:[#allocation109_spill] sm:$0xff] }
 0x611   : > { %v13852_v14 = vpop.eup %9371  ;;  %6067 = vmatprep.mubr.bf16.mxu0 %v5820_v25  ;;  %v5381_v45 = vadd.f32 %v15384_v51, %v5380_v49  ;;  %v5406_v47 = vadd.f32 %v15385_v15, %v5405_v18  ;;  %v15388_v25 = vld [vmem:[#allocation89_spill] sm:$0xff]  ;;  %v5424_v52 = vadd.f32 %v13695_v42, %v13691_v17  ;;  %v5817_v0 = vpack.c.bf16 %v13776_v1, %v13801_v16  ;;  %v15391_v42 = vld [vmem:[#allocation99_spill] sm:$0xff]  ;;  %v15392_v51 = vld [vmem:[#allocation88_spill] sm:$0xff] }
 0x612   : > { %v9374_v7 = vpop.eup %9373  ;;  %v5391_v63 = vadd.f32 %v15386_v55, %v5390_v34  ;;  %v5399_v31 = vadd.f32 %v15388_v25, %v15387_v32  ;;  %9387 = vpow2.f32 %v5245_v26  ;;  %v5822_v3 = vpack.c.bf16 %v13846_v43, %v13852_v14  ;;  %v15390_v17 = vld [vmem:[#allocation93_spill] sm:$0xff] }
 0x613   : > { %v13869_v33 = vpop.eup %9375  ;;  %5382 = vadd.xlane.f32.xlu1 %v5381_v45  ;;  %9389 = vpow2.f32 %v5237_v29  ;;  %v5416_v60 = vadd.f32 %v13664_v2, %v5415_v6  ;;  %v5409_v4 = vadd.f32 %v15391_v42, %v15390_v17  ;;  %v5434_v15 = vadd.f32 %v13739_v61, %v13733_v57  ;;  %v13886_v29 = vpop.permute.xlu1 %6442 }
 0x614   : > { %5407 = vadd.xlane.f32.xlu0 %v5406_v47  ;;  %6068 = vmatmul.mubr.bf16.gmra.mrb[248].mxu0 %v5819_v13  ;;  %v5400_v49 = vadd.f32 %v15389_v59, %v5399_v31  ;;  %v9378_v18 = vpop.eup %9377  ;;  %v5425_v13 = vadd.f32 %v13713_v41, %v5424_v52  ;;  %v13890_v6 = vpop.permute.xlu0 %6457  ;;  %v5419_v25 = vadd.f32 %v13637_v19, %v13630_v8 }
 0x615   : > { %6221 = vmatmul.mubr.bf16.gmra.mrb[244].mxu1 %v5817_v0  ;;  %v13879_v34 = vpop.eup %9379  ;;  %v5824_v45 = vpack.c.bf16 %v13869_v33, %v9378_v18  ;;  %v5410_v32 = vadd.f32 %v13603_v27, %v5409_v4  ;;  %v5435_v61 = vadd.f32 %v13756_v23, %v5434_v15  ;;  %v5821_v31 = vpack.c.bf16 %v13823_v62, %v9374_v7  ;;  %v15393_v0 = vld [vmem:[#allocation118_spill] sm:$0xff] }
 0x616   : > { %6228 = vmatprep.mubr.bf16.mxu1 %v5822_v3  ;;  %v5401_v26 = vadd.f32 %v15392_v51, %v5400_v49  ;;  %v9382_v47 = vpop.eup %9381  ;;  %v5426_v41 = vadd.f32 %v13709_v30, %v5425_v13  ;;  %v5420_v19 = vadd.f32 %v13642_v56, %v5419_v25  ;;  %v5429_v30 = vadd.f32 %v13681_v24, %v13673_v54 }
 0x617   : > { %5392 = vadd.xlane.f32.xlu1 %v5391_v63  ;;  %v13888_v2 = vpop.eup %9383  ;;  %6075 = vmatprep.mubr.bf16.mxu0 %v5824_v45  ;;  %v5823_v57 = vpack.c.bf16 %v13879_v34, %v9382_v47  ;;  %v5444_v63 = vadd.f32 %v13794_v48, %v13786_v10  ;;  %v13902_v27 = vpop.permute.xlu1 %6452  ;;  %v5411_v8 = vadd.f32 %v15393_v0, %v5410_v32 }
 0x618   : > { %5417 = vadd.xlane.f32.xlu0 %v5416_v60  ;;  %v9386_v55 = vpop.eup %9385  ;;  %v13908_v3 = vpop.permute.xlu0 %6467  ;;  %v5436_v10 = vadd.f32 %v13753_v21, %v5435_v61  ;;  %v5454_v59 = vadd.f32 %v13839_v50, %v13832_v20  ;;  %v15394_v60 = vld [vmem:[#allocation113_spill] sm:$0xff]  ;;  %v5430_v56 = vadd.f32 %v13686_v40, %v5429_v30  ;;  %v5439_v54 = vadd.f32 %v13722_v28, %v13718_v53  ;;  %v15395_v20 = vld [vmem:[#allocation107_spill] sm:$0xff] }
 0x619   : > { %v5826_v52 = vpack.c.bf16 %v13888_v2, %v9386_v55  ;;  %v5445_v48 = vadd.f32 %v13801_v16, %v5444_v63  ;;  %v5421_v17 = vadd.f32 %v15394_v60, %v5420_v19  ;;  %v5464_v21 = vadd.f32 %v9382_v47, %v9378_v18 }
 0x61a   : > { %v5455_v42 = vadd.f32 %v9374_v7, %v5454_v59  ;;  %v5431_v50 = vadd.f32 %v15395_v20, %v5430_v56  ;;  %v5449_v40 = vadd.f32 %v13767_v11, %v13761_v9  ;;  %v5459_v45 = vadd.f32 %v13818_v36, %v13811_v35  ;;  %v6375_v36 = vld [vmem:[#allocation3 + $0xf8] sm:$0xff] }
 0x61b   : > { %5402 = vadd.xlane.f32.xlu1 %v5401_v26  ;;  %v5446_v24 = vadd.f32 %v13806_v46, %v5445_v48  ;;  %v13919_v4 = vpop.permute.xlu1 %6462  ;;  %v5440_v26 = vadd.f32 %v13729_v44, %v5439_v54  ;;  %9391 = vrcp.f32 %v6375_v36 }
 0x61c   : > { %5427 = vadd.xlane.f32.xlu0 %v5426_v41  ;;  %6076 = vmatmul.mubr.bf16.gmra.mrb[252].mxu0 %v5823_v57  ;;  %v9388_v23 = vpop.eup %9387  ;;  %v13921_v51 = vpop.permute.xlu0 %6477  ;;  %v5456_v53 = vadd.f32 %v13852_v14, %v5455_v42  ;;  %v5450_v18 = vadd.f32 %v13776_v1, %v5449_v40  ;;  %v5460_v11 = vadd.f32 %v13823_v62, %v5459_v45  ;;  %v5252_v42 = vld [vmem:[#allocation3 + $0x110] sm:$0xff]  ;;  %v5254_v45 = vld [vmem:[#allocation3 + $0x120] sm:$0xff] }
 0x61d   : > { %6229 = vmatmul.mubr.bf16.gmra.mrb[248].mxu1 %v5821_v31  ;;  %v9390_v49 = vpop.eup %9389  ;;  %v5441_v7 = vadd.f32 %v13745_v38, %v5440_v26  ;;  %v5469_v14 = vadd.f32 %v13879_v34, %v13869_v33 }
 0x61e   : > { %6236 = vmatprep.mubr.bf16.mxu1 %v5826_v52  ;;  %v5825_v16 = vpack.c.bf16 %v9388_v23, %v9390_v49  ;;  %v5465_v28 = vadd.f32 %v9390_v49, %v5464_v21  ;;  %v5451_v9 = vadd.f32 %v13790_v58, %v5450_v18  ;;  %v5461_v1 = vadd.f32 %v13846_v43, %v5460_v11  ;;  %v5251_v49 = vld [vmem:[#allocation3 + $0x108] sm:$0xff]  ;;  %v5250_v11 = vld [vmem:[#allocation3 + $0x100] sm:$0xff] }
 0x61f   : > { %5412 = vadd.xlane.f32.xlu1 %v5411_v8  ;;  %v13928_v46 = vpop.permute.xlu1 %6472  ;;  %v5470_v35 = vadd.f32 %v9388_v23, %v5469_v14 }
 0x620   : > { %5437 = vadd.xlane.f32.xlu0 %v5436_v10  ;;  %v13934_v13 = vpop.permute.xlu0 %6487  ;;  %v5466_v44 = vadd.f32 %v9386_v55, %v5465_v28 }
 0x621   : > { %v5471_v55 = vadd.f32 %v13888_v2, %v5470_v35  ;;  %v5539_v35 = vld [vmem:[#allocation4 + $0x100] sm:$0xff] }
 0x623   : > { %5422 = vadd.xlane.f32.xlu1 %v5421_v17  ;;  %v13940_v15 = vpop.permute.xlu1 %6482  ;;  %v15401_v17 = vld [vmem:[#allocation135_spill] sm:$0xff] }
 0x624   : > { %5447 = vadd.xlane.f32.xlu0 %v5446_v24  ;;  %v13942_v38 = vpop.permute.xlu0 %6497  ;;  %v5283_v56 = vmul.f32 %v15401_v17, %v5251_v49  ;;  %v15403_v49 = vld [vmem:[#allocation137_spill] sm:$0xff] }
 0x625   : > { %6237 = vmatmul.mubr.bf16.gmra.mrb[252].mxu1 %v5825_v16  ;;  %v9392_v34 = vpop.eup %9391 }
 0x627   : > { %5432 = vadd.xlane.f32.xlu1 %v5431_v50  ;;  %v13945_v47 = vpop.permute.xlu1 %6492 }
 0x628   : > { %5457 = vadd.xlane.f32.xlu0 %v5456_v53  ;;  %v13948_v58 = vpop.permute.xlu0 %6507  ;;  %v15402_v53 = vld [vmem:[#allocation46_spill] sm:$0xff] }
 0x629   : > { %v5284_v28 = vmul.f32 %v15402_v53, %v5252_v42  ;;  %v15404_v42 = vld [vmem:[#allocation125_spill] sm:$0xff] }
 0x62b   : > { %5442 = vadd.xlane.f32.xlu1 %v5441_v7  ;;  %v13950_v62 = vpop.permute.xlu1 %6502 }
 0x62c   : > { %5467 = vadd.xlane.f32.xlu0 %v5466_v44  ;;  %v13952_v33 = vpop.permute.xlu0 %6517 }
 0x62f   : > { %5452 = vadd.xlane.f32.xlu1 %v5451_v9  ;;  %v13954_v32 = vpop.permute.xlu1 %6512 }
 0x630   : > { %v13956_v25 = vpop.permute.xlu0 %6527 }
 0x633   : > { %5462 = vadd.xlane.f32.xlu1 %v5461_v1  ;;  %v13958_v43 = vpop.permute.xlu1 %6522 }
 0x634   : > { %v13960_v41 = vpop.permute.xlu0 %6537 }
 0x637   : > { %5472 = vadd.xlane.f32.xlu1 %v5471_v55  ;;  %v13962_v61 = vpop.permute.xlu1 %6532 }
 0x638   : > { %v13964_v2 = vpop.permute.xlu0 %6547 }
 0x63b   : > { %v13966_v57 = vpop.permute.xlu1 %6542 }
 0x63c   : > { %v13968_v63 = vpop.permute.xlu0 %6557 }
 0x63f   : > { %v13970_v31 = vpop.permute.xlu1 %6552 }
 0x640   : > { %v13972_v52 = vpop.permute.xlu0 %6567 }
 0x642   : > { %6597 = vperm.xlu0 %8527, %v9392_v34  }
 0x643   : > { %v13974_v0 = vpop.permute.xlu1 %6562 }
 0x644   : > { %v13976_v8 = vpop.permute.xlu0 %6577 }
 0x645   : > { %15396 = vst [vmem:[#allocation121_spill] sm:$0xff] %v13976_v8 }
 0x647   : > { %v13978_v19 = vpop.permute.xlu1 %6572 }
 0x648   : > { %15397 = vst [vmem:[#allocation106_spill] sm:$0xff] %v13978_v19  ;;  %v13980_v30 = vpop.permute.xlu0 %6587 }
 0x649   : > { %15398 = vst [vmem:[#allocation116_spill] sm:$0xff] %v13980_v30 }
 0x64b   : > { %v13982_v23 = vpop.permute.xlu1 %6582 }
 0x64c   : > { %15399 = vst [vmem:[#allocation120_spill] sm:$0xff] %v13982_v23  ;;  %v13984_v10 = vpop.permute.xlu0 %5718 }
 0x64f   : > { %v13986_v48 = vpop.permute.xlu1 %6592 }
 0x650   : > { %15400 = vst [vmem:[#allocation111_spill] sm:$0xff] %v13986_v48  ;;  %v13988_v59 = vpop.permute.xlu0 %5728  ;;  %v15405_v48 = vld [vmem:[#allocation70_spill] sm:$0xff] }
 0x653   : > { %v13991_v21 = vpop.permute.xlu1 %5713 }
 0x657   : > { %v13995_v44 = vpop.permute.xlu1 %5723 }
 0x676   : > { %v8168_v60 = vpop.f32.mrb[192].mxu0 }
 0x677   : > { %v8169_v54 = vpop.f32.mrb[193].mxu0 }
 0x678   : > { %v8170_v16 = vadd.f32 %v8169_v54, %v8168_v60  ;;  %v8171_v20 = vpop.f32.mrb[194].mxu0  ;;  %v5286_v60 = vmul.f32 %v15403_v49, %v5254_v45 }
 0x679   : > { %v5323_v24 = vpop.xlane.xlu0 %5322  ;;  %v8172_v26 = vpop.f32.mrb[195].mxu0 }
 0x67a   : > { %v5475_v50 = vadd.f32 %v5323_v24, %v5283_v56  ;;  %v8173_v40 = vadd.f32 %v8172_v26, %v8171_v20  ;;  %v5282_v20 = vmul.f32 %v15404_v42, %v5250_v11 }
 0x67c   : > { %5507 = vst.msk [vmem:[#allocation3 + $0x108] sm:$0xff] %vm326_vm1, %v5475_v50  ;;  %v5256_v50 = vld [vmem:[#allocation3 + $0x130] sm:$0xff] }
 0x67d   : > { %v5328_v7 = vpop.xlane.xlu0 %5327 }
 0x67e   : > { %v5476_v18 = vadd.f32 %v5328_v7, %v5284_v28  ;;  %v8174_v9 = vpop.f32.mrb[196].mxu0 }
 0x67f   : > { %v8175_v14 = vpop.f32.mrb[197].mxu0  ;;  %v8280_v1 = vpop.f32.mrb[192].mxu1 }
 0x680   : > { %5508 = vst.msk [vmem:[#allocation3 + $0x110] sm:$0xff] %vm326_vm1, %v5476_v18  ;;  %v8176_v36 = vadd.f32 %v8175_v14, %v8174_v9  ;;  %v8177_v55 = vpop.f32.mrb[198].mxu0  ;;  %v8281_v34 = vpop.f32.mrb[193].mxu1  ;;  %v5253_v18 = vld [vmem:[#allocation3 + $0x118] sm:$0xff]  ;;  %v5731_v9 = vmul.f32 %v15405_v48, %v5539_v35  ;;  %v5540_v14 = vld [vmem:[#allocation4 + $0x108] sm:$0xff] }
 0x681   : > { %v8282_v56 = vadd.f32 %v8281_v34, %v8280_v1  ;;  %v5338_v54 = vpop.xlane.xlu0 %5337  ;;  %v8178_v24 = vpop.f32.mrb[199].mxu0  ;;  %v15406_v34 = vld [vmem:[#allocation139_spill] sm:$0xff] }
 0x682   : > { %v5478_v26 = vadd.f32 %v5338_v54, %v5286_v60  ;;  %v14000_v53 = vadd.f32 %v8178_v24, %v8177_v55  ;;  %v8283_v28 = vpop.f32.mrb[194].mxu1  ;;  %v5288_v49 = vmul.f32 %v15406_v34, %v5256_v50  ;;  %v15407_v55 = vld [vmem:[#allocation126_spill] sm:$0xff]  ;;  %v5258_v54 = vld [vmem:[#allocation3 + $0x140] sm:$0xff]  ;;  %v15410_v34 = vld [vmem:[#allocation153_spill] sm:$0xff] }
 0x683   : > { %v6633_v17 = vld [vmem:[#allocation3 + $0x108] sm:$0xff]  ;;  %v5318_v7 = vpop.xlane.xlu1 %5317  ;;  %v6119_v23 = vadd.f32 %v8282_v56, %v8170_v16  ;;  %v8284_v30 = vpop.f32.mrb[195].mxu1  ;;  %v15408_v24 = vld [vmem:[#allocation38_spill] sm:$0xff] }
 0x684   : > { %9393 = vrcp.f32 %v6633_v17  ;;  %v5474_v45 = vadd.f32 %v5318_v7, %v5282_v20  ;;  %5510 = vst.msk [vmem:[#allocation3 + $0x120] sm:$0xff] %vm326_vm1, %v5478_v26  ;;  %v8285_v1 = vadd.f32 %v8284_v30, %v8283_v28  ;;  %v5285_v17 = vmul.f32 %v15407_v55, %v5253_v18  ;;  %v5255_v56 = vld [vmem:[#allocation3 + $0x128] sm:$0xff]  ;;  %v5541_v50 = vld [vmem:[#allocation4 + $0x110] sm:$0xff] }
 0x685   : > { %v6245_v11 = vadd.f32 %v6119_v23, %v5731_v9  ;;  %v5348_v60 = vpop.xlane.xlu0 %5347  ;;  %v5732_v42 = vmul.f32 %v15408_v24, %v5540_v14  ;;  %v15409_v9 = vld [vmem:[#allocation130_spill] sm:$0xff]  ;;  %v5257_v24 = vld [vmem:[#allocation3 + $0x138] sm:$0xff] }
 0x686   : > { %5506 = vst.msk [vmem:[#allocation3 + $0x100] sm:$0xff] %vm326_vm1, %v5474_v45  ;;  %v6122_v19 = vadd.f32 %v8285_v1, %v8173_v40  ;;  %v5480_v48 = vadd.f32 %v5348_v60, %v5288_v49  ;;  %v8180_v35 = vpop.f32.mrb[200].mxu0  ;;  %v5290_v14 = vmul.f32 %v15409_v9, %v5258_v54  ;;  %v5287_v49 = vmul.f32 %v15410_v34, %v5255_v56  ;;  %v15412_v56 = vld [vmem:[#allocation141_spill] sm:$0xff] }
 0x687   : > { %v5333_v16 = vpop.xlane.xlu1 %5332  ;;  %6277 = vst.msk [vmem:[#allocation4 + $0x100] sm:$0xff] %vm455_vm0, %v6245_v11  ;;  %v8181_v30 = vpop.f32.mrb[201].mxu0  ;;  %v5260_v11 = vld [vmem:[#allocation3 + $0x150] sm:$0xff] }
 0x688   : > { %v5477_v20 = vadd.f32 %v5333_v16, %v5285_v17  ;;  %v8286_v26 = vpop.f32.mrb[196].mxu1  ;;  %v6246_v23 = vadd.f32 %v6122_v19, %v5732_v42  ;;  %5512 = vst.msk [vmem:[#allocation3 + $0x130] sm:$0xff] %vm326_vm1, %v5480_v48  ;;  %v14010_v28 = vadd.f32 %v8181_v30, %v8180_v35  ;;  %v8183_v7 = vpop.f32.mrb[202].mxu0  ;;  %v15411_v42 = vld [vmem:[#allocation82_spill] sm:$0xff]  ;;  %v5542_v35 = vld [vmem:[#allocation4 + $0x118] sm:$0xff]  ;;  %v5292_v9 = vmul.f32 %v15412_v56, %v5260_v11 }
 0x689   : > { %v8287_v18 = vpop.f32.mrb[197].mxu1  ;;  %v5358_v45 = vpop.xlane.xlu0 %5357  ;;  %v5733_v48 = vmul.f32 %v15411_v42, %v5541_v50  ;;  %v6634_v34 = vld [vmem:[#allocation3 + $0x110] sm:$0xff] }
 0x68a   : > { %5509 = vst.msk [vmem:[#allocation3 + $0x118] sm:$0xff] %vm326_vm1, %v5477_v20  ;;  %v8288_v40 = vadd.f32 %v8287_v18, %v8286_v26  ;;  %v8184_v1 = vpop.f32.mrb[203].mxu0  ;;  %v5482_v60 = vadd.f32 %v5358_v45, %v5290_v14  ;;  %v8289_v55 = vpop.f32.mrb[198].mxu1  ;;  %v15413_v14 = vld [vmem:[#allocation128_spill] sm:$0xff]  ;;  %v15414_v45 = vld [vmem:[#allocation83_spill] sm:$0xff] }
 0x68b   : > { %6278 = vst.msk [vmem:[#allocation4 + $0x108] sm:$0xff] %vm455_vm0, %v6246_v23  ;;  %v8185_v19 = vadd.f32 %v8184_v1, %v8183_v7  ;;  %v5343_v17 = vpop.xlane.xlu1 %5342  ;;  %v8290_v54 = vpop.f32.mrb[199].mxu1  ;;  %v5289_v50 = vmul.f32 %v15413_v14, %v5257_v24 }
 0x68c   : > { %v6127_v16 = vadd.f32 %v8288_v40, %v8176_v36  ;;  %v5479_v30 = vadd.f32 %v5343_v17, %v5287_v49  ;;  %5514 = vst.msk [vmem:[#allocation3 + $0x140] sm:$0xff] %vm326_vm1, %v5482_v60  ;;  %v8291_v18 = vadd.f32 %v8290_v54, %v8289_v55  ;;  %v5734_v36 = vmul.f32 %v15414_v45, %v5542_v35  ;;  %v5262_v60 = vld [vmem:[#allocation3 + $0x160] sm:$0xff] }
 0x68d   : > { %v6632_v26 = vld [vmem:[#allocation3 + $0x100] sm:$0xff]  ;;  %v5368_v7 = vpop.xlane.xlu0 %5367 }
 0x68e   : > { %v9394_v20 = vpop.eup %9393  ;;  %9395 = vrcp.f32 %v6632_v26  ;;  %v6247_v23 = vadd.f32 %v6127_v16, %v5733_v48  ;;  %5511 = vst.msk [vmem:[#allocation3 + $0x128] sm:$0xff] %vm326_vm1, %v5479_v30  ;;  %v6130_v40 = vadd.f32 %v8291_v18, %v14000_v53  ;;  %v5484_v1 = vadd.f32 %v5368_v7, %v5292_v9  ;;  %v5543_v48 = vld [vmem:[#allocation4 + $0x120] sm:$0xff]  ;;  %v15415_v26 = vld [vmem:[#allocation143_spill] sm:$0xff] }
 0x68f   : > { %6735 = vperm.xlu0 %8527, %v9394_v20   ;;  %v8186_v49 = vpop.f32.mrb[204].mxu0  ;;  %v5353_v17 = vpop.xlane.xlu1 %5352  ;;  %9397 = vrcp.f32 %v6634_v34  ;;  %v6636_v20 = vld [vmem:[#allocation3 + $0x120] sm:$0xff]  ;;  %v5294_v18 = vmul.f32 %v15415_v26, %v5262_v60  ;;  %v6638_v60 = vld [vmem:[#allocation3 + $0x130] sm:$0xff] }
 0x690   : > { %6279 = vst.msk [vmem:[#allocation4 + $0x110] sm:$0xff] %vm455_vm0, %v6247_v23  ;;  %v5481_v11 = vadd.f32 %v5353_v17, %v5289_v50  ;;  %v8187_v55 = vpop.f32.mrb[205].mxu0  ;;  %v8292_v42 = vpop.f32.mrb[200].mxu1  ;;  %v6248_v54 = vadd.f32 %v6130_v40, %v5734_v36  ;;  %v5544_v23 = vld [vmem:[#allocation4 + $0x128] sm:$0xff]  ;;  %v15416_v50 = vld [vmem:[#allocation140_spill] sm:$0xff]  ;;  %v5545_v26 = vld [vmem:[#allocation4 + $0x130] sm:$0xff] }
 0x691   : > { %v6635_v16 = vld [vmem:[#allocation3 + $0x118] sm:$0xff]  ;;  %5516 = vst.msk [vmem:[#allocation3 + $0x150] sm:$0xff] %vm326_vm1, %v5484_v1  ;;  %v8188_v24 = vadd.f32 %v8187_v55, %v8186_v49  ;;  %v8189_v30 = vpop.f32.mrb[206].mxu0  ;;  %v8293_v35 = vpop.f32.mrb[201].mxu1  ;;  %v5735_v45 = vmul.f32 %v15416_v50, %v5543_v48  ;;  %v15417_v17 = vld [vmem:[#allocation144_spill] sm:$0xff] }
 0x692   : > { %9399 = vrcp.f32 %v6635_v16  ;;  %5513 = vst.msk [vmem:[#allocation3 + $0x138] sm:$0xff] %vm326_vm1, %v5481_v11  ;;  %v8294_v53 = vadd.f32 %v8293_v35, %v8292_v42  ;;  %v8190_v56 = vpop.f32.mrb[207].mxu0  ;;  %v8295_v9 = vpop.f32.mrb[202].mxu1  ;;  %v5736_v11 = vmul.f32 %v15417_v17, %v5544_v23  ;;  %v5259_v16 = vld [vmem:[#allocation3 + $0x148] sm:$0xff] }
 0x693   : > { %6280 = vst.msk [vmem:[#allocation4 + $0x118] sm:$0xff] %vm455_vm0, %v6248_v54  ;;  %v5378_v34 = vpop.xlane.xlu0 %5377  ;;  %v14028_v7 = vadd.f32 %v8190_v56, %v8189_v30  ;;  %v8296_v14 = vpop.f32.mrb[203].mxu1  ;;  %9401 = vrcp.f32 %v6636_v20  ;;  %v5264_v54 = vld [vmem:[#allocation3 + $0x170] sm:$0xff] }
 0x694   : > { %v6135_v36 = vadd.f32 %v8294_v53, %v14010_v28  ;;  %v5486_v40 = vadd.f32 %v5378_v34, %v5294_v18  ;;  %v8297_v1 = vadd.f32 %v8296_v14, %v8295_v9  ;;  %v15418_v18 = vld [vmem:[#allocation34_spill] sm:$0xff] }
 0x695   : > { %v6637_v49 = vld [vmem:[#allocation3 + $0x128] sm:$0xff]  ;;  %v5291_v56 = vmul.f32 %v15418_v18, %v5259_v16  ;;  %v15419_v14 = vld [vmem:[#allocation134_spill] sm:$0xff] }
 0x696   : > { %9403 = vrcp.f32 %v6637_v49  ;;  %v6249_v55 = vadd.f32 %v6135_v36, %v5735_v45  ;;  %5518 = vst.msk [vmem:[#allocation3 + $0x160] sm:$0xff] %vm326_vm1, %v5486_v40  ;;  %v6138_v42 = vadd.f32 %v8297_v1, %v8185_v19  ;;  %v5296_v50 = vmul.f32 %v15419_v14, %v5264_v54  ;;  %v5261_v45 = vld [vmem:[#allocation3 + $0x158] sm:$0xff]  ;;  %v6640_v49 = vld [vmem:[#allocation3 + $0x140] sm:$0xff] }
 0x697   : > { %v8192_v30 = vpop.f32.mrb[208].mxu0  ;;  %9405 = vrcp.f32 %v6638_v60  ;;  %v5266_v60 = vld [vmem:[#allocation3 + $0x180] sm:$0xff]  ;;  %v15421_v54 = vld [vmem:[#allocation43_spill] sm:$0xff] }
 0x698   : > { %v9396_v35 = vpop.eup %9395  ;;  %6281 = vst.msk [vmem:[#allocation4 + $0x120] sm:$0xff] %vm455_vm0, %v6249_v55  ;;  %v6250_v48 = vadd.f32 %v6138_v42, %v5736_v11  ;;  %v8193_v28 = vpop.f32.mrb[209].mxu0 }
 0x699   : > { %v8298_v53 = vpop.f32.mrb[204].mxu1  ;;  %v6639_v20 = vld [vmem:[#allocation3 + $0x138] sm:$0xff]  ;;  %v14036_v9 = vadd.f32 %v8193_v28, %v8192_v30  ;;  %v8195_v23 = vpop.f32.mrb[210].mxu0  ;;  %6730 = vperm.xlu1 %8528, %v9396_v35   ;;  %v15420_v35 = vld [vmem:[#allocation73_spill] sm:$0xff] }
 0x69a   : > { %v8299_v34 = vpop.f32.mrb[205].mxu1  ;;  %9407 = vrcp.f32 %v6639_v20  ;;  %6282 = vst.msk [vmem:[#allocation4 + $0x128] sm:$0xff] %vm455_vm0, %v6250_v48  ;;  %v5363_v19 = vpop.xlane.xlu1 %5362  ;;  %v5546_v30 = vld [vmem:[#allocation4 + $0x138] sm:$0xff]  ;;  %v5737_v28 = vmul.f32 %v15420_v35, %v5545_v26 }
 0x69b   : > { %v8300_v36 = vadd.f32 %v8299_v34, %v8298_v53  ;;  %v8196_v40 = vpop.f32.mrb[211].mxu0  ;;  %v9398_v1 = vpop.eup %9397  ;;  %v5483_v17 = vadd.f32 %v5363_v19, %v5291_v56  ;;  %v5293_v53 = vmul.f32 %v15421_v54, %v5261_v45  ;;  %9409 = vrcp.f32 %v6640_v49  ;;  %v15422_v19 = vld [vmem:[#allocation145_spill] sm:$0xff]  ;;  %v15423_v26 = vld [vmem:[#allocation71_spill] sm:$0xff]  ;;  %v5268_v45 = vld [vmem:[#allocation3 + $0x190] sm:$0xff] }
 0x69c   : > { %v5388_v11 = vpop.xlane.xlu0 %5387  ;;  %v14040_v55 = vadd.f32 %v8196_v40, %v8195_v23  ;;  %v8301_v42 = vpop.f32.mrb[206].mxu1  ;;  %v5298_v14 = vmul.f32 %v15422_v19, %v5266_v60  ;;  %v5263_v40 = vld [vmem:[#allocation3 + $0x168] sm:$0xff] }
 0x69d   : > { %v9400_v16 = vpop.eup %9399  ;;  %v5488_v20 = vadd.f32 %v5388_v11, %v5296_v50  ;;  %v6143_v48 = vadd.f32 %v8300_v36, %v8188_v24  ;;  %v8302_v18 = vpop.f32.mrb[207].mxu1  ;;  %5515 = vst.msk [vmem:[#allocation3 + $0x148] sm:$0xff] %vm326_vm1, %v5483_v17  ;;  %6740 = vperm.xlu1 %8528, %v9398_v1   ;;  %v5738_v50 = vmul.f32 %v15423_v26, %v5546_v30  ;;  %v6642_v24 = vld [vmem:[#allocation3 + $0x150] sm:$0xff]  ;;  %v6644_v26 = vld [vmem:[#allocation3 + $0x160] sm:$0xff] }
 0x69e   : > { %v8303_v34 = vadd.f32 %v8302_v18, %v8301_v42  ;;  %6745 = vperm.xlu0 %8527, %v9400_v16   ;;  %v5373_v56 = vpop.xlane.xlu1 %5372  ;;  %v9402_v8 = vpop.eup %9401  ;;  %9411 = vrcp.f32 %v6642_v24  ;;  %v5548_v24 = vld [vmem:[#allocation4 + $0x148] sm:$0xff] }
 0x69f   : > { %5520 = vst.msk [vmem:[#allocation3 + $0x170] sm:$0xff] %vm326_vm1, %v5488_v20  ;;  %v6251_v23 = vadd.f32 %v6143_v48, %v5737_v28  ;;  %v5485_v36 = vadd.f32 %v5373_v56, %v5293_v53  ;;  %v8198_v42 = vpop.f32.mrb[212].mxu0  ;;  %v5547_v28 = vld [vmem:[#allocation4 + $0x140] sm:$0xff]  ;;  %v15425_v53 = vld [vmem:[#allocation147_spill] sm:$0xff] }
 0x6a0   : > { %v5398_v11 = vpop.xlane.xlu0 %5397  ;;  %v6146_v17 = vadd.f32 %v8303_v34, %v14028_v7  ;;  %v9404_v1 = vpop.eup %9403  ;;  %v15424_v20 = vld [vmem:[#allocation132_spill] sm:$0xff]  ;;  %v5300_v34 = vmul.f32 %v15425_v53, %v5268_v45  ;;  %v5265_v56 = vld [vmem:[#allocation3 + $0x178] sm:$0xff]  ;;  %v5267_v53 = vld [vmem:[#allocation3 + $0x188] sm:$0xff] }
 0x6a1   : > { %6283 = vst.msk [vmem:[#allocation4 + $0x130] sm:$0xff] %vm455_vm0, %v6251_v23  ;;  %v5490_v49 = vadd.f32 %v5398_v11, %v5298_v14  ;;  %v8199_v16 = vpop.f32.mrb[213].mxu0  ;;  %v8304_v35 = vpop.f32.mrb[208].mxu1  ;;  %v5295_v48 = vmul.f32 %v15424_v20, %v5263_v40  ;;  %6750 = vperm.xlu1 %8528, %v9402_v8   ;;  %v15427_v20 = vld [vmem:[#allocation39_spill] sm:$0xff] }
 0x6a2   : > { %5517 = vst.msk [vmem:[#allocation3 + $0x158] sm:$0xff] %vm326_vm1, %v5485_v36  ;;  %v6252_v60 = vadd.f32 %v6146_v17, %v5738_v50  ;;  %v14052_v30 = vadd.f32 %v8199_v16, %v8198_v42  ;;  %v8201_v18 = vpop.f32.mrb[214].mxu0  ;;  %v8305_v54 = vpop.f32.mrb[209].mxu1  ;;  %6755 = vperm.xlu0 %8527, %v9404_v1   ;;  %v5270_v36 = vld [vmem:[#allocation3 + $0x1a0] sm:$0xff] }
 0x6a3   : > { %5522 = vst.msk [vmem:[#allocation3 + $0x180] sm:$0xff] %vm326_vm1, %v5490_v49  ;;  %v5383_v7 = vpop.xlane.xlu1 %5382  ;;  %v8306_v23 = vadd.f32 %v8305_v54, %v8304_v35  ;;  %v8202_v19 = vpop.f32.mrb[215].mxu0  ;;  %v15426_v42 = vld [vmem:[#allocation92_spill] sm:$0xff] }
 0x6a4   : > { %v9406_v14 = vpop.eup %9405  ;;  %6284 = vst.msk [vmem:[#allocation4 + $0x138] sm:$0xff] %vm455_vm0, %v6252_v60  ;;  %v5487_v40 = vadd.f32 %v5383_v7, %v5295_v48  ;;  %v5408_v50 = vpop.xlane.xlu0 %5407  ;;  %v14057_v11 = vadd.f32 %v8202_v19, %v8201_v18  ;;  %v5739_v1 = vmul.f32 %v15426_v42, %v5547_v28  ;;  %v6641_v49 = vld [vmem:[#allocation3 + $0x148] sm:$0xff]  ;;  %v5297_v60 = vmul.f32 %v15427_v20, %v5265_v56  ;;  %v15428_v7 = vld [vmem:[#allocation138_spill] sm:$0xff] }
 0x6a5   : > { %v8307_v8 = vpop.f32.mrb[210].mxu1  ;;  %v9408_v17 = vpop.eup %9407  ;;  %v5492_v16 = vadd.f32 %v5408_v50, %v5300_v34  ;;  %v6151_v45 = vadd.f32 %v8306_v23, %v14036_v9  ;;  %9413 = vrcp.f32 %v6641_v49  ;;  %6760 = vperm.xlu1 %8528, %v9406_v14   ;;  %v5302_v28 = vmul.f32 %v15428_v7, %v5270_v36  ;;  %v15429_v34 = vld [vmem:[#allocation91_spill] sm:$0xff]  ;;  %v5272_v42 = vld [vmem:[#allocation3 + $0x1b0] sm:$0xff] }
 0x6a6   : > { %v8308_v35 = vpop.f32.mrb[211].mxu1  ;;  %5519 = vst.msk [vmem:[#allocation3 + $0x168] sm:$0xff] %vm326_vm1, %v5487_v40  ;;  %6765 = vperm.xlu0 %8527, %v9408_v17   ;;  %9415 = vrcp.f32 %v6644_v26  ;;  %v5740_v19 = vmul.f32 %v15429_v34, %v5548_v24  ;;  %v6646_v9 = vld [vmem:[#allocation3 + $0x170] sm:$0xff]  ;;  %v15430_v24 = vld [vmem:[#allocation152_spill] sm:$0xff] }
 0x6a7   : > { %v8309_v48 = vadd.f32 %v8308_v35, %v8307_v8  ;;  %5524 = vst.msk [vmem:[#allocation3 + $0x190] sm:$0xff] %vm326_vm1, %v5492_v16  ;;  %v5393_v18 = vpop.xlane.xlu1 %5392  ;;  %v6253_v54 = vadd.f32 %v6151_v45, %v5739_v1  ;;  %v8204_v56 = vpop.f32.mrb[216].mxu0  ;;  %v5549_v1 = vld [vmem:[#allocation4 + $0x150] sm:$0xff]  ;;  %v5299_v16 = vmul.f32 %v15430_v24, %v5267_v53  ;;  %v5274_v53 = vld [vmem:[#allocation3 + $0x1c0] sm:$0xff] }
 0x6a8   : > { %v5489_v23 = vadd.f32 %v5393_v18, %v5297_v60  ;;  %v5418_v50 = vpop.xlane.xlu0 %5417  ;;  %v9410_v8 = vpop.eup %9409  ;;  %v15431_v60 = vld [vmem:[#allocation149_spill] sm:$0xff]  ;;  %v5269_v18 = vld [vmem:[#allocation3 + $0x198] sm:$0xff] }
 0x6a9   : > { %v6154_v40 = vadd.f32 %v8309_v48, %v14040_v55  ;;  %v6643_v14 = vld [vmem:[#allocation3 + $0x158] sm:$0xff]  ;;  %6285 = vst.msk [vmem:[#allocation4 + $0x140] sm:$0xff] %vm455_vm0, %v6253_v54  ;;  %v5494_v26 = vadd.f32 %v5418_v50, %v5302_v28  ;;  %v8205_v17 = vpop.f32.mrb[217].mxu0  ;;  %v8310_v49 = vpop.f32.mrb[212].mxu1  ;;  %6770 = vperm.xlu1 %8528, %v9410_v8   ;;  %v5304_v48 = vmul.f32 %v15431_v60, %v5272_v42 }
 0x6aa   : > { %9417 = vrcp.f32 %v6643_v14  ;;  %5521 = vst.msk [vmem:[#allocation3 + $0x178] sm:$0xff] %vm326_vm1, %v5489_v23  ;;  %v14070_v45 = vadd.f32 %v8205_v17, %v8204_v56  ;;  %v8207_v35 = vpop.f32.mrb[218].mxu0  ;;  %v8311_v55 = vpop.f32.mrb[213].mxu1  ;;  %v6648_v28 = vld [vmem:[#allocation3 + $0x180] sm:$0xff]  ;;  %v5550_v56 = vld [vmem:[#allocation4 + $0x158] sm:$0xff] }
 0x6ab   : > { %v6254_v36 = vadd.f32 %v6154_v40, %v5740_v19  ;;  %9419 = vrcp.f32 %v6646_v9  ;;  %5526 = vst.msk [vmem:[#allocation3 + $0x1a0] sm:$0xff] %vm326_vm1, %v5494_v26  ;;  %v5403_v20 = vpop.xlane.xlu1 %5402  ;;  %v8312_v54 = vadd.f32 %v8311_v55, %v8310_v49  ;;  %v8208_v7 = vpop.f32.mrb[219].mxu0  ;;  %v15432_v9 = vld [vmem:[#allocation72_spill] sm:$0xff]  ;;  %v15434_v55 = vld [vmem:[#allocation142_spill] sm:$0xff] }
 0x6ac   : > { %v5491_v34 = vadd.f32 %v5403_v20, %v5299_v16  ;;  %v5428_v19 = vpop.xlane.xlu0 %5427  ;;  %v14075_v23 = vadd.f32 %v8208_v7, %v8207_v35  ;;  %v8313_v50 = vpop.f32.mrb[214].mxu1  ;;  %v5741_v8 = vmul.f32 %v15432_v9, %v5549_v1  ;;  %v15433_v49 = vld [vmem:[#allocation136_spill] sm:$0xff]  ;;  %v5306_v20 = vmul.f32 %v15434_v55, %v5274_v53  ;;  %v5271_v1 = vld [vmem:[#allocation3 + $0x1a8] sm:$0xff]  ;;  %v5276_v9 = vld [vmem:[#allocation3 + $0x1d0] sm:$0xff] }
 0x6ad   : > { %6286 = vst.msk [vmem:[#allocation4 + $0x148] sm:$0xff] %vm455_vm0, %v6254_v36  ;;  %v9412_v40 = vpop.eup %9411  ;;  %v6645_v14 = vld [vmem:[#allocation3 + $0x168] sm:$0xff]  ;;  %v5496_v26 = vadd.f32 %v5428_v19, %v5304_v48  ;;  %v6159_v42 = vadd.f32 %v8312_v54, %v14052_v30  ;;  %v8314_v17 = vpop.f32.mrb[215].mxu1  ;;  %v5301_v36 = vmul.f32 %v15433_v49, %v5269_v18  ;;  %v15435_v48 = vld [vmem:[#allocation151_spill] sm:$0xff]  ;;  %v5551_v53 = vld [vmem:[#allocation4 + $0x160] sm:$0xff] }
 0x6ae   : > { %9421 = vrcp.f32 %v6645_v14  ;;  %5523 = vst.msk [vmem:[#allocation3 + $0x188] sm:$0xff] %vm326_vm1, %v5491_v34  ;;  %v8315_v24 = vadd.f32 %v8314_v17, %v8313_v50  ;;  %6780 = vperm.xlu1 %8528, %v9412_v40   ;;  %v5742_v7 = vmul.f32 %v15435_v48, %v5550_v56  ;;  %v6650_v30 = vld [vmem:[#allocation3 + $0x190] sm:$0xff] }
 0x6af   : > { %9423 = vrcp.f32 %v6648_v28  ;;  %5528 = vst.msk [vmem:[#allocation3 + $0x1b0] sm:$0xff] %vm326_vm1, %v5496_v26  ;;  %v5413_v16 = vpop.xlane.xlu1 %5412  ;;  %v6255_v35 = vadd.f32 %v6159_v42, %v5741_v8  ;;  %v9414_v60 = vpop.eup %9413  ;;  %v15436_v26 = vld [vmem:[#allocation47_spill] sm:$0xff] }
 0x6b0   : > { %v5493_v54 = vadd.f32 %v5413_v16, %v5301_v36  ;;  %v5438_v19 = vpop.xlane.xlu0 %5437  ;;  %v6162_v34 = vadd.f32 %v8315_v24, %v14057_v11  ;;  %v8210_v18 = vpop.f32.mrb[220].mxu0  ;;  %6775 = vperm.xlu0 %8527, %v9414_v60   ;;  %v5303_v42 = vmul.f32 %v15436_v26, %v5271_v1  ;;  %v15437_v24 = vld [vmem:[#allocation48_spill] sm:$0xff] }
 0x6b1   : > { %v9416_v50 = vpop.eup %9415  ;;  %v6647_v40 = vld [vmem:[#allocation3 + $0x178] sm:$0xff]  ;;  %6287 = vst.msk [vmem:[#allocation4 + $0x150] sm:$0xff] %vm455_vm0, %v6255_v35  ;;  %v5498_v28 = vadd.f32 %v5438_v19, %v5306_v20  ;;  %v8211_v8 = vpop.f32.mrb[221].mxu0  ;;  %v5308_v16 = vmul.f32 %v15437_v24, %v5276_v9  ;;  %v5275_v24 = vld [vmem:[#allocation3 + $0x1c8] sm:$0xff] }
 0x6b2   : > { %v8316_v14 = vpop.f32.mrb[216].mxu1  ;;  %9425 = vrcp.f32 %v6647_v40  ;;  %5525 = vst.msk [vmem:[#allocation3 + $0x198] sm:$0xff] %vm326_vm1, %v5493_v54  ;;  %v6256_v56 = vadd.f32 %v6162_v34, %v5742_v7  ;;  %v14088_v17 = vadd.f32 %v8211_v8, %v8210_v18  ;;  %v8213_v11 = vpop.f32.mrb[222].mxu0  ;;  %6790 = vperm.xlu1 %8528, %v9416_v50   ;;  %v5273_v35 = vld [vmem:[#allocation3 + $0x1b8] sm:$0xff]  ;;  %v6652_v48 = vld [vmem:[#allocation3 + $0x1a0] sm:$0xff]  ;;  %v15438_v50 = vld [vmem:[#allocation101_spill] sm:$0xff] }
 0x6b3   : > { %v8317_v49 = vpop.f32.mrb[217].mxu1  ;;  %9427 = vrcp.f32 %v6650_v30  ;;  %5530 = vst.msk [vmem:[#allocation3 + $0x1c0] sm:$0xff] %vm326_vm1, %v5498_v28  ;;  %v5423_v36 = vpop.xlane.xlu1 %5422  ;;  %v5278_v54 = vld [vmem:[#allocation3 + $0x1e0] sm:$0xff]  ;;  %v5552_v30 = vld [vmem:[#allocation4 + $0x168] sm:$0xff]  ;;  %v5743_v40 = vmul.f32 %v15438_v50, %v5551_v53  ;;  %v5280_v50 = vld [vmem:[#allocation3 + $0x1f0] sm:$0xff] }
 0x6b4   : > { %v8318_v55 = vadd.f32 %v8317_v49, %v8316_v14  ;;  %v8214_v20 = vpop.f32.mrb[223].mxu0  ;;  %v9418_v60 = vpop.eup %9417  ;;  %6288 = vst.msk [vmem:[#allocation4 + $0x158] sm:$0xff] %vm455_vm0, %v6256_v56  ;;  %v5495_v7 = vadd.f32 %v5423_v36, %v5303_v42  ;;  %v15439_v56 = vld [vmem:[#allocation36_spill] sm:$0xff] }
 0x6b5   : > { %v5448_v1 = vpop.xlane.xlu0 %5447  ;;  %v14093_v19 = vadd.f32 %v8214_v20, %v8213_v11  ;;  %v8319_v34 = vpop.f32.mrb[218].mxu1  ;;  %v6649_v28 = vld [vmem:[#allocation3 + $0x188] sm:$0xff]  ;;  %6785 = vperm.xlu0 %8527, %v9418_v60   ;;  %v5305_v26 = vmul.f32 %v15439_v56, %v5273_v35  ;;  %v15440_v36 = vld [vmem:[#allocation148_spill] sm:$0xff] }
 0x6b6   : > { %v9420_v18 = vpop.eup %9419  ;;  %v5500_v8 = vadd.f32 %v5448_v1, %v5308_v16  ;;  %v6167_v9 = vadd.f32 %v8318_v55, %v14070_v45  ;;  %v8320_v14 = vpop.f32.mrb[219].mxu1  ;;  %9429 = vrcp.f32 %v6649_v28  ;;  %5527 = vst.msk [vmem:[#allocation3 + $0x1a8] sm:$0xff] %vm326_vm1, %v5495_v7  ;;  %v5310_v53 = vmul.f32 %v15440_v36, %v5278_v54  ;;  %v15441_v20 = vld [vmem:[#allocation100_spill] sm:$0xff]  ;;  %v6654_v45 = vld [vmem:[#allocation3 + $0x1b0] sm:$0xff] }
 0x6b7   : > { %v8321_v42 = vadd.f32 %v8320_v14, %v8319_v34  ;;  %6800 = vperm.xlu1 %8528, %v9420_v18   ;;  %9431 = vrcp.f32 %v6652_v48  ;;  %v5433_v11 = vpop.xlane.xlu1 %5432  ;;  %v5744_v60 = vmul.f32 %v15441_v20, %v5552_v30  ;;  %v8216_v35 = vpop.f32.mrb[224].mxu0  ;;  %v5553_v54 = vld [vmem:[#allocation4 + $0x170] sm:$0xff] }
 0x6b8   : > { %5532 = vst.msk [vmem:[#allocation3 + $0x1d0] sm:$0xff] %vm326_vm1, %v5500_v8  ;;  %v6257_v49 = vadd.f32 %v6167_v9, %v5743_v40  ;;  %v9422_v16 = vpop.eup %9421  ;;  %v5497_v55 = vadd.f32 %v5433_v11, %v5305_v26  ;;  %v8217_v40 = vpop.f32.mrb[225].mxu0  ;;  %v15442_v8 = vld [vmem:[#allocation67_spill] sm:$0xff] }
 0x6b9   : > { %v5458_v1 = vpop.xlane.xlu0 %5457  ;;  %v6170_v7 = vadd.f32 %v8321_v42, %v14075_v23  ;;  %v9424_v34 = vpop.eup %9423  ;;  %v6651_v18 = vld [vmem:[#allocation3 + $0x198] sm:$0xff]  ;;  %6795 = vperm.xlu0 %8527, %v9422_v16   ;;  %v5307_v9 = vmul.f32 %v15442_v8, %v5275_v24  ;;  %v14106_v14 = vadd.f32 %v8217_v40, %v8216_v35  ;;  %v15443_v42 = vld [vmem:[#allocation162_spill] sm:$0xff] }
 0x6ba   : > { %6289 = vst.msk [vmem:[#allocation4 + $0x160] sm:$0xff] %vm455_vm0, %v6257_v49  ;;  %v5502_v48 = vadd.f32 %v5458_v1, %v5310_v53  ;;  %v8322_v28 = vpop.f32.mrb[220].mxu1  ;;  %9433 = vrcp.f32 %v6651_v18  ;;  %v8219_v23 = vpop.f32.mrb[226].mxu0  ;;  %v5312_v11 = vmul.f32 %v15443_v42, %v5280_v50  ;;  %v5277_v49 = vld [vmem:[#allocation3 + $0x1d8] sm:$0xff]  ;;  %v6656_v20 = vld [vmem:[#allocation3 + $0x1c0] sm:$0xff] }
 0x6bb   : > { %5529 = vst.msk [vmem:[#allocation3 + $0x1b8] sm:$0xff] %vm326_vm1, %v5497_v55  ;;  %v6258_v30 = vadd.f32 %v6170_v7, %v5744_v60  ;;  %v8323_v56 = vpop.f32.mrb[221].mxu1  ;;  %6810 = vperm.xlu1 %8528, %v9424_v34   ;;  %9435 = vrcp.f32 %v6654_v45  ;;  %v5443_v26 = vpop.xlane.xlu1 %5442  ;;  %v5554_v35 = vld [vmem:[#allocation4 + $0x178] sm:$0xff]  ;;  %v15444_v45 = vld [vmem:[#allocation37_spill] sm:$0xff] }
 0x6bc   : > { %5534 = vst.msk [vmem:[#allocation3 + $0x1e0] sm:$0xff] %vm326_vm1, %v5502_v48  ;;  %v8324_v36 = vadd.f32 %v8323_v56, %v8322_v28  ;;  %v8220_v53 = vpop.f32.mrb[227].mxu0  ;;  %v9426_v16 = vpop.eup %9425  ;;  %v5499_v60 = vadd.f32 %v5443_v26, %v5307_v9  ;;  %v5745_v34 = vmul.f32 %v15444_v45, %v5553_v54  ;;  %v15445_v28 = vld [vmem:[#allocation57_spill] sm:$0xff]  ;;  %v15446_v26 = vld [vmem:[#allocation80_spill] sm:$0xff] }
 0x6bd   : > { %6290 = vst.msk [vmem:[#allocation4 + $0x168] sm:$0xff] %vm455_vm0, %v6258_v30  ;;  %v5468_v24 = vpop.xlane.xlu0 %5467  ;;  %v14111_v55 = vadd.f32 %v8220_v53, %v8219_v23  ;;  %v8325_v1 = vpop.f32.mrb[222].mxu1  ;;  %v6653_v18 = vld [vmem:[#allocation3 + $0x1a8] sm:$0xff]  ;;  %6805 = vperm.xlu0 %8527, %v9426_v16   ;;  %v5309_v30 = vmul.f32 %v15445_v28, %v5277_v49  ;;  %v5746_v42 = vmul.f32 %v15446_v26, %v5554_v35 }
 0x6be   : > { %v9428_v7 = vpop.eup %9427  ;;  %v5504_v48 = vadd.f32 %v5468_v24, %v5312_v11  ;;  %v6175_v50 = vadd.f32 %v8324_v36, %v14088_v17  ;;  %v8326_v40 = vpop.f32.mrb[223].mxu1  ;;  %9437 = vrcp.f32 %v6653_v18  ;;  %5531 = vst.msk [vmem:[#allocation3 + $0x1c8] sm:$0xff] %vm326_vm1, %v5499_v60  ;;  %v5279_v56 = vld [vmem:[#allocation3 + $0x1e8] sm:$0xff]  ;;  %v5555_v24 = vld [vmem:[#allocation4 + $0x180] sm:$0xff] }
 0x6bf   : > { %v8327_v8 = vadd.f32 %v8326_v40, %v8325_v1  ;;  %6820 = vperm.xlu1 %8528, %v9428_v7   ;;  %9439 = vrcp.f32 %v6656_v20  ;;  %v5453_v9 = vpop.xlane.xlu1 %5452  ;;  %v6658_v11 = vld [vmem:[#allocation3 + $0x1d0] sm:$0xff]  ;;  %v8222_v36 = vpop.f32.mrb[228].mxu0  ;;  %v15447_v7 = vld [vmem:[#allocation64_spill] sm:$0xff]  ;;  %v5556_v26 = vld [vmem:[#allocation4 + $0x188] sm:$0xff] }
 0x6c0   : > { %5536 = vst.msk [vmem:[#allocation3 + $0x1f0] sm:$0xff] %vm326_vm1, %v5504_v48  ;;  %v6259_v23 = vadd.f32 %v6175_v50, %v5745_v34  ;;  %v9430_v54 = vpop.eup %9429  ;;  %v5501_v53 = vadd.f32 %v5453_v9, %v5309_v30  ;;  %v8223_v49 = vpop.f32.mrb[229].mxu0  ;;  %v5311_v45 = vmul.f32 %v15447_v7, %v5279_v56  ;;  %v5281_v48 = vld [vmem:[#allocation3 + $0x1f8] sm:$0xff]  ;;  %v15448_v56 = vld [vmem:[#allocation146_spill] sm:$0xff] }
 0x6c1   : > { %v6178_v17 = vadd.f32 %v8327_v8, %v14093_v19  ;;  %v9432_v16 = vpop.eup %9431  ;;  %6815 = vperm.xlu0 %8527, %v9430_v54   ;;  %v8328_v20 = vpop.f32.mrb[224].mxu1  ;;  %v14123_v35 = vadd.f32 %v8223_v49, %v8222_v36  ;;  %v15449_v36 = vld [vmem:[#allocation60_spill] sm:$0xff]  ;;  %v15450_v7 = vld [vmem:[#allocation103_spill] sm:$0xff] }
 0x6c2   : > { %v6655_v60 = vld [vmem:[#allocation3 + $0x1b8] sm:$0xff]  ;;  %6291 = vst.msk [vmem:[#allocation4 + $0x170] sm:$0xff] %vm455_vm0, %v6259_v23  ;;  %v8225_v34 = vpop.f32.mrb[230].mxu0  ;;  %v8329_v18 = vpop.f32.mrb[225].mxu1 }
 0x6c3   : > { %9441 = vrcp.f32 %v6655_v60  ;;  %5533 = vst.msk [vmem:[#allocation3 + $0x1d8] sm:$0xff] %vm326_vm1, %v5501_v53  ;;  %v6260_v1 = vadd.f32 %v6178_v17, %v5746_v42  ;;  %6830 = vperm.xlu1 %8528, %v9432_v16   ;;  %v5463_v19 = vpop.xlane.xlu1 %5462  ;;  %v8330_v50 = vadd.f32 %v8329_v18, %v8328_v20  ;;  %v8226_v40 = vpop.f32.mrb[231].mxu0  ;;  %v6660_v30 = vld [vmem:[#allocation3 + $0x1e0] sm:$0xff]  ;;  %v5747_v42 = vmul.f32 %v15448_v56, %v5555_v24 }
 0x6c4   : > { %9443 = vrcp.f32 %v6658_v11  ;;  %v9434_v28 = vpop.eup %9433  ;;  %v5503_v8 = vadd.f32 %v5463_v19, %v5311_v45  ;;  %v8227_v9 = vadd.f32 %v8226_v40, %v8225_v34  ;;  %v8331_v23 = vpop.f32.mrb[226].mxu1  ;;  %v5313_v16 = vmul.f32 %v15449_v36, %v5281_v48 }
 0x6c5   : > { %6292 = vst.msk [vmem:[#allocation4 + $0x178] sm:$0xff] %vm455_vm0, %v6260_v1  ;;  %v9436_v54 = vpop.eup %9435  ;;  %v6657_v53 = vld [vmem:[#allocation3 + $0x1c8] sm:$0xff]  ;;  %6825 = vperm.xlu0 %8527, %v9434_v28   ;;  %v6183_v17 = vadd.f32 %v8330_v50, %v14106_v14  ;;  %v8332_v11 = vpop.f32.mrb[227].mxu1  ;;  %v5748_v45 = vmul.f32 %v15450_v7, %v5556_v26  ;;  %v5557_v28 = vld [vmem:[#allocation4 + $0x190] sm:$0xff] }
 0x6c6   : > { %9445 = vrcp.f32 %v6657_v53  ;;  %5535 = vst.msk [vmem:[#allocation3 + $0x1e8] sm:$0xff] %vm326_vm1, %v5503_v8  ;;  %v8333_v60 = vadd.f32 %v8332_v11, %v8331_v23  ;;  %v5558_v53 = vld [vmem:[#allocation4 + $0x198] sm:$0xff]  ;;  %v15452_v7 = vld [vmem:[#allocation98_spill] sm:$0xff] }
 0x6c7   : > { %6840 = vperm.xlu1 %8528, %v9436_v54   ;;  %9447 = vrcp.f32 %v6660_v30  ;;  %v5473_v49 = vpop.xlane.xlu1 %5472  ;;  %v6261_v20 = vadd.f32 %v6183_v17, %v5747_v42  ;;  %v6662_v34 = vld [vmem:[#allocation3 + $0x1f0] sm:$0xff]  ;;  %v8228_v19 = vpop.f32.mrb[232].mxu0 }
 0x6c8   : > { %v9438_v1 = vpop.eup %9437  ;;  %v5505_v24 = vadd.f32 %v5473_v49, %v5313_v16  ;;  %v6186_v18 = vadd.f32 %v8333_v60, %v14111_v55  ;;  %v8229_v40 = vpop.f32.mrb[233].mxu0  ;;  %v15451_v16 = vld [vmem:[#allocation112_spill] sm:$0xff] }
 0x6c9   : > { %v9440_v14 = vpop.eup %9439  ;;  %6293 = vst.msk [vmem:[#allocation4 + $0x180] sm:$0xff] %vm455_vm0, %v6261_v20  ;;  %6835 = vperm.xlu0 %8527, %v9438_v1   ;;  %v8334_v48 = vpop.f32.mrb[228].mxu1  ;;  %v8230_v8 = vadd.f32 %v8229_v40, %v8228_v19  ;;  %v5749_v60 = vmul.f32 %v15451_v16, %v5557_v28  ;;  %v15453_v16 = vld [vmem:[#allocation102_spill] sm:$0xff] }
 0x6ca   : > { %v6659_v50 = vld [vmem:[#allocation3 + $0x1d8] sm:$0xff]  ;;  %5537 = vst.msk [vmem:[#allocation3 + $0x1f8] sm:$0xff] %vm326_vm1, %v5505_v24  ;;  %v6262_v30 = vadd.f32 %v6186_v18, %v5748_v45  ;;  %v8231_v23 = vpop.f32.mrb[234].mxu0  ;;  %v8335_v54 = vpop.f32.mrb[229].mxu1  ;;  %v5750_v45 = vmul.f32 %v15452_v7, %v5558_v53 }
 0x6cb   : > { %9449 = vrcp.f32 %v6659_v50  ;;  %6850 = vperm.xlu1 %8528, %v9440_v14   ;;  %v8336_v26 = vadd.f32 %v8335_v54, %v8334_v48  ;;  %v8232_v55 = vpop.f32.mrb[235].mxu0  ;;  %v8337_v56 = vpop.f32.mrb[230].mxu1 }
 0x6cc   : > { %9451 = vrcp.f32 %v6662_v34  ;;  %6294 = vst.msk [vmem:[#allocation4 + $0x188] sm:$0xff] %vm455_vm0, %v6262_v30  ;;  %v8233_v17 = vadd.f32 %v8232_v55, %v8231_v23  ;;  %v8338_v11 = vpop.f32.mrb[231].mxu1  ;;  %v5559_v30 = vld [vmem:[#allocation4 + $0x1a0] sm:$0xff] }
 0x6cd   : > { %v9442_v42 = vpop.eup %9441  ;;  %v6661_v49 = vld [vmem:[#allocation3 + $0x1e8] sm:$0xff]  ;;  %v6191_v20 = vadd.f32 %v8336_v26, %v14123_v35  ;;  %v8339_v1 = vadd.f32 %v8338_v11, %v8337_v56 }
 0x6ce   : > { %v9444_v36 = vpop.eup %9443  ;;  %6845 = vperm.xlu0 %8527, %v9442_v42   ;;  %9453 = vrcp.f32 %v6661_v49  ;;  %v5560_v42 = vld [vmem:[#allocation4 + $0x1a8] sm:$0xff] }
 0x6cf   : > { %6860 = vperm.xlu1 %8528, %v9444_v36   ;;  %v6263_v34 = vadd.f32 %v6191_v20, %v5749_v60  ;;  %v6194_v24 = vadd.f32 %v8339_v1, %v8227_v9  ;;  %v8234_v19 = vpop.f32.mrb[236].mxu0  ;;  %v5751_v60 = vmul.f32 %v15453_v16, %v5559_v30  ;;  %v15454_v1 = vld [vmem:[#allocation117_spill] sm:$0xff]  ;;  %v15456_v16 = vld [vmem:[#allocation108_spill] sm:$0xff] }
 0x6d0   : > { %v9446_v18 = vpop.eup %9445  ;;  %v8235_v48 = vpop.f32.mrb[237].mxu0  ;;  %v5752_v7 = vmul.f32 %v15454_v1, %v5560_v42 }
 0x6d1   : > { %v9448_v14 = vpop.eup %9447  ;;  %v6663_v50 = vld [vmem:[#allocation3 + $0x1f8] sm:$0xff]  ;;  %6295 = vst.msk [vmem:[#allocation4 + $0x190] sm:$0xff] %vm455_vm0, %v6263_v34  ;;  %v6264_v40 = vadd.f32 %v6194_v24, %v5750_v45  ;;  %v8340_v28 = vpop.f32.mrb[232].mxu1  ;;  %v8236_v35 = vadd.f32 %v8235_v48, %v8234_v19 }
 0x6d2   : > { %6855 = vperm.xlu0 %8527, %v9446_v18   ;;  %9455 = vrcp.f32 %v6663_v50  ;;  %v8237_v23 = vpop.f32.mrb[238].mxu0  ;;  %v8341_v54 = vpop.f32.mrb[233].mxu1 }
 0x6d3   : > { %6870 = vperm.xlu1 %8528, %v9448_v14   ;;  %6296 = vst.msk [vmem:[#allocation4 + $0x198] sm:$0xff] %vm455_vm0, %v6264_v40  ;;  %v8342_v26 = vadd.f32 %v8341_v54, %v8340_v28  ;;  %v8238_v9 = vpop.f32.mrb[239].mxu0  ;;  %v8343_v55 = vpop.f32.mrb[234].mxu1  ;;  %v5561_v40 = vld [vmem:[#allocation4 + $0x1b0] sm:$0xff] }
 0x6d4   : > { %v8239_v53 = vadd.f32 %v8238_v9, %v8237_v23  ;;  %v8344_v11 = vpop.f32.mrb[235].mxu1  ;;  %v5562_v9 = vld [vmem:[#allocation4 + $0x1b8] sm:$0xff] }
 0x6d5   : > { %v9450_v56 = vpop.eup %9449  ;;  %v6199_v49 = vadd.f32 %v8342_v26, %v8230_v8  ;;  %v8345_v20 = vadd.f32 %v8344_v11, %v8343_v55 }
 0x6d6   : > { %v9452_v36 = vpop.eup %9451  ;;  %6865 = vperm.xlu0 %8527, %v9450_v56   ;;  %v15455_v56 = vld [vmem:[#allocation114_spill] sm:$0xff] }
 0x6d7   : > { %6880 = vperm.xlu1 %8528, %v9452_v36   ;;  %v6265_v45 = vadd.f32 %v6199_v49, %v5751_v60  ;;  %v6202_v34 = vadd.f32 %v8345_v20, %v8233_v17  ;;  %v8240_v18 = vpop.f32.mrb[240].mxu0  ;;  %v5753_v42 = vmul.f32 %v15455_v56, %v5561_v40  ;;  %v5754_v60 = vmul.f32 %v15456_v16, %v5562_v9  ;;  %v5565_v16 = vld [vmem:[#allocation4 + $0x1d0] sm:$0xff] }
 0x6d8   : > { %v9454_v24 = vpop.eup %9453  ;;  %v8241_v14 = vpop.f32.mrb[241].mxu0 }
 0x6d9   : > { %6297 = vst.msk [vmem:[#allocation4 + $0x1a0] sm:$0xff] %vm455_vm0, %v6265_v45  ;;  %v6266_v19 = vadd.f32 %v6202_v34, %v5752_v7  ;;  %v8346_v50 = vpop.f32.mrb[236].mxu1  ;;  %v8242_v48 = vadd.f32 %v8241_v14, %v8240_v18  ;;  %v8243_v28 = vpop.f32.mrb[242].mxu0 }
 0x6da   : > { %6875 = vperm.xlu0 %8527, %v9454_v24   ;;  %v8347_v30 = vpop.f32.mrb[237].mxu1  ;;  %v8244_v23 = vpop.f32.mrb[243].mxu0  ;;  %v5563_v24 = vld [vmem:[#allocation4 + $0x1c0] sm:$0xff] }
 0x6db   : > { %6298 = vst.msk [vmem:[#allocation4 + $0x1a8] sm:$0xff] %vm455_vm0, %v6266_v19  ;;  %v8348_v8 = vadd.f32 %v8347_v30, %v8346_v50  ;;  %v8349_v54 = vpop.f32.mrb[238].mxu1  ;;  %v8245_v17 = vadd.f32 %v8244_v23, %v8243_v28  ;;  %v5564_v28 = vld [vmem:[#allocation4 + $0x1c8] sm:$0xff] }
 0x6dc   : > { %v9456_v26 = vpop.eup %9455  ;;  %v8350_v55 = vpop.f32.mrb[239].mxu1 }
 0x6dd   : > { %v6207_v11 = vadd.f32 %v8348_v8, %v8236_v35  ;;  %v8351_v36 = vadd.f32 %v8350_v55, %v8349_v54 }
 0x6de   : > { %6885 = vperm.xlu0 %8527, %v9456_v26   ;;  %v5756_v26 = vmul.f32 %v13743_v39, %v5564_v28 }
 0x6df   : > { %v6267_v49 = vadd.f32 %v6207_v11, %v5753_v42  ;;  %v6210_v20 = vadd.f32 %v8351_v36, %v8239_v53  ;;  %v8246_v7 = vpop.f32.mrb[244].mxu0  ;;  %v5755_v53 = vmul.f32 %v13749_v12, %v5563_v24 }
 0x6e0   : > { %v8247_v45 = vpop.f32.mrb[245].mxu0  ;;  %v8352_v34 = vpop.f32.mrb[240].mxu1 }
 0x6e1   : > { %6299 = vst.msk [vmem:[#allocation4 + $0x1b0] sm:$0xff] %vm455_vm0, %v6267_v49  ;;  %v6268_v1 = vadd.f32 %v6210_v20, %v5754_v60  ;;  %v8248_v18 = vadd.f32 %v8247_v45, %v8246_v7  ;;  %v8249_v19 = vpop.f32.mrb[246].mxu0  ;;  %v8353_v14 = vpop.f32.mrb[241].mxu1  ;;  %v5566_v7 = vld [vmem:[#allocation4 + $0x1d8] sm:$0xff] }
 0x6e2   : > { %v8354_v50 = vadd.f32 %v8353_v14, %v8352_v34  ;;  %v8250_v40 = vpop.f32.mrb[247].mxu0  ;;  %v8355_v35 = vpop.f32.mrb[242].mxu1 }
 0x6e3   : > { %6300 = vst.msk [vmem:[#allocation4 + $0x1b8] sm:$0xff] %vm455_vm0, %v6268_v1  ;;  %v8251_v30 = vadd.f32 %v8250_v40, %v8249_v19  ;;  %v8356_v8 = vpop.f32.mrb[243].mxu1  ;;  %v5758_v19 = vmul.f32 %v13827_v22, %v5566_v7 }
 0x6e4   : > { %v6215_v23 = vadd.f32 %v8354_v50, %v8242_v48  ;;  %v8357_v54 = vadd.f32 %v8356_v8, %v8355_v35 }
 0x6e6   : > { %v6269_v9 = vadd.f32 %v6215_v23, %v5755_v53  ;;  %v6218_v55 = vadd.f32 %v8357_v54, %v8245_v17  ;;  %v5757_v17 = vmul.f32 %v13855_v37, %v5565_v16  ;;  %v5567_v53 = vld [vmem:[#allocation4 + $0x1e0] sm:$0xff] }
 0x6e7   : > { %v8252_v56 = vpop.f32.mrb[248].mxu0 }
 0x6e8   : > { %6301 = vst.msk [vmem:[#allocation4 + $0x1c0] sm:$0xff] %vm455_vm0, %v6269_v9  ;;  %v6270_v42 = vadd.f32 %v6218_v55, %v5756_v26  ;;  %v8253_v11 = vpop.f32.mrb[249].mxu0  ;;  %v8358_v36 = vpop.f32.mrb[244].mxu1  ;;  %v5568_v55 = vld [vmem:[#allocation4 + $0x1e8] sm:$0xff] }
 0x6e9   : > { %v8254_v60 = vadd.f32 %v8253_v11, %v8252_v56  ;;  %v8255_v49 = vpop.f32.mrb[250].mxu0  ;;  %v8359_v20 = vpop.f32.mrb[245].mxu1 }
 0x6ea   : > { %6302 = vst.msk [vmem:[#allocation4 + $0x1c8] sm:$0xff] %vm455_vm0, %v6270_v42  ;;  %v8360_v1 = vadd.f32 %v8359_v20, %v8358_v36  ;;  %v8256_v12 = vpop.f32.mrb[251].mxu0  ;;  %v8361_v48 = vpop.f32.mrb[246].mxu1  ;;  %v5760_v36 = vmul.f32 %v13984_v10, %v5568_v55 }
 0x6eb   : > { %v8257_v45 = vadd.f32 %v8256_v12, %v8255_v49  ;;  %v8362_v39 = vpop.f32.mrb[247].mxu1  ;;  %v5569_v12 = vld [vmem:[#allocation4 + $0x1f0] sm:$0xff] }
 0x6ec   : > { %v6223_v34 = vadd.f32 %v8360_v1, %v8248_v18  ;;  %v8363_v24 = vadd.f32 %v8362_v39, %v8361_v48 }
 0x6ee   : > { %v6271_v14 = vadd.f32 %v6223_v34, %v5757_v17  ;;  %v6226_v50 = vadd.f32 %v8363_v24, %v8251_v30  ;;  %v5759_v30 = vmul.f32 %v13991_v21, %v5567_v53  ;;  %v5570_v17 = vld [vmem:[#allocation4 + $0x1f8] sm:$0xff]  ;;  %v5761_v21 = vmul.f32 %v13995_v44, %v5569_v12 }
 0x6ef   : > { %v8258_v40 = vpop.f32.mrb[252].mxu0  ;;  %v5762_v10 = vmul.f32 %v13988_v59, %v5570_v17 }
 0x6f0   : > { %6303 = vst.msk [vmem:[#allocation4 + $0x1d0] sm:$0xff] %vm455_vm0, %v6271_v14  ;;  %v6272_v35 = vadd.f32 %v6226_v50, %v5758_v19  ;;  %v8259_v28 = vpop.f32.mrb[253].mxu0  ;;  %v8364_v8 = vpop.f32.mrb[248].mxu1 }
 0x6f1   : > { %v8260_v23 = vadd.f32 %v8259_v28, %v8258_v40  ;;  %v8261_v54 = vpop.f32.mrb[254].mxu0  ;;  %v8365_v26 = vpop.f32.mrb[249].mxu1  ;;  %v6696_v28 = vld [vmem:[#allocation4 + $0x100] sm:$0xff] }
 0x6f2   : > { %6304 = vst.msk [vmem:[#allocation4 + $0x1d8] sm:$0xff] %vm455_vm0, %v6272_v35  ;;  %v8366_v9 = vadd.f32 %v8365_v26, %v8364_v8  ;;  %v8262_v37 = vpop.f32.mrb[255].mxu0  ;;  %v8367_v18 = vpop.f32.mrb[250].mxu1  ;;  %v6697_v35 = vld [vmem:[#allocation4 + $0x108] sm:$0xff] }
 0x6f3   : > { %v8263_v56 = vadd.f32 %v8262_v37, %v8261_v54  ;;  %v8368_v22 = vpop.f32.mrb[251].mxu1  ;;  %v14164_v50 = vpop.permute.xlu0 %6597 }
 0x6f4   : > { %v6231_v42 = vadd.f32 %v8366_v9, %v8254_v60  ;;  %v8369_v11 = vadd.f32 %v8368_v22, %v8367_v18  ;;  %v6698_v9 = vld [vmem:[#allocation4 + $0x110] sm:$0xff] }
 0x6f6   : > { %v6273_v16 = vadd.f32 %v6231_v42, %v5759_v30  ;;  %v6234_v49 = vadd.f32 %v8369_v11, %v8257_v45  ;;  %v6700_v30 = vld [vmem:[#allocation4 + $0x120] sm:$0xff] }
 0x6f8   : > { %6305 = vst.msk [vmem:[#allocation4 + $0x1e0] sm:$0xff] %vm455_vm0, %v6273_v16  ;;  %v6274_v20 = vadd.f32 %v6234_v49, %v5760_v36  ;;  %v8370_v1 = vpop.f32.mrb[252].mxu1  ;;  %v6703_v49 = vld [vmem:[#allocation4 + $0x138] sm:$0xff] }
 0x6f9   : > { %v8371_v48 = vpop.f32.mrb[253].mxu1 }
 0x6fa   : > { %6306 = vst.msk [vmem:[#allocation4 + $0x1e8] sm:$0xff] %vm455_vm0, %v6274_v20  ;;  %v8372_v7 = vadd.f32 %v8371_v48, %v8370_v1  ;;  %v8373_v39 = vpop.f32.mrb[254].mxu1  ;;  %v6702_v1 = vld [vmem:[#allocation4 + $0x130] sm:$0xff] }
 0x6fb   : > { %v8374_v34 = vpop.f32.mrb[255].mxu1 }
 0x6fc   : > { %v6239_v60 = vadd.f32 %v8372_v7, %v8260_v23  ;;  %v8375_v24 = vadd.f32 %v8374_v34, %v8373_v39  ;;  %v6699_v23 = vld [vmem:[#allocation4 + $0x118] sm:$0xff] }
 0x6fe   : > { %v6275_v19 = vadd.f32 %v6239_v60, %v5761_v21  ;;  %v6242_v45 = vadd.f32 %v8375_v24, %v8263_v56  ;;  %v6701_v56 = vld [vmem:[#allocation4 + $0x128] sm:$0xff]  ;;  %v6704_v21 = vld [vmem:[#allocation4 + $0x140] sm:$0xff] }
 0x6ff   : > { %v6705_v24 = vld [vmem:[#allocation4 + $0x148] sm:$0xff] }
 0x700   : > { %6307 = vst.msk [vmem:[#allocation4 + $0x1f0] sm:$0xff] %vm455_vm0, %v6275_v19  ;;  %v6276_v14 = vadd.f32 %v6242_v45, %v5762_v10 }
 0x702   : > { %6308 = vst.msk [vmem:[#allocation4 + $0x1f8] sm:$0xff] %vm455_vm0, %v6276_v14  ;;  %v6706_v14 = vld [vmem:[#allocation4 + $0x150] sm:$0xff] }
 0x70e   : > { %v6736_v40 = vpop.permute.xlu0 %6735 }
 0x70f   : > { %v6889_v53 = vmul.f32 %v6736_v40, %v6697_v35 }
 0x718   : > { %v6731_v8 = vpop.permute.xlu1 %6730 }
 0x719   : > { %v6888_v54 = vmul.f32 %v6731_v8, %v6696_v28  ;;  %v6707_v28 = vld [vmem:[#allocation4 + $0x158] sm:$0xff] }
 0x71b   : > { %v8529_v44 = vpack.i.bf16 %v6889_v53, %v6888_v54 }
 0x71c   : > { %v6741_v59 = vpop.permute.xlu1 %6740 }
 0x71d   : > { %v6746_v26 = vpop.permute.xlu0 %6745  ;;  %v6890_v18 = vmul.f32 %v6741_v59, %v6698_v9  ;;  %8530 = vrot.lane.b32.xlu1 %v8529_v44, %s9743_s26  ;;  %v6708_v44 = vld [vmem:[#allocation4 + $0x160] sm:$0xff]  ;;  %v6709_v9 = vld [vmem:[#allocation4 + $0x168] sm:$0xff] }
 0x71e   : > { %v6891_v37 = vmul.f32 %v6746_v26, %v6699_v23 }
 0x720   : > { %v8534_v55 = vpack.i.bf16 %v6891_v37, %v6890_v18  ;;  %v6751_v42 = vpop.permute.xlu1 %6750 }
 0x721   : > { %v6756_v22 = vpop.permute.xlu0 %6755  ;;  %v6892_v36 = vmul.f32 %v6751_v42, %v6700_v30  ;;  %v6711_v30 = vld [vmem:[#allocation4 + $0x178] sm:$0xff] }
 0x722   : > { %v6893_v11 = vmul.f32 %v6756_v22, %v6701_v56  ;;  %8535 = vrot.lane.b32.xlu0 %v8534_v55, %s9743_s26  ;;  %v6710_v55 = vld [vmem:[#allocation4 + $0x170] sm:$0xff] }
 0x724   : > { %v8539_v16 = vpack.i.bf16 %v6893_v11, %v6892_v36  ;;  %v6761_v12 = vpop.permute.xlu1 %6760 }
 0x725   : > { %v6766_v20 = vpop.permute.xlu0 %6765  ;;  %v6894_v7 = vmul.f32 %v6761_v12, %v6702_v1  ;;  %v6713_v1 = vld [vmem:[#allocation4 + $0x188] sm:$0xff] }
 0x726   : > { %v6895_v48 = vmul.f32 %v6766_v20, %v6703_v49  ;;  %8540 = vrot.lane.b32.xlu1 %v8539_v16, %s9743_s26  ;;  %v6712_v16 = vld [vmem:[#allocation4 + $0x180] sm:$0xff] }
 0x728   : > { %v8544_v39 = vpack.i.bf16 %v6895_v48, %v6894_v7  ;;  %v6771_v17 = vpop.permute.xlu1 %6770 }
 0x729   : > { %v6896_v60 = vmul.f32 %v6771_v17, %v6704_v21  ;;  %v6715_v21 = vld [vmem:[#allocation4 + $0x198] sm:$0xff] }
 0x72a   : > { %8545 = vrot.lane.b32.xlu0 %v8544_v39, %s9743_s26  ;;  %v6714_v39 = vld [vmem:[#allocation4 + $0x190] sm:$0xff] }
 0x72d   : > { %v6781_v34 = vpop.permute.xlu1 %6780 }
 0x72e   : > { %v6898_v35 = vmul.f32 %v6781_v34, %v6706_v14 }
 0x72f   : > { %v6776_v10 = vpop.permute.xlu0 %6775 }
 0x730   : > { %v6897_v19 = vmul.f32 %v6776_v10, %v6705_v24 }
 0x731   : > { %v6791_v45 = vpop.permute.xlu1 %6790 }
 0x732   : > { %v8549_v40 = vpack.i.bf16 %v6897_v19, %v6896_v60  ;;  %v6900_v26 = vmul.f32 %v6791_v45, %v6708_v44  ;;  %v6716_v19 = vld [vmem:[#allocation4 + $0x1a0] sm:$0xff] }
 0x734   : > { %v6786_v8 = vpop.permute.xlu0 %6785  ;;  %8550 = vrot.lane.b32.xlu1 %v8549_v40, %s9743_s26  ;;  %v6717_v40 = vld [vmem:[#allocation4 + $0x1a8] sm:$0xff] }
 0x735   : > { %v6899_v53 = vmul.f32 %v6786_v8, %v6707_v28 }
 0x736   : > { %v6801_v54 = vpop.permute.xlu1 %6800 }
 0x737   : > { %v8554_v23 = vpack.i.bf16 %v6899_v53, %v6898_v35  ;;  %v6902_v22 = vmul.f32 %v6801_v54, %v6710_v55  ;;  %v6718_v53 = vld [vmem:[#allocation4 + $0x1b0] sm:$0xff] }
 0x738   : > { %v6796_v59 = vpop.permute.xlu0 %6795 }
 0x739   : > { %v6901_v37 = vmul.f32 %v6796_v59, %v6709_v9  ;;  %8555 = vrot.lane.b32.xlu0 %v8554_v23, %s9743_s26  ;;  %v6719_v23 = vld [vmem:[#allocation4 + $0x1b8] sm:$0xff] }
 0x73a   : > { %v6811_v18 = vpop.permute.xlu1 %6810 }
 0x73b   : > { %v8559_v56 = vpack.i.bf16 %v6901_v37, %v6900_v26  ;;  %v6904_v20 = vmul.f32 %v6811_v18, %v6712_v16  ;;  %v6720_v37 = vld [vmem:[#allocation4 + $0x1c0] sm:$0xff] }
 0x73c   : > { %v6806_v42 = vpop.permute.xlu0 %6805 }
 0x73d   : > { %v6903_v11 = vmul.f32 %v6806_v42, %v6711_v30  ;;  %8560 = vrot.lane.b32.xlu1 %v8559_v56, %s9743_s26  ;;  %v6721_v56 = vld [vmem:[#allocation4 + $0x1c8] sm:$0xff]  ;;  %v6722_v42 = vld [vmem:[#allocation4 + $0x1d0] sm:$0xff] }
 0x73e   : > { %v6821_v36 = vpop.permute.xlu1 %6820 }
 0x73f   : > { %v8564_v49 = vpack.i.bf16 %v6903_v11, %v6902_v22  ;;  %v6906_v34 = vmul.f32 %v6821_v36, %v6714_v39  ;;  %v6725_v39 = vld [vmem:[#allocation4 + $0x1e8] sm:$0xff] }
 0x740   : > { %v6816_v12 = vpop.permute.xlu0 %6815 }
 0x741   : > { %v6905_v48 = vmul.f32 %v6816_v12, %v6713_v1  ;;  %8565 = vrot.lane.b32.xlu0 %v8564_v49, %s9743_s26  ;;  %v6723_v49 = vld [vmem:[#allocation4 + $0x1d8] sm:$0xff]  ;;  %v6724_v12 = vld [vmem:[#allocation4 + $0x1e0] sm:$0xff] }
 0x742   : > { %v6831_v7 = vpop.permute.xlu1 %6830 }
 0x743   : > { %v8569_v17 = vpack.i.bf16 %v6905_v48, %v6904_v20  ;;  %v6908_v14 = vmul.f32 %v6831_v7, %v6716_v19  ;;  %v6727_v19 = vld [vmem:[#allocation4 + $0x1f8] sm:$0xff] }
 0x744   : > { %v6826_v60 = vpop.permute.xlu0 %6825 }
 0x745   : > { %v6907_v24 = vmul.f32 %v6826_v60, %v6715_v21  ;;  %8570 = vrot.lane.b32.xlu1 %v8569_v17, %s9743_s26  ;;  %v6726_v60 = vld [vmem:[#allocation4 + $0x1f0] sm:$0xff] }
 0x746   : > { %v6841_v10 = vpop.permute.xlu1 %6840 }
 0x747   : > { %v8574_v45 = vpack.i.bf16 %v6907_v24, %v6906_v34  ;;  %v6910_v44 = vmul.f32 %v6841_v10, %v6718_v53 }
 0x748   : > { %v6836_v35 = vpop.permute.xlu0 %6835 }
 0x749   : > { %v6909_v28 = vmul.f32 %v6836_v35, %v6717_v40  ;;  %8575 = vrot.lane.b32.xlu0 %v8574_v45, %s9743_s26  ;;  %v6409_v35 = vld [vmem:[#allocation4 + $0x8] sm:$0xff] }
 0x74a   : > { %v6851_v8 = vpop.permute.xlu1 %6850  ;;  %v6601_v53 = vmul.f32 %v13861_v5, %v6409_v35 }
 0x74b   : > { %v8579_v54 = vpack.i.bf16 %v6909_v28, %v6908_v14  ;;  %v6912_v55 = vmul.f32 %v6851_v8, %v6720_v37  ;;  %v6408_v28 = vld [vmem:[#allocation4] sm:$0xff]  ;;  %v6410_v37 = vld [vmem:[#allocation4 + $0x10] sm:$0xff] }
 0x74d   : > { %v6846_v26 = vpop.permute.xlu0 %6845  ;;  %8580 = vrot.lane.b32.xlu1 %v8579_v54, %s9743_s26  ;;  %v6600_v54 = vmul.f32 %v13886_v29, %v6408_v28 }
 0x74e   : > { %v6911_v9 = vmul.f32 %v6846_v26, %v6719_v23  ;;  %v6861_v59 = vpop.permute.xlu1 %6860 }
 0x74f   : > { %v6914_v16 = vmul.f32 %v6861_v59, %v6722_v42  ;;  %v6411_v59 = vld [vmem:[#allocation4 + $0x18] sm:$0xff] }
 0x750   : > { %v8584_v18 = vpack.i.bf16 %v6911_v9, %v6910_v44 }
 0x751   : > { %v6856_v22 = vpop.permute.xlu0 %6855 }
 0x752   : > { %v6913_v30 = vmul.f32 %v6856_v22, %v6721_v56  ;;  %8585 = vrot.lane.b32.xlu0 %v8584_v18, %s9743_s26  ;;  %v6871_v11 = vpop.permute.xlu1 %6870  ;;  %v6603_v56 = vmul.f32 %v13890_v6, %v6411_v59  ;;  %v6602_v22 = vmul.f32 %v13902_v27, %v6410_v37 }
 0x753   : > { %v6916_v7 = vmul.f32 %v6871_v11, %v6724_v12  ;;  %v6413_v11 = vld [vmem:[#allocation4 + $0x28] sm:$0xff] }
 0x754   : > { %v8589_v36 = vpack.i.bf16 %v6913_v30, %v6912_v55  ;;  %v6605_v6 = vmul.f32 %v13908_v3, %v6413_v11 }
 0x755   : > { %v6866_v20 = vpop.permute.xlu0 %6865 }
 0x756   : > { %v6915_v1 = vmul.f32 %v6866_v20, %v6723_v49  ;;  %8590 = vrot.lane.b32.xlu1 %v8589_v36, %s9743_s26  ;;  %v6881_v34 = vpop.permute.xlu1 %6880  ;;  %v6412_v36 = vld [vmem:[#allocation4 + $0x20] sm:$0xff] }
 0x757   : > { %v6918_v10 = vmul.f32 %v6881_v34, %v6726_v60  ;;  %v6604_v27 = vmul.f32 %v13919_v4, %v6412_v36  ;;  %v6423_v36 = vld [vmem:[#allocation4 + $0x78] sm:$0xff] }
 0x758   : > { %v8594_v48 = vpack.i.bf16 %v6915_v1, %v6914_v16 }
 0x759   : > { %v6876_v17 = vpop.permute.xlu0 %6875 }
 0x75a   : > { %v6917_v21 = vmul.f32 %v6876_v17, %v6725_v39  ;;  %8595 = vrot.lane.b32.xlu0 %v8594_v48, %s9743_s26  ;;  %v6414_v39 = vld [vmem:[#allocation4 + $0x30] sm:$0xff] }
 0x75b   : > { %v6606_v60 = vmul.f32 %v13928_v46, %v6414_v39 }
 0x75c   : > { %v8599_v24 = vpack.i.bf16 %v6917_v21, %v6916_v7  ;;  %v6415_v7 = vld [vmem:[#allocation4 + $0x38] sm:$0xff] }
 0x75d   : > { %v6886_v45 = vpop.permute.xlu0 %6885  ;;  %v6607_v21 = vmul.f32 %v13921_v51, %v6415_v7  ;;  %v6424_v7 = vld [vmem:[#allocation4 + $0x80] sm:$0xff] }
 0x75e   : > { %v6919_v14 = vmul.f32 %v6886_v45, %v6727_v19  ;;  %8600 = vrot.lane.b32.xlu1 %v8599_v24, %s9743_s26  ;;  %v6417_v45 = vld [vmem:[#allocation4 + $0x48] sm:$0xff] }
 0x75f   : > { %v6609_v35 = vmul.f32 %v13934_v13, %v6417_v45 }
 0x760   : > { %v8604_v40 = vpack.i.bf16 %v6919_v14, %v6918_v10  ;;  %v6416_v14 = vld [vmem:[#allocation4 + $0x40] sm:$0xff] }
 0x761   : > { %v6608_v28 = vmul.f32 %v13940_v15, %v6416_v14 }
 0x762   : > { %8605 = vrot.lane.b32.xlu0 %v8604_v40, %s9743_s26 }
 0x78f   : > { %v8531_v8 = vpop.permute.xlu1 %8530 }
 0x790   : > { %v8533_v44 = vunpack.i.h.bf16 %v8531_v8  ;;  %v8532_v23 = vunpack.i.l.bf16 %v8531_v8 }
 0x792   : > { %v7049_v26 = vsel %vm455_vm0, %v6601_v53, %v8533_v44  ;;  %v7048_v9 = vsel %vm455_vm0, %v6600_v54, %v8532_v23  ;;  %v6419_v54 = vld [vmem:[#allocation4 + $0x58] sm:$0xff]  ;;  %v6418_v44 = vld [vmem:[#allocation4 + $0x50] sm:$0xff] }
 0x793   : > { %v7644_v18 = vpack.c.bf16 %v7049_v26, %v7048_v9  ;;  %v6611_v9 = vmul.f32 %v13942_v38, %v6419_v54  ;;  %v6610_v59 = vmul.f32 %v13945_v47, %v6418_v44 }
 0x794   : > { %v8536_v55 = vpop.permute.xlu0 %8535 }
 0x795   : > { %v8538_v30 = vunpack.i.h.bf16 %v8536_v55  ;;  %v8537_v42 = vunpack.i.l.bf16 %v8536_v55  ;;  %7645 = vst [vmem:[%s14190_s6] sm:$0xff] %v7644_v18   ;;  %v6421_v55 = vld [vmem:[#allocation4 + $0x68] sm:$0xff] }
 0x797   : > { %v7051_v5 = vsel %vm455_vm0, %v6603_v56, %v8538_v30  ;;  %v7050_v29 = vsel %vm455_vm0, %v6602_v22, %v8537_v42  ;;  %v6420_v56 = vld [vmem:[#allocation4 + $0x60] sm:$0xff]  ;;  %v6613_v42 = vmul.f32 %v13948_v58, %v6421_v55 }
 0x798   : > { %v7649_v16 = vpack.c.bf16 %v7051_v5, %v7050_v29  ;;  %v8541_v49 = vpop.permute.xlu1 %8540  ;;  %v6612_v5 = vmul.f32 %v13950_v62, %v6420_v56  ;;  %v6433_v56 = vld [vmem:[#allocation4 + $0xc8] sm:$0xff] }
 0x799   : > { %v8543_v20 = vunpack.i.h.bf16 %v8541_v49  ;;  %v8542_v1 = vunpack.i.l.bf16 %v8541_v49 }
 0x79a   : > { %7721 = vst [vmem:[%s14190_s6 + $0x8] sm:$0xff] %v7649_v16   ;;  %v6422_v16 = vld [vmem:[#allocation4 + $0x70] sm:$0xff] }
 0x79b   : > { %v7053_v12 = vsel %vm455_vm0, %v6605_v6, %v8543_v20  ;;  %v7052_v48 = vsel %vm455_vm0, %v6604_v27, %v8542_v1  ;;  %v6615_v27 = vmul.f32 %v13952_v33, %v6423_v36  ;;  %v6614_v20 = vmul.f32 %v13954_v32, %v6422_v16  ;;  %v6434_v36 = vld [vmem:[#allocation4 + $0xd0] sm:$0xff] }
 0x79c   : > { %v7654_v17 = vpack.c.bf16 %v7053_v12, %v7052_v48  ;;  %v8546_v34 = vpop.permute.xlu0 %8545  ;;  %v6425_v48 = vld [vmem:[#allocation4 + $0x88] sm:$0xff] }
 0x79d   : > { %v8548_v24 = vunpack.i.h.bf16 %v8546_v34  ;;  %v8547_v3 = vunpack.i.l.bf16 %v8546_v34  ;;  %v6617_v34 = vmul.f32 %v13956_v25, %v6425_v48  ;;  %v6436_v48 = vld [vmem:[#allocation4 + $0xe0] sm:$0xff] }
 0x79e   : > { %7722 = vst [vmem:[%s14190_s6 + $0x10] sm:$0xff] %v7654_v17  }
 0x79f   : > { %v7055_v4 = vsel %vm455_vm0, %v6607_v21, %v8548_v24  ;;  %v7054_v10 = vsel %vm455_vm0, %v6606_v60, %v8547_v3  ;;  %v6616_v21 = vmul.f32 %v13958_v43, %v6424_v7  ;;  %v6427_v3 = vld [vmem:[#allocation4 + $0x98] sm:$0xff] }
 0x7a0   : > { %v7659_v19 = vpack.c.bf16 %v7055_v4, %v7054_v10  ;;  %v6426_v4 = vld [vmem:[#allocation4 + $0x90] sm:$0xff]  ;;  %v6619_v45 = vmul.f32 %v13960_v41, %v6427_v3 }
 0x7a1   : > { %v6618_v14 = vmul.f32 %v13962_v61, %v6426_v4  ;;  %v6438_v4 = vld [vmem:[#allocation4 + $0xf0] sm:$0xff] }
 0x7a2   : > { %7723 = vst [vmem:[%s14190_s6 + $0x18] sm:$0xff] %v7659_v19  }
 0x7a6   : > { %v8551_v40 = vpop.permute.xlu1 %8550 }
 0x7a7   : > { %v8553_v51 = vunpack.i.h.bf16 %v8551_v40  ;;  %v8552_v8 = vunpack.i.l.bf16 %v8551_v40 }
 0x7a9   : > { %v7057_v46 = vsel %vm455_vm0, %v6609_v35, %v8553_v51  ;;  %v7056_v53 = vsel %vm455_vm0, %v6608_v28, %v8552_v8  ;;  %v6429_v28 = vld [vmem:[#allocation4 + $0xa8] sm:$0xff]  ;;  %v6428_v51 = vld [vmem:[#allocation4 + $0xa0] sm:$0xff] }
 0x7aa   : > { %v7664_v23 = vpack.c.bf16 %v7057_v46, %v7056_v53  ;;  %v6621_v53 = vmul.f32 %v13964_v2, %v6429_v28  ;;  %v6620_v54 = vmul.f32 %v13966_v57, %v6428_v51 }
 0x7ab   : > { %v8556_v26 = vpop.permute.xlu0 %8555 }
 0x7ac   : > { %v8558_v37 = vunpack.i.h.bf16 %v8556_v26  ;;  %v8557_v18 = vunpack.i.l.bf16 %v8556_v26  ;;  %7724 = vst [vmem:[%s14190_s6 + $0x20] sm:$0xff] %v7664_v23   ;;  %v6431_v26 = vld [vmem:[#allocation4 + $0xb8] sm:$0xff] }
 0x7ae   : > { %v7059_v13 = vsel %vm455_vm0, %v6611_v9, %v8558_v37  ;;  %v7058_v15 = vsel %vm455_vm0, %v6610_v59, %v8557_v18  ;;  %v6430_v9 = vld [vmem:[#allocation4 + $0xb0] sm:$0xff]  ;;  %v6623_v18 = vmul.f32 %v13968_v63, %v6431_v26 }
 0x7af   : > { %v7669_v22 = vpack.c.bf16 %v7059_v13, %v7058_v15  ;;  %v8561_v30 = vpop.permute.xlu1 %8560  ;;  %v6622_v13 = vmul.f32 %v13970_v31, %v6430_v9 }
 0x7b0   : > { %v8563_v29 = vunpack.i.h.bf16 %v8561_v30  ;;  %v8562_v38 = vunpack.i.l.bf16 %v8561_v30 }
 0x7b1   : > { %7725 = vst [vmem:[%s14190_s6 + $0x28] sm:$0xff] %v7669_v22   ;;  %v6432_v22 = vld [vmem:[#allocation4 + $0xc0] sm:$0xff] }
 0x7b2   : > { %v7061_v47 = vsel %vm455_vm0, %v6613_v42, %v8563_v29  ;;  %v7060_v11 = vsel %vm455_vm0, %v6612_v5, %v8562_v38  ;;  %v6625_v5 = vmul.f32 %v13972_v52, %v6433_v56  ;;  %v6624_v29 = vmul.f32 %v13974_v0, %v6432_v22 }
 0x7b3   : > { %v7674_v49 = vpack.c.bf16 %v7061_v47, %v7060_v11  ;;  %v8566_v6 = vpop.permute.xlu0 %8565  ;;  %v6435_v11 = vld [vmem:[#allocation4 + $0xd8] sm:$0xff] }
 0x7b4   : > { %v8568_v1 = vunpack.i.h.bf16 %v8566_v6  ;;  %v8567_v58 = vunpack.i.l.bf16 %v8566_v6  ;;  %v15459_v6 = vld [vmem:[#allocation121_spill] sm:$0xff] }
 0x7b5   : > { %7726 = vst [vmem:[%s14190_s6 + $0x30] sm:$0xff] %v7674_v49  }
 0x7b6   : > { %v7063_v62 = vsel %vm455_vm0, %v6615_v27, %v8568_v1  ;;  %v7062_v12 = vsel %vm455_vm0, %v6614_v20, %v8567_v58  ;;  %v6627_v27 = vmul.f32 %v15459_v6, %v6435_v11  ;;  %v15460_v20 = vld [vmem:[#allocation106_spill] sm:$0xff] }
 0x7b7   : > { %v7679_v39 = vpack.c.bf16 %v7063_v62, %v7062_v12  ;;  %v8571_v17 = vpop.permute.xlu1 %8570  ;;  %v6626_v1 = vmul.f32 %v15460_v20, %v6434_v36  ;;  %v6437_v12 = vld [vmem:[#allocation4 + $0xe8] sm:$0xff] }
 0x7b8   : > { %v8573_v60 = vunpack.i.h.bf16 %v8571_v17  ;;  %v8572_v33 = vunpack.i.l.bf16 %v8571_v17  ;;  %v15461_v17 = vld [vmem:[#allocation116_spill] sm:$0xff] }
 0x7b9   : > { %7727 = vst [vmem:[%s14190_s6 + $0x38] sm:$0xff] %v7679_v39  }
 0x7ba   : > { %v7065_v32 = vsel %vm455_vm0, %v6617_v34, %v8573_v60  ;;  %v7064_v24 = vsel %vm455_vm0, %v6616_v21, %v8572_v33  ;;  %v6629_v34 = vmul.f32 %v15461_v17, %v6437_v12  ;;  %v15462_v21 = vld [vmem:[#allocation120_spill] sm:$0xff] }
 0x7bb   : > { %v7684_v10 = vpack.c.bf16 %v7065_v32, %v7064_v24  ;;  %v8576_v19 = vpop.permute.xlu0 %8575  ;;  %v6628_v60 = vmul.f32 %v15462_v21, %v6436_v48 }
 0x7bc   : > { %v8578_v40 = vunpack.i.h.bf16 %v8576_v19  ;;  %v8577_v25 = vunpack.i.l.bf16 %v8576_v19 }
 0x7bd   : > { %7728 = vst [vmem:[%s14190_s6 + $0x40] sm:$0xff] %v7684_v10   ;;  %v6439_v10 = vld [vmem:[#allocation4 + $0xf8] sm:$0xff] }
 0x7be   : > { %v7067_v43 = vsel %vm455_vm0, %v6619_v45, %v8578_v40  ;;  %v7066_v35 = vsel %vm455_vm0, %v6618_v14, %v8577_v25  ;;  %v15463_v14 = vld [vmem:[#allocation111_spill] sm:$0xff]  ;;  %v6631_v25 = vmul.f32 %v14164_v50, %v6439_v10 }
 0x7bf   : > { %v7689_v8 = vpack.c.bf16 %v7067_v43, %v7066_v35  ;;  %v8581_v46 = vpop.permute.xlu1 %8580  ;;  %v6630_v40 = vmul.f32 %v15463_v14, %v6438_v4 }
 0x7c0   : > { %v8583_v44 = vunpack.i.h.bf16 %v8581_v46  ;;  %v8582_v41 = vunpack.i.l.bf16 %v8581_v46 }
 0x7c1   : > { %7729 = vst [vmem:[%s14190_s6 + $0x48] sm:$0xff] %v7689_v8  }
 0x7c2   : > { %v7069_v61 = vsel %vm455_vm0, %v6621_v53, %v8583_v44  ;;  %v7068_v23 = vsel %vm455_vm0, %v6620_v54, %v8582_v41 }
 0x7c3   : > { %v7694_v59 = vpack.c.bf16 %v7069_v61, %v7068_v23 }
 0x7c4   : > { %v8586_v37 = vpop.permute.xlu0 %8585 }
 0x7c5   : > { %v8588_v15 = vunpack.i.h.bf16 %v8586_v37  ;;  %v8587_v2 = vunpack.i.l.bf16 %v8586_v37  ;;  %7730 = vst [vmem:[%s14190_s6 + $0x50] sm:$0xff] %v7694_v59  }
 0x7c7   : > { %v7071_v57 = vsel %vm455_vm0, %v6623_v18, %v8588_v15  ;;  %v7070_v55 = vsel %vm455_vm0, %v6622_v13, %v8587_v2 }
 0x7c8   : > { %v7699_v30 = vpack.c.bf16 %v7071_v57, %v7070_v55  ;;  %v8591_v42 = vpop.permute.xlu1 %8590 }
 0x7c9   : > { %v8593_v38 = vunpack.i.h.bf16 %v8591_v42  ;;  %v8592_v63 = vunpack.i.l.bf16 %v8591_v42 }
 0x7ca   : > { %7731 = vst [vmem:[%s14190_s6 + $0x58] sm:$0xff] %v7699_v30  }
 0x7cb   : > { %v7073_v31 = vsel %vm455_vm0, %v6625_v5, %v8593_v38  ;;  %v7072_v47 = vsel %vm455_vm0, %v6624_v29, %v8592_v63 }
 0x7cc   : > { %v7704_v16 = vpack.c.bf16 %v7073_v31, %v7072_v47  ;;  %v8596_v49 = vpop.permute.xlu0 %8595 }
 0x7cd   : > { %v8598_v52 = vunpack.i.h.bf16 %v8596_v49  ;;  %v8597_v0 = vunpack.i.l.bf16 %v8596_v49 }
 0x7ce   : > { %7732 = vst [vmem:[%s14190_s6 + $0x60] sm:$0xff] %v7704_v16  }
 0x7cf   : > { %v7075_v58 = vsel %vm455_vm0, %v6627_v27, %v8598_v52  ;;  %v7074_v62 = vsel %vm455_vm0, %v6626_v1, %v8597_v0 }
 0x7d0   : > { %v7709_v7 = vpack.c.bf16 %v7075_v58, %v7074_v62  ;;  %v8601_v39 = vpop.permute.xlu1 %8600 }
 0x7d1   : > { %v8603_v33 = vunpack.i.h.bf16 %v8601_v39  ;;  %v8602_v32 = vunpack.i.l.bf16 %v8601_v39 }
 0x7d2   : > { %7733 = vst [vmem:[%s14190_s6 + $0x68] sm:$0xff] %v7709_v7  }
 0x7d3   : > { %v7077_v24 = vsel %vm455_vm0, %v6629_v34, %v8603_v33  ;;  %v7076_v3 = vsel %vm455_vm0, %v6628_v60, %v8602_v32 }
 0x7d4   : > { %v7714_v19 = vpack.c.bf16 %v7077_v24, %v7076_v3  ;;  %v8606_v45 = vpop.permute.xlu0 %8605 }
 0x7d5   : > { %v8608_v43 = vunpack.i.h.bf16 %v8606_v45  ;;  %v8607_v35 = vunpack.i.l.bf16 %v8606_v45 }
 0x7d6   : > { %7734 = vst [vmem:[%s14190_s6 + $0x70] sm:$0xff] %v7714_v19  }
 0x7d7   : > { %v7079_v28 = vsel %vm455_vm0, %v6631_v25, %v8608_v43  ;;  %v7078_v51 = vsel %vm455_vm0, %v6630_v40, %v8607_v35 }
 0x7d8   : > { %v7719_v8 = vpack.c.bf16 %v7079_v28, %v7078_v51 }
 0x7da   : > { %7735 = vst [vmem:[%s14190_s6 + $0x78] sm:$0xff] %v7719_v8  }
 0x7db   : > { %9623 = shalt.err (!%p9620_p5)
}
 0x7dc   : > { %s9624_s6 = scalar_lea.hbm %s14273_s18, 2048  ;;  %s9628_s15 = scalar_lea.hbm %s15466_s4, 8192 }
 0x7dd   : > { %p9625_p0 = scmp.ne.s32.totalorder %s14273_s18, %s9624_s6  ;;  %p9629_p1 = scmp.lt.u32.totalorder %s14273_s18, %s15466_s4 }
 0x7de   : > { %p9630_p3 = scmp.lt.u32.totalorder %s9628_s15, %s9624_s6  ;;  %p9632_p8 = scmp.lt.u32.totalorder %s9624_s6, %s14273_s18 }
 0x7df   : > { %p9626_p12 = pnand %p9625_p0, %p15467_p13 }
 0x7e0   : > { %p9631_p7 = por %p9630_p3, %p9629_p1 }
 0x7e1   : > { %p9627_p11 = pneg %p9626_p12 }
 0x7e2   : > { %p9633_p10 = por %p9632_p8, %p9631_p7 }
 0x7e4   : > { %p9634_p4 = pnand %p9633_p10, %p9627_p11 }
 0x7e6   : > { %9637 = shalt.err (!%p9634_p4)
}
 0x7e7   : > { %s9748_s10 = smov 4  }
 0x7e8   : > { %8414 = dma.vmem_to_hbm [thread:$0]  (%p15467_p13), %s14268_s3, 2048, %s14273_s18, %s7241_s23, %s9743_s26, %s9743_s26, %s9748_s10  }
 0x7e9 PF: > { %s15468_s9 = sld [smem:[#allocation16_spill]]  ;;  %s15469_s12 = sld [smem:[#allocation23_spill]] }
 0x7ea   : > { %p8431_p2 = scmp.ge.s32.totalorder %s9736_s22, 2 }
 0x7ef   : > { %s7272_s7 = sand.u32 1, %s15468_s9   ;;  %p15470_p9 = scmp.ne.s32.totalorder %s15469_s12, 0 }
 0x7f0   : > { %s7273_s29 = scalar_lea.sflag [#allocation7], %s7272_s7 }
 0x7f1   : > { %p8427_p6 = pnand %p8431_p2, %p15470_p9 }
 0x7f3   : > { %9691 = dma.done.wait (!%p8427_p6), %s7273_s29, 2048  }
 0x7f4   : > { %9693 = vsyncadd (!%p8427_p6), %s7273_s29, 4294965248  ;;  %s22_s22 = sadd.s32 1, %s9736_s22   ;;  %s15471_s12 = sld [smem:[#allocation15_spill]] }
 0x7f5   : > { %p19_p5 = scmp.ge.s32.totalorder %s22_s22, 6   ;;  %s15472_s1 = sld [smem:[#allocation21_spill]] }
 0x7f6   : > { %s15473_s13 = smov %s9704_s14  ;;  %s15474_s14 = smov %s9952_s19 }
 0x7f7   : > { %s15475_s15 = smov %s9712_s16  ;;  %s15476_s16 = smov %s9716_s17 }
 0x7f8   : > { %s15477_s17 = smov %s9955_s24  ;;  %s15478_s18 = smov %s9728_s20 }
 0x7f9   : > { %s15479_s19 = smov %s9732_s21  ;;  %s15481_s21 = smov %s15487_s28 }
 0x7fa   :  { %21 = sbr.rel (!%p19_p5) target bundleno = 14 (0xe), region = 112 }
 0x7fb   : > { %s15480_s20 = smov %s15472_s1 }
 0x801   :  { %7278 = vsyncpa [#allocation6], 1 }
 0x802   :  { %7280 = vsyncpa [#allocation6 + $0x1], 1 }
 0x803   :  { %7281 = vsyncpa [#allocation9], 1 }
 0x804   :  { %7283 = vsyncpa [#allocation9 + $0x1], 1 }
 0x805   :  { %7284 = vsyncpa [#allocation7], 1 }
 0x806   :  { %7286 = vsyncpa [#allocation7 + $0x1], 1 }

</bundles_post_ra>
